<compile_context>
chip_gen: v5e
topology: v5e:2x2
jax: 0.10.0
libtpu: 0.0.40
codegen_flags: <defaults>
</compile_context>

<pallas_src>
import functools
import numpy as np
import jax
import jax.numpy as jnp
from jax import lax
from jax.experimental import pallas as pl
from jax.experimental.pallas import tpu as pltpu

GLOVE_DIM = 300      # GloVe('6B') 300-d vectors
CHAR_EMB = 50        # LSTMByteEmbeddingModel(emb_dim=50)
HIDDEN = 50
VOCAB = 64           # synthetic GloVe vocab; row VOCAB == <unk>
DROP_P = 0.2
GATE_PAD = 128                       # one 128-lane block per LSTM gate
DROP_THRESHOLD = int(DROP_P * (1 << 24))
OUT_DIM = GLOVE_DIM + 2 * HIDDEN     # 400 (logical output width)
GLOVE_PAD = 384                      # glove slab padded to 3 x 128 lanes
CB_OFF = GLOVE_PAD + GATE_PAD        # 512: lane offset of the backward cell state
KOUT = GLOVE_PAD + 2 * GATE_PAD      # 640: kernel output width (5 x 128, lane-dense)


def embedding_kernel(wid_ref, byte_ref, bits_ref, glove_ref, bproj_ref,
                     whh_ref, h0_ref, c0_ref, o_ref, *, fuse_dirs=True):
    f32 = jnp.float32
    Wb = wid_ref.shape[0]            # words in this block
    V = glove_ref.shape[0]
    TW = byte_ref.shape[0]           # T * Wb
    T = TW // Wb
    GP = GATE_PAD
    G = 4 * GP                       # 512 lanes of gates per direction

    # ---- GloVe lookup: one-hot @ padded table (single MXU matmul), lanes >= 300 stay zero ----
    # TODO(synk): for the real 400k x 300 GloVe table keep it in HBM (memory_space=pl.ANY) and
    # DMA-gather the needed rows via scalar-prefetched ids instead of the one-hot matmul.
    wid = wid_ref[...]                                                          # (Wb, 1)
    oh_w = (lax.broadcasted_iota(jnp.int32, (Wb, V), 1) == wid).astype(f32)
    word_emb = jnp.dot(oh_w, glove_ref[...], preferred_element_type=f32)        # (Wb, 384)

    # ---- fused byte -> gate-preactivation projection: one K=256 matmul (bias folded in) ----
    bids = byte_ref[...]                                                        # (T*Wb, 1)
    oh_b = (lax.broadcasted_iota(jnp.int32, (TW, 256), 1) == bids).astype(f32)
    xproj = jnp.dot(oh_b, bproj_ref[...], preferred_element_type=f32)           # (T*Wb, 1024)

    # padded (Wb, 128) states; lanes >= HIDDEN are zero and stay exactly zero through the loop
    h_f = jnp.broadcast_to(h0_ref[0:1, :], (Wb, GP))
    c_f = jnp.broadcast_to(c0_ref[0:1, :], (Wb, GP))
    h_b = jnp.broadcast_to(h0_ref[1:2, :], (Wb, GP))
    c_b = jnp.broadcast_to(c0_ref[1:2, :], (Wb, GP))

    if fuse_dirs:
        whh_all = whh_ref[...]                          # (256, 1024) block-diagonal
    else:                                               # v5e: native K=128 passes, keep split
        whh_f = whh_ref[0:GP, 0:G]
        whh_b = whh_ref[GP:2 * GP, G:2 * G]

    def cell_c(gates, c):
        # gate order i, f, g, o; i|f contiguous -> single sigmoid call
        sif = jax.nn.sigmoid(gates[:, 0:2 * GP])
        return sif[:, GP:2 * GP] * c + sif[:, 0:GP] * jnp.tanh(gates[:, 2 * GP:3 * GP])

    def cell_hc(gates, c):
        c_new = cell_c(gates, c)
        h_new = jax.nn.sigmoid(gates[:, 3 * GP:4 * GP]) * jnp.tanh(c_new)
        return h_new, c_new

    # fully-unrolled static loop; step t drives forward x[t] and backward x[T-1-t].
    # Padded byte positions are processed too (torch model feeds padded, not packed, sequences).
    # TODO(synk): switch to lax.fori_loop over a VMEM-staged xproj if T grows beyond ~12.
    for t in range(T):
        x_f = xproj[t * Wb:(t + 1) * Wb, 0:G]
        x_b = xproj[(T - 1 - t) * Wb:(T - t) * Wb, G:2 * G]
        if fuse_dirs:
            h_cat = jnp.concatenate([h_f, h_b], axis=1)                         # (Wb, 256)
            g_rec = jnp.dot(h_cat, whh_all, preferred_element_type=f32)         # (Wb, 1024)
            g_f = x_f + g_rec[:, 0:G]
            g_b = x_b + g_rec[:, G:2 * G]
        else:
            g_f = x_f + jnp.dot(h_f, whh_f, preferred_element_type=f32)
            g_b = x_b + jnp.dot(h_b, whh_b, preferred_element_type=f32)
        if t == T - 1:
            # only the final cell state is used -> skip o-gate sigmoid and tanh(c) on the tail
            c_f = cell_c(g_f, c_f)
            c_b = cell_c(g_b, c_b)
        else:
            h_f, c_f = cell_hc(g_f, c_f)
            h_b, c_b = cell_hc(g_b, c_b)

    # ---- 128-aligned concat (no lane rotates) + inverted dropout, single unmasked store ----
    out = jnp.concatenate([word_emb, c_f, c_b], axis=1)                         # (Wb, 640)
    keep = bits_ref[...] >= jnp.int32(DROP_THRESHOLD)
    o_ref[...] = jnp.where(keep, out * (1.0 / (1.0 - DROP_P)), 0.0)


def _round_up(n, m):
    return ((n + m - 1) // m) * m


def _device_kind():
    try:
        return jax.devices()[0].device_kind.lower()
    except Exception:
        return ""


def embedding_model_forward(kp, word_ids, byte_ids_tw, drop_bits, w_block=None):
    """word_ids: (W,1) int32; byte_ids_tw: (T,W) int32 time-major; drop_bits: (W,400) int32."""
    W = int(word_ids.shape[0])
    T = int(byte_ids_tw.shape[0])
    kind = _device_kind()
    # block-diagonal K=256 recurrence fusion only pays off on 256-deep MXUs (v6e/v7x and newer)
    fuse_dirs = not any(v in kind for v in ("v2", "v3", "v4", "v5"))
    multi_tc = "7" in kind            # v7x has 2 TensorCores per chip

    if w_block is None:
        w_block = min(128, max(8, _round_up(W, 8)))
        if multi_tc and W >= 16 and _round_up(W, w_block) // w_block == 1:
            w_block = _round_up((W + 1) // 2, 8)      # >=2 grid points -> both v7x TCs busy
    W_pad = _round_up(W, w_block)
    n_blk = W_pad // w_block

    wid_p = np.zeros((W_pad, 1), np.int32)
    wid_p[:W] = np.asarray(word_ids)
    bts_p = np.zeros((T, W_pad), np.int32)
    bts_p[:, :W] = np.asarray(byte_ids_tw)
    # block-major, time-major within block, flattened: row = b*(T*w_block) + t*w_block + w_local
    bytes_blocked = np.ascontiguousarray(
        bts_p.reshape(T, n_blk, w_block).transpose(1, 0, 2).reshape(n_blk * T * w_block, 1))

    # scatter the logical (W,400) dropout bits into the lane-aligned 640-wide kernel layout
    bits_p = np.full((W_pad, KOUT), (1 << 24) - 1, np.int32)   # filler lanes "keep" (they are 0)
    db = np.asarray(drop_bits)
    bits_p[:W, 0:GLOVE_DIM] = db[:, 0:GLOVE_DIM]
    bits_p[:W, GLOVE_PAD:GLOVE_PAD + HIDDEN] = db[:, GLOVE_DIM:GLOVE_DIM + HIDDEN]
    bits_p[:W, CB_OFF:CB_OFF + HIDDEN] = db[:, GLOVE_DIM + HIDDEN:OUT_DIM]

    # explicit VMEM budget (v7x: 64 MiB physical / 32 MiB default scoped); never below defaults
    est = 4 * (2 * (w_block * (2 + T) + 2 * w_block * KOUT)
               + int(kp["glove"].size) + int(kp["byte_proj"].size) + int(kp["whh_all"].size)
               + 512 + T * w_block * (256 + 1024) + 2 * w_block * KOUT)
    vmem_limit = int(min(max(32 << 20, 2 * est), 48 << 20))

    full = lambda arr: pl.BlockSpec(arr.shape, lambda i: (0, 0))
    # TODO(synk): mark the grid-invariant weight specs pipeline_mode=pl.Buffered(1) once the
    # real GloVe/char tables are large enough for double-buffered copies to matter for VMEM.

    out = pl.pallas_call(
        functools.partial(embedding_kernel, fuse_dirs=fuse_dirs),
        out_shape=jax.ShapeDtypeStruct((W_pad, KOUT), jnp.float32),
        grid=(n_blk,),
        in_specs=[
            pl.BlockSpec((w_block, 1), lambda i: (i, 0)),          # word ids
            pl.BlockSpec((T * w_block, 1), lambda i: (i, 0)),      # bytes (per word-block slab)
            pl.BlockSpec((w_block, KOUT), lambda i: (i, 0)),       # dropout bits
            full(kp["glove"]), full(kp["byte_proj"]), full(kp["whh_all"]),
            full(kp["h0"]), full(kp["c0"]),
        ],
        out_specs=pl.BlockSpec((w_block, KOUT), lambda i: (i, 0)),
        compiler_params=pltpu.CompilerParams(
            dimension_semantics=("parallel",), vmem_limit_bytes=vmem_limit),
    )(wid_p, bytes_blocked, bits_p,
      kp["glove"], kp["byte_proj"], kp["whh_all"], kp["h0"], kp["c0"])

    out = out[:W]
    # slice the lane-aligned layout back to dropout(cat([glove_emb, c_fwd, c_bwd], 1))
    return jnp.concatenate([out[:, :GLOVE_DIM],
                            out[:, GLOVE_PAD:GLOVE_PAD + HIDDEN],
                            out[:, CB_OFF:CB_OFF + HIDDEN]], axis=1)


# ------------------------- deterministic parameter init (torch layout) -------------------------
def make_params(key):
    ks = jax.random.split(key, 12)

    def u(k, shape, scale):
        return (jax.random.uniform(k, shape, jnp.float32) * 2.0 - 1.0) * scale

    stdv = 1.0 / float(np.sqrt(HIDDEN))
    raw = dict(
        glove=jax.random.normal(ks[0], (VOCAB + 1, GLOVE_DIM), jnp.float32),
        char=jax.random.normal(ks[1], (256, CHAR_EMB), jnp.float32),
        h0=jax.random.normal(ks[2], (2, HIDDEN), jnp.float32),
        c0=jax.random.normal(ks[3], (2, HIDDEN), jnp.float32),
    )
    i = 4
    for d in ("f", "b"):
        raw[f"wih_{d}"] = u(ks[i], (4 * HIDDEN, CHAR_EMB), stdv); i += 1    # torch (4H, E)
        raw[f"whh_{d}"] = u(ks[i], (4 * HIDDEN, HIDDEN), stdv); i += 1      # torch (4H, H)
        raw[f"b_ih_{d}"] = u(ks[i], (4 * HIDDEN,), stdv); i += 1
        raw[f"b_hh_{d}"] = u(ks[i], (4 * HIDDEN,), stdv); i += 1
    return raw


def pack_params(raw):
    """Transpose + pad torch-layout weights to the 128-lane-per-gate kernel layout,
    and precompute the fused byte->gate table and the block-diagonal recurrent weight."""
    H, E, GP = HIDDEN, CHAR_EMB, GATE_PAD
    G = 4 * GP

    def wih_pad(d):                       # torch (4H, E) -> (E, G), gate k at lanes [k*GP, k*GP+H)
        out = np.zeros((E, G), np.float32)
        w = np.asarray(raw[f"wih_{d}"])
        for k in range(4):
            out[:, k * GP:k * GP + H] = w[k * H:(k + 1) * H, :].T
        return out

    def bias_pad(d):                      # (b_ih + b_hh) -> (1, G)
        b = np.asarray(raw[f"b_ih_{d}"]) + np.asarray(raw[f"b_hh_{d}"])
        out = np.zeros((1, G), np.float32)
        for k in range(4):
            out[0, k * GP:k * GP + H] = b[k * H:(k + 1) * H]
        return out

    char = np.asarray(raw["char"], np.float32)                      # (256, E)
    # fused byte -> gate-preactivation table (bias folded in; one-hot rows sum to exactly 1)
    byte_proj = np.concatenate([char @ wih_pad("f") + bias_pad("f"),
                                char @ wih_pad("b") + bias_pad("b")], axis=1)   # (256, 2G)

    def whh_pad(d):                       # torch (4H, H) -> (GP, G), rows >= H zero
        out = np.zeros((GP, G), np.float32)
        w = np.asarray(raw[f"whh_{d}"])
        for k in range(4):
            out[:H, k * GP:k * GP + H] = w[k * H:(k + 1) * H, :].T
        return out

    # block-diagonal: h_cat (Wb, 2*GP) @ whh_all (2*GP, 2G) drives both directions at once
    whh_all = np.zeros((2 * GP, 2 * G), np.float32)
    whh_all[0:GP, 0:G] = whh_pad("f")
    whh_all[GP:2 * GP, G:2 * G] = whh_pad("b")

    def pad_state(s):                     # (2, H) -> (2, GP)
        out = np.zeros((2, GP), np.float32)
        out[:, :H] = np.asarray(s)
        return out

    glove_pad = np.zeros((VOCAB + 1, GLOVE_PAD), np.float32)
    glove_pad[:, :GLOVE_DIM] = np.asarray(raw["glove"])

    return dict(
        glove=jnp.asarray(glove_pad),
        byte_proj=jnp.asarray(byte_proj),
        whh_all=jnp.asarray(whh_all),
        h0=jnp.asarray(pad_state(raw["h0"])),
        c0=jnp.asarray(pad_state(raw["c0"])),
    )


# ------------------------- host-side tokenization glue -------------------------
_VOCAB = {w: i for i, w in enumerate(
    ["the", "quick", "brown", "fox", "jumps", "over", "lazy", "dog",
     "a", "cat", "sat", "on", "mat", "hello", "world", "pallas"])}
UNK_INDEX = VOCAB  # last row of the glove table


def tokenize(sentence):
    word_ids = np.array([[_VOCAB.get(w.lower(), UNK_INDEX)] for w in sentence], dtype=np.int32)
    byte_seqs = [list(w.encode("utf-8")) for w in sentence]
    T = max(len(b) for b in byte_seqs)
    padded = np.zeros((len(sentence), T), dtype=np.int32)     # pad=0, like pad_sequence
    for i, b in enumerate(byte_seqs):
        padded[i, :len(b)] = b
    return jnp.asarray(word_ids), jnp.asarray(padded.T)       # (W,1), (T,W) time-major


# ------------------------- pure-JAX reference (no dropout) -------------------------
def reference_no_dropout(raw, word_ids, byte_ids_tw):
    W = word_ids.shape[0]
    T = byte_ids_tw.shape[0]
    H = HIDDEN
    word_emb = raw["glove"][word_ids[:, 0]]
    x_all = raw["char"][byte_ids_tw]                          # (T, W, E)

    def run(d, times):
        wih, whh = raw[f"wih_{d}"], raw[f"whh_{d}"]
        b = raw[f"b_ih_{d}"] + raw[f"b_hh_{d}"]
        idx = 0 if d == "f" else 1
        h = jnp.broadcast_to(raw["h0"][idx], (W, H))
        c = jnp.broadcast_to(raw["c0"][idx], (W, H))
        for t in times:
            gates = x_all[t] @ wih.T + h @ whh.T + b
            i_g = jax.nn.sigmoid(gates[:, 0:H])
            f_g = jax.nn.sigmoid(gates[:, H:2 * H])
            g_g = jnp.tanh(gates[:, 2 * H:3 * H])
            o_g = jax.nn.sigmoid(gates[:, 3 * H:4 * H])
            c = f_g * c + i_g * g_g
            h = o_g * jnp.tanh(c)
        return c

    c_f = run("f", range(T))
    c_b = run("b", range(T - 1, -1, -1))
    return jnp.concatenate([word_emb, c_f, c_b], axis=1)


if __name__ == "__main__":
    key = jax.random.PRNGKey(0)
    raw = make_params(key)
    kparams = pack_params(raw)

    sentence = ["The", "quick", "brown", "Foxish", "jumps", "over", "zzqj", "dog"]  # W=8, T=6
    word_ids, byte_ids_tw = tokenize(sentence)
    W = len(sentence)

    # TODO(synk): torch's dropout RNG stream cannot be bit-matched; use jax.random bits instead.
    drop_bits = jax.random.randint(jax.random.PRNGKey(1234), (W, OUT_DIM), 0, 1 << 24,
                                   dtype=jnp.int32)

    out = embedding_model_forward(kparams, word_ids, byte_ids_tw, drop_bits)
    out = jax.block_until_ready(out)

    # correctness: kept elements equal reference / (1 - p); dropped elements are exactly 0
    ref = np.asarray(reference_no_dropout(raw, word_ids, byte_ids_tw))
    out_np = np.asarray(out)
    keep = np.asarray(drop_bits) >= DROP_THRESHOLD
    assert out_np.shape == (W, OUT_DIM)
    assert np.isfinite(out_np).all()
    assert np.allclose(out_np[keep] * (1.0 - DROP_P), ref[keep], rtol=1e-4, atol=1e-4)
    assert np.all(out_np[~keep] == 0.0)

    print("KERNEL_OK")
</pallas_src>

<mosaic_0001>
module attributes {stable_mosaic.version = 11 : i64} {
  func.func @embedding_kernel(%arg0: i32, %arg1: memref<8x1xi32, #tpu.memory_space<vmem>>, %arg2: memref<48x1xi32, #tpu.memory_space<vmem>>, %arg3: memref<8x640xi32, #tpu.memory_space<vmem>>, %arg4: memref<65x384xf32, #tpu.memory_space<vmem>>, %arg5: memref<256x1024xf32, #tpu.memory_space<vmem>>, %arg6: memref<256x1024xf32, #tpu.memory_space<vmem>>, %arg7: memref<2x128xf32, #tpu.memory_space<vmem>>, %arg8: memref<2x128xf32, #tpu.memory_space<vmem>>, %arg9: memref<8x640xf32, #tpu.memory_space<vmem>>) attributes {dimension_semantics = [#tpu.dimension_semantics<parallel>], iteration_bounds = array<i64: 1>, scalar_prefetch = 0 : i64, scratch_operands = 0 : i64, tpu.core_type = #tpu.core_type<tc>, window_params = [{transform_indices = @transform_0, window_bounds = array<i64: 8, 1>}, {transform_indices = @transform_1, window_bounds = array<i64: 48, 1>}, {transform_indices = @transform_2, window_bounds = array<i64: 8, 640>}, {pipeline_mode = #tpu.pipeline_mode<synchronous>, transform_indices = @transform_3, window_bounds = array<i64: 65, 384>}, {pipeline_mode = #tpu.pipeline_mode<synchronous>, transform_indices = @transform_4, window_bounds = array<i64: 256, 1024>}, {pipeline_mode = #tpu.pipeline_mode<synchronous>, transform_indices = @transform_5, window_bounds = array<i64: 256, 1024>}, {pipeline_mode = #tpu.pipeline_mode<synchronous>, transform_indices = @transform_6, window_bounds = array<i64: 2, 128>}, {pipeline_mode = #tpu.pipeline_mode<synchronous>, transform_indices = @transform_7, window_bounds = array<i64: 2, 128>}, {transform_indices = @transform_8, window_bounds = array<i64: 8, 640>}]} {
    %c0 = arith.constant 0 : index
    %c0_0 = arith.constant 0 : index
    %0 = vector.load %arg1[%c0, %c0_0] : memref<8x1xi32, #tpu.memory_space<vmem>>, vector<8x1xi32>
    %1 = tpu.iota {dimensions = array<i32: 1>} : vector<8x65xi32>
    %2 = vector.broadcast %0 : vector<8x1xi32> to vector<8x65xi32>
    %3 = arith.cmpi eq, %1, %2 : vector<8x65xi32>
    %4 = arith.extui %3 : vector<8x65xi1> to vector<8x65xi32>
    %5 = arith.sitofp %4 : vector<8x65xi32> to vector<8x65xf32>
    %c0_1 = arith.constant 0 : index
    %c0_2 = arith.constant 0 : index
    %6 = vector.load %arg4[%c0_1, %c0_2] : memref<65x384xf32, #tpu.memory_space<vmem>>, vector<65x384xf32>
    %cst = arith.constant dense<0.000000e+00> : vector<8x384xf32>
    %7 = tpu.matmul %5, %6, %cst {dimension_numbers = #tpu.dot_dimension_numbers<[1], [0], [0], [1], [0, 0, 1, 1], [], []>} : vector<8x65xf32>, vector<65x384xf32>, vector<8x384xf32> -> vector<8x384xf32>
    %c0_3 = arith.constant 0 : index
    %c0_4 = arith.constant 0 : index
    %8 = vector.load %arg2[%c0_3, %c0_4] : memref<48x1xi32, #tpu.memory_space<vmem>>, vector<48x1xi32>
    %9 = tpu.iota {dimensions = array<i32: 1>} : vector<48x256xi32>
    %10 = vector.broadcast %8 : vector<48x1xi32> to vector<48x256xi32>
    %11 = arith.cmpi eq, %9, %10 : vector<48x256xi32>
    %12 = arith.extui %11 : vector<48x256xi1> to vector<48x256xi32>
    %13 = arith.sitofp %12 : vector<48x256xi32> to vector<48x256xf32>
    %c0_5 = arith.constant 0 : index
    %c0_6 = arith.constant 0 : index
    %14 = vector.load %arg5[%c0_5, %c0_6] : memref<256x1024xf32, #tpu.memory_space<vmem>>, vector<256x1024xf32>
    %cst_7 = arith.constant dense<0.000000e+00> : vector<48x1024xf32>
    %15 = tpu.matmul %13, %14, %cst_7 {dimension_numbers = #tpu.dot_dimension_numbers<[1], [0], [0], [1], [0, 0, 1, 1], [], []>} : vector<48x256xf32>, vector<256x1024xf32>, vector<48x1024xf32> -> vector<48x1024xf32>
    %c0_8 = arith.constant 0 : index
    %c0_9 = arith.constant 0 : index
    %16 = vector.load %arg7[%c0_8, %c0_9] : memref<2x128xf32, #tpu.memory_space<vmem>>, vector<1x128xf32>
    %17 = vector.shape_cast %16 : vector<1x128xf32> to vector<1x128xf32>
    %18 = vector.broadcast %17 : vector<1x128xf32> to vector<8x128xf32>
    %c0_10 = arith.constant 0 : index
    %c0_11 = arith.constant 0 : index
    %19 = vector.load %arg8[%c0_10, %c0_11] : memref<2x128xf32, #tpu.memory_space<vmem>>, vector<1x128xf32>
    %20 = vector.shape_cast %19 : vector<1x128xf32> to vector<1x128xf32>
    %21 = vector.broadcast %20 : vector<1x128xf32> to vector<8x128xf32>
    %c1 = arith.constant 1 : index
    %c0_12 = arith.constant 0 : index
    %22 = vector.load %arg7[%c1, %c0_12] : memref<2x128xf32, #tpu.memory_space<vmem>>, vector<1x128xf32>
    %23 = vector.shape_cast %22 : vector<1x128xf32> to vector<1x128xf32>
    %24 = vector.broadcast %23 : vector<1x128xf32> to vector<8x128xf32>
    %c1_13 = arith.constant 1 : index
    %c0_14 = arith.constant 0 : index
    %25 = vector.load %arg8[%c1_13, %c0_14] : memref<2x128xf32, #tpu.memory_space<vmem>>, vector<1x128xf32>
    %26 = vector.shape_cast %25 : vector<1x128xf32> to vector<1x128xf32>
    %27 = vector.broadcast %26 : vector<1x128xf32> to vector<8x128xf32>
    %c0_15 = arith.constant 0 : index
    %c0_16 = arith.constant 0 : index
    %28 = vector.load %arg6[%c0_15, %c0_16] : memref<256x1024xf32, #tpu.memory_space<vmem>>, vector<256x1024xf32>
    %29 = vector.extract_strided_slice %15 {offsets = [0, 0], sizes = [8, 512], strides = [1, 1]} : vector<48x1024xf32> to vector<8x512xf32>
    %30 = vector.extract_strided_slice %15 {offsets = [40, 512], sizes = [8, 512], strides = [1, 1]} : vector<48x1024xf32> to vector<8x512xf32>
    %31 = tpu.concatenate %18, %24 in 1 : vector<8x128xf32>, vector<8x128xf32> -> vector<8x256xf32>
    %cst_17 = arith.constant dense<0.000000e+00> : vector<8x1024xf32>
    %32 = tpu.matmul %31, %28, %cst_17 {dimension_numbers = #tpu.dot_dimension_numbers<[1], [0], [0], [1], [0, 0, 1, 1], [], []>} : vector<8x256xf32>, vector<256x1024xf32>, vector<8x1024xf32> -> vector<8x1024xf32>
    %33 = vector.extract_strided_slice %32 {offsets = [0, 0], sizes = [8, 512], strides = [1, 1]} : vector<8x1024xf32> to vector<8x512xf32>
    %34 = arith.addf %29, %33 : vector<8x512xf32>
    %35 = vector.extract_strided_slice %32 {offsets = [0, 512], sizes = [8, 512], strides = [1, 1]} : vector<8x1024xf32> to vector<8x512xf32>
    %36 = arith.addf %30, %35 : vector<8x512xf32>
    %37 = vector.extract_strided_slice %34 {offsets = [0, 0], sizes = [8, 256], strides = [1, 1]} : vector<8x512xf32> to vector<8x256xf32>
    %38 = arith.negf %37 : vector<8x256xf32>
    %39 = math.exp %38 : vector<8x256xf32>
    %cst_18 = arith.constant 1.000000e+00 : f32
    %40 = vector.broadcast %cst_18 : f32 to vector<8x256xf32>
    %41 = arith.addf %40, %39 : vector<8x256xf32>
    %42 = arith.divf %40, %41 : vector<8x256xf32>
    %43 = vector.extract_strided_slice %42 {offsets = [0, 128], sizes = [8, 128], strides = [1, 1]} : vector<8x256xf32> to vector<8x128xf32>
    %44 = arith.mulf %43, %21 : vector<8x128xf32>
    %45 = vector.extract_strided_slice %42 {offsets = [0, 0], sizes = [8, 128], strides = [1, 1]} : vector<8x256xf32> to vector<8x128xf32>
    %46 = vector.extract_strided_slice %34 {offsets = [0, 256], sizes = [8, 128], strides = [1, 1]} : vector<8x512xf32> to vector<8x128xf32>
    %47 = math.tanh %46 : vector<8x128xf32>
    %48 = arith.mulf %45, %47 : vector<8x128xf32>
    %49 = arith.addf %44, %48 : vector<8x128xf32>
    %50 = vector.extract_strided_slice %34 {offsets = [0, 384], sizes = [8, 128], strides = [1, 1]} : vector<8x512xf32> to vector<8x128xf32>
    %51 = arith.negf %50 : vector<8x128xf32>
    %52 = math.exp %51 : vector<8x128xf32>
    %cst_19 = arith.constant 1.000000e+00 : f32
    %53 = vector.broadcast %cst_19 : f32 to vector<8x128xf32>
    %54 = arith.addf %53, %52 : vector<8x128xf32>
    %55 = arith.divf %53, %54 : vector<8x128xf32>
    %56 = math.tanh %49 : vector<8x128xf32>
    %57 = arith.mulf %55, %56 : vector<8x128xf32>
    %58 = vector.extract_strided_slice %36 {offsets = [0, 0], sizes = [8, 256], strides = [1, 1]} : vector<8x512xf32> to vector<8x256xf32>
    %59 = arith.negf %58 : vector<8x256xf32>
    %60 = math.exp %59 : vector<8x256xf32>
    %cst_20 = arith.constant 1.000000e+00 : f32
    %61 = vector.broadcast %cst_20 : f32 to vector<8x256xf32>
    %62 = arith.addf %61, %60 : vector<8x256xf32>
    %63 = arith.divf %61, %62 : vector<8x256xf32>
    %64 = vector.extract_strided_slice %63 {offsets = [0, 128], sizes = [8, 128], strides = [1, 1]} : vector<8x256xf32> to vector<8x128xf32>
    %65 = arith.mulf %64, %27 : vector<8x128xf32>
    %66 = vector.extract_strided_slice %63 {offsets = [0, 0], sizes = [8, 128], strides = [1, 1]} : vector<8x256xf32> to vector<8x128xf32>
    %67 = vector.extract_strided_slice %36 {offsets = [0, 256], sizes = [8, 128], strides = [1, 1]} : vector<8x512xf32> to vector<8x128xf32>
    %68 = math.tanh %67 : vector<8x128xf32>
    %69 = arith.mulf %66, %68 : vector<8x128xf32>
    %70 = arith.addf %65, %69 : vector<8x128xf32>
    %71 = vector.extract_strided_slice %36 {offsets = [0, 384], sizes = [8, 128], strides = [1, 1]} : vector<8x512xf32> to vector<8x128xf32>
    %72 = arith.negf %71 : vector<8x128xf32>
    %73 = math.exp %72 : vector<8x128xf32>
    %cst_21 = arith.constant 1.000000e+00 : f32
    %74 = vector.broadcast %cst_21 : f32 to vector<8x128xf32>
    %75 = arith.addf %74, %73 : vector<8x128xf32>
    %76 = arith.divf %74, %75 : vector<8x128xf32>
    %77 = math.tanh %70 : vector<8x128xf32>
    %78 = arith.mulf %76, %77 : vector<8x128xf32>
    %79 = vector.extract_strided_slice %15 {offsets = [8, 0], sizes = [8, 512], strides = [1, 1]} : vector<48x1024xf32> to vector<8x512xf32>
    %80 = vector.extract_strided_slice %15 {offsets = [32, 512], sizes = [8, 512], strides = [1, 1]} : vector<48x1024xf32> to vector<8x512xf32>
    %81 = tpu.concatenate %57, %78 in 1 : vector<8x128xf32>, vector<8x128xf32> -> vector<8x256xf32>
    %cst_22 = arith.constant dense<0.000000e+00> : vector<8x1024xf32>
    %82 = tpu.matmul %81, %28, %cst_22 {dimension_numbers = #tpu.dot_dimension_numbers<[1], [0], [0], [1], [0, 0, 1, 1], [], []>} : vector<8x256xf32>, vector<256x1024xf32>, vector<8x1024xf32> -> vector<8x1024xf32>
    %83 = vector.extract_strided_slice %82 {offsets = [0, 0], sizes = [8, 512], strides = [1, 1]} : vector<8x1024xf32> to vector<8x512xf32>
    %84 = arith.addf %79, %83 : vector<8x512xf32>
    %85 = vector.extract_strided_slice %82 {offsets = [0, 512], sizes = [8, 512], strides = [1, 1]} : vector<8x1024xf32> to vector<8x512xf32>
    %86 = arith.addf %80, %85 : vector<8x512xf32>
    %87 = vector.extract_strided_slice %84 {offsets = [0, 0], sizes = [8, 256], strides = [1, 1]} : vector<8x512xf32> to vector<8x256xf32>
    %88 = arith.negf %87 : vector<8x256xf32>
    %89 = math.exp %88 : vector<8x256xf32>
    %cst_23 = arith.constant 1.000000e+00 : f32
    %90 = vector.broadcast %cst_23 : f32 to vector<8x256xf32>
    %91 = arith.addf %90, %89 : vector<8x256xf32>
    %92 = arith.divf %90, %91 : vector<8x256xf32>
    %93 = vector.extract_strided_slice %92 {offsets = [0, 128], sizes = [8, 128], strides = [1, 1]} : vector<8x256xf32> to vector<8x128xf32>
    %94 = arith.mulf %93, %49 : vector<8x128xf32>
    %95 = vector.extract_strided_slice %92 {offsets = [0, 0], sizes = [8, 128], strides = [1, 1]} : vector<8x256xf32> to vector<8x128xf32>
    %96 = vector.extract_strided_slice %84 {offsets = [0, 256], sizes = [8, 128], strides = [1, 1]} : vector<8x512xf32> to vector<8x128xf32>
    %97 = math.tanh %96 : vector<8x128xf32>
    %98 = arith.mulf %95, %97 : vector<8x128xf32>
    %99 = arith.addf %94, %98 : vector<8x128xf32>
    %100 = vector.extract_strided_slice %84 {offsets = [0, 384], sizes = [8, 128], strides = [1, 1]} : vector<8x512xf32> to vector<8x128xf32>
    %101 = arith.negf %100 : vector<8x128xf32>
    %102 = math.exp %101 : vector<8x128xf32>
    %cst_24 = arith.constant 1.000000e+00 : f32
    %103 = vector.broadcast %cst_24 : f32 to vector<8x128xf32>
    %104 = arith.addf %103, %102 : vector<8x128xf32>
    %105 = arith.divf %103, %104 : vector<8x128xf32>
    %106 = math.tanh %99 : vector<8x128xf32>
    %107 = arith.mulf %105, %106 : vector<8x128xf32>
    %108 = vector.extract_strided_slice %86 {offsets = [0, 0], sizes = [8, 256], strides = [1, 1]} : vector<8x512xf32> to vector<8x256xf32>
    %109 = arith.negf %108 : vector<8x256xf32>
    %110 = math.exp %109 : vector<8x256xf32>
    %cst_25 = arith.constant 1.000000e+00 : f32
    %111 = vector.broadcast %cst_25 : f32 to vector<8x256xf32>
    %112 = arith.addf %111, %110 : vector<8x256xf32>
    %113 = arith.divf %111, %112 : vector<8x256xf32>
    %114 = vector.extract_strided_slice %113 {offsets = [0, 128], sizes = [8, 128], strides = [1, 1]} : vector<8x256xf32> to vector<8x128xf32>
    %115 = arith.mulf %114, %70 : vector<8x128xf32>
    %116 = vector.extract_strided_slice %113 {offsets = [0, 0], sizes = [8, 128], strides = [1, 1]} : vector<8x256xf32> to vector<8x128xf32>
    %117 = vector.extract_strided_slice %86 {offsets = [0, 256], sizes = [8, 128], strides = [1, 1]} : vector<8x512xf32> to vector<8x128xf32>
    %118 = math.tanh %117 : vector<8x128xf32>
    %119 = arith.mulf %116, %118 : vector<8x128xf32>
    %120 = arith.addf %115, %119 : vector<8x128xf32>
    %121 = vector.extract_strided_slice %86 {offsets = [0, 384], sizes = [8, 128], strides = [1, 1]} : vector<8x512xf32> to vector<8x128xf32>
    %122 = arith.negf %121 : vector<8x128xf32>
    %123 = math.exp %122 : vector<8x128xf32>
    %cst_26 = arith.constant 1.000000e+00 : f32
    %124 = vector.broadcast %cst_26 : f32 to vector<8x128xf32>
    %125 = arith.addf %124, %123 : vector<8x128xf32>
    %126 = arith.divf %124, %125 : vector<8x128xf32>
    %127 = math.tanh %120 : vector<8x128xf32>
    %128 = arith.mulf %126, %127 : vector<8x128xf32>
    %129 = vector.extract_strided_slice %15 {offsets = [16, 0], sizes = [8, 512], strides = [1, 1]} : vector<48x1024xf32> to vector<8x512xf32>
    %130 = vector.extract_strided_slice %15 {offsets = [24, 512], sizes = [8, 512], strides = [1, 1]} : vector<48x1024xf32> to vector<8x512xf32>
    %131 = tpu.concatenate %107, %128 in 1 : vector<8x128xf32>, vector<8x128xf32> -> vector<8x256xf32>
    %cst_27 = arith.constant dense<0.000000e+00> : vector<8x1024xf32>
    %132 = tpu.matmul %131, %28, %cst_27 {dimension_numbers = #tpu.dot_dimension_numbers<[1], [0], [0], [1], [0, 0, 1, 1], [], []>} : vector<8x256xf32>, vector<256x1024xf32>, vector<8x1024xf32> -> vector<8x1024xf32>
    %133 = vector.extract_strided_slice %132 {offsets = [0, 0], sizes = [8, 512], strides = [1, 1]} : vector<8x1024xf32> to vector<8x512xf32>
    %134 = arith.addf %129, %133 : vector<8x512xf32>
    %135 = vector.extract_strided_slice %132 {offsets = [0, 512], sizes = [8, 512], strides = [1, 1]} : vector<8x1024xf32> to vector<8x512xf32>
    %136 = arith.addf %130, %135 : vector<8x512xf32>
    %137 = vector.extract_strided_slice %134 {offsets = [0, 0], sizes = [8, 256], strides = [1, 1]} : vector<8x512xf32> to vector<8x256xf32>
    %138 = arith.negf %137 : vector<8x256xf32>
    %139 = math.exp %138 : vector<8x256xf32>
    %cst_28 = arith.constant 1.000000e+00 : f32
    %140 = vector.broadcast %cst_28 : f32 to vector<8x256xf32>
    %141 = arith.addf %140, %139 : vector<8x256xf32>
    %142 = arith.divf %140, %141 : vector<8x256xf32>
    %143 = vector.extract_strided_slice %142 {offsets = [0, 128], sizes = [8, 128], strides = [1, 1]} : vector<8x256xf32> to vector<8x128xf32>
    %144 = arith.mulf %143, %99 : vector<8x128xf32>
    %145 = vector.extract_strided_slice %142 {offsets = [0, 0], sizes = [8, 128], strides = [1, 1]} : vector<8x256xf32> to vector<8x128xf32>
    %146 = vector.extract_strided_slice %134 {offsets = [0, 256], sizes = [8, 128], strides = [1, 1]} : vector<8x512xf32> to vector<8x128xf32>
    %147 = math.tanh %146 : vector<8x128xf32>
    %148 = arith.mulf %145, %147 : vector<8x128xf32>
    %149 = arith.addf %144, %148 : vector<8x128xf32>
    %150 = vector.extract_strided_slice %134 {offsets = [0, 384], sizes = [8, 128], strides = [1, 1]} : vector<8x512xf32> to vector<8x128xf32>
    %151 = arith.negf %150 : vector<8x128xf32>
    %152 = math.exp %151 : vector<8x128xf32>
    %cst_29 = arith.constant 1.000000e+00 : f32
    %153 = vector.broadcast %cst_29 : f32 to vector<8x128xf32>
    %154 = arith.addf %153, %152 : vector<8x128xf32>
    %155 = arith.divf %153, %154 : vector<8x128xf32>
    %156 = math.tanh %149 : vector<8x128xf32>
    %157 = arith.mulf %155, %156 : vector<8x128xf32>
    %158 = vector.extract_strided_slice %136 {offsets = [0, 0], sizes = [8, 256], strides = [1, 1]} : vector<8x512xf32> to vector<8x256xf32>
    %159 = arith.negf %158 : vector<8x256xf32>
    %160 = math.exp %159 : vector<8x256xf32>
    %cst_30 = arith.constant 1.000000e+00 : f32
    %161 = vector.broadcast %cst_30 : f32 to vector<8x256xf32>
    %162 = arith.addf %161, %160 : vector<8x256xf32>
    %163 = arith.divf %161, %162 : vector<8x256xf32>
    %164 = vector.extract_strided_slice %163 {offsets = [0, 128], sizes = [8, 128], strides = [1, 1]} : vector<8x256xf32> to vector<8x128xf32>
    %165 = arith.mulf %164, %120 : vector<8x128xf32>
    %166 = vector.extract_strided_slice %163 {offsets = [0, 0], sizes = [8, 128], strides = [1, 1]} : vector<8x256xf32> to vector<8x128xf32>
    %167 = vector.extract_strided_slice %136 {offsets = [0, 256], sizes = [8, 128], strides = [1, 1]} : vector<8x512xf32> to vector<8x128xf32>
    %168 = math.tanh %167 : vector<8x128xf32>
    %169 = arith.mulf %166, %168 : vector<8x128xf32>
    %170 = arith.addf %165, %169 : vector<8x128xf32>
    %171 = vector.extract_strided_slice %136 {offsets = [0, 384], sizes = [8, 128], strides = [1, 1]} : vector<8x512xf32> to vector<8x128xf32>
    %172 = arith.negf %171 : vector<8x128xf32>
    %173 = math.exp %172 : vector<8x128xf32>
    %cst_31 = arith.constant 1.000000e+00 : f32
    %174 = vector.broadcast %cst_31 : f32 to vector<8x128xf32>
    %175 = arith.addf %174, %173 : vector<8x128xf32>
    %176 = arith.divf %174, %175 : vector<8x128xf32>
    %177 = math.tanh %170 : vector<8x128xf32>
    %178 = arith.mulf %176, %177 : vector<8x128xf32>
    %179 = vector.extract_strided_slice %15 {offsets = [24, 0], sizes = [8, 512], strides = [1, 1]} : vector<48x1024xf32> to vector<8x512xf32>
    %180 = vector.extract_strided_slice %15 {offsets = [16, 512], sizes = [8, 512], strides = [1, 1]} : vector<48x1024xf32> to vector<8x512xf32>
    %181 = tpu.concatenate %157, %178 in 1 : vector<8x128xf32>, vector<8x128xf32> -> vector<8x256xf32>
    %cst_32 = arith.constant dense<0.000000e+00> : vector<8x1024xf32>
    %182 = tpu.matmul %181, %28, %cst_32 {dimension_numbers = #tpu.dot_dimension_numbers<[1], [0], [0], [1], [0, 0, 1, 1], [], []>} : vector<8x256xf32>, vector<256x1024xf32>, vector<8x1024xf32> -> vector<8x1024xf32>
    %183 = vector.extract_strided_slice %182 {offsets = [0, 0], sizes = [8, 512], strides = [1, 1]} : vector<8x1024xf32> to vector<8x512xf32>
    %184 = arith.addf %179, %183 : vector<8x512xf32>
    %185 = vector.extract_strided_slice %182 {offsets = [0, 512], sizes = [8, 512], strides = [1, 1]} : vector<8x1024xf32> to vector<8x512xf32>
    %186 = arith.addf %180, %185 : vector<8x512xf32>
    %187 = vector.extract_strided_slice %184 {offsets = [0, 0], sizes = [8, 256], strides = [1, 1]} : vector<8x512xf32> to vector<8x256xf32>
    %188 = arith.negf %187 : vector<8x256xf32>
    %189 = math.exp %188 : vector<8x256xf32>
    %cst_33 = arith.constant 1.000000e+00 : f32
    %190 = vector.broadcast %cst_33 : f32 to vector<8x256xf32>
    %191 = arith.addf %190, %189 : vector<8x256xf32>
    %192 = arith.divf %190, %191 : vector<8x256xf32>
    %193 = vector.extract_strided_slice %192 {offsets = [0, 128], sizes = [8, 128], strides = [1, 1]} : vector<8x256xf32> to vector<8x128xf32>
    %194 = arith.mulf %193, %149 : vector<8x128xf32>
    %195 = vector.extract_strided_slice %192 {offsets = [0, 0], sizes = [8, 128], strides = [1, 1]} : vector<8x256xf32> to vector<8x128xf32>
    %196 = vector.extract_strided_slice %184 {offsets = [0, 256], sizes = [8, 128], strides = [1, 1]} : vector<8x512xf32> to vector<8x128xf32>
    %197 = math.tanh %196 : vector<8x128xf32>
    %198 = arith.mulf %195, %197 : vector<8x128xf32>
    %199 = arith.addf %194, %198 : vector<8x128xf32>
    %200 = vector.extract_strided_slice %184 {offsets = [0, 384], sizes = [8, 128], strides = [1, 1]} : vector<8x512xf32> to vector<8x128xf32>
    %201 = arith.negf %200 : vector<8x128xf32>
    %202 = math.exp %201 : vector<8x128xf32>
    %cst_34 = arith.constant 1.000000e+00 : f32
    %203 = vector.broadcast %cst_34 : f32 to vector<8x128xf32>
    %204 = arith.addf %203, %202 : vector<8x128xf32>
    %205 = arith.divf %203, %204 : vector<8x128xf32>
    %206 = math.tanh %199 : vector<8x128xf32>
    %207 = arith.mulf %205, %206 : vector<8x128xf32>
    %208 = vector.extract_strided_slice %186 {offsets = [0, 0], sizes = [8, 256], strides = [1, 1]} : vector<8x512xf32> to vector<8x256xf32>
    %209 = arith.negf %208 : vector<8x256xf32>
    %210 = math.exp %209 : vector<8x256xf32>
    %cst_35 = arith.constant 1.000000e+00 : f32
    %211 = vector.broadcast %cst_35 : f32 to vector<8x256xf32>
    %212 = arith.addf %211, %210 : vector<8x256xf32>
    %213 = arith.divf %211, %212 : vector<8x256xf32>
    %214 = vector.extract_strided_slice %213 {offsets = [0, 128], sizes = [8, 128], strides = [1, 1]} : vector<8x256xf32> to vector<8x128xf32>
    %215 = arith.mulf %214, %170 : vector<8x128xf32>
    %216 = vector.extract_strided_slice %213 {offsets = [0, 0], sizes = [8, 128], strides = [1, 1]} : vector<8x256xf32> to vector<8x128xf32>
    %217 = vector.extract_strided_slice %186 {offsets = [0, 256], sizes = [8, 128], strides = [1, 1]} : vector<8x512xf32> to vector<8x128xf32>
    %218 = math.tanh %217 : vector<8x128xf32>
    %219 = arith.mulf %216, %218 : vector<8x128xf32>
    %220 = arith.addf %215, %219 : vector<8x128xf32>
    %221 = vector.extract_strided_slice %186 {offsets = [0, 384], sizes = [8, 128], strides = [1, 1]} : vector<8x512xf32> to vector<8x128xf32>
    %222 = arith.negf %221 : vector<8x128xf32>
    %223 = math.exp %222 : vector<8x128xf32>
    %cst_36 = arith.constant 1.000000e+00 : f32
    %224 = vector.broadcast %cst_36 : f32 to vector<8x128xf32>
    %225 = arith.addf %224, %223 : vector<8x128xf32>
    %226 = arith.divf %224, %225 : vector<8x128xf32>
    %227 = math.tanh %220 : vector<8x128xf32>
    %228 = arith.mulf %226, %227 : vector<8x128xf32>
    %229 = vector.extract_strided_slice %15 {offsets = [32, 0], sizes = [8, 512], strides = [1, 1]} : vector<48x1024xf32> to vector<8x512xf32>
    %230 = vector.extract_strided_slice %15 {offsets = [8, 512], sizes = [8, 512], strides = [1, 1]} : vector<48x1024xf32> to vector<8x512xf32>
    %231 = tpu.concatenate %207, %228 in 1 : vector<8x128xf32>, vector<8x128xf32> -> vector<8x256xf32>
    %cst_37 = arith.constant dense<0.000000e+00> : vector<8x1024xf32>
    %232 = tpu.matmul %231, %28, %cst_37 {dimension_numbers = #tpu.dot_dimension_numbers<[1], [0], [0], [1], [0, 0, 1, 1], [], []>} : vector<8x256xf32>, vector<256x1024xf32>, vector<8x1024xf32> -> vector<8x1024xf32>
    %233 = vector.extract_strided_slice %232 {offsets = [0, 0], sizes = [8, 512], strides = [1, 1]} : vector<8x1024xf32> to vector<8x512xf32>
    %234 = arith.addf %229, %233 : vector<8x512xf32>
    %235 = vector.extract_strided_slice %232 {offsets = [0, 512], sizes = [8, 512], strides = [1, 1]} : vector<8x1024xf32> to vector<8x512xf32>
    %236 = arith.addf %230, %235 : vector<8x512xf32>
    %237 = vector.extract_strided_slice %234 {offsets = [0, 0], sizes = [8, 256], strides = [1, 1]} : vector<8x512xf32> to vector<8x256xf32>
    %238 = arith.negf %237 : vector<8x256xf32>
    %239 = math.exp %238 : vector<8x256xf32>
    %cst_38 = arith.constant 1.000000e+00 : f32
    %240 = vector.broadcast %cst_38 : f32 to vector<8x256xf32>
    %241 = arith.addf %240, %239 : vector<8x256xf32>
    %242 = arith.divf %240, %241 : vector<8x256xf32>
    %243 = vector.extract_strided_slice %242 {offsets = [0, 128], sizes = [8, 128], strides = [1, 1]} : vector<8x256xf32> to vector<8x128xf32>
    %244 = arith.mulf %243, %199 : vector<8x128xf32>
    %245 = vector.extract_strided_slice %242 {offsets = [0, 0], sizes = [8, 128], strides = [1, 1]} : vector<8x256xf32> to vector<8x128xf32>
    %246 = vector.extract_strided_slice %234 {offsets = [0, 256], sizes = [8, 128], strides = [1, 1]} : vector<8x512xf32> to vector<8x128xf32>
    %247 = math.tanh %246 : vector<8x128xf32>
    %248 = arith.mulf %245, %247 : vector<8x128xf32>
    %249 = arith.addf %244, %248 : vector<8x128xf32>
    %250 = vector.extract_strided_slice %234 {offsets = [0, 384], sizes = [8, 128], strides = [1, 1]} : vector<8x512xf32> to vector<8x128xf32>
    %251 = arith.negf %250 : vector<8x128xf32>
    %252 = math.exp %251 : vector<8x128xf32>
    %cst_39 = arith.constant 1.000000e+00 : f32
    %253 = vector.broadcast %cst_39 : f32 to vector<8x128xf32>
    %254 = arith.addf %253, %252 : vector<8x128xf32>
    %255 = arith.divf %253, %254 : vector<8x128xf32>
    %256 = math.tanh %249 : vector<8x128xf32>
    %257 = arith.mulf %255, %256 : vector<8x128xf32>
    %258 = vector.extract_strided_slice %236 {offsets = [0, 0], sizes = [8, 256], strides = [1, 1]} : vector<8x512xf32> to vector<8x256xf32>
    %259 = arith.negf %258 : vector<8x256xf32>
    %260 = math.exp %259 : vector<8x256xf32>
    %cst_40 = arith.constant 1.000000e+00 : f32
    %261 = vector.broadcast %cst_40 : f32 to vector<8x256xf32>
    %262 = arith.addf %261, %260 : vector<8x256xf32>
    %263 = arith.divf %261, %262 : vector<8x256xf32>
    %264 = vector.extract_strided_slice %263 {offsets = [0, 128], sizes = [8, 128], strides = [1, 1]} : vector<8x256xf32> to vector<8x128xf32>
    %265 = arith.mulf %264, %220 : vector<8x128xf32>
    %266 = vector.extract_strided_slice %263 {offsets = [0, 0], sizes = [8, 128], strides = [1, 1]} : vector<8x256xf32> to vector<8x128xf32>
    %267 = vector.extract_strided_slice %236 {offsets = [0, 256], sizes = [8, 128], strides = [1, 1]} : vector<8x512xf32> to vector<8x128xf32>
    %268 = math.tanh %267 : vector<8x128xf32>
    %269 = arith.mulf %266, %268 : vector<8x128xf32>
    %270 = arith.addf %265, %269 : vector<8x128xf32>
    %271 = vector.extract_strided_slice %236 {offsets = [0, 384], sizes = [8, 128], strides = [1, 1]} : vector<8x512xf32> to vector<8x128xf32>
    %272 = arith.negf %271 : vector<8x128xf32>
    %273 = math.exp %272 : vector<8x128xf32>
    %cst_41 = arith.constant 1.000000e+00 : f32
    %274 = vector.broadcast %cst_41 : f32 to vector<8x128xf32>
    %275 = arith.addf %274, %273 : vector<8x128xf32>
    %276 = arith.divf %274, %275 : vector<8x128xf32>
    %277 = math.tanh %270 : vector<8x128xf32>
    %278 = arith.mulf %276, %277 : vector<8x128xf32>
    %279 = vector.extract_strided_slice %15 {offsets = [40, 0], sizes = [8, 512], strides = [1, 1]} : vector<48x1024xf32> to vector<8x512xf32>
    %280 = vector.extract_strided_slice %15 {offsets = [0, 512], sizes = [8, 512], strides = [1, 1]} : vector<48x1024xf32> to vector<8x512xf32>
    %281 = tpu.concatenate %257, %278 in 1 : vector<8x128xf32>, vector<8x128xf32> -> vector<8x256xf32>
    %cst_42 = arith.constant dense<0.000000e+00> : vector<8x1024xf32>
    %282 = tpu.matmul %281, %28, %cst_42 {dimension_numbers = #tpu.dot_dimension_numbers<[1], [0], [0], [1], [0, 0, 1, 1], [], []>} : vector<8x256xf32>, vector<256x1024xf32>, vector<8x1024xf32> -> vector<8x1024xf32>
    %283 = vector.extract_strided_slice %282 {offsets = [0, 0], sizes = [8, 512], strides = [1, 1]} : vector<8x1024xf32> to vector<8x512xf32>
    %284 = arith.addf %279, %283 : vector<8x512xf32>
    %285 = vector.extract_strided_slice %282 {offsets = [0, 512], sizes = [8, 512], strides = [1, 1]} : vector<8x1024xf32> to vector<8x512xf32>
    %286 = arith.addf %280, %285 : vector<8x512xf32>
    %287 = vector.extract_strided_slice %284 {offsets = [0, 0], sizes = [8, 256], strides = [1, 1]} : vector<8x512xf32> to vector<8x256xf32>
    %288 = arith.negf %287 : vector<8x256xf32>
    %289 = math.exp %288 : vector<8x256xf32>
    %cst_43 = arith.constant 1.000000e+00 : f32
    %290 = vector.broadcast %cst_43 : f32 to vector<8x256xf32>
    %291 = arith.addf %290, %289 : vector<8x256xf32>
    %292 = arith.divf %290, %291 : vector<8x256xf32>
    %293 = vector.extract_strided_slice %292 {offsets = [0, 128], sizes = [8, 128], strides = [1, 1]} : vector<8x256xf32> to vector<8x128xf32>
    %294 = arith.mulf %293, %249 : vector<8x128xf32>
    %295 = vector.extract_strided_slice %292 {offsets = [0, 0], sizes = [8, 128], strides = [1, 1]} : vector<8x256xf32> to vector<8x128xf32>
    %296 = vector.extract_strided_slice %284 {offsets = [0, 256], sizes = [8, 128], strides = [1, 1]} : vector<8x512xf32> to vector<8x128xf32>
    %297 = math.tanh %296 : vector<8x128xf32>
    %298 = arith.mulf %295, %297 : vector<8x128xf32>
    %299 = arith.addf %294, %298 : vector<8x128xf32>
    %300 = vector.extract_strided_slice %286 {offsets = [0, 0], sizes = [8, 256], strides = [1, 1]} : vector<8x512xf32> to vector<8x256xf32>
    %301 = arith.negf %300 : vector<8x256xf32>
    %302 = math.exp %301 : vector<8x256xf32>
    %cst_44 = arith.constant 1.000000e+00 : f32
    %303 = vector.broadcast %cst_44 : f32 to vector<8x256xf32>
    %304 = arith.addf %303, %302 : vector<8x256xf32>
    %305 = arith.divf %303, %304 : vector<8x256xf32>
    %306 = vector.extract_strided_slice %305 {offsets = [0, 128], sizes = [8, 128], strides = [1, 1]} : vector<8x256xf32> to vector<8x128xf32>
    %307 = arith.mulf %306, %270 : vector<8x128xf32>
    %308 = vector.extract_strided_slice %305 {offsets = [0, 0], sizes = [8, 128], strides = [1, 1]} : vector<8x256xf32> to vector<8x128xf32>
    %309 = vector.extract_strided_slice %286 {offsets = [0, 256], sizes = [8, 128], strides = [1, 1]} : vector<8x512xf32> to vector<8x128xf32>
    %310 = math.tanh %309 : vector<8x128xf32>
    %311 = arith.mulf %308, %310 : vector<8x128xf32>
    %312 = arith.addf %307, %311 : vector<8x128xf32>
    %313 = tpu.concatenate %7, %299, %312 in 1 : vector<8x384xf32>, vector<8x128xf32>, vector<8x128xf32> -> vector<8x640xf32>
    %c0_45 = arith.constant 0 : index
    %c0_46 = arith.constant 0 : index
    %314 = vector.load %arg3[%c0_45, %c0_46] : memref<8x640xi32, #tpu.memory_space<vmem>>, vector<8x640xi32>
    %c3355443_i32 = arith.constant 3355443 : i32
    %315 = vector.broadcast %c3355443_i32 : i32 to vector<8x640xi32>
    %316 = arith.cmpi sge, %314, %315 : vector<8x640xi32>
    %cst_47 = arith.constant 1.250000e+00 : f32
    %317 = vector.broadcast %cst_47 : f32 to vector<8x640xf32>
    %318 = arith.mulf %313, %317 : vector<8x640xf32>
    %cst_48 = arith.constant 0.000000e+00 : f32
    %319 = vector.broadcast %cst_48 : f32 to vector<8x640xf32>
    %320 = arith.select %316, %318, %319 : vector<8x640xi1>, vector<8x640xf32>
    %c0_49 = arith.constant 0 : index
    %c0_50 = arith.constant 0 : index
    %321 = vector.load %arg9[%c0_49, %c0_50] : memref<8x640xf32, #tpu.memory_space<vmem>>, vector<8x640xf32>
    tpu.vector_store %arg9[%c0_49, %c0_50], %320 {strides = array<i32>} : memref<8x640xf32, #tpu.memory_space<vmem>>, vector<8x640xf32>,
    return
  }
  func.func @transform_0(%arg0: i32) -> (i32, i32) {
    %c0_i32 = arith.constant 0 : i32
    %c0_i32_0 = arith.constant 0 : i32
    return %arg0, %c0_i32 : i32, i32
  }
  func.func @transform_1(%arg0: i32) -> (i32, i32) {
    %c0_i32 = arith.constant 0 : i32
    %c0_i32_0 = arith.constant 0 : i32
    return %arg0, %c0_i32 : i32, i32
  }
  func.func @transform_2(%arg0: i32) -> (i32, i32) {
    %c0_i32 = arith.constant 0 : i32
    %c0_i32_0 = arith.constant 0 : i32
    return %arg0, %c0_i32 : i32, i32
  }
  func.func @transform_3(%arg0: i32) -> (i32, i32) {
    %c0_i32 = arith.constant 0 : i32
    %c0_i32_0 = arith.constant 0 : i32
    %c0_i32_1 = arith.constant 0 : i32
    return %c0_i32, %c0_i32_0 : i32, i32
  }
  func.func @transform_4(%arg0: i32) -> (i32, i32) {
    %c0_i32 = arith.constant 0 : i32
    %c0_i32_0 = arith.constant 0 : i32
    %c0_i32_1 = arith.constant 0 : i32
    return %c0_i32, %c0_i32_0 : i32, i32
  }
  func.func @transform_5(%arg0: i32) -> (i32, i32) {
    %c0_i32 = arith.constant 0 : i32
    %c0_i32_0 = arith.constant 0 : i32
    %c0_i32_1 = arith.constant 0 : i32
    return %c0_i32, %c0_i32_0 : i32, i32
  }
  func.func @transform_6(%arg0: i32) -> (i32, i32) {
    %c0_i32 = arith.constant 0 : i32
    %c0_i32_0 = arith.constant 0 : i32
    %c0_i32_1 = arith.constant 0 : i32
    return %c0_i32, %c0_i32_0 : i32, i32
  }
  func.func @transform_7(%arg0: i32) -> (i32, i32) {
    %c0_i32 = arith.constant 0 : i32
    %c0_i32_0 = arith.constant 0 : i32
    %c0_i32_1 = arith.constant 0 : i32
    return %c0_i32, %c0_i32_0 : i32, i32
  }
  func.func @transform_8(%arg0: i32) -> (i32, i32) {
    %c0_i32 = arith.constant 0 : i32
    %c0_i32_0 = arith.constant 0 : i32
    return %arg0, %c0_i32 : i32, i32
  }
}

</mosaic_0001>

<bundles_post_ra>
// kernel: tpu_custom_call.1
= control target key start
LH: loop header
LB: loop body
LE: loop exit
PB: predicated region body
PF: predicated region fallthrough
CT: control target
= control target key end

     0   :  { %13 = vsyncpa [#allocation3], 0  ;;  %s8444_s0 = inlined_call_operand.vmem [shape: s32[8,1], index: 0, kind: input, shape index: {}]   ;;  %s8445_s1 = inlined_call_operand.vmem [shape: s32[48,1], index: 1, kind: input, shape index: {}]   ;;  %s8446_s2 = inlined_call_operand.vmem [shape: s32[8,640], index: 2, kind: input, shape index: {}]   ;;  %s8447_s3 = inlined_call_operand.hbm [shape: f32[65,384], index: 3, kind: input, shape index: {}]   ;;  %s8448_s4 = inlined_call_operand.hbm [shape: f32[256,1024], index: 4, kind: input, shape index: {}]   ;;  %s8449_s5 = inlined_call_operand.hbm [shape: f32[256,1024], index: 5, kind: input, shape index: {}]   ;;  %s8450_s6 = inlined_call_operand.vmem [shape: f32[2,128], index: 6, kind: input, shape index: {}]   ;;  %s8451_s7 = inlined_call_operand.vmem [shape: f32[2,128], index: 7, kind: input, shape index: {}]   ;;  %s8452_s8 = inlined_call_operand.hbm [shape: f32[8,640], index: 8, kind: output, shape index: {}]  }
   0x1   :  { %14 = vsyncpa [#allocation6], 0  ;;  %s39_s29 = sshll.u32 %s8448_s4, 4  ;;  %s40_s29 = int_to_ptr.hbm [resolvable:$true] %s39_s29 }
   0x2   :  { %15 = vsyncpa [#allocation4], 0  ;;  %s5072_s30 = smov [#allocation5]   ;;  %s26_s12 = sshll.u32 %s8447_s3, 4  ;;  %s27_s12 = int_to_ptr.hbm [resolvable:$true] %s26_s12 }
   0x3   :  { %s41_s9 = sshll.u32 %s5072_s30, 4  ;;  %s5073_s13 = smov 1024   ;;  %s42_s9 = int_to_ptr.vmem [resolvable:$true] %s41_s9 }
   0x4   :  { %s5074_s14 = smov 64   ;;  %s5075_s15 = smov [#allocation2]  }
   0x5   :  { %47 = dma.hbm_to_vmem [thread:$0]  %s40_s29, 32768, %s42_s9, [#allocation6], %s5073_s13, %s5073_s13, %s5074_s14  }
   0x6   :  { %s28_s16 = sshll.u32 %s5075_s15, 4  ;;  %s5076_s17 = smov 384   ;;  %s29_s16 = int_to_ptr.vmem [resolvable:$true] %s28_s16 }
   0x7   :  { %s5077_s18 = smov 24   ;;  %s52_s20 = sshll.u32 %s8449_s5, 4  ;;  %s53_s20 = int_to_ptr.hbm [resolvable:$true] %s52_s20 }
   0x8   :  { %34 = dma.hbm_to_vmem [thread:$0]  %s27_s12, 3456, %s29_s16, [#allocation3], %s5076_s17, %s5076_s17, %s5077_s18  }
   0x9   :  { %s5078_s21 = smov [#allocation7]  }
   0xa   :  { %s54_s22 = sshll.u32 %s5078_s21, 4  ;;  %s55_s22 = int_to_ptr.vmem [resolvable:$true] %s54_s22 }
   0xb   :  { %60 = dma.hbm_to_vmem [thread:$0]  %s53_s20, 32768, %s55_s22, [#allocation6], %s5073_s13, %s5073_s13, %s5074_s14  }
   0xc   :  { %5066 = dma.done.wait [#allocation3], 3456  }
   0xd   :  { %5067 = vsyncadd [#allocation3], 4294963840 }
   0xe   :  { %5068 = dma.done.wait [#allocation6], 65536  }
   0xf   :  { %5069 = vsyncadd [#allocation6], 4294901760  ;;  %v5079_v0 = vmov 0   ;;  %v77_v1 = vld [vmem:[%s8444_s0] sm:$0xff]  ;;  %v188_v2 = vld [vmem:[%s8445_s1 + $0x8] sm:$0xff]  ;;  %vm117_vm0 = vcmask 1040384  }
  0x10   :  { %4127 = vset.pattern.permute.xlu0 %v5079_v0  ;;  %4128 = vset.pattern.permute.xlu1 %v5079_v0  ;;  %v190_v3 = vld [vmem:[%s8445_s1 + $0x18] sm:$0xff]  ;;  %v110_v4 = vld [vmem:[#allocation2 + $0xc0] sm:$0x1]  ;;  %v111_v5 = vld [vmem:[#allocation2 + $0xc8] sm:$0x1]  ;;  %vm113_vm1 = vcmask 531456  }
  0x11   :  { %4129 = vset.pattern.permute.xlu2 %v5079_v0  ;;  %81 = vperm.xlu0 %4127, %v77_v1   ;;  %v112_v6 = vld [vmem:[#allocation2 + $0xd0] sm:$0x1]  ;;  %v107_v7 = vld [vmem:[#allocation2 + $0xa8] sm:$0xff]  ;;  %v109_v9 = vld [vmem:[#allocation2 + $0xb8] sm:$0xff]  ;;  %s5082_s25 = smov [#allocation8]   ;;  %s3956_s27 = sshll.u32 %s8452_s8, 4  ;;  %s3957_s27 = int_to_ptr.hbm [resolvable:$true] %s3956_s27 }
  0x12   :  { %198 = vperm.xlu1 %4128, %v188_v2   ;;  %204 = vperm.xlu2 %4129, %v190_v3   ;;  %v108_v8 = vld [vmem:[#allocation2 + $0xb0] sm:$0xff]  ;;  %v105_v11 = vld [vmem:[#allocation2 + $0x98] sm:$0xff]  ;;  %v106_v12 = vld [vmem:[#allocation2 + $0xa0] sm:$0xff]  ;;  %s3954_s5 = sshll.u32 %s5082_s25, 4  ;;  %s3955_s5 = int_to_ptr.vmem [resolvable:$true] %s3954_s5 }
  0x13   :  { %3968 = vmatpush.msk.msra.mxu0 %vm117_vm0, %v110_v4  ;;  %3970 = vmatpush.msk.msra.mxu1 %vm117_vm0, %v111_v5  ;;  %v104_v10 = vld [vmem:[#allocation2 + $0x90] sm:$0xff]  ;;  %v187_v13 = vld [vmem:[%s8445_s1] sm:$0xff]  ;;  %v101_v16 = vld [vmem:[#allocation2 + $0x78] sm:$0xff] }
  0x14   :  { %3972 = vmatpush.msk.msra.mxu2 %vm117_vm0, %v112_v6  ;;  %v189_v14 = vld [vmem:[%s8445_s1 + $0x10] sm:$0xff]  ;;  %v191_v15 = vld [vmem:[%s8445_s1 + $0x20] sm:$0xff]  ;;  %v103_v18 = vld [vmem:[#allocation2 + $0x88] sm:$0xff] }
  0x15   :  { %135 = vmatpush.msra.mxu0 %v107_v7  ;;  %155 = vmatpush.msra.mxu1 %v108_v8  ;;  %v102_v17 = vld [vmem:[#allocation2 + $0x80] sm:$0xff]  ;;  %v99_v20 = vld [vmem:[#allocation2 + $0x68] sm:$0xff]  ;;  %v100_v21 = vld [vmem:[#allocation2 + $0x70] sm:$0xff] }
  0x16   :  { %175 = vmatpush.msra.mxu2 %v109_v9  ;;  %v98_v19 = vld [vmem:[#allocation2 + $0x60] sm:$0xff]  ;;  %v95_v22 = vld [vmem:[#allocation2 + $0x48] sm:$0xff]  ;;  %v368_v23 = vld [vmem:[#allocation5 + $0x3c0] sm:$0xff] }
  0x17   :  { %136 = vmatpush.msra.mxu0 %v104_v10  ;;  %156 = vmatpush.msra.mxu1 %v105_v11  ;;  %v96_v24 = vld [vmem:[#allocation2 + $0x50] sm:$0xff]  ;;  %v97_v25 = vld [vmem:[#allocation2 + $0x58] sm:$0xff]  ;;  %v192_v28 = vld [vmem:[%s8445_s1 + $0x28] sm:$0xff] }
  0x18   :  { %176 = vmatpush.msra.mxu2 %v106_v12  ;;  %504 = vmatpush.msra.mxu3 %v368_v23  ;;  %v360_v26 = vld [vmem:[#allocation5 + $0x380] sm:$0xff]  ;;  %v92_v27 = vld [vmem:[#allocation2 + $0x30] sm:$0xff]  ;;  %v94_v31 = vld [vmem:[#allocation2 + $0x40] sm:$0xff] }
  0x19   :  { %195 = vperm.xlu0 %4127, %v187_v13   ;;  %137 = vmatpush.msra.mxu0 %v101_v16  ;;  %v93_v29 = vld [vmem:[#allocation2 + $0x38] sm:$0xff]  ;;  %v90_v33 = vld [vmem:[#allocation2 + $0x20] sm:$0xff]  ;;  %v91_v35 = vld [vmem:[#allocation2 + $0x28] sm:$0xff] }
  0x1a   :  { %201 = vperm.xlu1 %4128, %v189_v14   ;;  %207 = vperm.xlu2 %4129, %v191_v15   ;;  %v352_v30 = vld [vmem:[#allocation5 + $0x340] sm:$0xff]  ;;  %v86_v36 = vld [vmem:[#allocation2] sm:$0xff]  ;;  %v87_v37 = vld [vmem:[#allocation2 + $0x8] sm:$0xff] }
  0x1b   :  { %157 = vmatpush.msra.mxu1 %v102_v17  ;;  %177 = vmatpush.msra.mxu2 %v103_v18  ;;  %v89_v32 = vld [vmem:[#allocation2 + $0x18] sm:$0xff]  ;;  %v88_v39 = vld [vmem:[#allocation2 + $0x10] sm:$0xff]  ;;  %v369_v40 = vld [vmem:[#allocation5 + $0x3c8] sm:$0xff] }
  0x1c   :  { %138 = vmatpush.msra.mxu0 %v98_v19  ;;  %505 = vmatpush.msra.mxu3 %v360_v26  ;;  %v344_v34 = vld [vmem:[#allocation5 + $0x300] sm:$0xff]  ;;  %v497_v41 = vld [vmem:[#allocation5 + $0x7c8] sm:$0xff] }
  0x1d   :  { %158 = vmatpush.msra.mxu1 %v99_v20  ;;  %178 = vmatpush.msra.mxu2 %v100_v21  ;;  %v496_v38 = vld [vmem:[#allocation5 + $0x7c0] sm:$0xff]  ;;  %v361_v43 = vld [vmem:[#allocation5 + $0x388] sm:$0xff] }
  0x1e   :  { %139 = vmatpush.msra.mxu0 %v95_v22  ;;  %506 = vmatpush.msra.mxu3 %v352_v30  ;;  %v488_v42 = vld [vmem:[#allocation5 + $0x780] sm:$0xff]  ;;  %v489_v45 = vld [vmem:[#allocation5 + $0x788] sm:$0xff] }
  0x1f   :  { %159 = vmatpush.msra.mxu1 %v96_v24  ;;  %179 = vmatpush.msra.mxu2 %v97_v25  ;;  %v336_v44 = vld [vmem:[#allocation5 + $0x2c0] sm:$0xff]  ;;  %v353_v47 = vld [vmem:[#allocation5 + $0x348] sm:$0xff] }
  0x20   :  { %140 = vmatpush.msra.mxu0 %v92_v27  ;;  %507 = vmatpush.msra.mxu3 %v344_v34  ;;  %v480_v46 = vld [vmem:[#allocation5 + $0x740] sm:$0xff]  ;;  %v481_v49 = vld [vmem:[#allocation5 + $0x748] sm:$0xff] }
  0x21   :  { %210 = vperm.xlu0 %4127, %v192_v28   ;;  %160 = vmatpush.msra.mxu1 %v93_v29  ;;  %v328_v48 = vld [vmem:[#allocation5 + $0x280] sm:$0xff]  ;;  %v345_v51 = vld [vmem:[#allocation5 + $0x308] sm:$0xff] }
  0x22   :  { %180 = vmatpush.msra.mxu2 %v94_v31  ;;  %141 = vmatpush.msra.mxu0 %v89_v32  ;;  %v472_v50 = vld [vmem:[#allocation5 + $0x700] sm:$0xff]  ;;  %v473_v52 = vld [vmem:[#allocation5 + $0x708] sm:$0xff] }
  0x23   :  { %161 = vmatpush.msra.mxu1 %v90_v33  ;;  %508 = vmatpush.msra.mxu3 %v336_v44  ;;  %v464_v53 = vld [vmem:[#allocation5 + $0x6c0] sm:$0xff]  ;;  %v337_v55 = vld [vmem:[#allocation5 + $0x2c8] sm:$0xff] }
  0x24   :  { %181 = vmatpush.msra.mxu2 %v91_v35  ;;  %142 = vmatpush.msra.mxu0 %v86_v36  ;;  %v320_v54 = vld [vmem:[#allocation5 + $0x240] sm:$0xff]  ;;  %v465_v57 = vld [vmem:[#allocation5 + $0x6c8] sm:$0xff]  ;;  %v78_v35 = vlaneseq  ;;  %v370_v36 = vld [vmem:[#allocation5 + $0x3d0] sm:$0xff] }
  0x25   :  { %162 = vmatpush.msra.mxu1 %v87_v37  ;;  %509 = vmatpush.msra.mxu3 %v328_v48  ;;  %v312_v56 = vld [vmem:[#allocation5 + $0x200] sm:$0xff]  ;;  %v329_v59 = vld [vmem:[#allocation5 + $0x288] sm:$0xff]  ;;  %v338_v48 = vld [vmem:[#allocation5 + $0x2d0] sm:$0xff] }
  0x26   :  { %539 = vmatpush.msrb.mxu0 %v496_v38  ;;  %182 = vmatpush.msra.mxu2 %v88_v39  ;;  %v456_v58 = vld [vmem:[#allocation5 + $0x680] sm:$0xff]  ;;  %v457_v61 = vld [vmem:[#allocation5 + $0x688] sm:$0xff]  ;;  %v5158_v37 = vand.u32 127, %v78_v35  ;;  %v362_v38 = vld [vmem:[#allocation5 + $0x390] sm:$0xff] }
  0x27   :  { %574 = vmatpush.msrb.mxu1 %v369_v40  ;;  %510 = vmatpush.msra.mxu3 %v320_v54  ;;  %v304_v60 = vld [vmem:[#allocation5 + $0x1c0] sm:$0xff]  ;;  %v321_v63 = vld [vmem:[#allocation5 + $0x248] sm:$0xff]  ;;  %v354_v39 = vld [vmem:[#allocation5 + $0x350] sm:$0xff] }
  0x28   :  { %609 = vmatpush.msrb.mxu2 %v497_v41  ;;  %540 = vmatpush.msrb.mxu0 %v488_v42  ;;  %v448_v62 = vld [vmem:[#allocation5 + $0x640] sm:$0xff]  ;;  %v449_v1 = vld [vmem:[#allocation5 + $0x648] sm:$0xff]  ;;  %v346_v40 = vld [vmem:[#allocation5 + $0x310] sm:$0xff] }
  0x29   :  { %575 = vmatpush.msrb.mxu1 %v361_v43  ;;  %511 = vmatpush.msra.mxu3 %v312_v56  ;;  %v296_v0 = vld [vmem:[#allocation5 + $0x180] sm:$0xff]  ;;  %v313_v3 = vld [vmem:[#allocation5 + $0x208] sm:$0xff]  ;;  %v498_v42 = vld [vmem:[#allocation5 + $0x7d0] sm:$0xff]  ;;  %v5080_v43 = vmov 0.0  }
  0x2a   :  { %610 = vmatpush.msrb.mxu2 %v489_v45  ;;  %541 = vmatpush.msrb.mxu0 %v480_v46  ;;  %v440_v2 = vld [vmem:[#allocation5 + $0x600] sm:$0xff]  ;;  %v441_v5 = vld [vmem:[#allocation5 + $0x608] sm:$0xff]  ;;  %v371_v45 = vld [vmem:[#allocation5 + $0x3d8] sm:$0xff] }
  0x2b   :  { %576 = vmatpush.msrb.mxu1 %v353_v47  ;;  %512 = vmatpush.msra.mxu3 %v304_v60  ;;  %v288_v4 = vld [vmem:[#allocation5 + $0x140] sm:$0xff]  ;;  %v305_v7 = vld [vmem:[#allocation5 + $0x1c8] sm:$0xff]  ;;  %v499_v46 = vld [vmem:[#allocation5 + $0x7d8] sm:$0xff]  ;;  %v5081_v60 = vmov 1.0  }
  0x2c   :  { %611 = vmatpush.msrb.mxu2 %v481_v49  ;;  %542 = vmatpush.msrb.mxu0 %v472_v50  ;;  %v432_v6 = vld [vmem:[#allocation5 + $0x5c0] sm:$0xff]  ;;  %v433_v8 = vld [vmem:[#allocation5 + $0x5c8] sm:$0xff]  ;;  %v490_v47 = vld [vmem:[#allocation5 + $0x790] sm:$0xff] }
  0x2d   :  { %577 = vmatpush.msrb.mxu1 %v345_v51  ;;  %513 = vmatpush.msra.mxu3 %v296_v0  ;;  %v424_v9 = vld [vmem:[#allocation5 + $0x580] sm:$0xff]  ;;  %v297_v10 = vld [vmem:[#allocation5 + $0x188] sm:$0xff]  ;;  %v363_v49 = vld [vmem:[#allocation5 + $0x398] sm:$0xff]  ;;  %v5162_v51 = vadd.s32 128, %v5158_v37 }
  0x2e   :  { %612 = vmatpush.msrb.mxu2 %v473_v52  ;;  %543 = vmatpush.msrb.mxu0 %v464_v53  ;;  %v425_v11 = vld [vmem:[#allocation5 + $0x588] sm:$0xff]  ;;  %v416_v12 = vld [vmem:[#allocation5 + $0x540] sm:$0xff]  ;;  %v491_v50 = vld [vmem:[#allocation5 + $0x798] sm:$0xff] }
  0x2f   :  { %578 = vmatpush.msrb.mxu1 %v337_v55  ;;  %514 = vmatpush.msra.mxu3 %v288_v4  ;;  %v289_v13 = vld [vmem:[#allocation5 + $0x148] sm:$0xff]  ;;  %v280_v15 = vld [vmem:[#allocation5 + $0x100] sm:$0xff]  ;;  %v482_v52 = vld [vmem:[#allocation5 + $0x750] sm:$0xff] }
  0x30   :  { %613 = vmatpush.msrb.mxu2 %v465_v57  ;;  %544 = vmatpush.msrb.mxu0 %v456_v58  ;;  %v417_v14 = vld [vmem:[#allocation5 + $0x548] sm:$0xff]  ;;  %v408_v16 = vld [vmem:[#allocation5 + $0x500] sm:$0xff]  ;;  %v330_v53 = vld [vmem:[#allocation5 + $0x290] sm:$0xff] }
  0x31   :  { %579 = vmatpush.msrb.mxu1 %v329_v59  ;;  %515 = vmatpush.msra.mxu3 %v280_v15  ;;  %v281_v17 = vld [vmem:[#allocation5 + $0x108] sm:$0xff]  ;;  %v272_v19 = vld [vmem:[#allocation5 + $0xc0] sm:$0xff]  ;;  %v355_v54 = vld [vmem:[#allocation5 + $0x358] sm:$0xff] }
  0x32   :  { %614 = vmatpush.msrb.mxu2 %v457_v61  ;;  %545 = vmatpush.msrb.mxu0 %v448_v62  ;;  %v409_v18 = vld [vmem:[#allocation5 + $0x508] sm:$0xff]  ;;  %v400_v20 = vld [vmem:[#allocation5 + $0x4c0] sm:$0xff]  ;;  %v483_v55 = vld [vmem:[#allocation5 + $0x758] sm:$0xff] }
  0x33   :  { %580 = vmatpush.msrb.mxu1 %v321_v63  ;;  %516 = vmatpush.msra.mxu3 %v272_v19  ;;  %v273_v21 = vld [vmem:[#allocation5 + $0xc8] sm:$0xff]  ;;  %v264_v23 = vld [vmem:[#allocation5 + $0x80] sm:$0xff]  ;;  %v474_v59 = vld [vmem:[#allocation5 + $0x710] sm:$0xff] }
  0x34   :  { %615 = vmatpush.msrb.mxu2 %v449_v1  ;;  %546 = vmatpush.msrb.mxu0 %v440_v2  ;;  %v401_v22 = vld [vmem:[#allocation5 + $0x4c8] sm:$0xff]  ;;  %v392_v24 = vld [vmem:[#allocation5 + $0x480] sm:$0xff]  ;;  %v347_v61 = vld [vmem:[#allocation5 + $0x318] sm:$0xff] }
  0x35   :  { %581 = vmatpush.msrb.mxu1 %v313_v3  ;;  %v265_v25 = vld [vmem:[#allocation5 + $0x88] sm:$0xff]  ;;  %517 = vmatpush.msra.mxu3 %v264_v23  ;;  %v256_v27 = vld [vmem:[#allocation5 + $0x40] sm:$0xff]  ;;  %v475_v62 = vld [vmem:[#allocation5 + $0x718] sm:$0xff] }
  0x36   :  { %616 = vmatpush.msrb.mxu2 %v441_v5  ;;  %547 = vmatpush.msrb.mxu0 %v432_v6  ;;  %v393_v26 = vld [vmem:[#allocation5 + $0x488] sm:$0xff]  ;;  %v384_v28 = vld [vmem:[#allocation5 + $0x440] sm:$0xff]  ;;  %v466_v63 = vld [vmem:[#allocation5 + $0x6d0] sm:$0xff] }
  0x37   :  { %582 = vmatpush.msrb.mxu1 %v305_v7  ;;  %v257_v29 = vld [vmem:[#allocation5 + $0x48] sm:$0xff]  ;;  %518 = vmatpush.msra.mxu3 %v256_v27  ;;  %v248_v31 = vld [vmem:[#allocation5] sm:$0xff]  ;;  %v322_v0 = vld [vmem:[#allocation5 + $0x250] sm:$0xff] }
  0x38   :  { %617 = vmatpush.msrb.mxu2 %v433_v8  ;;  %548 = vmatpush.msrb.mxu0 %v424_v9  ;;  %v385_v30 = vld [vmem:[#allocation5 + $0x448] sm:$0xff]  ;;  %v376_v32 = vld [vmem:[#allocation5 + $0x400] sm:$0xff]  ;;  %v339_v2 = vld [vmem:[#allocation5 + $0x2d8] sm:$0xff] }
  0x39   :  { %583 = vmatpush.msrb.mxu1 %v297_v10  ;;  %519 = vmatpush.msra.mxu3 %v248_v31  ;;  %v249_v33 = vld [vmem:[#allocation5 + $0x8] sm:$0xff]  ;;  %v467_v3 = vld [vmem:[#allocation5 + $0x6d8] sm:$0xff]  ;;  %v458_v4 = vld [vmem:[#allocation5 + $0x690] sm:$0xff] }
  0x3a   :  { %618 = vmatpush.msrb.mxu2 %v425_v11  ;;  %549 = vmatpush.msrb.mxu0 %v416_v12  ;;  %v377_v34 = vld [vmem:[#allocation5 + $0x408] sm:$0xff]  ;;  %v314_v5 = vld [vmem:[#allocation5 + $0x210] sm:$0xff]  ;;  %v331_v6 = vld [vmem:[#allocation5 + $0x298] sm:$0xff] }
  0x3b   :  { %584 = vmatpush.msrb.mxu1 %v289_v13  ;;  %644 = vmatpush.msrb.mxu3 %v370_v36  ;;  %v459_v7 = vld [vmem:[#allocation5 + $0x698] sm:$0xff]  ;;  %v450_v9 = vld [vmem:[#allocation5 + $0x650] sm:$0xff]  ;;  %v1213_v57 = vld [vmem:[#allocation7 + $0x488] sm:$0xff] }
  0x3c   :  { %619 = vmatpush.msrb.mxu2 %v417_v14  ;;  %550 = vmatpush.msrb.mxu0 %v408_v16  ;;  %v323_v11 = vld [vmem:[#allocation5 + $0x258] sm:$0xff]  ;;  %v442_v13 = vld [vmem:[#allocation5 + $0x610] sm:$0xff]  ;;  %v1085_v8 = vld [vmem:[#allocation7 + $0x88] sm:$0xff] }
  0x3d   :  { %585 = vmatpush.msrb.mxu1 %v281_v17  ;;  %645 = vmatpush.msrb.mxu3 %v362_v38  ;;  %v451_v12 = vld [vmem:[#allocation5 + $0x658] sm:$0xff]  ;;  %v306_v15 = vld [vmem:[#allocation5 + $0x1d0] sm:$0xff] }
  0x3e   :  { %620 = vmatpush.msrb.mxu2 %v409_v18  ;;  %551 = vmatpush.msrb.mxu0 %v400_v20  ;;  %v315_v14 = vld [vmem:[#allocation5 + $0x218] sm:$0xff]  ;;  %v434_v17 = vld [vmem:[#allocation5 + $0x5d0] sm:$0xff] }
  0x3f   :  { %586 = vmatpush.msrb.mxu1 %v273_v21  ;;  %646 = vmatpush.msrb.mxu3 %v354_v39  ;;  %v443_v16 = vld [vmem:[#allocation5 + $0x618] sm:$0xff]  ;;  %v298_v19 = vld [vmem:[#allocation5 + $0x190] sm:$0xff] }
  0x40   :  { %621 = vmatpush.msrb.mxu2 %v401_v22  ;;  %552 = vmatpush.msrb.mxu0 %v392_v24  ;;  %v307_v18 = vld [vmem:[#allocation5 + $0x1d8] sm:$0xff]  ;;  %v426_v22 = vld [vmem:[#allocation5 + $0x590] sm:$0xff] }
  0x41   :  { %587 = vmatpush.msrb.mxu1 %v265_v25  ;;  %647 = vmatpush.msrb.mxu3 %v346_v40  ;;  %v435_v21 = vld [vmem:[#allocation5 + $0x5d8] sm:$0xff]  ;;  %v290_v25 = vld [vmem:[#allocation5 + $0x150] sm:$0xff] }
  0x42   :  { %622 = vmatpush.msrb.mxu2 %v393_v26  ;;  %553 = vmatpush.msrb.mxu0 %v384_v28  ;;  %v299_v23 = vld [vmem:[#allocation5 + $0x198] sm:$0xff]  ;;  %v418_v28 = vld [vmem:[#allocation5 + $0x550] sm:$0xff] }
  0x43   :  { %588 = vmatpush.msrb.mxu1 %v257_v29  ;;  %648 = vmatpush.msrb.mxu3 %v338_v48  ;;  %v427_v27 = vld [vmem:[#allocation5 + $0x598] sm:$0xff]  ;;  %v274_v35 = vld [vmem:[#allocation5 + $0xd0] sm:$0xff] }
  0x44   :  { %623 = vmatpush.msrb.mxu2 %v385_v30  ;;  %554 = vmatpush.msrb.mxu0 %v376_v32  ;;  %v291_v29 = vld [vmem:[#allocation5 + $0x158] sm:$0xff]  ;;  %v282_v30 = vld [vmem:[#allocation5 + $0x110] sm:$0xff] }
  0x45   :  { %589 = vmatpush.msrb.mxu1 %v249_v33  ;;  %649 = vmatpush.msrb.mxu3 %v330_v53  ;;  %v419_v32 = vld [vmem:[#allocation5 + $0x558] sm:$0xff]  ;;  %v410_v33 = vld [vmem:[#allocation5 + $0x510] sm:$0xff] }
  0x46   :  { %624 = vmatpush.msrb.mxu2 %v377_v34  ;;  %v283_v34 = vld [vmem:[#allocation5 + $0x118] sm:$0xff]  ;;  %v402_v38 = vld [vmem:[#allocation5 + $0x4d0] sm:$0xff] }
  0x47   :  { %650 = vmatpush.msrb.mxu3 %v322_v0  ;;  %v411_v36 = vld [vmem:[#allocation5 + $0x518] sm:$0xff]  ;;  %v386_v48 = vld [vmem:[#allocation5 + $0x450] sm:$0xff]  ;;  %v373_v0 = vld [vmem:[#allocation5 + $0x3e8] sm:$0xff] }
  0x48   :  { %v275_v40 = vld [vmem:[#allocation5 + $0xd8] sm:$0xff] }
  0x49   :  { %651 = vmatpush.msrb.mxu3 %v314_v5  ;;  %v387_v53 = vld [vmem:[#allocation5 + $0x458] sm:$0xff] }
  0x4a   :  { %v1295_v24 = vld [vmem:[#allocation7 + $0x718] sm:$0xff] }
  0x4b   :  { %652 = vmatpush.msrb.mxu3 %v306_v15  ;;  %v485_v15 = vld [vmem:[#allocation5 + $0x768] sm:$0xff]  ;;  %v1271_v39 = vld [vmem:[#allocation7 + $0x658] sm:$0xff] }
  0x4d   :  { %653 = vmatpush.msrb.mxu3 %v298_v19  ;;  %v341_v19 = vld [vmem:[#allocation5 + $0x2e8] sm:$0xff] }
  0x4f   :  { %654 = vmatpush.msrb.mxu3 %v290_v25  ;;  %v324_v25 = vld [vmem:[#allocation5 + $0x260] sm:$0xff] }
  0x51   :  { %655 = vmatpush.msrb.mxu3 %v282_v30  ;;  %v316_v30 = vld [vmem:[#allocation5 + $0x220] sm:$0xff] }
  0x53   :  { %656 = vmatpush.msrb.mxu3 %v274_v35  ;;  %v445_v35 = vld [vmem:[#allocation5 + $0x628] sm:$0xff] }
  0x6c   :  { %v205_v31 = vpop.permute.xlu2 %204 }
  0x6d   :  { %vm5231_vm9 = vcmp.eq.s32.totalorder %v5158_v37, %v205_v31  ;;  %vm5236_vm10 = vcmp.eq.s32.totalorder %v5162_v51, %v205_v31  ;;  %v453_v31 = vld [vmem:[#allocation5 + $0x668] sm:$0xff] }
  0x83   :  { %v82_v41 = vpop.permute.xlu0 %81 }
  0x84   :  { %vm83_vm2 = vcmp.eq.s32.totalorder %v5158_v37, %v82_v41  ;;  %v199_v1 = vpop.permute.xlu1 %198  ;;  %v1286_v41 = vld [vmem:[#allocation7 + $0x6d0] sm:$0xff] }
  0x85   :  { %v3967_v44 = vsel %vm83_vm2, 1.0, %v5080_v43  ;;  %vm5187_vm5 = vcmp.eq.s32.totalorder %v5158_v37, %v199_v1  ;;  %vm5192_vm6 = vcmp.eq.s32.totalorder %v5162_v51, %v199_v1  ;;  %v403_v43 = vld [vmem:[#allocation5 + $0x4d8] sm:$0xff]  ;;  %v501_v1 = vld [vmem:[#allocation5 + $0x7e8] sm:$0xff] }
  0x86   :  { %3969 = vmatmul.msk.f32.vlgmr.msra.gmra.mxu0 %vm113_vm1, %v3967_v44  ;;  %3971 = vmatmul.msk.f32.vlgmr.msra.gmra.mxu1 %vm113_vm1, %v3967_v44 }
  0x87   :  { %3973 = vmatmul.msk.f32.vlgmr.msra.gmra.mxu2 %vm113_vm1, %v3967_v44  ;;  %679 = vmatpush.msra.mxu0 %v498_v42  ;;  %v266_v42 = vld [vmem:[#allocation5 + $0x90] sm:$0xff] }
  0x88   :  { %714 = vmatpush.msra.mxu1 %v371_v45  ;;  %748 = vmatpush.msra.mxu2 %v499_v46  ;;  %v394_v44 = vld [vmem:[#allocation5 + $0x490] sm:$0xff]  ;;  %v267_v45 = vld [vmem:[#allocation5 + $0x98] sm:$0xff] }
  0x89   :  { %680 = vmatpush.msra.mxu0 %v490_v47  ;;  %v258_v46 = vld [vmem:[#allocation5 + $0x50] sm:$0xff]  ;;  %657 = vmatpush.msrb.mxu3 %v266_v42  ;;  %v395_v47 = vld [vmem:[#allocation5 + $0x498] sm:$0xff]  ;;  %v437_v42 = vld [vmem:[#allocation5 + $0x5e8] sm:$0xff] }
  0x8a   :  { %715 = vmatpush.msra.mxu1 %v363_v49  ;;  %749 = vmatpush.msra.mxu2 %v491_v50  ;;  %v259_v49 = vld [vmem:[#allocation5 + $0x58] sm:$0xff]  ;;  %v250_v50 = vld [vmem:[#allocation5 + $0x10] sm:$0xff] }
  0x8b   :  { %v196_v56 = vpop.permute.xlu0 %195  ;;  %681 = vmatpush.msra.mxu0 %v482_v52  ;;  %v208_v52 = vpop.permute.xlu2 %207  ;;  %658 = vmatpush.msrb.mxu3 %v258_v46  ;;  %v429_v46 = vld [vmem:[#allocation5 + $0x5a8] sm:$0xff] }
  0x8c   :  { %vm5165_vm3 = vcmp.eq.s32.totalorder %v5158_v37, %v196_v56  ;;  %vm5170_vm4 = vcmp.eq.s32.totalorder %v5162_v51, %v196_v56  ;;  %716 = vmatpush.msra.mxu1 %v355_v54  ;;  %750 = vmatpush.msra.mxu2 %v483_v55  ;;  %v202_v20 = vpop.permute.xlu1 %201  ;;  %v378_v54 = vld [vmem:[#allocation5 + $0x410] sm:$0xff]  ;;  %v251_v55 = vld [vmem:[#allocation5 + $0x18] sm:$0xff]  ;;  %vm5253_vm11 = vcmp.eq.s32.totalorder %v5158_v37, %v208_v52 }
  0x8d   :  { %3986 = vmatmul.msk.f32.vlgmr.msra.gmra.mxu3 %vm5165_vm3, %v5081_v60  ;;  %682 = vmatpush.msra.mxu0 %v474_v59  ;;  %vm5209_vm7 = vcmp.eq.s32.totalorder %v5158_v37, %v202_v20  ;;  %vm5214_vm8 = vcmp.eq.s32.totalorder %v5162_v51, %v202_v20  ;;  %vm5258_vm12 = vcmp.eq.s32.totalorder %v5162_v51, %v208_v52  ;;  %v332_v20 = vld [vmem:[#allocation5 + $0x2a0] sm:$0xff]  ;;  %v5576_v59 = vld [vmem:[#allocation7 + $0x610] sm:$0xff] }
  0x8e   :  { %3992 = vmatmul.msk.f32.vlgmr.msrb.gmra.mxu0 %vm5170_vm4, %v5081_v60  ;;  %3998 = vmatmul.msk.f32.vlgmr.msrb.gmra.mxu1 %vm5165_vm3, %v5081_v60  ;;  %v412_v52 = vld [vmem:[#allocation5 + $0x520] sm:$0xff] }
  0x8f   :  { %4004 = vmatmul.msk.f32.vlgmr.msrb.gmra.mxu2 %vm5170_vm4, %v5081_v60  ;;  %717 = vmatpush.msra.mxu1 %v347_v61  ;;  %v379_v61 = vld [vmem:[#allocation5 + $0x418] sm:$0xff] }
  0x90   :  { %751 = vmatpush.msra.mxu2 %v475_v62  ;;  %683 = vmatpush.msra.mxu0 %v466_v63  ;;  %v372_v62 = vld [vmem:[#allocation5 + $0x3e0] sm:$0xff] }
  0x91   :  { %718 = vmatpush.msra.mxu1 %v339_v2  ;;  %659 = vmatpush.msrb.mxu3 %v250_v50  ;;  %v500_v63 = vld [vmem:[#allocation5 + $0x7e0] sm:$0xff]  ;;  %v421_v50 = vld [vmem:[#allocation5 + $0x568] sm:$0xff] }
  0x92   :  { %752 = vmatpush.msra.mxu2 %v467_v3  ;;  %684 = vmatpush.msra.mxu0 %v458_v4  ;;  %v364_v2 = vld [vmem:[#allocation5 + $0x3a0] sm:$0xff]  ;;  %v365_v4 = vld [vmem:[#allocation5 + $0x3a8] sm:$0xff] }
  0x93   :  { %719 = vmatpush.msra.mxu1 %v331_v6  ;;  %782 = vmatpush.msra.mxu3 %v372_v62  ;;  %v492_v3 = vld [vmem:[#allocation5 + $0x7a0] sm:$0xff]  ;;  %v211_v5 = vpop.permute.xlu0 %210  ;;  %v493_v6 = vld [vmem:[#allocation5 + $0x7a8] sm:$0xff] }
  0x94   :  { %753 = vmatpush.msra.mxu2 %v459_v7  ;;  %685 = vmatpush.msra.mxu0 %v450_v9  ;;  %v356_v7 = vld [vmem:[#allocation5 + $0x360] sm:$0xff]  ;;  %vm5275_vm13 = vcmp.eq.s32.totalorder %v5158_v37, %v211_v5  ;;  %vm5280_vm14 = vcmp.eq.s32.totalorder %v5162_v51, %v211_v5  ;;  %v349_v37 = vld [vmem:[#allocation5 + $0x328] sm:$0xff] }
  0x95   :  { %3987 = vmatmul.msk.f32.gmra.mxu3 %vm5187_vm5, %v5081_v60  ;;  %720 = vmatpush.msra.mxu1 %v323_v11  ;;  %v484_v9 = vld [vmem:[#allocation5 + $0x760] sm:$0xff]  ;;  %v357_v11 = vld [vmem:[#allocation5 + $0x368] sm:$0xff] }
  0x96   :  { %3993 = vmatmul.msk.f32.gmra.mxu0 %vm5192_vm6, %v5081_v60  ;;  %3999 = vmatmul.msk.f32.gmra.mxu1 %vm5187_vm5, %v5081_v60  ;;  %v340_v51 = vld [vmem:[#allocation5 + $0x2e0] sm:$0xff]  ;;  %v277_v62 = vld [vmem:[#allocation5 + $0xe8] sm:$0xff] }
  0x97   :  { %4005 = vmatmul.msk.f32.gmra.mxu2 %vm5192_vm6, %v5081_v60  ;;  %686 = vmatpush.msra.mxu0 %v442_v13  ;;  %v348_v13 = vld [vmem:[#allocation5 + $0x320] sm:$0xff] }
  0x98   :  { %754 = vmatpush.msra.mxu2 %v451_v12  ;;  %721 = vmatpush.msra.mxu1 %v315_v14  ;;  %v388_v5 = vld [vmem:[#allocation5 + $0x460] sm:$0xff]  ;;  %v5638_v14 = vld [vmem:[#allocation7 + $0x510] sm:$0xff] }
  0x99   :  { %687 = vmatpush.msra.mxu0 %v434_v17  ;;  %783 = vmatpush.msra.mxu3 %v364_v2  ;;  %v477_v17 = vld [vmem:[#allocation5 + $0x728] sm:$0xff] }
  0x9a   :  { %755 = vmatpush.msra.mxu2 %v443_v16  ;;  %722 = vmatpush.msra.mxu1 %v307_v18  ;;  %v476_v16 = vld [vmem:[#allocation5 + $0x720] sm:$0xff]  ;;  %v269_v2 = vld [vmem:[#allocation5 + $0xa8] sm:$0xff] }
  0x9b   :  { %688 = vmatpush.msra.mxu0 %v426_v22  ;;  %784 = vmatpush.msra.mxu3 %v356_v7  ;;  %v468_v18 = vld [vmem:[#allocation5 + $0x6e0] sm:$0xff] }
  0x9c   :  { %756 = vmatpush.msra.mxu2 %v435_v21  ;;  %723 = vmatpush.msra.mxu1 %v299_v23  ;;  %v469_v21 = vld [vmem:[#allocation5 + $0x6e8] sm:$0xff]  ;;  %v460_v22 = vld [vmem:[#allocation5 + $0x6a0] sm:$0xff] }
  0x9d   :  { %3988 = vmatmul.msk.f32.gmra.mxu3 %vm5209_vm7, %v5081_v60  ;;  %689 = vmatpush.msra.mxu0 %v418_v28  ;;  %v333_v23 = vld [vmem:[#allocation5 + $0x2a8] sm:$0xff]  ;;  %v452_v28 = vld [vmem:[#allocation5 + $0x660] sm:$0xff] }
  0x9e   :  { %3994 = vmatmul.msk.f32.gmra.mxu0 %vm5214_vm8, %v5081_v60  ;;  %4000 = vmatmul.msk.f32.gmra.mxu1 %vm5209_vm7, %v5081_v60  ;;  %v252_v7 = vld [vmem:[#allocation5 + $0x20] sm:$0xff] }
  0x9f   :  { %4006 = vmatmul.msk.f32.gmra.mxu2 %vm5214_vm8, %v5081_v60  ;;  %724 = vmatpush.msra.mxu1 %v291_v29  ;;  %v325_v29 = vld [vmem:[#allocation5 + $0x268] sm:$0xff] }
  0xa0   :  { %757 = vmatpush.msra.mxu2 %v427_v27  ;;  %690 = vmatpush.msra.mxu0 %v410_v33  ;;  %v461_v27 = vld [vmem:[#allocation5 + $0x6a8] sm:$0xff] }
  0xa1   :  { %725 = vmatpush.msra.mxu1 %v283_v34  ;;  %785 = vmatpush.msra.mxu3 %v348_v13  ;;  %v317_v33 = vld [vmem:[#allocation5 + $0x228] sm:$0xff]  ;;  %v308_v34 = vld [vmem:[#allocation5 + $0x1e0] sm:$0xff] }
  0xa2   :  { %758 = vmatpush.msra.mxu2 %v419_v32  ;;  %691 = vmatpush.msra.mxu0 %v402_v38  ;;  %v444_v32 = vld [vmem:[#allocation5 + $0x620] sm:$0xff]  ;;  %v309_v38 = vld [vmem:[#allocation5 + $0x1e8] sm:$0xff] }
  0xa3   :  { %726 = vmatpush.msra.mxu1 %v275_v40  ;;  %786 = vmatpush.msra.mxu3 %v340_v51  ;;  %v300_v40 = vld [vmem:[#allocation5 + $0x1a0] sm:$0xff]  ;;  %v253_v13 = vld [vmem:[#allocation5 + $0x28] sm:$0xff]  ;;  %v503_v51 = vld [vmem:[#allocation5 + $0x7f8] sm:$0xff] }
  0xa4   :  { %759 = vmatpush.msra.mxu2 %v411_v36  ;;  %692 = vmatpush.msra.mxu0 %v394_v44  ;;  %v436_v36 = vld [vmem:[#allocation5 + $0x5e0] sm:$0xff]  ;;  %v301_v44 = vld [vmem:[#allocation5 + $0x1a8] sm:$0xff] }
  0xa5   :  { %3989 = vmatmul.msk.f32.gmra.mxu3 %vm5231_vm9, %v5081_v60  ;;  %727 = vmatpush.msra.mxu1 %v267_v45  ;;  %v292_v45 = vld [vmem:[#allocation5 + $0x160] sm:$0xff] }
  0xa6   :  { %3995 = vmatmul.msk.f32.gmra.mxu0 %vm5236_vm10, %v5081_v60  ;;  %4001 = vmatmul.msk.f32.gmra.mxu1 %vm5231_vm9, %v5081_v60 }
  0xa7   :  { %4007 = vmatmul.msk.f32.gmra.mxu2 %vm5236_vm10, %v5081_v60  ;;  %693 = vmatpush.msra.mxu0 %v386_v48  ;;  %v293_v48 = vld [vmem:[#allocation5 + $0x168] sm:$0xff] }
  0xa8   :  { %760 = vmatpush.msra.mxu2 %v403_v43  ;;  %728 = vmatpush.msra.mxu1 %v259_v49  ;;  %v428_v43 = vld [vmem:[#allocation5 + $0x5a0] sm:$0xff] }
  0xa9   :  { %694 = vmatpush.msra.mxu0 %v378_v54  ;;  %787 = vmatpush.msra.mxu3 %v332_v20  ;;  %v284_v49 = vld [vmem:[#allocation5 + $0x120] sm:$0xff]  ;;  %v495_v20 = vld [vmem:[#allocation5 + $0x7b8] sm:$0xff] }
  0xaa   :  { %761 = vmatpush.msra.mxu2 %v395_v47  ;;  %729 = vmatpush.msra.mxu1 %v251_v55  ;;  %v420_v47 = vld [vmem:[#allocation5 + $0x560] sm:$0xff]  ;;  %v413_v55 = vld [vmem:[#allocation5 + $0x528] sm:$0xff] }
  0xab   :  { %817 = vmatpush.msrb.mxu0 %v500_v63  ;;  %788 = vmatpush.msra.mxu3 %v324_v25  ;;  %v276_v54 = vld [vmem:[#allocation5 + $0xe0] sm:$0xff]  ;;  %v350_v25 = vld [vmem:[#allocation5 + $0x330] sm:$0xff] }
  0xac   :  { %762 = vmatpush.msra.mxu2 %v387_v53  ;;  %852 = vmatpush.msrb.mxu1 %v373_v0  ;;  %v285_v53 = vld [vmem:[#allocation5 + $0x128] sm:$0xff]  ;;  %v268_v63 = vld [vmem:[#allocation5 + $0xa0] sm:$0xff] }
  0xad   :  { %3990 = vmatmul.msk.f32.gmra.mxu3 %vm5253_vm11, %v5081_v60  ;;  %818 = vmatpush.msrb.mxu0 %v492_v3  ;;  %v405_v0 = vld [vmem:[#allocation5 + $0x4e8] sm:$0xff]  ;;  %v260_v3 = vld [vmem:[#allocation5 + $0x60] sm:$0xff] }
  0xae   :  { %3996 = vmatmul.msk.f32.gmra.mxu0 %vm5258_vm12, %v5081_v60  ;;  %4002 = vmatmul.msk.f32.gmra.mxu1 %vm5253_vm11, %v5081_v60 }
  0xaf   :  { %4008 = vmatmul.msk.f32.gmra.mxu2 %vm5258_vm12, %v5081_v60  ;;  %853 = vmatpush.msrb.mxu1 %v365_v4  ;;  %v397_v4 = vld [vmem:[#allocation5 + $0x4a8] sm:$0xff] }
  0xb0   :  { %763 = vmatpush.msra.mxu2 %v379_v61  ;;  %819 = vmatpush.msrb.mxu0 %v484_v9  ;;  %v404_v61 = vld [vmem:[#allocation5 + $0x4e0] sm:$0xff]  ;;  %v389_v9 = vld [vmem:[#allocation5 + $0x468] sm:$0xff] }
  0xb1   :  { %854 = vmatpush.msrb.mxu1 %v357_v11  ;;  %789 = vmatpush.msra.mxu3 %v316_v30  ;;  %v380_v11 = vld [vmem:[#allocation5 + $0x420] sm:$0xff]  ;;  %v342_v30 = vld [vmem:[#allocation5 + $0x2f0] sm:$0xff] }
  0xb2   :  { %887 = vmatpush.msrb.mxu2 %v501_v1  ;;  %820 = vmatpush.msrb.mxu0 %v476_v16  ;;  %v396_v1 = vld [vmem:[#allocation5 + $0x4a0] sm:$0xff]  ;;  %v381_v16 = vld [vmem:[#allocation5 + $0x428] sm:$0xff] }
  0xb3   :  { %855 = vmatpush.msrb.mxu1 %v349_v37  ;;  %790 = vmatpush.msra.mxu3 %v308_v34  ;;  %v502_v37 = vld [vmem:[#allocation5 + $0x7f0] sm:$0xff] }
  0xb4   :  { %888 = vmatpush.msrb.mxu2 %v493_v6  ;;  %821 = vmatpush.msrb.mxu0 %v468_v18  ;;  %v261_v6 = vld [vmem:[#allocation5 + $0x68] sm:$0xff]  ;;  %v375_v18 = vld [vmem:[#allocation5 + $0x3f8] sm:$0xff]  ;;  %v470_v34 = vld [vmem:[#allocation5 + $0x6f0] sm:$0xff] }
  0xb5   :  { %3991 = vmatmul.msk.f32.gmra.mxu3 %vm5275_vm13, %v5081_v60  ;;  %856 = vmatpush.msrb.mxu1 %v341_v19  ;;  %v494_v19 = vld [vmem:[#allocation5 + $0x7b0] sm:$0xff] }
  0xb6   :  { %3997 = vmatmul.msk.f32.gmra.mxu0 %vm5280_vm14, %v5081_v60  ;;  %4003 = vmatmul.msk.f32.gmra.mxu1 %vm5275_vm13, %v5081_v60 }
  0xb7   :  { %4009 = vmatmul.msk.f32.gmra.mxu2 %vm5280_vm14, %v5081_v60  ;;  %822 = vmatpush.msrb.mxu0 %v460_v22  ;;  %v487_v22 = vld [vmem:[#allocation5 + $0x778] sm:$0xff] }
  0xb8   :  { %889 = vmatpush.msrb.mxu2 %v485_v15  ;;  %857 = vmatpush.msrb.mxu1 %v333_v23  ;;  %v374_v15 = vld [vmem:[#allocation5 + $0x3f0] sm:$0xff]  ;;  %v367_v23 = vld [vmem:[#allocation5 + $0x3b8] sm:$0xff] }
  0xb9   :  { %823 = vmatpush.msrb.mxu0 %v452_v28  ;;  %791 = vmatpush.msra.mxu3 %v300_v40  ;;  %v479_v28 = vld [vmem:[#allocation5 + $0x738] sm:$0xff]  ;;  %v326_v40 = vld [vmem:[#allocation5 + $0x270] sm:$0xff] }
  0xba   :  { %890 = vmatpush.msrb.mxu2 %v477_v17  ;;  %858 = vmatpush.msrb.mxu1 %v325_v29  ;;  %v366_v17 = vld [vmem:[#allocation5 + $0x3b0] sm:$0xff]  ;;  %v359_v29 = vld [vmem:[#allocation5 + $0x378] sm:$0xff] }
  0xbb   :  { %824 = vmatpush.msrb.mxu0 %v444_v32  ;;  %792 = vmatpush.msra.mxu3 %v292_v45  ;;  %v471_v32 = vld [vmem:[#allocation5 + $0x6f8] sm:$0xff]  ;;  %v318_v45 = vld [vmem:[#allocation5 + $0x230] sm:$0xff] }
  0xbc   :  { %891 = vmatpush.msrb.mxu2 %v469_v21  ;;  %859 = vmatpush.msrb.mxu1 %v317_v33  ;;  %v358_v21 = vld [vmem:[#allocation5 + $0x370] sm:$0xff]  ;;  %v351_v33 = vld [vmem:[#allocation5 + $0x338] sm:$0xff] }
  0xbd   :  { %4010 = vmatmul.msk.f32.vlgmr.msrb.gmra.mxu3 %vm5165_vm3, %v5081_v60  ;;  %825 = vmatpush.msrb.mxu0 %v436_v36  ;;  %v463_v36 = vld [vmem:[#allocation5 + $0x6b8] sm:$0xff] }
  0xbe   :  { %4016 = vmatmul.msk.f32.vlgmr.msra.gmra.mxu0 %vm5170_vm4, %v5081_v60  ;;  %4022 = vmatmul.msk.f32.vlgmr.msra.gmra.mxu1 %vm5165_vm3, %v5081_v60 }
  0xbf   :  { %4028 = vmatmul.msk.f32.vlgmr.msra.gmra.mxu2 %vm5170_vm4, %v5081_v60  ;;  %860 = vmatpush.msrb.mxu1 %v309_v38  ;;  %v343_v38 = vld [vmem:[#allocation5 + $0x2f8] sm:$0xff] }
  0xc0   :  { %892 = vmatpush.msrb.mxu2 %v461_v27  ;;  %826 = vmatpush.msrb.mxu0 %v428_v43  ;;  %v486_v27 = vld [vmem:[#allocation5 + $0x770] sm:$0xff]  ;;  %v455_v43 = vld [vmem:[#allocation5 + $0x678] sm:$0xff] }
  0xc1   :  { %861 = vmatpush.msrb.mxu1 %v301_v44  ;;  %793 = vmatpush.msra.mxu3 %v284_v49  ;;  %v335_v44 = vld [vmem:[#allocation5 + $0x2b8] sm:$0xff]  ;;  %v446_v49 = vld [vmem:[#allocation5 + $0x630] sm:$0xff] }
  0xc2   :  { %893 = vmatpush.msrb.mxu2 %v453_v31  ;;  %827 = vmatpush.msrb.mxu0 %v420_v47  ;;  %v478_v31 = vld [vmem:[#allocation5 + $0x730] sm:$0xff]  ;;  %v447_v47 = vld [vmem:[#allocation5 + $0x638] sm:$0xff] }
  0xc3   :  { %862 = vmatpush.msrb.mxu1 %v293_v48  ;;  %794 = vmatpush.msra.mxu3 %v276_v54  ;;  %v327_v48 = vld [vmem:[#allocation5 + $0x278] sm:$0xff]  ;;  %v302_v54 = vld [vmem:[#allocation5 + $0x1b0] sm:$0xff] }
  0xc4   :  { %894 = vmatpush.msrb.mxu2 %v445_v35  ;;  %828 = vmatpush.msrb.mxu0 %v412_v52  ;;  %v334_v35 = vld [vmem:[#allocation5 + $0x2b0] sm:$0xff]  ;;  %v439_v52 = vld [vmem:[#allocation5 + $0x5f8] sm:$0xff] }
  0xc5   :  { %4011 = vmatmul.msk.f32.gmra.mxu3 %vm5187_vm5, %v5081_v60  ;;  %863 = vmatpush.msrb.mxu1 %v285_v53  ;;  %v319_v53 = vld [vmem:[#allocation5 + $0x238] sm:$0xff] }
  0xc6   :  { %4017 = vmatmul.msk.f32.gmra.mxu0 %vm5192_vm6, %v5081_v60  ;;  %4023 = vmatmul.msk.f32.gmra.mxu1 %vm5187_vm5, %v5081_v60 }
  0xc7   :  { %4029 = vmatmul.msk.f32.gmra.mxu2 %vm5192_vm6, %v5081_v60  ;;  %829 = vmatpush.msrb.mxu0 %v404_v61  ;;  %v431_v61 = vld [vmem:[#allocation5 + $0x5b8] sm:$0xff] }
  0xc8   :  { %895 = vmatpush.msrb.mxu2 %v437_v42  ;;  %864 = vmatpush.msrb.mxu1 %v277_v62  ;;  %v462_v42 = vld [vmem:[#allocation5 + $0x6b0] sm:$0xff]  ;;  %v311_v62 = vld [vmem:[#allocation5 + $0x1f8] sm:$0xff] }
  0xc9   :  { %795 = vmatpush.msra.mxu3 %v268_v63  ;;  %830 = vmatpush.msrb.mxu0 %v396_v1  ;;  %v294_v63 = vld [vmem:[#allocation5 + $0x170] sm:$0xff]  ;;  %v423_v1 = vld [vmem:[#allocation5 + $0x578] sm:$0xff] }
  0xca   :  { %896 = vmatpush.msrb.mxu2 %v429_v46  ;;  %865 = vmatpush.msrb.mxu1 %v269_v2  ;;  %v454_v46 = vld [vmem:[#allocation5 + $0x670] sm:$0xff]  ;;  %v303_v2 = vld [vmem:[#allocation5 + $0x1b8] sm:$0xff] }
  0xcb   :  { %796 = vmatpush.msra.mxu3 %v260_v3  ;;  %831 = vmatpush.msrb.mxu0 %v388_v5  ;;  %v422_v3 = vld [vmem:[#allocation5 + $0x570] sm:$0xff]  ;;  %v415_v5 = vld [vmem:[#allocation5 + $0x538] sm:$0xff] }
  0xcc   :  { %897 = vmatpush.msrb.mxu2 %v421_v50  ;;  %866 = vmatpush.msrb.mxu1 %v261_v6  ;;  %v310_v50 = vld [vmem:[#allocation5 + $0x1f0] sm:$0xff]  ;;  %v295_v6 = vld [vmem:[#allocation5 + $0x178] sm:$0xff] }
  0xcd   :  { %4012 = vmatmul.msk.f32.gmra.mxu3 %vm5209_vm7, %v5081_v60  ;;  %832 = vmatpush.msrb.mxu0 %v380_v11  ;;  %v407_v11 = vld [vmem:[#allocation5 + $0x4f8] sm:$0xff] }
  0xce   :  { %4018 = vmatmul.msk.f32.gmra.mxu0 %vm5214_vm8, %v5081_v60  ;;  %4024 = vmatmul.msk.f32.gmra.mxu1 %vm5209_vm7, %v5081_v60 }
  0xcf   :  { %4030 = vmatmul.msk.f32.gmra.mxu2 %vm5214_vm8, %v5081_v60  ;;  %797 = vmatpush.msra.mxu3 %v252_v7  ;;  %v278_v7 = vld [vmem:[#allocation5 + $0xf0] sm:$0xff] }
  0xd0   :  { %898 = vmatpush.msrb.mxu2 %v413_v55  ;;  %867 = vmatpush.msrb.mxu1 %v253_v13  ;;  %v438_v55 = vld [vmem:[#allocation5 + $0x5f0] sm:$0xff]  ;;  %v287_v13 = vld [vmem:[#allocation5 + $0x138] sm:$0xff] }
  0xd1   :  { %922 = vmatpush.msrb.mxu3 %v374_v15  ;;  %957 = vmatpush.msra.mxu0 %v502_v37  ;;  %v270_v15 = vld [vmem:[#allocation5 + $0xb0] sm:$0xff]  ;;  %v399_v37 = vld [vmem:[#allocation5 + $0x4b8] sm:$0xff] }
  0xd2   :  { %899 = vmatpush.msrb.mxu2 %v405_v0  ;;  %992 = vmatpush.msra.mxu1 %v375_v18  ;;  %v430_v0 = vld [vmem:[#allocation5 + $0x5b0] sm:$0xff] }
  0xd3   :  { %923 = vmatpush.msrb.mxu3 %v366_v17  ;;  %958 = vmatpush.msra.mxu0 %v494_v19  ;;  %v398_v17 = vld [vmem:[#allocation5 + $0x4b0] sm:$0xff]  ;;  %v391_v19 = vld [vmem:[#allocation5 + $0x478] sm:$0xff] }
  0xd4   :  { %900 = vmatpush.msrb.mxu2 %v397_v4  ;;  %993 = vmatpush.msra.mxu1 %v367_v23  ;;  %v286_v4 = vld [vmem:[#allocation5 + $0x130] sm:$0xff]  ;;  %v3924_v23 = vld [vmem:[%s8446_s2] sm:$0xff] }
  0xd5   :  { %4013 = vmatmul.msk.f32.gmra.mxu3 %vm5231_vm9, %v5081_v60  ;;  %959 = vmatpush.msra.mxu0 %v486_v27  ;;  %v262_v18 = vld [vmem:[#allocation5 + $0x70] sm:$0xff]  ;;  %v1188_v27 = vld [vmem:[#allocation7 + $0x3c0] sm:$0xff]  ;;  %vm3929_vm15 = vcmp.ge.s32.totalorder %v3924_v23, 3355443  ;;  %v1253_v23 = vld [vmem:[#allocation7 + $0x5c8] sm:$0xff] }
  0xd6   :  { %4019 = vmatmul.msk.f32.gmra.mxu0 %vm5236_vm10, %v5081_v60  ;;  %4025 = vmatmul.msk.f32.gmra.mxu1 %vm5231_vm9, %v5081_v60 }
  0xd7   :  { %4031 = vmatmul.msk.f32.gmra.mxu2 %vm5236_vm10, %v5081_v60  ;;  %924 = vmatpush.msrb.mxu3 %v358_v21  ;;  %v254_v21 = vld [vmem:[#allocation5 + $0x30] sm:$0xff] }
  0xd8   :  { %901 = vmatpush.msrb.mxu2 %v389_v9  ;;  %994 = vmatpush.msra.mxu1 %v359_v29  ;;  %v414_v9 = vld [vmem:[#allocation5 + $0x530] sm:$0xff]  ;;  %v1317_v29 = vld [vmem:[#allocation7 + $0x7c8] sm:$0xff] }
  0xd9   :  { %925 = vmatpush.msrb.mxu3 %v350_v25  ;;  %960 = vmatpush.msra.mxu0 %v478_v31  ;;  %v383_v25 = vld [vmem:[#allocation5 + $0x438] sm:$0xff]  ;;  %v1180_v31 = vld [vmem:[#allocation7 + $0x380] sm:$0xff] }
  0xda   :  { %902 = vmatpush.msrb.mxu2 %v381_v16  ;;  %995 = vmatpush.msra.mxu1 %v351_v33  ;;  %v406_v16 = vld [vmem:[#allocation5 + $0x4f0] sm:$0xff]  ;;  %v1309_v33 = vld [vmem:[#allocation7 + $0x788] sm:$0xff] }
  0xdb   :  { %926 = vmatpush.msrb.mxu3 %v342_v30  ;;  %961 = vmatpush.msra.mxu0 %v470_v34  ;;  %v263_v30 = vld [vmem:[#allocation5 + $0x78] sm:$0xff] }
  0xdc   :  { %1026 = vmatpush.msra.mxu2 %v503_v51  ;;  %996 = vmatpush.msra.mxu1 %v343_v38  ;;  %v279_v51 = vld [vmem:[#allocation5 + $0xf8] sm:$0xff] }
  0xdd   :  { %4014 = vmatmul.msk.f32.gmra.mxu3 %vm5253_vm11, %v5081_v60  ;;  %962 = vmatpush.msra.mxu0 %v462_v42  ;;  %v1301_v42 = vld [vmem:[#allocation7 + $0x748] sm:$0xff] }
  0xde   :  { %1027 = vmatpush.msra.mxu2 %v495_v20  ;;  %4020 = vmatmul.msk.f32.gmra.mxu0 %vm5258_vm12, %v5081_v60  ;;  %v271_v20 = vld [vmem:[#allocation5 + $0xb8] sm:$0xff] }
  0xdf   :  { %4026 = vmatmul.msk.f32.gmra.mxu1 %vm5253_vm11, %v5081_v60  ;;  %4032 = vmatmul.msk.f32.gmra.mxu2 %vm5258_vm12, %v5081_v60 }
  0xe0   :  { %1028 = vmatpush.msra.mxu2 %v487_v22  ;;  %927 = vmatpush.msrb.mxu3 %v334_v35  ;;  %v390_v22 = vld [vmem:[#allocation5 + $0x470] sm:$0xff] }
  0xe1   :  { %997 = vmatpush.msra.mxu1 %v335_v44  ;;  %963 = vmatpush.msra.mxu0 %v454_v46  ;;  %v1164_v46 = vld [vmem:[#allocation7 + $0x300] sm:$0xff] }
  0xe2   :  { %1029 = vmatpush.msra.mxu2 %v479_v28  ;;  %928 = vmatpush.msrb.mxu3 %v326_v40  ;;  %v3925_v28 = vld [vmem:[%s8446_s2 + $0x8] sm:$0xff]  ;;  %v1172_v40 = vld [vmem:[#allocation7 + $0x340] sm:$0xff] }
  0xe3   :  { %998 = vmatpush.msra.mxu1 %v327_v48  ;;  %964 = vmatpush.msra.mxu0 %v446_v49  ;;  %vm3930_vm0 = vcmp.ge.s32.totalorder %v3925_v28, 3355443  ;;  %v3926_v48 = vld [vmem:[%s8446_s2 + $0x10] sm:$0xff]  ;;  %v1189_v49 = vld [vmem:[#allocation7 + $0x3c8] sm:$0xff] }
  0xe4   :  { %1030 = vmatpush.msra.mxu2 %v471_v32  ;;  %929 = vmatpush.msrb.mxu3 %v318_v45  ;;  %v382_v32 = vld [vmem:[#allocation5 + $0x430] sm:$0xff]  ;;  %vm3931_vm1 = vcmp.ge.s32.totalorder %v3926_v48, 3355443  ;;  %v1141_v28 = vld [vmem:[#allocation7 + $0x248] sm:$0xff] }
  0xe5   :  { %4015 = vmatmul.msk.f32.gmra.mxu3 %vm5275_vm13, %v5081_v60  ;;  %999 = vmatpush.msra.mxu1 %v319_v53  ;;  %v1308_v53 = vld [vmem:[#allocation7 + $0x780] sm:$0xff]  ;;  %v1221_v48 = vld [vmem:[#allocation7 + $0x4c8] sm:$0xff] }
  0xe6   :  { %4021 = vmatmul.msk.f32.gmra.mxu0 %vm5280_vm14, %v5081_v60  ;;  %1031 = vmatpush.msra.mxu2 %v463_v36 }
  0xe7   :  { %4027 = vmatmul.msk.f32.gmra.mxu1 %vm5275_vm13, %v5081_v60  ;;  %4033 = vmatmul.msk.f32.gmra.mxu2 %vm5280_vm14, %v5081_v60 }
  0xe8   :  { %1032 = vmatpush.msra.mxu2 %v455_v43  ;;  %930 = vmatpush.msrb.mxu3 %v310_v50  ;;  %v255_v43 = vld [vmem:[#allocation5 + $0x38] sm:$0xff]  ;;  %v1293_v50 = vld [vmem:[#allocation7 + $0x708] sm:$0xff] }
  0xe9   :  { %965 = vmatpush.msra.mxu0 %v438_v55  ;;  %1000 = vmatpush.msra.mxu1 %v311_v62  ;;  %v1285_v55 = vld [vmem:[#allocation7 + $0x6c8] sm:$0xff]  ;;  %v1300_v62 = vld [vmem:[#allocation7 + $0x740] sm:$0xff] }
  0xea   :  { %1033 = vmatpush.msra.mxu2 %v447_v47  ;;  %931 = vmatpush.msrb.mxu3 %v302_v54  ;;  %v1316_v47 = vld [vmem:[#allocation7 + $0x7c0] sm:$0xff]  ;;  %v1181_v54 = vld [vmem:[#allocation7 + $0x388] sm:$0xff] }
  0xeb   :  { %966 = vmatpush.msra.mxu0 %v430_v0  ;;  %1001 = vmatpush.msra.mxu1 %v303_v2  ;;  %v1148_v2 = vld [vmem:[#allocation7 + $0x280] sm:$0xff] }
  0xec   :  { %1034 = vmatpush.msra.mxu2 %v439_v52  ;;  %932 = vmatpush.msrb.mxu3 %v294_v63  ;;  %v1156_v52 = vld [vmem:[#allocation7 + $0x2c0] sm:$0xff] }
  0xed   :  { %4034 = vmatmul.msk.f32.vlgmr.msra.gmra.mxu3 %vm5165_vm3, %v5081_v60  ;;  %967 = vmatpush.msra.mxu0 %v422_v3 }
  0xee   :  { %4040 = vmatmul.msk.f32.vlgmr.msrb.gmra.mxu0 %vm5170_vm4, %v5081_v60  ;;  %1035 = vmatpush.msra.mxu2 %v431_v61 }
  0xef   :  { %4046 = vmatmul.msk.f32.vlgmr.msrb.gmra.mxu1 %vm5165_vm3, %v5081_v60  ;;  %4052 = vmatmul.msk.f32.vlgmr.msrb.gmra.mxu2 %vm5170_vm4, %v5081_v60 }
  0xf0   :  { %1036 = vmatpush.msra.mxu2 %v423_v1  ;;  %933 = vmatpush.msrb.mxu3 %v286_v4  ;;  %v1173_v4 = vld [vmem:[#allocation7 + $0x348] sm:$0xff] }
  0xf1   :  { %1002 = vmatpush.msra.mxu1 %v295_v6  ;;  %968 = vmatpush.msra.mxu0 %v414_v9  ;;  %v1140_v6 = vld [vmem:[#allocation7 + $0x240] sm:$0xff]  ;;  %v1165_v9 = vld [vmem:[#allocation7 + $0x308] sm:$0xff] }
  0xf2   :  { %1037 = vmatpush.msra.mxu2 %v415_v5  ;;  %934 = vmatpush.msrb.mxu3 %v278_v7  ;;  %v1277_v5 = vld [vmem:[#allocation7 + $0x688] sm:$0xff]  ;;  %v1292_v7 = vld [vmem:[#allocation7 + $0x700] sm:$0xff] }
  0xf3   :  { %1003 = vmatpush.msra.mxu1 %v287_v13  ;;  %969 = vmatpush.msra.mxu0 %v406_v16  ;;  %v1284_v16 = vld [vmem:[#allocation7 + $0x6c0] sm:$0xff] }
  0xf4   :  { %1038 = vmatpush.msra.mxu2 %v407_v11  ;;  %935 = vmatpush.msrb.mxu3 %v270_v15  ;;  %v1269_v11 = vld [vmem:[#allocation7 + $0x648] sm:$0xff]  ;;  %v1132_v15 = vld [vmem:[#allocation7 + $0x200] sm:$0xff] }
  0xf5   :  { %4035 = vmatmul.msk.f32.gmra.mxu3 %vm5187_vm5, %v5081_v60  ;;  %1004 = vmatpush.msra.mxu1 %v279_v51  ;;  %v1261_v51 = vld [vmem:[#allocation7 + $0x608] sm:$0xff] }
  0xf6   :  { %4041 = vmatmul.msk.f32.gmra.mxu0 %vm5192_vm6, %v5081_v60  ;;  %1039 = vmatpush.msra.mxu2 %v399_v37  ;;  %v1157_v37 = vld [vmem:[#allocation7 + $0x2c8] sm:$0xff] }
  0xf7   :  { %4047 = vmatmul.msk.f32.gmra.mxu1 %vm5187_vm5, %v5081_v60  ;;  %4053 = vmatmul.msk.f32.gmra.mxu2 %vm5192_vm6, %v5081_v60 }
  0xf8   :  { %970 = vmatpush.msra.mxu0 %v398_v17  ;;  %936 = vmatpush.msrb.mxu3 %v262_v18  ;;  %v1276_v18 = vld [vmem:[#allocation7 + $0x680] sm:$0xff] }
  0xf9   :  { %1040 = vmatpush.msra.mxu2 %v391_v19  ;;  %1005 = vmatpush.msra.mxu1 %v271_v20 }
  0xfa   :  { %937 = vmatpush.msrb.mxu3 %v254_v21  ;;  %971 = vmatpush.msra.mxu0 %v390_v22  ;;  %v1124_v21 = vld [vmem:[#allocation7 + $0x1c0] sm:$0xff]  ;;  %v1149_v22 = vld [vmem:[#allocation7 + $0x288] sm:$0xff] }
  0xfb   :  { %1041 = vmatpush.msra.mxu2 %v383_v25  ;;  %1006 = vmatpush.msra.mxu1 %v263_v30  ;;  %v1116_v25 = vld [vmem:[#allocation7 + $0x180] sm:$0xff] }
  0xfc   :  { %1324 = vmatpush.msra.mxu3 %v1188_v27  ;;  %972 = vmatpush.msra.mxu0 %v382_v32  ;;  %v1268_v27 = vld [vmem:[#allocation7 + $0x640] sm:$0xff] }
  0xfd   :  { %4036 = vmatmul.msk.f32.gmra.mxu3 %vm5209_vm7, %v5081_v60  ;;  %1384 = vmatpush.msrb.mxu2 %v1317_v29  ;;  %v1245_v29 = vld [vmem:[#allocation7 + $0x588] sm:$0xff]  ;;  %v1260_v32 = vld [vmem:[#allocation7 + $0x600] sm:$0xff] }
  0xfe   :  { %4042 = vmatmul.msk.f32.gmra.mxu0 %vm5214_vm8, %v5081_v60  ;;  %1325 = vmatpush.msra.mxu3 %v1180_v31  ;;  %v1108_v31 = vld [vmem:[#allocation7 + $0x140] sm:$0xff] }
  0xff   :  { %4048 = vmatmul.msk.f32.gmra.mxu1 %vm5209_vm7, %v5081_v60  ;;  %4054 = vmatmul.msk.f32.gmra.mxu2 %vm5214_vm8, %v5081_v60 }
 0x100   :  { %1385 = vmatpush.msrb.mxu2 %v1309_v33  ;;  %1326 = vmatpush.msra.mxu3 %v1172_v40  ;;  %v1133_v33 = vld [vmem:[#allocation7 + $0x208] sm:$0xff] }
 0x101   :  { %1007 = vmatpush.msra.mxu1 %v255_v43  ;;  %1344 = vmatpush.msrb.mxu0 %v1316_v47  ;;  %v1125_v43 = vld [vmem:[#allocation7 + $0x1c8] sm:$0xff] }
 0x102   :  { %1386 = vmatpush.msrb.mxu2 %v1301_v42  ;;  %1327 = vmatpush.msra.mxu3 %v1164_v46  ;;  %v1100_v42 = vld [vmem:[#allocation7 + $0x100] sm:$0xff]  ;;  %v1117_v47 = vld [vmem:[#allocation7 + $0x188] sm:$0xff] }
 0x103   :  { %v144_v34 = vpop.f32.mrf.mxu0  ;;  %v164_v35 = vpop.f32.mrf.mxu1  ;;  %1364 = vmatpush.msrb.mxu1 %v1189_v49  ;;  %1345 = vmatpush.msrb.mxu0 %v1308_v53  ;;  %v1244_v46 = vld [vmem:[#allocation7 + $0x580] sm:$0xff]  ;;  %v1109_v53 = vld [vmem:[#allocation7 + $0x148] sm:$0xff] }
 0x104   :  { %v3934_v36 = vmul.f32 1.25, %v144_v34  ;;  %v3935_v38 = vmul.f32 1.25, %v164_v35  ;;  %1387 = vmatpush.msrb.mxu2 %v1293_v50  ;;  %1328 = vmatpush.msra.mxu3 %v1156_v52  ;;  %v1237_v34 = vld [vmem:[#allocation7 + $0x548] sm:$0xff]  ;;  %v1084_v50 = vld [vmem:[#allocation7 + $0x80] sm:$0xff] }
 0x105   :  { %4037 = vmatmul.msk.f32.gmra.mxu3 %vm5231_vm9, %v5081_v60  ;;  %1365 = vmatpush.msrb.mxu1 %v1181_v54  ;;  %v1236_v52 = vld [vmem:[#allocation7 + $0x540] sm:$0xff] }
 0x106   :  { %v3939_v44 = vsel %vm3929_vm15, %v3934_v36, 0.0  ;;  %v3940_v45 = vsel %vm3930_vm0, %v3935_v38, 0.0  ;;  %4043 = vmatmul.msk.f32.gmra.mxu0 %vm5236_vm10, %v5081_v60  ;;  %1388 = vmatpush.msrb.mxu2 %v1285_v55  ;;  %v1252_v36 = vld [vmem:[#allocation7 + $0x5c0] sm:$0xff] }
 0x107   :  { %4049 = vmatmul.msk.f32.gmra.mxu1 %vm5231_vm9, %v5081_v60  ;;  %3944 = vst [vmem:[#allocation8] sm:$0xff] %v3939_v44  ;;  %4055 = vmatmul.msk.f32.gmra.mxu2 %vm5236_vm10, %v5081_v60  ;;  %v1229_v44 = vld [vmem:[#allocation7 + $0x508] sm:$0xff]  ;;  %v1228_v55 = vld [vmem:[#allocation7 + $0x500] sm:$0xff] }
 0x108   :  { %3945 = vst [vmem:[#allocation8 + $0x8] sm:$0xff] %v3940_v45  ;;  %1346 = vmatpush.msrb.mxu0 %v1300_v62  ;;  %1329 = vmatpush.msra.mxu3 %v1148_v2  ;;  %v1092_v45 = vld [vmem:[#allocation7 + $0xc0] sm:$0xff]  ;;  %v1205_v2 = vld [vmem:[#allocation7 + $0x448] sm:$0xff] }
 0x109   :  { %1366 = vmatpush.msrb.mxu1 %v1173_v4  ;;  %1389 = vmatpush.msrb.mxu2 %v1277_v5  ;;  %v1076_v62 = vld [vmem:[#allocation7 + $0x40] sm:$0xff]  ;;  %v1093_v5 = vld [vmem:[#allocation7 + $0xc8] sm:$0xff] }
 0x10a   :  { %v184_v61 = vpop.f32.mrf.mxu2  ;;  %1330 = vmatpush.msra.mxu3 %v1140_v6  ;;  %1347 = vmatpush.msrb.mxu0 %v1292_v7  ;;  %v1220_v4 = vld [vmem:[#allocation7 + $0x4c0] sm:$0xff]  ;;  %v1197_v6 = vld [vmem:[#allocation7 + $0x408] sm:$0xff] }
 0x10b   :  { %v3936_v63 = vmul.f32 1.25, %v184_v61  ;;  %v5425_v0 = vpop.f32.mrf.mxu0  ;;  %v5427_v1 = vpop.f32.mrf.mxu1  ;;  %1367 = vmatpush.msrb.mxu1 %v1165_v9  ;;  %1390 = vmatpush.msrb.mxu2 %v1269_v11  ;;  %v1190_v9 = vld [vmem:[#allocation7 + $0x3d0] sm:$0xff]  ;;  %v1212_v11 = vld [vmem:[#allocation7 + $0x480] sm:$0xff] }
 0x10c   :  { %1331 = vmatpush.msra.mxu3 %v1132_v15  ;;  %1348 = vmatpush.msrb.mxu0 %v1284_v16  ;;  %v1319_v15 = vld [vmem:[#allocation7 + $0x7d8] sm:$0xff] }
 0x10d   :  { %v3941_v3 = vsel %vm3931_vm1, %v3936_v63, 0.0  ;;  %4038 = vmatmul.msk.f32.gmra.mxu3 %vm5253_vm11, %v5081_v60  ;;  %1368 = vmatpush.msrb.mxu1 %v1157_v37  ;;  %v1101_v63 = vld [vmem:[#allocation7 + $0x108] sm:$0xff]  ;;  %v1204_v37 = vld [vmem:[#allocation7 + $0x440] sm:$0xff] }
 0x10e   :  { %3946 = vst [vmem:[#allocation8 + $0x10] sm:$0xff] %v3941_v3  ;;  %4044 = vmatmul.msk.f32.gmra.mxu0 %vm5258_vm12, %v5081_v60  ;;  %1391 = vmatpush.msrb.mxu2 %v1261_v51  ;;  %v1068_v3 = vld [vmem:[#allocation7] sm:$0xff] }
 0x10f   :  { %4050 = vmatmul.msk.f32.gmra.mxu1 %vm5253_vm11, %v5081_v60  ;;  %4056 = vmatmul.msk.f32.gmra.mxu2 %vm5258_vm12, %v5081_v60 }
 0x110   :  { %v5441_v13 = vpop.f32.mrf.mxu3  ;;  %1349 = vmatpush.msrb.mxu0 %v1276_v18  ;;  %1332 = vmatpush.msra.mxu3 %v1124_v21  ;;  %v1182_v18 = vld [vmem:[#allocation7 + $0x390] sm:$0xff]  ;;  %v1311_v21 = vld [vmem:[#allocation7 + $0x798] sm:$0xff] }
 0x111   :  { %1369 = vmatpush.msrb.mxu1 %v1149_v22  ;;  %1392 = vmatpush.msrb.mxu2 %v1253_v23  ;;  %v1077_v22 = vld [vmem:[#allocation7 + $0x48] sm:$0xff]  ;;  %v1174_v23 = vld [vmem:[#allocation7 + $0x350] sm:$0xff] }
 0x112   :  { %v5443_v17 = vpop.f32.mrf.mxu2  ;;  %1333 = vmatpush.msra.mxu3 %v1116_v25  ;;  %1350 = vmatpush.msrb.mxu0 %v1268_v27  ;;  %v1196_v25 = vld [vmem:[#allocation7 + $0x400] sm:$0xff]  ;;  %v1303_v27 = vld [vmem:[#allocation7 + $0x758] sm:$0xff] }
 0x113   :  { %v5445_v19 = vpop.f32.mrf.mxu0  ;;  %v5447_v20 = vpop.f32.mrf.mxu1  ;;  %1370 = vmatpush.msrb.mxu1 %v1141_v28  ;;  %1393 = vmatpush.msrb.mxu2 %v1245_v29  ;;  %v1069_v28 = vld [vmem:[#allocation7 + $0x8] sm:$0xff] }
 0x114   :  { %8853 = vst [vmem:[#allocation12_spill] sm:$0xff] %v5445_v19  ;;  %1334 = vmatpush.msra.mxu3 %v1108_v31  ;;  %1351 = vmatpush.msrb.mxu0 %v1260_v32  ;;  %v1166_v31 = vld [vmem:[#allocation7 + $0x310] sm:$0xff]  ;;  %v5781_v19 = vld [vmem:[#allocation7 + $0x68] sm:$0xff] }
 0x115   :  { %8854 = vst [vmem:[#allocation13_spill] sm:$0xff] %v5447_v20  ;;  %4039 = vmatmul.msk.f32.gmra.mxu3 %vm5275_vm13, %v5081_v60  ;;  %1371 = vmatpush.msrb.mxu1 %v1133_v33  ;;  %v1318_v32 = vld [vmem:[#allocation7 + $0x7d0] sm:$0xff]  ;;  %v1191_v33 = vld [vmem:[#allocation7 + $0x3d8] sm:$0xff] }
 0x116   :  { %4045 = vmatmul.msk.f32.gmra.mxu0 %vm5280_vm14, %v5081_v60  ;;  %1394 = vmatpush.msrb.mxu2 %v1237_v34  ;;  %v5770_v20 = vld [vmem:[#allocation7 + $0x3f0] sm:$0xff]  ;;  %8903 = vst [vmem:[#allocation62_spill] sm:$0xff] %v5781_v19 }
 0x117   :  { %4051 = vmatmul.msk.f32.gmra.mxu1 %vm5275_vm13, %v5081_v60  ;;  %4057 = vmatmul.msk.f32.gmra.mxu2 %vm5280_vm14, %v5081_v60  ;;  %8900 = vst [vmem:[#allocation59_spill] sm:$0xff] %v5770_v20 }
 0x118   :  { %v5461_v30 = vpop.f32.mrf.mxu3  ;;  %1352 = vmatpush.msrb.mxu0 %v1252_v36  ;;  %1335 = vmatpush.msra.mxu3 %v1100_v42  ;;  %v1310_v36 = vld [vmem:[#allocation7 + $0x790] sm:$0xff] }
 0x119   :  { %8855 = vst [vmem:[#allocation14_spill] sm:$0xff] %v5461_v30  ;;  %1372 = vmatpush.msrb.mxu1 %v1125_v43  ;;  %1395 = vmatpush.msrb.mxu2 %v1229_v44  ;;  %v1158_v43 = vld [vmem:[#allocation7 + $0x2d0] sm:$0xff]  ;;  %v1183_v44 = vld [vmem:[#allocation7 + $0x398] sm:$0xff] }
 0x11a   :  { %v5463_v35 = vpop.f32.mrf.mxu2  ;;  %1336 = vmatpush.msra.mxu3 %v1092_v45  ;;  %1353 = vmatpush.msrb.mxu0 %v1244_v46  ;;  %v1287_v45 = vld [vmem:[#allocation7 + $0x6d8] sm:$0xff]  ;;  %v1150_v46 = vld [vmem:[#allocation7 + $0x290] sm:$0xff] }
 0x11b   :  { %8856 = vst [vmem:[#allocation15_spill] sm:$0xff] %v5463_v35  ;;  %v5465_v38 = vpop.f32.mrf.mxu0  ;;  %v5467_v40 = vpop.f32.mrf.mxu1  ;;  %1373 = vmatpush.msrb.mxu1 %v1117_v47  ;;  %1396 = vmatpush.msrb.mxu2 %v1221_v48  ;;  %v1302_v47 = vld [vmem:[#allocation7 + $0x750] sm:$0xff]  ;;  %v1175_v48 = vld [vmem:[#allocation7 + $0x358] sm:$0xff] }
 0x11c   :  { %8857 = vst [vmem:[#allocation16_spill] sm:$0xff] %v5465_v38  ;;  %1337 = vmatpush.msra.mxu3 %v1084_v50  ;;  %1354 = vmatpush.msrb.mxu0 %v1236_v52  ;;  %v1279_v50 = vld [vmem:[#allocation7 + $0x698] sm:$0xff]  ;;  %v5786_v30 = vld [vmem:[#allocation7 + $0x370] sm:$0xff] }
 0x11d   :  { %8858 = vst [vmem:[#allocation17_spill] sm:$0xff] %v5467_v40  ;;  %4058 = vmatmul.msk.f32.vlgmr.msrb.gmra.mxu3 %vm5165_vm3, %v5081_v60  ;;  %1374 = vmatpush.msrb.mxu1 %v1109_v53  ;;  %v1142_v53 = vld [vmem:[#allocation7 + $0x250] sm:$0xff]  ;;  %v1144_v40 = vld [vmem:[#allocation7 + $0x260] sm:$0xff] }
 0x11e   :  { %4064 = vmatmul.msk.f32.vlgmr.msra.gmra.mxu0 %vm5170_vm4, %v5081_v60  ;;  %1397 = vmatpush.msrb.mxu2 %v1213_v57  ;;  %v1294_v57 = vld [vmem:[#allocation7 + $0x710] sm:$0xff]  ;;  %8905 = vst [vmem:[#allocation64_spill] sm:$0xff] %v5786_v30 }
 0x11f   :  { %4070 = vmatmul.msk.f32.vlgmr.msra.gmra.mxu1 %vm5165_vm3, %v5081_v60  ;;  %4076 = vmatmul.msk.f32.vlgmr.msra.gmra.mxu2 %vm5170_vm4, %v5081_v60 }
 0x120   :  { %v5481_v49 = vpop.f32.mrf.mxu3  ;;  %1355 = vmatpush.msrb.mxu0 %v1228_v55  ;;  %1338 = vmatpush.msra.mxu3 %v1076_v62  ;;  %v1167_v55 = vld [vmem:[#allocation7 + $0x318] sm:$0xff] }
 0x121   :  { %8859 = vst [vmem:[#allocation18_spill] sm:$0xff] %v5481_v49  ;;  %1375 = vmatpush.msrb.mxu1 %v1101_v63  ;;  %1398 = vmatpush.msrb.mxu2 %v1205_v2  ;;  %v1134_v63 = vld [vmem:[#allocation7 + $0x210] sm:$0xff] }
 0x122   :  { %v5483_v54 = vpop.f32.mrf.mxu2  ;;  %1339 = vmatpush.msra.mxu3 %v1068_v3  ;;  %1356 = vmatpush.msrb.mxu0 %v1220_v4  ;;  %v1159_v4 = vld [vmem:[#allocation7 + $0x2d8] sm:$0xff] }
 0x123   :  { %8860 = vst [vmem:[#allocation19_spill] sm:$0xff] %v5483_v54  ;;  %v5485_v58 = vpop.f32.mrf.mxu0  ;;  %v5487_v61 = vpop.f32.mrf.mxu1  ;;  %1376 = vmatpush.msrb.mxu1 %v1093_v5  ;;  %1399 = vmatpush.msrb.mxu2 %v1197_v6  ;;  %v1263_v5 = vld [vmem:[#allocation7 + $0x618] sm:$0xff]  ;;  %v1126_v6 = vld [vmem:[#allocation7 + $0x1d0] sm:$0xff]  ;;  %v1152_v54 = vld [vmem:[#allocation7 + $0x2a0] sm:$0xff] }
 0x124   :  { %8861 = vst [vmem:[#allocation20_spill] sm:$0xff] %v5485_v58  ;;  %1404 = vmatpush.msrb.mxu3 %v1190_v9  ;;  %1357 = vmatpush.msrb.mxu0 %v1212_v11  ;;  %v1278_v9 = vld [vmem:[#allocation7 + $0x690] sm:$0xff]  ;;  %v5555_v11 = vld [vmem:[#allocation7 + $0x298] sm:$0xff] }
 0x125   :  { %8862 = vst [vmem:[#allocation21_spill] sm:$0xff] %v5487_v61  ;;  %4059 = vmatmul.msk.f32.gmra.mxu3 %vm5187_vm5, %v5081_v60  ;;  %1464 = vmatpush.msra.mxu2 %v1319_v15  ;;  %v1255_v15 = vld [vmem:[#allocation7 + $0x5d8] sm:$0xff]  ;;  %v1176_v61 = vld [vmem:[#allocation7 + $0x360] sm:$0xff]  ;;  %v5694_v58 = vld [vmem:[#allocation7 + $0x410] sm:$0xff] }
 0x126   :  { %4065 = vmatmul.msk.f32.gmra.mxu0 %vm5192_vm6, %v5081_v60  ;;  %1377 = vmatpush.msrb.mxu1 %v1085_v8 }
 0x127   :  { %4071 = vmatmul.msk.f32.gmra.mxu1 %vm5187_vm5, %v5081_v60  ;;  %4077 = vmatmul.msk.f32.gmra.mxu2 %vm5192_vm6, %v5081_v60 }
 0x128   :  { %v5501_v7 = vpop.f32.mrf.mxu3  ;;  %1358 = vmatpush.msrb.mxu0 %v1204_v37  ;;  %1405 = vmatpush.msrb.mxu3 %v1182_v18  ;;  %v5565_v37 = vld [vmem:[#allocation7 + $0x190] sm:$0xff] }
 0x129   :  { %8863 = vst [vmem:[#allocation22_spill] sm:$0xff] %v5501_v7  ;;  %1465 = vmatpush.msra.mxu2 %v1311_v21  ;;  %1378 = vmatpush.msrb.mxu1 %v1077_v22  ;;  %v5567_v18 = vld [vmem:[#allocation7 + $0x650] sm:$0xff]  ;;  %v5569_v21 = vld [vmem:[#allocation7 + $0x258] sm:$0xff]  ;;  %v1320_v7 = vld [vmem:[#allocation7 + $0x7e0] sm:$0xff] }
 0x12a   :  { %v5503_v16 = vpop.f32.mrf.mxu2  ;;  %1406 = vmatpush.msrb.mxu3 %v1174_v23  ;;  %1359 = vmatpush.msrb.mxu0 %v1196_v25  ;;  %v1247_v22 = vld [vmem:[#allocation7 + $0x598] sm:$0xff]  ;;  %v5574_v23 = vld [vmem:[#allocation7 + $0x150] sm:$0xff] }
 0x12b   :  { %8864 = vst [vmem:[#allocation23_spill] sm:$0xff] %v5503_v16  ;;  %v5505_v10 = vpop.f32.mrf.mxu0  ;;  %v5507_v51 = vpop.f32.mrf.mxu1  ;;  %1466 = vmatpush.msra.mxu2 %v1303_v27  ;;  %1379 = vmatpush.msrb.mxu1 %v1069_v28  ;;  %v5584_v28 = vld [vmem:[#allocation7 + $0x218] sm:$0xff] }
 0x12c   :  { %8865 = vst [vmem:[#allocation24_spill] sm:$0xff] %v5505_v10  ;;  %1407 = vmatpush.msrb.mxu3 %v1166_v31  ;;  %1424 = vmatpush.msra.mxu0 %v1318_v32  ;;  %v1239_v31 = vld [vmem:[#allocation7 + $0x558] sm:$0xff]  ;;  %v5587_v32 = vld [vmem:[#allocation7 + $0x110] sm:$0xff] }
 0x12d   :  { %8866 = vst [vmem:[#allocation25_spill] sm:$0xff] %v5507_v51  ;;  %4060 = vmatmul.msk.f32.gmra.mxu3 %vm5209_vm7, %v5081_v60  ;;  %1444 = vmatpush.msra.mxu1 %v1191_v33  ;;  %v5589_v33 = vld [vmem:[#allocation7 + $0x5d0] sm:$0xff]  ;;  %v5691_v16 = vld [vmem:[#allocation7 + $0x58] sm:$0xff] }
 0x12e   :  { %4066 = vmatmul.msk.f32.gmra.mxu0 %vm5214_vm8, %v5081_v60  ;;  %1467 = vmatpush.msra.mxu2 %v1295_v24  ;;  %v5593_v24 = vld [vmem:[#allocation7 + $0x1d8] sm:$0xff] }
 0x12f   :  { %4072 = vmatmul.msk.f32.gmra.mxu1 %vm5209_vm7, %v5081_v60  ;;  %4078 = vmatmul.msk.f32.gmra.mxu2 %vm5214_vm8, %v5081_v60 }
 0x130   :  { %v5521_v29 = vpop.f32.mrf.mxu3  ;;  %1425 = vmatpush.msra.mxu0 %v1310_v36  ;;  %1408 = vmatpush.msrb.mxu3 %v1158_v43  ;;  %v1231_v36 = vld [vmem:[#allocation7 + $0x518] sm:$0xff]  ;;  %v5602_v43 = vld [vmem:[#allocation7 + $0xd0] sm:$0xff] }
 0x131   :  { %8867 = vst [vmem:[#allocation26_spill] sm:$0xff] %v5521_v29  ;;  %1445 = vmatpush.msra.mxu1 %v1183_v44  ;;  %1468 = vmatpush.msra.mxu2 %v1287_v45  ;;  %v5604_v44 = vld [vmem:[#allocation7 + $0x590] sm:$0xff]  ;;  %v1313_v29 = vld [vmem:[#allocation7 + $0x7a8] sm:$0xff] }
 0x132   :  { %v5523_v34 = vpop.f32.mrf.mxu2  ;;  %1409 = vmatpush.msrb.mxu3 %v1150_v46  ;;  %1426 = vmatpush.msra.mxu0 %v1302_v47  ;;  %v5611_v46 = vld [vmem:[#allocation7 + $0x198] sm:$0xff] }
 0x133   :  { %8868 = vst [vmem:[#allocation27_spill] sm:$0xff] %v5523_v34  ;;  %v5525_v26 = vpop.f32.mrf.mxu0  ;;  %v5527_v42 = vpop.f32.mrf.mxu1  ;;  %1446 = vmatpush.msra.mxu1 %v1175_v48  ;;  %1469 = vmatpush.msra.mxu2 %v1279_v50  ;;  %v1223_v47 = vld [vmem:[#allocation7 + $0x4d8] sm:$0xff]  ;;  %v5619_v48 = vld [vmem:[#allocation7 + $0x90] sm:$0xff] }
 0x134   :  { %8869 = vst [vmem:[#allocation28_spill] sm:$0xff] %v5525_v26  ;;  %1410 = vmatpush.msrb.mxu3 %v1142_v53  ;;  %1427 = vmatpush.msra.mxu0 %v1294_v57  ;;  %v5621_v50 = vld [vmem:[#allocation7 + $0x550] sm:$0xff]  ;;  %v5627_v57 = vld [vmem:[#allocation7 + $0x158] sm:$0xff] }
 0x135   :  { %8870 = vst [vmem:[#allocation29_spill] sm:$0xff] %v5527_v42  ;;  %4061 = vmatmul.msk.f32.gmra.mxu3 %vm5231_vm9, %v5081_v60  ;;  %1447 = vmatpush.msra.mxu1 %v1167_v55  ;;  %v5629_v55 = vld [vmem:[#allocation7 + $0x498] sm:$0xff]  ;;  %v5683_v34 = vld [vmem:[#allocation7 + $0x450] sm:$0xff] }
 0x136   :  { %4067 = vmatmul.msk.f32.gmra.mxu0 %vm5236_vm10, %v5081_v60  ;;  %1470 = vmatpush.msra.mxu2 %v1271_v39  ;;  %v5678_v42 = vld [vmem:[#allocation7 + $0x98] sm:$0xff] }
 0x137   :  { %4073 = vmatmul.msk.f32.gmra.mxu1 %vm5231_vm9, %v5081_v60  ;;  %4079 = vmatmul.msk.f32.gmra.mxu2 %vm5236_vm10, %v5081_v60 }
 0x138   :  { %v5541_v52 = vpop.f32.mrf.mxu3  ;;  %1411 = vmatpush.msrb.mxu3 %v1134_v63  ;;  %1428 = vmatpush.msra.mxu0 %v1286_v41  ;;  %v5642_v63 = vld [vmem:[#allocation7 + $0x118] sm:$0xff] }
 0x139   :  { %8871 = vst [vmem:[#allocation30_spill] sm:$0xff] %v5541_v52  ;;  %1448 = vmatpush.msra.mxu1 %v1159_v4  ;;  %1471 = vmatpush.msra.mxu2 %v1263_v5  ;;  %v5644_v41 = vld [vmem:[#allocation7 + $0x458] sm:$0xff]  ;;  %v5648_v4 = vld [vmem:[#allocation7 + $0x10] sm:$0xff]  ;;  %v1184_v52 = vld [vmem:[#allocation7 + $0x3a0] sm:$0xff] }
 0x13a   :  { %v5543_v62 = vpop.f32.mrf.mxu2  ;;  %1412 = vmatpush.msrb.mxu3 %v1126_v6  ;;  %1429 = vmatpush.msra.mxu0 %v1278_v9  ;;  %v5650_v5 = vld [vmem:[#allocation7 + $0x4d0] sm:$0xff]  ;;  %v5655_v6 = vld [vmem:[%s8450_s6] ss:$0 sm:$0xff]  ;;  %v5659_v9 = vld [vmem:[#allocation7 + $0xd8] sm:$0xff] }
 0x13b   :  { %8872 = vst [vmem:[#allocation31_spill] sm:$0xff] %v5543_v62  ;;  %v5545_v2 = vpop.f32.mrf.mxu0  ;;  %v5547_v3 = vpop.f32.mrf.mxu1  ;;  %1449 = vmatpush.msra.mxu1 %v5555_v11  ;;  %1472 = vmatpush.msra.mxu2 %v1255_v15  ;;  %v5663_v15 = vld [vmem:[#allocation7 + $0x418] sm:$0xff]  ;;  %v1321_v62 = vld [vmem:[#allocation7 + $0x7e8] sm:$0xff] }
 0x13c   :  { %1413 = vmatpush.msrb.mxu3 %v5565_v37  ;;  %1430 = vmatpush.msra.mxu0 %v5567_v18 }
 0x13d   :  { %4062 = vmatmul.msk.f32.gmra.mxu3 %vm5253_vm11, %v5081_v60  ;;  %1450 = vmatpush.msra.mxu1 %v5569_v21 }
 0x13e   :  { %4068 = vmatmul.msk.f32.gmra.mxu0 %vm5258_vm12, %v5081_v60  ;;  %1473 = vmatpush.msra.mxu2 %v1247_v22  ;;  %v1192_v22 = vld [vmem:[#allocation7 + $0x3e0] sm:$0xff] }
 0x13f   :  { %4074 = vmatmul.msk.f32.gmra.mxu1 %vm5253_vm11, %v5081_v60  ;;  %4080 = vmatmul.msk.f32.gmra.mxu2 %vm5258_vm12, %v5081_v60 }
 0x140   :  { %v5563_v8 = vpop.f32.mrf.mxu3  ;;  %1414 = vmatpush.msrb.mxu3 %v5574_v23  ;;  %1431 = vmatpush.msra.mxu0 %v5576_v59 }
 0x141   :  { %1451 = vmatpush.msra.mxu1 %v5584_v28  ;;  %1474 = vmatpush.msra.mxu2 %v1239_v31  ;;  %v5668_v31 = vld [vmem:[%s8450_s6 + $0x1] ss:$0 sm:$0xff] }
 0x142   :  { %v5572_v56 = vpop.f32.mrf.mxu2  ;;  %1415 = vmatpush.msrb.mxu3 %v5587_v32  ;;  %1432 = vmatpush.msra.mxu0 %v5589_v33 }
 0x143   :  { %v5580_v25 = vpop.f32.mrf.mxu0  ;;  %v5582_v27 = vpop.f32.mrf.mxu1  ;;  %1452 = vmatpush.msra.mxu1 %v5593_v24  ;;  %1475 = vmatpush.msra.mxu2 %v1231_v36 }
 0x144   :  { %8873 = vst [vmem:[#allocation32_spill] sm:$0xff] %v5580_v25  ;;  %1416 = vmatpush.msrb.mxu3 %v5602_v43  ;;  %1433 = vmatpush.msra.mxu0 %v5604_v44 }
 0x145   :  { %8874 = vst [vmem:[#allocation33_spill] sm:$0xff] %v5582_v27  ;;  %4063 = vmatmul.msk.f32.gmra.mxu3 %vm5275_vm13, %v5081_v60  ;;  %1453 = vmatpush.msra.mxu1 %v5611_v46 }
 0x146   :  { %4069 = vmatmul.msk.f32.gmra.mxu0 %vm5280_vm14, %v5081_v60  ;;  %1476 = vmatpush.msra.mxu2 %v1223_v47  ;;  %v5674_v47 = vld [vmem:[#allocation7 + $0x490] sm:$0xff] }
 0x147   :  { %4075 = vmatmul.msk.f32.gmra.mxu1 %vm5275_vm13, %v5081_v60  ;;  %4081 = vmatmul.msk.f32.gmra.mxu2 %vm5280_vm14, %v5081_v60  ;;  %v5636_v60 = vld [vmem:[#allocation7 + $0x50] sm:$0xff] }
 0x148   :  { %v5606_v45 = vpop.f32.mrf.mxu3  ;;  %1417 = vmatpush.msrb.mxu3 %v5619_v48  ;;  %1434 = vmatpush.msra.mxu0 %v5621_v50 }
 0x149   :  { %8875 = vst [vmem:[#allocation34_spill] sm:$0xff] %v5606_v45  ;;  %1454 = vmatpush.msra.mxu1 %v5627_v57  ;;  %1477 = vmatpush.msra.mxu2 %v5629_v55  ;;  %v1209_v45 = vld [vmem:[#allocation7 + $0x468] sm:$0xff] }
 0x14a   :  { %v5623_v53 = vpop.f32.mrf.mxu2  ;;  %1418 = vmatpush.msrb.mxu3 %v5636_v60  ;;  %1435 = vmatpush.msra.mxu0 %v5638_v14 }
 0x14b   :  { %8876 = vst [vmem:[#allocation35_spill] sm:$0xff] %v5623_v53  ;;  %v5631_v12 = vpop.f32.mrf.mxu0  ;;  %v5633_v39 = vpop.f32.mrf.mxu1  ;;  %1455 = vmatpush.msra.mxu1 %v5642_v63  ;;  %1478 = vmatpush.msra.mxu2 %v5644_v41  ;;  %v1224_v53 = vld [vmem:[#allocation7 + $0x4e0] sm:$0xff] }
 0x14c   :  { %8877 = vst [vmem:[#allocation36_spill] sm:$0xff] %v5631_v12  ;;  %1419 = vmatpush.msrb.mxu3 %v5648_v4  ;;  %1436 = vmatpush.msra.mxu0 %v5650_v5  ;;  %v1193_v12 = vld [vmem:[#allocation7 + $0x3e8] sm:$0xff] }
 0x14d   :  { %8878 = vst [vmem:[#allocation37_spill] sm:$0xff] %v5633_v39  ;;  %1340 = vmatmul.f32.vlgmr.msra.gmra.mxu3 %v5655_v6  ;;  %1456 = vmatpush.msra.mxu1 %v5659_v9 }
 0x14e   :  { %1479 = vmatpush.msra.mxu2 %v5663_v15  ;;  %1484 = vmatpush.msra.mxu3 %v1192_v22  ;;  %v1305_v22 = vld [vmem:[#allocation7 + $0x768] sm:$0xff] }
 0x14f   :  { %1400 = vmatmul.f32.vlgmr.msrb.gmra.mxu2 %v5668_v31  ;;  %1437 = vmatpush.msra.mxu0 %v5674_v47 }
 0x150   :  { %v5670_v36 = vpop.f32.mrf.mxu3  ;;  %1544 = vmatpush.msrb.mxu2 %v1321_v62  ;;  %1457 = vmatpush.msra.mxu1 %v5678_v42 }
 0x151   :  { %8879 = vst [vmem:[#allocation38_spill] sm:$0xff] %v5670_v36  ;;  %1485 = vmatpush.msra.mxu3 %v1184_v52  ;;  %1438 = vmatpush.msra.mxu0 %v5683_v34  ;;  %v1297_v52 = vld [vmem:[#allocation7 + $0x728] sm:$0xff] }
 0x152   :  { %v5680_v26 = vpop.f32.mrf.mxu2  ;;  %1545 = vmatpush.msrb.mxu2 %v1313_v29  ;;  %1458 = vmatpush.msra.mxu1 %v5691_v16  ;;  %v1312_v29 = vld [vmem:[#allocation7 + $0x7a0] sm:$0xff] }
 0x153   :  { %8880 = vst [vmem:[#allocation39_spill] sm:$0xff] %v5680_v26  ;;  %v5685_v51 = vpop.f32.mrf.mxu0  ;;  %v5687_v10 = vpop.f32.mrf.mxu1  ;;  %1486 = vmatpush.msra.mxu3 %v1176_v61  ;;  %1439 = vmatpush.msra.mxu0 %v5694_v58  ;;  %v1160_v61 = vld [vmem:[#allocation7 + $0x2e0] sm:$0xff] }
 0x154   :  { %8881 = vst [vmem:[#allocation40_spill] sm:$0xff] %v5685_v51  ;;  %v5698_v51 = vld [vmem:[#allocation7 + $0x18] sm:$0xff]  ;;  %1546 = vmatpush.msrb.mxu2 %v1305_v22  ;;  %1360 = vmatmul.f32.vlgmr.msrb.gmra.mxu0 %v5668_v31  ;;  %v1185_v22 = vld [vmem:[#allocation7 + $0x3a8] sm:$0xff] }
 0x155   :  { %8882 = vst [vmem:[#allocation41_spill] sm:$0xff] %v5687_v10  ;;  %v1168_v10 = vld [vmem:[#allocation7 + $0x320] sm:$0xff]  ;;  %1459 = vmatpush.msra.mxu1 %v5698_v51  ;;  %1504 = vmatpush.msrb.mxu0 %v1320_v7  ;;  %v1177_v7 = vld [vmem:[#allocation7 + $0x368] sm:$0xff] }
 0x156   :  { %1487 = vmatpush.msra.mxu3 %v1168_v10  ;;  %1380 = vmatmul.f32.vlgmr.msrb.gmra.mxu1 %v5655_v6  ;;  %v1304_v10 = vld [vmem:[#allocation7 + $0x760] sm:$0xff] }
 0x157   :  { %1524 = vmatpush.msrb.mxu1 %v1193_v12  ;;  %1547 = vmatpush.msrb.mxu2 %v1297_v52  ;;  %v1169_v12 = vld [vmem:[#allocation7 + $0x328] sm:$0xff] }
 0x158   :  { %v5701_v62 = vpop.f32.mrf.mxu3  ;;  %1420 = vmatmul.f32.vlgmr.msrb.gmra.mxu3 %v5655_v6  ;;  %1505 = vmatpush.msrb.mxu0 %v1312_v29  ;;  %v1273_v52 = vld [vmem:[#allocation7 + $0x668] sm:$0xff]  ;;  %v1136_v29 = vld [vmem:[#allocation7 + $0x220] sm:$0xff] }
 0x159   :  { %8883 = vst [vmem:[#allocation42_spill] sm:$0xff] %v5701_v62  ;;  %v1289_v62 = vld [vmem:[#allocation7 + $0x6e8] sm:$0xff]  ;;  %1488 = vmatpush.msra.mxu3 %v1160_v61  ;;  %1480 = vmatmul.f32.vlgmr.msra.gmra.mxu2 %v5668_v31  ;;  %v1288_v61 = vld [vmem:[#allocation7 + $0x6e0] sm:$0xff] }
 0x15a   :  { %v5705_v36 = vpop.f32.mrf.mxu2  ;;  %1525 = vmatpush.msrb.mxu1 %v1185_v22  ;;  %1548 = vmatpush.msrb.mxu2 %v1289_v62  ;;  %v1161_v22 = vld [vmem:[#allocation7 + $0x2e8] sm:$0xff] }
 0x15b   :  { %8884 = vst [vmem:[#allocation43_spill] sm:$0xff] %v5705_v36  ;;  %v5708_v26 = vpop.f32.mrf.mxu0  ;;  %v1281_v36 = vld [vmem:[#allocation7 + $0x6a8] sm:$0xff]  ;;  %1489 = vmatpush.msra.mxu3 %v1152_v54  ;;  %1506 = vmatpush.msrb.mxu0 %v1304_v10  ;;  %v1128_v10 = vld [vmem:[#allocation7 + $0x1e0] sm:$0xff] }
 0x15c   :  { %8885 = vst [vmem:[#allocation44_spill] sm:$0xff] %v5708_v26  ;;  %v5710_v39 = vpop.f32.mrf.mxu1  ;;  %v1296_v26 = vld [vmem:[#allocation7 + $0x720] sm:$0xff]  ;;  %1526 = vmatpush.msrb.mxu1 %v1177_v7  ;;  %1549 = vmatpush.msrb.mxu2 %v1281_v36  ;;  %v1265_v62 = vld [vmem:[#allocation7 + $0x628] sm:$0xff] }
 0x15d   :  { %8886 = vst [vmem:[#allocation45_spill] sm:$0xff] %v5710_v39  ;;  %1490 = vmatpush.msra.mxu3 %v1144_v40  ;;  %1507 = vmatpush.msrb.mxu0 %v1296_v26  ;;  %v1153_v40 = vld [vmem:[#allocation7 + $0x2a8] sm:$0xff]  ;;  %v1120_v36 = vld [vmem:[#allocation7 + $0x1a0] sm:$0xff] }
 0x15e   :  { %1527 = vmatpush.msrb.mxu1 %v1169_v12  ;;  %1550 = vmatpush.msrb.mxu2 %v1273_v52  ;;  %v1257_v26 = vld [vmem:[#allocation7 + $0x5e8] sm:$0xff]  ;;  %v1272_v7 = vld [vmem:[#allocation7 + $0x660] sm:$0xff] }
 0x15f   :  { %1440 = vmatmul.f32.vlgmr.msra.gmra.mxu0 %v5668_v31  ;;  %1491 = vmatpush.msra.mxu3 %v1136_v29  ;;  %v5722_v12 = vld [vmem:[#allocation7 + $0x268] sm:$0xff]  ;;  %v1264_v29 = vld [vmem:[#allocation7 + $0x620] sm:$0xff] }
 0x160   :  { %v5714_v39 = vpop.f32.mrf.mxu3  ;;  %1508 = vmatpush.msrb.mxu0 %v1288_v61  ;;  %1460 = vmatmul.f32.vlgmr.msra.gmra.mxu1 %v5655_v6  ;;  %v1249_v52 = vld [vmem:[#allocation7 + $0x5a8] sm:$0xff] }
 0x161   :  { %8887 = vst [vmem:[#allocation46_spill] sm:$0xff] %v5714_v39  ;;  %v1280_v39 = vld [vmem:[#allocation7 + $0x6a0] sm:$0xff]  ;;  %1528 = vmatpush.msrb.mxu1 %v1161_v22  ;;  %1551 = vmatpush.msrb.mxu2 %v1265_v62  ;;  %v5726_v61 = vld [vmem:[#allocation7 + $0x228] sm:$0xff] }
 0x162   :  { %v5716_v38 = vpop.f32.mrf.mxu2  ;;  %1492 = vmatpush.msra.mxu3 %v1128_v10  ;;  %1509 = vmatpush.msrb.mxu0 %v1280_v39  ;;  %v5729_v22 = vld [vmem:[#allocation7 + $0x120] sm:$0xff]  ;;  %v5731_v10 = vld [vmem:[#allocation7 + $0x1e8] sm:$0xff] }
 0x163   :  { %8888 = vst [vmem:[#allocation47_spill] sm:$0xff] %v5716_v38  ;;  %v5718_v49 = vpop.f32.mrf.mxu0  ;;  %1529 = vmatpush.msrb.mxu1 %v1153_v40  ;;  %1552 = vmatpush.msrb.mxu2 %v1257_v26  ;;  %v1241_v38 = vld [vmem:[#allocation7 + $0x568] sm:$0xff]  ;;  %v1256_v39 = vld [vmem:[#allocation7 + $0x5e0] sm:$0xff] }
 0x164   :  { %8889 = vst [vmem:[#allocation48_spill] sm:$0xff] %v5718_v49  ;;  %v746_v54 = vpop.f32.mrf.mxu1  ;;  %1493 = vmatpush.msra.mxu3 %v1120_v36  ;;  %1510 = vmatpush.msrb.mxu0 %v1272_v7  ;;  %v1233_v40 = vld [vmem:[#allocation7 + $0x528] sm:$0xff]  ;;  %v5738_v36 = vld [vmem:[#allocation7 + $0xe0] sm:$0xff] }
 0x165   :  { %v1112_v54 = vld [vmem:[#allocation7 + $0x160] sm:$0xff]  ;;  %1530 = vmatpush.msrb.mxu1 %v5722_v12  ;;  %1553 = vmatpush.msrb.mxu2 %v1249_v52  ;;  %v5741_v52 = vld [vmem:[#allocation7 + $0x1a8] sm:$0xff] }
 0x166   :  { %1494 = vmatpush.msra.mxu3 %v1112_v54  ;;  %1511 = vmatpush.msrb.mxu0 %v1264_v29  ;;  %v1248_v7 = vld [vmem:[#allocation7 + $0x5a0] sm:$0xff]  ;;  %v1225_v54 = vld [vmem:[#allocation7 + $0x4e8] sm:$0xff] }
 0x167   :  { %1531 = vmatpush.msrb.mxu1 %v5726_v61  ;;  %1554 = vmatpush.msrb.mxu2 %v1241_v38  ;;  %v5744_v29 = vld [vmem:[#allocation7 + $0xa0] sm:$0xff]  ;;  %v1217_v38 = vld [vmem:[#allocation7 + $0x4a8] sm:$0xff] }
 0x168   :  { %v5724_v49 = vpop.f32.mrf.mxu3  ;;  %1495 = vmatpush.msra.mxu3 %v5729_v22  ;;  %1512 = vmatpush.msrb.mxu0 %v1256_v39  ;;  %8893 = vst [vmem:[#allocation52_spill] sm:$0xff] %v5744_v29  ;;  %v1232_v39 = vld [vmem:[#allocation7 + $0x520] sm:$0xff] }
 0x169   :  { %8890 = vst [vmem:[#allocation49_spill] sm:$0xff] %v5724_v49  ;;  %1532 = vmatpush.msrb.mxu1 %v5731_v10  ;;  %1555 = vmatpush.msrb.mxu2 %v1233_v40  ;;  %v5755_v40 = vld [vmem:[#allocation7 + $0x128] sm:$0xff] }
 0x16a   :  { %v780_v62 = vpop.f32.mrf.mxu2  ;;  %1496 = vmatpush.msra.mxu3 %v5738_v36  ;;  %1513 = vmatpush.msrb.mxu0 %v1248_v7  ;;  %v5758_v7 = vld [vmem:[#allocation7 + $0x20] sm:$0xff] }
 0x16b   :  { %v5733_v26 = vpop.f32.mrf.mxu0  ;;  %v1240_v62 = vld [vmem:[#allocation7 + $0x560] sm:$0xff]  ;;  %1533 = vmatpush.msrb.mxu1 %v5741_v52  ;;  %1556 = vmatpush.msrb.mxu2 %v1225_v54  ;;  %8896 = vst [vmem:[#allocation55_spill] sm:$0xff] %v5758_v7  ;;  %v5763_v54 = vld [vmem:[#allocation7 + $0xe8] sm:$0xff] }
 0x16c   :  { %8891 = vst [vmem:[#allocation50_spill] sm:$0xff] %v5733_v26  ;;  %v5735_v49 = vpop.f32.mrf.mxu1  ;;  %v5750_v26 = vld [vmem:[#allocation7 + $0x60] sm:$0xff]  ;;  %1497 = vmatpush.msra.mxu3 %v5744_v29  ;;  %1514 = vmatpush.msrb.mxu0 %v1240_v62  ;;  %v1201_v62 = vld [vmem:[#allocation7 + $0x428] sm:$0xff] }
 0x16d   :  { %8892 = vst [vmem:[#allocation51_spill] sm:$0xff] %v5735_v49  ;;  %v5747_v49 = vld [vmem:[#allocation7 + $0x168] sm:$0xff]  ;;  %1557 = vmatpush.msrb.mxu2 %v1217_v38  ;;  %v1216_v38 = vld [vmem:[#allocation7 + $0x4a0] sm:$0xff] }
 0x16e   :  { %8894 = vst [vmem:[#allocation53_spill] sm:$0xff] %v5750_v26  ;;  %1534 = vmatpush.msrb.mxu1 %v5747_v49  ;;  %1498 = vmatpush.msra.mxu3 %v5750_v26  ;;  %v5794_v26 = vld [vmem:[#allocation7 + $0x330] sm:$0xff] }
 0x16f   :  { %1515 = vmatpush.msrb.mxu0 %v1232_v39  ;;  %1558 = vmatpush.msrb.mxu2 %v1209_v45  ;;  %v1323_v39 = vld [vmem:[#allocation7 + $0x7f8] sm:$0xff]  ;;  %v1208_v45 = vld [vmem:[#allocation7 + $0x460] sm:$0xff]  ;;  %8908 = vst [vmem:[#allocation67_spill] sm:$0xff] %v5794_v26 }
 0x170   :  { %v5752_v25 = vpop.f32.mrf.mxu3  ;;  %1535 = vmatpush.msrb.mxu1 %v5755_v40  ;;  %1499 = vmatpush.msra.mxu3 %v5758_v7  ;;  %v1200_v7 = vld [vmem:[#allocation7 + $0x420] sm:$0xff] }
 0x171   :  { %8895 = vst [vmem:[#allocation54_spill] sm:$0xff] %v5752_v25  ;;  %1516 = vmatpush.msrb.mxu0 %v1224_v53  ;;  %1500 = vmatmul.f32.vlgmr.msra.gmra.mxu3 %v5655_v6 }
 0x172   :  { %v5760_v27 = vpop.f32.mrf.mxu2  ;;  %1536 = vmatpush.msrb.mxu1 %v5763_v54  ;;  %1559 = vmatpush.msrb.mxu2 %v1201_v62  ;;  %v1307_v62 = vld [vmem:[#allocation7 + $0x778] sm:$0xff] }
 0x173   :  { %8897 = vst [vmem:[#allocation56_spill] sm:$0xff] %v5760_v27  ;;  %v5765_v25 = vpop.f32.mrf.mxu0  ;;  %v5775_v27 = vld [vmem:[#allocation7 + $0xa8] sm:$0xff]  ;;  %1564 = vmatpush.msrb.mxu3 %v5770_v20  ;;  %1517 = vmatpush.msrb.mxu0 %v1216_v38 }
 0x174   :  { %8898 = vst [vmem:[#allocation57_spill] sm:$0xff] %v5765_v25  ;;  %v5767_v35 = vpop.f32.mrf.mxu1  ;;  %1560 = vmatmul.f32.vlgmr.msrb.gmra.mxu2 %v5668_v31  ;;  %v1315_v25 = vld [vmem:[#allocation7 + $0x7b8] sm:$0xff]  ;;  %1537 = vmatpush.msrb.mxu1 %v5775_v27  ;;  %v5792_v38 = vld [vmem:[#allocation7 + $0x28] sm:$0xff] }
 0x175   :  { %8899 = vst [vmem:[#allocation58_spill] sm:$0xff] %v5767_v35  ;;  %v5778_v35 = vld [vmem:[#allocation7 + $0x3b0] sm:$0xff]  ;;  %1624 = vmatpush.msra.mxu2 %v1323_v39  ;;  %1518 = vmatpush.msrb.mxu0 %v1208_v45  ;;  %v5802_v45 = vld [vmem:[#allocation7 + $0x3f8] sm:$0xff] }
 0x176   :  { %8901 = vst [vmem:[#allocation60_spill] sm:$0xff] %v5775_v27  ;;  %1565 = vmatpush.msrb.mxu3 %v5778_v35  ;;  %1538 = vmatpush.msrb.mxu1 %v5781_v19  ;;  %v1322_v27 = vld [vmem:[#allocation7 + $0x7f0] sm:$0xff] }
 0x177   :  { %8902 = vst [vmem:[#allocation61_spill] sm:$0xff] %v5778_v35  ;;  %1625 = vmatpush.msra.mxu2 %v1315_v25  ;;  %1519 = vmatpush.msrb.mxu0 %v1200_v7  ;;  %v1299_v25 = vld [vmem:[#allocation7 + $0x738] sm:$0xff]  ;;  %v1314_v35 = vld [vmem:[#allocation7 + $0x7b0] sm:$0xff] }
 0x178   :  { %v5783_v53 = vpop.f32.mrf.mxu3  ;;  %8907 = vst [vmem:[#allocation66_spill] sm:$0xff] %v5792_v38  ;;  %1566 = vmatpush.msrb.mxu3 %v5786_v30  ;;  %1520 = vmatmul.f32.vlgmr.msrb.gmra.mxu0 %v5668_v31  ;;  %v1291_v7 = vld [vmem:[#allocation7 + $0x6f8] sm:$0xff]  ;;  %v1298_v19 = vld [vmem:[#allocation7 + $0x730] sm:$0xff] }
 0x179   :  { %8904 = vst [vmem:[#allocation63_spill] sm:$0xff] %v5783_v53  ;;  %1626 = vmatpush.msra.mxu2 %v1307_v62  ;;  %1539 = vmatpush.msrb.mxu1 %v5792_v38  ;;  %v5812_v62 = vld [vmem:[#allocation7 + $0x2b0] sm:$0xff]  ;;  %v1283_v38 = vld [vmem:[#allocation7 + $0x6b8] sm:$0xff] }
 0x17a   :  { %v5789_v20 = vpop.f32.mrf.mxu2  ;;  %8911 = vst [vmem:[#allocation70_spill] sm:$0xff] %v5802_v45  ;;  %1567 = vmatpush.msrb.mxu3 %v5794_v26  ;;  %1584 = vmatpush.msra.mxu0 %v1322_v27  ;;  %v5817_v26 = vld [vmem:[#allocation7 + $0x378] sm:$0xff]  ;;  %v5820_v27 = vld [vmem:[#allocation7 + $0x270] sm:$0xff] }
 0x17b   :  { %8906 = vst [vmem:[#allocation65_spill] sm:$0xff] %v5789_v20  ;;  %v5796_v53 = vpop.f32.mrf.mxu0  ;;  %v5806_v20 = vld [vmem:[#allocation7 + $0x2f0] sm:$0xff]  ;;  %1540 = vmatmul.f32.vlgmr.msrb.gmra.mxu1 %v5655_v6  ;;  %1627 = vmatpush.msra.mxu2 %v1299_v25  ;;  %v5825_v25 = vld [vmem:[#allocation7 + $0x338] sm:$0xff] }
 0x17c   :  { %8909 = vst [vmem:[#allocation68_spill] sm:$0xff] %v5796_v53  ;;  %v5798_v39 = vpop.f32.mrf.mxu1  ;;  %1604 = vmatpush.msra.mxu1 %v5802_v45  ;;  %v1306_v53 = vld [vmem:[#allocation7 + $0x770] sm:$0xff]  ;;  %1568 = vmatpush.msrb.mxu3 %v5806_v20 }
 0x17d   :  { %8910 = vst [vmem:[#allocation69_spill] sm:$0xff] %v5798_v39  ;;  %v5809_v39 = vld [vmem:[#allocation7 + $0x3b8] sm:$0xff]  ;;  %1585 = vmatpush.msra.mxu0 %v1314_v35  ;;  %1628 = vmatpush.msra.mxu2 %v1291_v7  ;;  %v1290_v7 = vld [vmem:[#allocation7 + $0x6f0] sm:$0xff] }
 0x17e   :  { %8912 = vst [vmem:[#allocation71_spill] sm:$0xff] %v5806_v20  ;;  %1605 = vmatpush.msra.mxu1 %v5809_v39  ;;  %1569 = vmatpush.msrb.mxu3 %v5812_v62  ;;  %v5832_v20 = vld [vmem:[#allocation7 + $0x230] sm:$0xff] }
 0x17f   :  { %8913 = vst [vmem:[#allocation72_spill] sm:$0xff] %v5809_v39  ;;  %1586 = vmatpush.msra.mxu0 %v1306_v53  ;;  %1629 = vmatpush.msra.mxu2 %v1283_v38  ;;  %v5838_v53 = vld [vmem:[#allocation7 + $0x1f0] sm:$0xff]  ;;  %v1259_v38 = vld [vmem:[#allocation7 + $0x5f8] sm:$0xff] }
 0x180   :  { %8914 = vst [vmem:[#allocation73_spill] sm:$0xff] %v5812_v62  ;;  %v5814_v30 = vpop.f32.mrf.mxu3  ;;  %1606 = vmatpush.msra.mxu1 %v5817_v26  ;;  %1570 = vmatpush.msrb.mxu3 %v5820_v27  ;;  %v1267_v62 = vld [vmem:[#allocation7 + $0x638] sm:$0xff] }
 0x181   :  { %8915 = vst [vmem:[#allocation74_spill] sm:$0xff] %v5814_v30  ;;  %v1275_v30 = vld [vmem:[#allocation7 + $0x678] sm:$0xff]  ;;  %1587 = vmatpush.msra.mxu0 %v1298_v19  ;;  %v1274_v19 = vld [vmem:[#allocation7 + $0x670] sm:$0xff] }
 0x182   :  { %8916 = vst [vmem:[#allocation75_spill] sm:$0xff] %v5817_v26  ;;  %v5822_v29 = vpop.f32.mrf.mxu2  ;;  %1607 = vmatpush.msra.mxu1 %v5825_v25  ;;  %1630 = vmatpush.msra.mxu2 %v1275_v30  ;;  %v5849_v30 = vld [vmem:[#allocation7 + $0x278] sm:$0xff] }
 0x183   :  { %8917 = vst [vmem:[#allocation76_spill] sm:$0xff] %v5820_v27  ;;  %v5827_v45 = vpop.f32.mrf.mxu0  ;;  %1571 = vmatpush.msrb.mxu3 %v5832_v20  ;;  %1588 = vmatpush.msra.mxu0 %v1290_v7  ;;  %v5844_v27 = vld [vmem:[#allocation7 + $0x1b0] sm:$0xff] }
 0x184   :  { %8918 = vst [vmem:[#allocation77_spill] sm:$0xff] %v5822_v29  ;;  %v5829_v35 = vpop.f32.mrf.mxu1  ;;  %v5835_v29 = vld [vmem:[#allocation7 + $0x2f8] sm:$0xff]  ;;  %1631 = vmatpush.msra.mxu2 %v1267_v62  ;;  %v5852_v7 = vld [vmem:[#allocation7 + $0x170] sm:$0xff] }
 0x185   :  { %8919 = vst [vmem:[#allocation78_spill] sm:$0xff] %v5825_v25  ;;  %1608 = vmatpush.msra.mxu1 %v5835_v29  ;;  %1572 = vmatpush.msrb.mxu3 %v5838_v53  ;;  %v1251_v25 = vld [vmem:[#allocation7 + $0x5b8] sm:$0xff] }
 0x186   :  { %8920 = vst [vmem:[#allocation79_spill] sm:$0xff] %v5827_v45  ;;  %v1282_v45 = vld [vmem:[#allocation7 + $0x6b0] sm:$0xff]  ;;  %1632 = vmatpush.msra.mxu2 %v1259_v38  ;;  %v5857_v62 = vld [vmem:[#allocation7 + $0x238] sm:$0xff] }
 0x187   :  { %8921 = vst [vmem:[#allocation80_spill] sm:$0xff] %v5829_v35  ;;  %v5841_v35 = vld [vmem:[#allocation7 + $0x2b8] sm:$0xff]  ;;  %1589 = vmatpush.msra.mxu0 %v1282_v45  ;;  %1573 = vmatpush.msrb.mxu3 %v5844_v27  ;;  %v1258_v38 = vld [vmem:[#allocation7 + $0x5f0] sm:$0xff] }
 0x188   :  { %8922 = vst [vmem:[#allocation81_spill] sm:$0xff] %v5832_v20  ;;  %v5846_v26 = vpop.f32.mrf.mxu3  ;;  %1609 = vmatpush.msra.mxu1 %v5841_v35  ;;  %v1266_v20 = vld [vmem:[#allocation7 + $0x630] sm:$0xff]  ;;  %1633 = vmatpush.msra.mxu2 %v1251_v25  ;;  %v1227_v25 = vld [vmem:[#allocation7 + $0x4f8] sm:$0xff] }
 0x189   :  { %8923 = vst [vmem:[#allocation82_spill] sm:$0xff] %v5835_v29  ;;  %1590 = vmatpush.msra.mxu0 %v1274_v19  ;;  %1574 = vmatpush.msrb.mxu3 %v5852_v7  ;;  %v5870_v19 = vld [vmem:[#allocation7 + $0xf0] sm:$0xff] }
 0x18a   :  { %8924 = vst [vmem:[#allocation83_spill] sm:$0xff] %v5838_v53  ;;  %v5854_v39 = vpop.f32.mrf.mxu2  ;;  %1610 = vmatpush.msra.mxu1 %v5849_v30  ;;  %v5864_v53 = vld [vmem:[#allocation7 + $0x130] sm:$0xff] }
 0x18b   :  { %8925 = vst [vmem:[#allocation84_spill] sm:$0xff] %v5841_v35  ;;  %v5859_v29 = vpop.f32.mrf.mxu0  ;;  %1591 = vmatpush.msra.mxu0 %v1266_v20  ;;  %1575 = vmatpush.msrb.mxu3 %v5864_v53  ;;  %v1242_v20 = vld [vmem:[#allocation7 + $0x570] sm:$0xff] }
 0x18c   :  { %8926 = vst [vmem:[#allocation85_spill] sm:$0xff] %v5844_v27  ;;  %v5861_v45 = vpop.f32.mrf.mxu1  ;;  %v1235_v27 = vld [vmem:[#allocation7 + $0x538] sm:$0xff]  ;;  %1611 = vmatpush.msra.mxu1 %v5857_v62 }
 0x18d   :  { %8927 = vst [vmem:[#allocation86_spill] sm:$0xff] %v5846_v26  ;;  %v1243_v26 = vld [vmem:[#allocation7 + $0x578] sm:$0xff]  ;;  %1592 = vmatpush.msra.mxu0 %v1258_v38  ;;  %1576 = vmatpush.msrb.mxu3 %v5870_v19  ;;  %v5884_v38 = vld [vmem:[#allocation7 + $0x70] sm:$0xff] }
 0x18e   :  { %8928 = vst [vmem:[#allocation87_spill] sm:$0xff] %v5849_v30  ;;  %1634 = vmatpush.msra.mxu2 %v1243_v26  ;;  %v5881_v26 = vld [vmem:[#allocation7 + $0x178] sm:$0xff] }
 0x18f   :  { %8929 = vst [vmem:[#allocation88_spill] sm:$0xff] %v5852_v7  ;;  %v5876_v7 = vld [vmem:[#allocation7 + $0xb0] sm:$0xff] }
 0x190   :  { %8930 = vst [vmem:[#allocation89_spill] sm:$0xff] %v5854_v39  ;;  %v5867_v39 = vld [vmem:[#allocation7 + $0x1f8] sm:$0xff]  ;;  %1635 = vmatpush.msra.mxu2 %v1235_v27  ;;  %v5878_v30 = vpop.f32.mrf.mxu3  ;;  %1577 = vmatpush.msrb.mxu3 %v5876_v7 }
 0x191   :  { %8931 = vst [vmem:[#allocation90_spill] sm:$0xff] %v5857_v62  ;;  %1612 = vmatpush.msra.mxu1 %v5867_v39  ;;  %v1219_v62 = vld [vmem:[#allocation7 + $0x4b8] sm:$0xff] }
 0x192   :  { %8932 = vst [vmem:[#allocation91_spill] sm:$0xff] %v5859_v29  ;;  %v1250_v29 = vld [vmem:[#allocation7 + $0x5b0] sm:$0xff]  ;;  %1636 = vmatpush.msra.mxu2 %v1227_v25  ;;  %v5886_v35 = vpop.f32.mrf.mxu2  ;;  %v5889_v27 = vld [vmem:[#allocation7 + $0x138] sm:$0xff]  ;;  %1578 = vmatpush.msrb.mxu3 %v5884_v38 }
 0x193   :  { %8933 = vst [vmem:[#allocation92_spill] sm:$0xff] %v5861_v45  ;;  %v5873_v45 = vld [vmem:[#allocation7 + $0x1b8] sm:$0xff]  ;;  %1593 = vmatpush.msra.mxu0 %v1250_v29  ;;  %v1226_v25 = vld [vmem:[#allocation7 + $0x4f0] sm:$0xff] }
 0x194   :  { %8934 = vst [vmem:[#allocation93_spill] sm:$0xff] %v5864_v53  ;;  %1613 = vmatpush.msra.mxu1 %v5873_v45  ;;  %v1234_v53 = vld [vmem:[#allocation7 + $0x530] sm:$0xff]  ;;  %v5893_v29 = vpop.f32.mrf.mxu1  ;;  %1637 = vmatpush.msra.mxu2 %v1219_v62 }
 0x195   :  { %8935 = vst [vmem:[#allocation94_spill] sm:$0xff] %v5867_v39  ;;  %1594 = vmatpush.msra.mxu0 %v1242_v20  ;;  %v5891_v39 = vpop.f32.mrf.mxu0  ;;  %v1203_v20 = vld [vmem:[#allocation7 + $0x438] sm:$0xff]  ;;  %v1210_v62 = vld [vmem:[#allocation7 + $0x470] sm:$0xff] }
 0x196   :  { %8936 = vst [vmem:[#allocation95_spill] sm:$0xff] %v5870_v19  ;;  %1614 = vmatpush.msra.mxu1 %v5881_v26  ;;  %v5896_v19 = vld [vmem:[#allocation7 + $0x30] sm:$0xff] }
 0x197   :  { %8937 = vst [vmem:[#allocation96_spill] sm:$0xff] %v5873_v45  ;;  %1595 = vmatpush.msra.mxu0 %v1234_v53  ;;  %1579 = vmatpush.msrb.mxu3 %v5896_v19  ;;  %v5903_v45 = vld [vmem:[#allocation7 + $0xb8] sm:$0xff] }
 0x198   :  { %8938 = vst [vmem:[#allocation97_spill] sm:$0xff] %v5876_v7  ;;  %1615 = vmatpush.msra.mxu1 %v5889_v27  ;;  %v1218_v7 = vld [vmem:[#allocation7 + $0x4b0] sm:$0xff]  ;;  %1580 = vmatmul.f32.vlgmr.msrb.gmra.mxu3 %v5655_v6  ;;  %v5909_v53 = vld [vmem:[#allocation7 + $0x78] sm:$0xff] }
 0x199   :  { %8939 = vst [vmem:[#allocation98_spill] sm:$0xff] %v5878_v30  ;;  %v1211_v30 = vld [vmem:[#allocation7 + $0x478] sm:$0xff]  ;;  %1596 = vmatpush.msra.mxu0 %v1226_v25 }
 0x19a   :  { %8940 = vst [vmem:[#allocation99_spill] sm:$0xff] %v5881_v26  ;;  %1638 = vmatpush.msra.mxu2 %v1211_v30  ;;  %v5907_v26 = vpop.f32.mrf.mxu3  ;;  %v1202_v30 = vld [vmem:[#allocation7 + $0x430] sm:$0xff]  ;;  %v5915_v25 = vld [vmem:[#allocation7 + $0x38] sm:$0xff] }
 0x19b   :  { %8941 = vst [vmem:[#allocation100_spill] sm:$0xff] %v5884_v38  ;;  %1597 = vmatpush.msra.mxu0 %v1218_v7  ;;  %v4315_v7 = vld [vmem:[#allocation7 + $0x7c8] sm:$0xff] }
 0x19c   :  { %8942 = vst [vmem:[#allocation101_spill] sm:$0xff] %v5886_v35  ;;  %v5899_v35 = vld [vmem:[#allocation7 + $0xf8] sm:$0xff]  ;;  %1639 = vmatpush.msra.mxu2 %v1203_v20  ;;  %v5923_v20 = vld [vmem:[#allocation7 + $0x380] sm:$0xff] }
 0x19d   :  { %8943 = vst [vmem:[#allocation102_spill] sm:$0xff] %v5889_v27  ;;  %1616 = vmatpush.msra.mxu1 %v5899_v35  ;;  %1640 = vmatmul.f32.vlgmr.msra.gmra.mxu2 %v5668_v31  ;;  %v5917_v38 = vpop.f32.mrf.mxu0  ;;  %v5919_v27 = vld [vmem:[#allocation7 + $0x3c0] sm:$0xff] }
 0x19e   :  { %8944 = vst [vmem:[#allocation103_spill] sm:$0xff] %v5896_v19  ;;  %v5913_v19 = vpop.f32.mrf.mxu2  ;;  %1598 = vmatpush.msra.mxu0 %v1210_v62  ;;  %1778 = vmatpush.msra.mxu3 %v5919_v27 }
 0x19f   :  { %8945 = vst [vmem:[#allocation104_spill] sm:$0xff] %v5899_v35  ;;  %1617 = vmatpush.msra.mxu1 %v5903_v45  ;;  %v1009_v35 = vpop.f32.mrf.mxu1  ;;  %1838 = vmatpush.msrb.mxu2 %v4315_v7  ;;  %v5937_v7 = vld [vmem:[#allocation7 + $0x300] sm:$0xff] }
 0x1a0   :  { %8946 = vst [vmem:[#allocation105_spill] sm:$0xff] %v5917_v38  ;;  %1599 = vmatpush.msra.mxu0 %v1202_v30  ;;  %1779 = vmatpush.msra.mxu3 %v5923_v20  ;;  %v5929_v35 = vld [vmem:[#allocation7 + $0x340] sm:$0xff]  ;;  %v5934_v38 = vld [vmem:[#allocation7 + $0x3c8] sm:$0xff] }
 0x1a1   :  { %1618 = vmatpush.msra.mxu1 %v5909_v53  ;;  %8947 = vst [vmem:[#allocation106_spill] sm:$0xff] %v5923_v20  ;;  %1600 = vmatmul.f32.vlgmr.msra.gmra.mxu0 %v5668_v31  ;;  %v4319_v30 = vld [vmem:[#allocation7 + $0x7c0] sm:$0xff]  ;;  %v4321_v31 = vld [vmem:[#allocation7 + $0x788] sm:$0xff] }
 0x1a2   :  { %8948 = vst [vmem:[#allocation107_spill] sm:$0xff] %v5929_v35  ;;  %1780 = vmatpush.msra.mxu3 %v5929_v35  ;;  %v5932_v62 = vpop.f32.mrf.mxu3  ;;  %1798 = vmatpush.msrb.mxu0 %v4319_v30  ;;  %v5943_v35 = vld [vmem:[#allocation7 + $0x780] sm:$0xff]  ;;  %v4325_v30 = vld [vmem:[#allocation7 + $0x748] sm:$0xff] }
 0x1a3   :  { %1619 = vmatpush.msra.mxu1 %v5915_v25  ;;  %8949 = vst [vmem:[#allocation108_spill] sm:$0xff] %v5932_v62  ;;  %1839 = vmatpush.msrb.mxu2 %v4321_v31 }
 0x1a4   :  { %1620 = vmatmul.f32.vlgmr.msra.gmra.mxu1 %v5655_v6  ;;  %8950 = vst [vmem:[#allocation109_spill] sm:$0xff] %v5934_v38  ;;  %1781 = vmatpush.msra.mxu3 %v5937_v7  ;;  %v5940_v6 = vld [vmem:[#allocation7 + $0x388] sm:$0xff] }
 0x1a5   :  { %1818 = vmatpush.msrb.mxu1 %v5934_v38  ;;  %8951 = vst [vmem:[#allocation110_spill] sm:$0xff] %v5937_v7  ;;  %1799 = vmatpush.msrb.mxu0 %v5943_v35  ;;  %v5946_v62 = vpop.f32.mrf.mxu0  ;;  %v5948_v38 = vld [vmem:[#allocation7 + $0x2c0] sm:$0xff]  ;;  %v5951_v7 = vld [vmem:[#allocation7 + $0x348] sm:$0xff] }
 0x1a6   :  { %v1043_v20 = vpop.f32.mrf.mxu2  ;;  %8952 = vst [vmem:[#allocation111_spill] sm:$0xff] %v5940_v6  ;;  %1782 = vmatpush.msra.mxu3 %v5948_v38  ;;  %1840 = vmatpush.msrb.mxu2 %v4325_v30  ;;  %v5965_v30 = vld [vmem:[#allocation7 + $0x700] sm:$0xff] }
 0x1a7   :  { %1819 = vmatpush.msrb.mxu1 %v5940_v6  ;;  %8953 = vst [vmem:[#allocation112_spill] sm:$0xff] %v5943_v35  ;;  %v5954_v20 = vld [vmem:[#allocation7 + $0x740] sm:$0xff]  ;;  %v5957_v31 = vpop.f32.mrf.mxu1  ;;  %v5962_v35 = vld [vmem:[#allocation7 + $0x308] sm:$0xff] }
 0x1a8   :  { %8954 = vst [vmem:[#allocation113_spill] sm:$0xff] %v5946_v62  ;;  %1800 = vmatpush.msrb.mxu0 %v5954_v20  ;;  %v5959_v6 = vld [vmem:[#allocation7 + $0x280] sm:$0xff]  ;;  %v4329_v62 = vld [vmem:[#allocation7 + $0x708] sm:$0xff] }
 0x1a9   :  { %8955 = vst [vmem:[#allocation114_spill] sm:$0xff] %v5948_v38  ;;  %1820 = vmatpush.msrb.mxu1 %v5951_v7  ;;  %1783 = vmatpush.msra.mxu3 %v5959_v6  ;;  %v5968_v38 = vld [vmem:[#allocation7 + $0x240] sm:$0xff] }
 0x1aa   :  { %8956 = vst [vmem:[#allocation115_spill] sm:$0xff] %v5951_v7  ;;  %1841 = vmatpush.msrb.mxu2 %v4329_v62  ;;  %1801 = vmatpush.msrb.mxu0 %v5965_v30  ;;  %v5973_v7 = vld [vmem:[#allocation7 + $0x2c8] sm:$0xff]  ;;  %v5976_v62 = vld [vmem:[#allocation7 + $0x6c0] sm:$0xff] }
 0x1ab   :  { %8957 = vst [vmem:[#allocation116_spill] sm:$0xff] %v5954_v20  ;;  %1821 = vmatpush.msrb.mxu1 %v5962_v35  ;;  %1784 = vmatpush.msra.mxu3 %v5968_v38  ;;  %v4333_v20 = vld [vmem:[#allocation7 + $0x6c8] sm:$0xff] }
 0x1ac   :  { %8958 = vst [vmem:[#allocation117_spill] sm:$0xff] %v5957_v31  ;;  %1842 = vmatpush.msrb.mxu2 %v4333_v20  ;;  %v5971_v31 = vpop.f32.mrf.mxu3  ;;  %1802 = vmatpush.msrb.mxu0 %v5976_v62  ;;  %v5987_v20 = vld [vmem:[#allocation7 + $0x288] sm:$0xff] }
 0x1ad   :  { %8959 = vst [vmem:[#allocation118_spill] sm:$0xff] %v5959_v6  ;;  %1822 = vmatpush.msrb.mxu1 %v5973_v7  ;;  %v5979_v6 = vld [vmem:[#allocation7 + $0x200] sm:$0xff] }
 0x1ae   :  { %8960 = vst [vmem:[#allocation119_spill] sm:$0xff] %v5965_v30  ;;  %1785 = vmatpush.msra.mxu3 %v5979_v6  ;;  %v5982_v30 = vld [vmem:[#allocation7 + $0x688] sm:$0xff] }
 0x1af   :  { %8961 = vst [vmem:[#allocation120_spill] sm:$0xff] %v5968_v38  ;;  %1843 = vmatpush.msrb.mxu2 %v5982_v30  ;;  %v5985_v38 = vpop.f32.mrf.mxu2  ;;  %1823 = vmatpush.msrb.mxu1 %v5987_v20 }
 0x1b0   :  { %8962 = vst [vmem:[#allocation121_spill] sm:$0xff] %v5971_v31  ;;  %v5990_v31 = vld [vmem:[#allocation7 + $0x680] sm:$0xff] }
 0x1b1   :  { %8963 = vst [vmem:[#allocation122_spill] sm:$0xff] %v5973_v7  ;;  %1803 = vmatpush.msrb.mxu0 %v5990_v31  ;;  %v5993_v7 = vld [vmem:[#allocation7 + $0x1c0] sm:$0xff] }
 0x1b2   :  { %8964 = vst [vmem:[#allocation123_spill] sm:$0xff] %v5976_v62  ;;  %1786 = vmatpush.msra.mxu3 %v5993_v7  ;;  %v5996_v62 = vld [vmem:[#allocation7 + $0x648] sm:$0xff] }
 0x1b3   :  { %8965 = vst [vmem:[#allocation124_spill] sm:$0xff] %v5979_v6  ;;  %1844 = vmatpush.msrb.mxu2 %v5996_v62  ;;  %v5999_v6 = vld [vmem:[#allocation7 + $0x248] sm:$0xff] }
 0x1b4   :  { %8966 = vst [vmem:[#allocation125_spill] sm:$0xff] %v5982_v30  ;;  %1824 = vmatpush.msrb.mxu1 %v5999_v6  ;;  %v6005_v30 = vpop.f32.mrf.mxu0 }
 0x1b5   :  { %8967 = vst [vmem:[#allocation126_spill] sm:$0xff] %v5985_v38  ;;  %v6002_v38 = vld [vmem:[#allocation7 + $0x640] sm:$0xff] }
 0x1b6   :  { %8968 = vst [vmem:[#allocation127_spill] sm:$0xff] %v5987_v20  ;;  %1804 = vmatpush.msrb.mxu0 %v6002_v38  ;;  %v6007_v20 = vld [vmem:[#allocation7 + $0x180] sm:$0xff] }
 0x1b7   :  { %8969 = vst [vmem:[#allocation128_spill] sm:$0xff] %v5990_v31  ;;  %1787 = vmatpush.msra.mxu3 %v6007_v20  ;;  %v6010_v31 = vld [vmem:[#allocation7 + $0x608] sm:$0xff] }
 0x1b8   :  { %8970 = vst [vmem:[#allocation129_spill] sm:$0xff] %v5993_v7  ;;  %1845 = vmatpush.msrb.mxu2 %v6010_v31  ;;  %v6013_v7 = vld [vmem:[#allocation7 + $0x208] sm:$0xff] }
 0x1b9   :  { %8971 = vst [vmem:[#allocation130_spill] sm:$0xff] %v5996_v62  ;;  %1825 = vmatpush.msrb.mxu1 %v6013_v7  ;;  %v6016_v62 = vld [vmem:[#allocation7 + $0x600] sm:$0xff] }
 0x1ba   :  { %8972 = vst [vmem:[#allocation131_spill] sm:$0xff] %v5999_v6  ;;  %1805 = vmatpush.msrb.mxu0 %v6016_v62  ;;  %v6019_v6 = vpop.f32.mrf.mxu1 }
 0x1bb   :  { %8973 = vst [vmem:[#allocation132_spill] sm:$0xff] %v6002_v38  ;;  %v6021_v38 = vld [vmem:[#allocation7 + $0x140] sm:$0xff] }
 0x1bc   :  { %8974 = vst [vmem:[#allocation133_spill] sm:$0xff] %v6005_v30  ;;  %1788 = vmatpush.msra.mxu3 %v6021_v38  ;;  %v6024_v30 = vld [vmem:[#allocation7 + $0x5c8] sm:$0xff] }
 0x1bd   :  { %8975 = vst [vmem:[#allocation134_spill] sm:$0xff] %v6007_v20  ;;  %1846 = vmatpush.msrb.mxu2 %v6024_v30  ;;  %v6027_v20 = vpop.f32.mrf.mxu3 }
 0x1be   :  { %8976 = vst [vmem:[#allocation135_spill] sm:$0xff] %v6010_v31  ;;  %v6029_v31 = vld [vmem:[#allocation7 + $0x1c8] sm:$0xff] }
 0x1bf   :  { %8977 = vst [vmem:[#allocation136_spill] sm:$0xff] %v6013_v7  ;;  %1826 = vmatpush.msrb.mxu1 %v6029_v31  ;;  %v6032_v7 = vld [vmem:[#allocation7 + $0x5c0] sm:$0xff] }
 0x1c0   :  { %8978 = vst [vmem:[#allocation137_spill] sm:$0xff] %v6016_v62  ;;  %1806 = vmatpush.msrb.mxu0 %v6032_v7  ;;  %v6035_v62 = vld [vmem:[#allocation7 + $0x100] sm:$0xff] }
 0x1c1   :  { %8979 = vst [vmem:[#allocation138_spill] sm:$0xff] %v6019_v6  ;;  %1789 = vmatpush.msra.mxu3 %v6035_v62  ;;  %v6038_v6 = vld [vmem:[#allocation7 + $0x588] sm:$0xff] }
 0x1c2   :  { %8980 = vst [vmem:[#allocation139_spill] sm:$0xff] %v6021_v38  ;;  %1847 = vmatpush.msrb.mxu2 %v6038_v6  ;;  %v6041_v38 = vpop.f32.mrf.mxu2 }
 0x1c3   :  { %8981 = vst [vmem:[#allocation140_spill] sm:$0xff] %v6024_v30  ;;  %v6043_v30 = vld [vmem:[#allocation7 + $0x188] sm:$0xff] }
 0x1c4   :  { %8982 = vst [vmem:[#allocation141_spill] sm:$0xff] %v6027_v20  ;;  %1827 = vmatpush.msrb.mxu1 %v6043_v30  ;;  %v6046_v20 = vld [vmem:[#allocation7 + $0x580] sm:$0xff] }
 0x1c5   :  { %8983 = vst [vmem:[#allocation142_spill] sm:$0xff] %v6029_v31  ;;  %1807 = vmatpush.msrb.mxu0 %v6046_v20  ;;  %v6049_v31 = vld [vmem:[#allocation7 + $0xc0] sm:$0xff] }
 0x1c6   :  { %8984 = vst [vmem:[#allocation143_spill] sm:$0xff] %v6032_v7  ;;  %1790 = vmatpush.msra.mxu3 %v6049_v31  ;;  %v6052_v7 = vld [vmem:[#allocation7 + $0x548] sm:$0xff] }
 0x1c7   :  { %8985 = vst [vmem:[#allocation144_spill] sm:$0xff] %v6035_v62  ;;  %1848 = vmatpush.msrb.mxu2 %v6052_v7  ;;  %v6055_v62 = vld [vmem:[#allocation7 + $0x148] sm:$0xff] }
 0x1c8   :  { %8986 = vst [vmem:[#allocation145_spill] sm:$0xff] %v6038_v6  ;;  %1828 = vmatpush.msrb.mxu1 %v6055_v62  ;;  %v6061_v6 = vld [vmem:[#allocation7 + $0x80] sm:$0xff] }
 0x1c9   :  { %8987 = vst [vmem:[#allocation146_spill] sm:$0xff] %v6041_v38  ;;  %v6058_v38 = vld [vmem:[#allocation7 + $0x540] sm:$0xff]  ;;  %1791 = vmatpush.msra.mxu3 %v6061_v6 }
 0x1ca   :  { %8988 = vst [vmem:[#allocation147_spill] sm:$0xff] %v6043_v30  ;;  %1808 = vmatpush.msrb.mxu0 %v6058_v38  ;;  %v6075_v30 = vld [vmem:[#allocation7 + $0x40] sm:$0xff] }
 0x1cb   :  { %8989 = vst [vmem:[#allocation148_spill] sm:$0xff] %v6046_v20  ;;  %v6064_v20 = vld [vmem:[#allocation7 + $0x508] sm:$0xff]  ;;  %1792 = vmatpush.msra.mxu3 %v6075_v30 }
 0x1cc   :  { %8990 = vst [vmem:[#allocation149_spill] sm:$0xff] %v6049_v31  ;;  %1849 = vmatpush.msrb.mxu2 %v6064_v20  ;;  %v6067_v31 = vld [vmem:[#allocation7 + $0x108] sm:$0xff] }
 0x1cd   :  { %8991 = vst [vmem:[#allocation150_spill] sm:$0xff] %v6052_v7  ;;  %1829 = vmatpush.msrb.mxu1 %v6067_v31  ;;  %v6070_v7 = vld [vmem:[#allocation7 + $0x500] sm:$0xff] }
 0x1ce   :  { %8992 = vst [vmem:[#allocation151_spill] sm:$0xff] %v6055_v62  ;;  %1809 = vmatpush.msrb.mxu0 %v6070_v7  ;;  %v6073_v62 = vpop.f32.mrf.mxu0 }
 0x1cf   :  { %8993 = vst [vmem:[#allocation152_spill] sm:$0xff] %v6058_v38  ;;  %v6078_v38 = vld [vmem:[#allocation7 + $0x4c8] sm:$0xff] }
 0x1d0   :  { %8994 = vst [vmem:[#allocation153_spill] sm:$0xff] %v6061_v6  ;;  %1850 = vmatpush.msrb.mxu2 %v6078_v38  ;;  %v6081_v6 = vpop.f32.mrf.mxu3 }
 0x1d1   :  { %8995 = vst [vmem:[#allocation154_spill] sm:$0xff] %v6064_v20  ;;  %v6083_v20 = vld [vmem:[#allocation7 + $0xc8] sm:$0xff] }
 0x1d2   :  { %8996 = vst [vmem:[#allocation155_spill] sm:$0xff] %v6067_v31  ;;  %1830 = vmatpush.msrb.mxu1 %v6083_v20  ;;  %v6086_v31 = vld [vmem:[#allocation7 + $0x4c0] sm:$0xff] }
 0x1d3   :  { %8997 = vst [vmem:[#allocation156_spill] sm:$0xff] %v6070_v7  ;;  %1810 = vmatpush.msrb.mxu0 %v6086_v31  ;;  %v6089_v7 = vpop.f32.mrf.mxu1 }
 0x1d4   :  { %8998 = vst [vmem:[#allocation157_spill] sm:$0xff] %v6073_v62  ;;  %v6091_v62 = vld [vmem:[#allocation7] sm:$0xff] }
 0x1d5   :  { %8999 = vst [vmem:[#allocation158_spill] sm:$0xff] %v6075_v30  ;;  %1793 = vmatpush.msra.mxu3 %v6091_v62  ;;  %v6094_v30 = vld [vmem:[#allocation7 + $0x488] sm:$0xff] }
 0x1d6   :  { %9000 = vst [vmem:[#allocation159_spill] sm:$0xff] %v6078_v38  ;;  %1851 = vmatpush.msrb.mxu2 %v6094_v30  ;;  %v6097_v38 = vpop.f32.mrf.mxu2 }
 0x1d7   :  { %9001 = vst [vmem:[#allocation160_spill] sm:$0xff] %v6081_v6  ;;  %v6099_v6 = vld [vmem:[#allocation7 + $0x88] sm:$0xff] }
 0x1d8   :  { %9002 = vst [vmem:[#allocation161_spill] sm:$0xff] %v6083_v20  ;;  %1831 = vmatpush.msrb.mxu1 %v6099_v6  ;;  %v6102_v20 = vld [vmem:[#allocation7 + $0x3d0] sm:$0xff] }
 0x1d9   :  { %9003 = vst [vmem:[#allocation162_spill] sm:$0xff] %v6086_v31  ;;  %1858 = vmatpush.msrb.mxu3 %v6102_v20  ;;  %v6105_v31 = vld [vmem:[#allocation7 + $0x480] sm:$0xff] }
 0x1da   :  { %9004 = vst [vmem:[#allocation163_spill] sm:$0xff] %v6089_v7  ;;  %1811 = vmatpush.msrb.mxu0 %v6105_v31  ;;  %v6108_v7 = vld [vmem:[#allocation7 + $0x448] sm:$0xff] }
 0x1db   :  { %9005 = vst [vmem:[#allocation164_spill] sm:$0xff] %v6091_v62  ;;  %1852 = vmatpush.msrb.mxu2 %v6108_v7  ;;  %v6111_v62 = vld [vmem:[#allocation7 + $0x48] sm:$0xff] }
 0x1dc   :  { %9006 = vst [vmem:[#allocation165_spill] sm:$0xff] %v6094_v30  ;;  %1832 = vmatpush.msrb.mxu1 %v6111_v62  ;;  %v6117_v30 = vld [vmem:[#allocation7 + $0x440] sm:$0xff] }
 0x1dd   :  { %9007 = vst [vmem:[#allocation166_spill] sm:$0xff] %v6097_v38  ;;  %v6114_v38 = vld [vmem:[#allocation7 + $0x390] sm:$0xff]  ;;  %1812 = vmatpush.msrb.mxu0 %v6117_v30 }
 0x1de   :  { %9008 = vst [vmem:[#allocation167_spill] sm:$0xff] %v6099_v6  ;;  %1859 = vmatpush.msrb.mxu3 %v6114_v38  ;;  %v6143_v6 = vpop.f32.mrf.mxu3 }
 0x1df   :  { %9009 = vst [vmem:[#allocation168_spill] sm:$0xff] %v6102_v20  ;;  %v6120_v20 = vld [vmem:[#allocation7 + $0x408] sm:$0xff] }
 0x1e0   :  { %9010 = vst [vmem:[#allocation169_spill] sm:$0xff] %v6105_v31  ;;  %1853 = vmatpush.msrb.mxu2 %v6120_v20  ;;  %v6123_v31 = vld [vmem:[#allocation7 + $0x8] sm:$0xff] }
 0x1e1   :  { %9011 = vst [vmem:[#allocation170_spill] sm:$0xff] %v6108_v7  ;;  %1833 = vmatpush.msrb.mxu1 %v6123_v31  ;;  %v6126_v7 = vld [vmem:[#allocation7 + $0x350] sm:$0xff] }
 0x1e2   :  { %9012 = vst [vmem:[#allocation171_spill] sm:$0xff] %v6111_v62  ;;  %1860 = vmatpush.msrb.mxu3 %v6126_v7  ;;  %v6129_v62 = vld [vmem:[#allocation7 + $0x3d8] sm:$0xff] }
 0x1e3   :  { %9013 = vst [vmem:[#allocation172_spill] sm:$0xff] %v6114_v38  ;;  %1898 = vmatpush.msra.mxu1 %v6129_v62  ;;  %v6132_v38 = vld [vmem:[#allocation7 + $0x400] sm:$0xff] }
 0x1e4   :  { %9014 = vst [vmem:[#allocation173_spill] sm:$0xff] %v6117_v30  ;;  %1813 = vmatpush.msrb.mxu0 %v6132_v38  ;;  %v6135_v30 = vld [vmem:[#allocation7 + $0x310] sm:$0xff] }
 0x1e5   :  { %9015 = vst [vmem:[#allocation174_spill] sm:$0xff] %v6120_v20  ;;  %1861 = vmatpush.msrb.mxu3 %v6135_v30  ;;  %v6138_v20 = vld [vmem:[#allocation7 + $0x7d0] sm:$0xff] }
 0x1e6   :  { %9016 = vst [vmem:[#allocation175_spill] sm:$0xff] %v6123_v31  ;;  %1878 = vmatpush.msra.mxu0 %v6138_v20  ;;  %v6141_v31 = vpop.f32.mrf.mxu0 }
 0x1e7   :  { %9017 = vst [vmem:[#allocation176_spill] sm:$0xff] %v6126_v7  ;;  %v6145_v7 = vld [vmem:[#allocation7 + $0x398] sm:$0xff] }
 0x1e8   :  { %9018 = vst [vmem:[#allocation177_spill] sm:$0xff] %v6129_v62  ;;  %1899 = vmatpush.msra.mxu1 %v6145_v7  ;;  %v6148_v62 = vld [vmem:[#allocation7 + $0x7d8] sm:$0xff] }
 0x1e9   :  { %9019 = vst [vmem:[#allocation178_spill] sm:$0xff] %v6132_v38  ;;  %1918 = vmatpush.msra.mxu2 %v6148_v62  ;;  %v6151_v38 = vld [vmem:[#allocation7 + $0x2d0] sm:$0xff] }
 0x1ea   :  { %9020 = vst [vmem:[#allocation179_spill] sm:$0xff] %v6135_v30  ;;  %1862 = vmatpush.msrb.mxu3 %v6151_v38  ;;  %v6154_v30 = vld [vmem:[#allocation7 + $0x790] sm:$0xff] }
 0x1eb   :  { %9021 = vst [vmem:[#allocation180_spill] sm:$0xff] %v6138_v20  ;;  %1879 = vmatpush.msra.mxu0 %v6154_v30  ;;  %v6157_v20 = vpop.f32.mrf.mxu1 }
 0x1ec   :  { %9022 = vst [vmem:[#allocation181_spill] sm:$0xff] %v6141_v31  ;;  %v6159_v31 = vpop.f32.mrf.mxu2 }
 0x1ed   :  { %9023 = vst [vmem:[#allocation182_spill] sm:$0xff] %v6143_v6  ;;  %v6161_v6 = vld [vmem:[#allocation7 + $0x358] sm:$0xff] }
 0x1ee   :  { %9024 = vst [vmem:[#allocation183_spill] sm:$0xff] %v6145_v7  ;;  %1900 = vmatpush.msra.mxu1 %v6161_v6  ;;  %v6164_v7 = vld [vmem:[#allocation7 + $0x798] sm:$0xff] }
 0x1ef   :  { %9025 = vst [vmem:[#allocation184_spill] sm:$0xff] %v6148_v62  ;;  %1919 = vmatpush.msra.mxu2 %v6164_v7  ;;  %v6167_v62 = vld [vmem:[#allocation7 + $0x290] sm:$0xff] }
 0x1f0   :  { %9026 = vst [vmem:[#allocation185_spill] sm:$0xff] %v6151_v38  ;;  %1863 = vmatpush.msrb.mxu3 %v6167_v62  ;;  %v6170_v38 = vld [vmem:[#allocation7 + $0x750] sm:$0xff] }
 0x1f1   :  { %9027 = vst [vmem:[#allocation186_spill] sm:$0xff] %v6154_v30  ;;  %1880 = vmatpush.msra.mxu0 %v6170_v38  ;;  %v6173_v30 = vld [vmem:[#allocation7 + $0x318] sm:$0xff] }
 0x1f2   :  { %9028 = vst [vmem:[#allocation187_spill] sm:$0xff] %v6157_v20  ;;  %1901 = vmatpush.msra.mxu1 %v6173_v30  ;;  %v6179_v20 = vld [vmem:[#allocation7 + $0x250] sm:$0xff] }
 0x1f3   :  { %9029 = vst [vmem:[#allocation188_spill] sm:$0xff] %v6159_v31  ;;  %v6176_v31 = vld [vmem:[#allocation7 + $0x758] sm:$0xff]  ;;  %1864 = vmatpush.msrb.mxu3 %v6179_v20 }
 0x1f4   :  { %9030 = vst [vmem:[#allocation189_spill] sm:$0xff] %v6161_v6  ;;  %1920 = vmatpush.msra.mxu2 %v6176_v31  ;;  %v6208_v6 = vld [vmem:[#allocation7 + $0x698] sm:$0xff] }
 0x1f5   :  { %9031 = vst [vmem:[#allocation190_spill] sm:$0xff] %v6164_v7  ;;  %v6182_v7 = vld [vmem:[#allocation7 + $0x710] sm:$0xff] }
 0x1f6   :  { %9032 = vst [vmem:[#allocation191_spill] sm:$0xff] %v6167_v62  ;;  %1881 = vmatpush.msra.mxu0 %v6182_v7  ;;  %v6185_v62 = vld [vmem:[#allocation7 + $0x2d8] sm:$0xff] }
 0x1f7   :  { %9033 = vst [vmem:[#allocation192_spill] sm:$0xff] %v6170_v38  ;;  %1902 = vmatpush.msra.mxu1 %v6185_v62  ;;  %v6188_v38 = vld [vmem:[#allocation7 + $0x718] sm:$0xff] }
 0x1f8   :  { %9034 = vst [vmem:[#allocation193_spill] sm:$0xff] %v6173_v30  ;;  %1921 = vmatpush.msra.mxu2 %v6188_v38  ;;  %v6191_v30 = vld [vmem:[#allocation7 + $0x210] sm:$0xff] }
 0x1f9   :  { %9035 = vst [vmem:[#allocation194_spill] sm:$0xff] %v6176_v31  ;;  %1865 = vmatpush.msrb.mxu3 %v6191_v30  ;;  %v6194_v31 = vld [vmem:[#allocation7 + $0x6d0] sm:$0xff]  ;;  %1903 = vmatpush.msra.mxu1 %v5555_v11 }
 0x1fa   :  { %9036 = vst [vmem:[#allocation195_spill] sm:$0xff] %v6179_v20  ;;  %1882 = vmatpush.msra.mxu0 %v6194_v31  ;;  %v6198_v20 = vld [vmem:[#allocation7 + $0x6d8] sm:$0xff] }
 0x1fb   :  { %9037 = vst [vmem:[#allocation196_spill] sm:$0xff] %v6182_v7  ;;  %1922 = vmatpush.msra.mxu2 %v6198_v20  ;;  %v6201_v7 = vld [vmem:[#allocation7 + $0x1d0] sm:$0xff]  ;;  %1904 = vmatpush.msra.mxu1 %v5569_v21  ;;  %v6224_v21 = vld [vmem:[#allocation7 + $0x618] sm:$0xff] }
 0x1fc   :  { %9038 = vst [vmem:[#allocation197_spill] sm:$0xff] %v6185_v62  ;;  %1866 = vmatpush.msrb.mxu3 %v6201_v7  ;;  %v6204_v62 = vld [vmem:[#allocation7 + $0x690] sm:$0xff] }
 0x1fd   :  { %9039 = vst [vmem:[#allocation198_spill] sm:$0xff] %v6188_v38  ;;  %1883 = vmatpush.msra.mxu0 %v6204_v62  ;;  %v989_v38 = vpop.f32.mrf.mxu0  ;;  %1923 = vmatpush.msra.mxu2 %v6208_v6 }
 0x1fe   :  { %9040 = vst [vmem:[#allocation199_spill] sm:$0xff] %v6191_v30  ;;  %v954_v30 = vpop.f32.mrf.mxu3  ;;  %1867 = vmatpush.msrb.mxu3 %v5565_v37  ;;  %1905 = vmatpush.msra.mxu1 %v5584_v28  ;;  %v6230_v37 = vld [vmem:[#allocation7 + $0x5d8] sm:$0xff] }
 0x1ff   :  { %9041 = vst [vmem:[#allocation200_spill] sm:$0xff] %v6194_v31  ;;  %v6211_v11 = vadd.f32 %v989_v38, %v954_v30  ;;  %1884 = vmatpush.msra.mxu0 %v5567_v18  ;;  %v1057_v31 = vpop.f32.mrf.mxu2  ;;  %v6236_v18 = vld [vmem:[#allocation7 + $0x598] sm:$0xff] }
 0x200   :  { %9042 = vst [vmem:[#allocation201_spill] sm:$0xff] %v6198_v20  ;;  %v1023_v20 = vpop.f32.mrf.mxu1  ;;  %1868 = vmatpush.msrb.mxu3 %v5574_v23  ;;  %1906 = vmatpush.msra.mxu1 %v5593_v24 }
 0x201   :  { %9043 = vst [vmem:[#allocation202_spill] sm:$0xff] %v6201_v7  ;;  %v6216_v7 = vld [vmem:[#allocation7 + $0x658] sm:$0xff]  ;;  %1885 = vmatpush.msra.mxu0 %v5576_v59 }
 0x202   :  { %9044 = vst [vmem:[#allocation203_spill] sm:$0xff] %v6204_v62  ;;  %1924 = vmatpush.msra.mxu2 %v6216_v7  ;;  %v6219_v62 = vadd.f32 %v1057_v31, %v1023_v20  ;;  %1869 = vmatpush.msrb.mxu3 %v5587_v32  ;;  %v6242_v59 = vld [vmem:[#allocation7 + $0x558] sm:$0xff]  ;;  %v557_v32 = vadd.f32 %v5425_v0, %v5441_v13 }
 0x203   :  { %1886 = vmatpush.msra.mxu0 %v5589_v33  ;;  %1907 = vmatpush.msra.mxu1 %v5611_v46  ;;  %v627_v46 = vadd.f32 %v5443_v17, %v5427_v1  ;;  %v6258_v0 = vld [vmem:[#allocation7 + $0x4d8] sm:$0xff] }
 0x204   :  { %1925 = vmatpush.msra.mxu2 %v6224_v21  ;;  %1870 = vmatpush.msrb.mxu3 %v5602_v43  ;;  %v6250_v43 = vld [vmem:[#allocation7 + $0x518] sm:$0xff] }
 0x205   :  { %1887 = vmatpush.msra.mxu0 %v5604_v44  ;;  %1908 = vmatpush.msra.mxu1 %v5627_v57  ;;  %v1361_v28 = vpop.f32.mrf.mxu0 }
 0x206   :  { %1926 = vmatpush.msra.mxu2 %v6230_v37  ;;  %1871 = vmatpush.msrb.mxu3 %v5619_v48  ;;  %v1341_v23 = vpop.f32.mrf.mxu3 }
 0x207   :  { %1888 = vmatpush.msra.mxu0 %v5621_v50  ;;  %1909 = vmatpush.msra.mxu1 %v5642_v63  ;;  %v1362_v33 = vadd.f32 %v1361_v28, %v1341_v23  ;;  %v1401_v24 = vpop.f32.mrf.mxu2 }
 0x208   :  { %1927 = vmatpush.msra.mxu2 %v6236_v18  ;;  %1872 = vmatpush.msrb.mxu3 %v5636_v60  ;;  %v1381_v44 = vpop.f32.mrf.mxu1 }
 0x209   :  { %1889 = vmatpush.msra.mxu0 %v5638_v14  ;;  %1910 = vmatpush.msra.mxu1 %v5659_v9  ;;  %v1644_v48 = vadd.f32 %v1362_v33, %v557_v32  ;;  %v1402_v50 = vadd.f32 %v1401_v24, %v1381_v44  ;;  %v697_v9 = vadd.f32 %v5545_v2, %v5563_v8 }
 0x20a   :  { %1928 = vmatpush.msra.mxu2 %v6242_v59  ;;  %1873 = vmatpush.msrb.mxu3 %v5648_v4 }
 0x20b   :  { %1890 = vmatpush.msra.mxu0 %v5650_v5  ;;  %1911 = vmatpush.msra.mxu1 %v5678_v42  ;;  %v4082_v13 = vmul.f32 -1.442695, %v1644_v48  ;;  %v1645_v57 = vadd.f32 %v1402_v50, %v627_v46  ;;  %v4132_v48 = vld [vmem:[%s8451_s7] ss:$0 sm:$0xff] }
 0x20c   :  { %1929 = vmatpush.msra.mxu2 %v6250_v43 }
 0x20d   :  { %1891 = vmatpush.msra.mxu0 %v5674_v47  ;;  %1912 = vmatpush.msra.mxu1 %v5691_v16  ;;  %4134 = vpow2.f32 %v4082_v13  ;;  %v4083_v1 = vmul.f32 -1.442695, %v1645_v57  ;;  %v766_v16 = vadd.f32 %v5572_v56, %v5547_v3  ;;  %v1441_v4 = vpop.f32.mrf.mxu0 }
 0x20e   :  { %1930 = vmatpush.msra.mxu2 %v6258_v0  ;;  %v1421_v63 = vpop.f32.mrf.mxu3 }
 0x20f   :  { %1892 = vmatpush.msra.mxu0 %v5683_v34  ;;  %1913 = vmatpush.msra.mxu1 %v5698_v51  ;;  %4136 = vpow2.f32 %v4083_v1  ;;  %v1481_v17 = vpop.f32.mrf.mxu2 }
 0x210   :  { %1931 = vmatpush.msra.mxu2 %v5629_v55  ;;  %v1461_v42 = vpop.f32.mrf.mxu1 }
 0x211   :  { %1893 = vmatpush.msra.mxu0 %v5694_v58  ;;  %v1482_v55 = vadd.f32 %v1481_v17, %v1461_v42  ;;  %v1442_v58 = vadd.f32 %v1441_v4, %v1421_v63 }
 0x212   :  { %1932 = vmatpush.msra.mxu2 %v5644_v41 }
 0x213   :  { %v4135_v60 = vpop.eup %4134  ;;  %v1647_v5 = vadd.f32 %v1482_v55, %v766_v16  ;;  %v1646_v47 = vadd.f32 %v1442_v58, %v697_v9 }
 0x214   :  { %1933 = vmatpush.msra.mxu2 %v5663_v15  ;;  %v1658_v14 = vadd.f32 1.0, %v4135_v60 }
 0x215   :  { %v4137_v34 = vpop.eup %4136  ;;  %v4084_v41 = vmul.f32 -1.442695, %v1647_v5  ;;  %v1521_v4 = vpop.f32.mrf.mxu0  ;;  %v850_v5 = vadd.f32 %v5891_v39, %v5907_v26 }
 0x216   :  { %4138 = vrcp.f32 %v1658_v14  ;;  %v1659_v51 = vadd.f32 1.0, %v4137_v34  ;;  %v1671_v20 = vand.u32 2147483648, %v1658_v14  ;;  %v1669_v33 = vand.u32 2147483647, %v1658_v14  ;;  %v1501_v63 = vpop.f32.mrf.mxu3 }
 0x217   :  { %vm1665_vm3 = vweird.f32 %v1658_v14  ;;  %v1522_v58 = vadd.f32 %v1521_v4, %v1501_v63  ;;  %v1561_v9 = vpop.f32.mrf.mxu2  ;;  %v6335_v63 = vld [vmem:[#allocation7 + $0x220] sm:$0xff] }
 0x218   :  { %4140 = vrcp.f32 %v1659_v51  ;;  %v1686_v24 = vand.u32 2147483648, %v1659_v51  ;;  %v1684_v8 = vand.u32 2147483647, %v1659_v51  ;;  %v1672_v46 = vor.u32 1.1754944e-38, %v1671_v20 }
 0x219   :  { %4142 = vpow2.f32 %v4084_v41  ;;  %vm1680_vm6 = vweird.f32 %v1659_v51  ;;  %vm1670_vm7 = vcmp.eq.f32.partialorder %v1669_v33, 8.507059e+37 }
 0x21a   :  { %4144 = vtanh.f32 %v1646_v47  ;;  %v1687_v1 = vor.u32 1.1754944e-38, %v1686_v24  ;;  %vm1685_vm9 = vcmp.eq.f32.partialorder %v1684_v8, 8.507059e+37  ;;  %v6296_v8 = vld [vmem:[#allocation7 + $0x3a8] sm:$0xff] }
 0x21c   :  { %v4139_v15 = vpop.eup %4138 }
 0x21d   :  { %v1661_v38 = vmul.f32 %v4139_v15, %v1658_v14  ;;  %vm1666_vm2 = vweird.f32 %v4139_v15 }
 0x21e   :  { %v4141_v31 = vpop.eup %4140  ;;  %vm1667_vm5 = vmor %vm1665_vm3, %vm1666_vm2 }
 0x21f   :  { %v4143_v3 = vpop.eup %4142  ;;  %v1662_v56 = vsub.f32 1.0, %v1661_v38  ;;  %v1676_v30 = vmul.f32 %v4141_v31, %v1659_v51  ;;  %vm1681_vm4 = vweird.f32 %v4141_v31  ;;  %v1541_v38 = vpop.f32.mrf.mxu1 }
 0x220   :  { %v1697_v23 = vadd.f32 1.0, %v4143_v3  ;;  %v4145_v57 = vpop.eup %4144  ;;  %vm1682_vm8 = vmor %vm1680_vm6, %vm1681_vm4  ;;  %v1648_v3 = vadd.f32 %v1522_v58, %v850_v5  ;;  %v6341_v5 = vld [vmem:[#allocation7 + $0x1e0] sm:$0xff] }
 0x221   :  { %v1677_v28 = vsub.f32 1.0, %v1676_v30  ;;  %v1663_v32 = vmul.f32 %v4139_v15, %v1662_v56  ;;  %v1562_v56 = vadd.f32 %v1561_v9, %v1541_v38  ;;  %v6347_v58 = vld [vmem:[#allocation7 + $0x1a0] sm:$0xff]  ;;  %v1581_v9 = vpop.f32.mrf.mxu3  ;;  %v1641_v38 = vpop.f32.mrf.mxu2 }
 0x222   :  { %4146 = vrcp.f32 %v1697_v23  ;;  %v1709_v47 = vand.u32 2147483648, %v1697_v23  ;;  %v1707_v30 = vand.u32 2147483647, %v1697_v23  ;;  %vm1703_vm11 = vweird.f32 %v1697_v23 }
 0x223   :  { %v1678_v44 = vmul.f32 %v4141_v31, %v1677_v28  ;;  %v1664_v2 = vadd.f32 %v4139_v15, %v1663_v32  ;;  %v4085_v26 = vmul.f32 -1.442695, %v1648_v3 }
 0x224   :  { %v1710_v32 = vor.u32 1.1754944e-38, %v1709_v47  ;;  %vm1708_vm13 = vcmp.eq.f32.partialorder %v1707_v30, 8.507059e+37  ;;  %v6355_v47 = vld [vmem:[#allocation7 + $0x160] sm:$0xff] }
 0x225   :  { %v1668_v50 = vsel %vm1667_vm5, %v4139_v15, %v1664_v2  ;;  %v1679_v13 = vadd.f32 %v4141_v31, %v1678_v44  ;;  %v920_v15 = vadd.f32 %v5913_v19, %v5893_v29  ;;  %v6287_v44 = vld [vmem:[#allocation7 + $0x3e0] sm:$0xff] }
 0x226   :  { %v1673_v17 = vsel %vm1670_vm7, %v1672_v46, %v1668_v50  ;;  %v6293_v2 = vld [vmem:[#allocation7 + $0x3a0] sm:$0xff] }
 0x227   :  { %v1683_v42 = vsel %vm1682_vm8, %v4141_v31, %v1679_v13  ;;  %v1692_v60 = vmul.f32 %v4145_v57, %v1673_v17  ;;  %v1649_v39 = vadd.f32 %v1562_v56, %v920_v15  ;;  %v6299_v50 = vld [vmem:[#allocation7 + $0x360] sm:$0xff]  ;;  %v6302_v13 = vld [vmem:[#allocation7 + $0x368] sm:$0xff]  ;;  %v1601_v15 = vpop.f32.mrf.mxu0 }
 0x228   :  { %v4147_v16 = vpop.eup %4146  ;;  %v1688_v55 = vsel %vm1685_vm9, %v1687_v1, %v1683_v42  ;;  %v6307_v1 = vld [vmem:[#allocation7 + $0x320] sm:$0xff]  ;;  %v6310_v17 = vld [vmem:[#allocation7 + $0x328] sm:$0xff] }
 0x229   :  { %v1690_v14 = vmul.f32 %v4132_v48, %v1688_v55  ;;  %v1699_v34 = vmul.f32 %v4147_v16, %v1697_v23  ;;  %vm1704_vm10 = vweird.f32 %v4147_v16  ;;  %v4086_v33 = vmul.f32 -1.442695, %v1649_v39  ;;  %v6290_v23 = vld [vmem:[#allocation7 + $0x3e8] sm:$0xff]  ;;  %v6324_v55 = vld [vmem:[#allocation7 + $0x2a0] sm:$0xff] }
 0x22a   :  { %vm1705_vm12 = vmor %vm1703_vm11, %vm1704_vm10  ;;  %v9046_v39 = vld [vmem:[#allocation60_spill] sm:$0xff] }
 0x22b   :  { %v6278_v51 = vadd.f32 %v1692_v60, %v1690_v14  ;;  %v1700_v41 = vsub.f32 1.0, %v1699_v34  ;;  %v6317_v60 = vld [vmem:[#allocation7 + $0x2e0] sm:$0xff]  ;;  %v6327_v14 = vld [vmem:[#allocation7 + $0x2a8] sm:$0xff] }
 0x22c   :  { %v6331_v34 = vld [vmem:[#allocation7 + $0x260] sm:$0xff] }
 0x22d   :  { %4148 = vtanh.f32 %v6278_v51  ;;  %v1701_v31 = vmul.f32 %v4147_v16, %v1700_v41 }
 0x22e   :  { %4150 = vpow2.f32 %v4085_v26 }
 0x22f   :  { %v1702_v20 = vadd.f32 %v4147_v16, %v1701_v31  ;;  %4152 = vpow2.f32 %v4086_v33  ;;  %v9051_v33 = vld [vmem:[#allocation59_spill] sm:$0xff] }
 0x231   :  { %v1706_v28 = vsel %vm1705_vm12, %v4147_v16, %v1702_v20  ;;  %v6320_v16 = vld [vmem:[#allocation7 + $0x2e8] sm:$0xff] }
 0x232   :  { %v1711_v19 = vsel %vm1708_vm13, %v1710_v32, %v1706_v28  ;;  %v9045_v20 = vld [vmem:[#allocation52_spill] sm:$0xff]  ;;  %v9047_v28 = vld [vmem:[#allocation53_spill] sm:$0xff]  ;;  %v9048_v32 = vld [vmem:[#allocation62_spill] sm:$0xff] }
 0x233   :  { %v4149_v24 = vpop.eup %4148 }
 0x234   :  { %v6283_v29 = vmul.f32 %v4149_v24, %v1711_v19  ;;  %v4151_v46 = vpop.eup %4150  ;;  %v9052_v24 = vld [vmem:[#allocation70_spill] sm:$0xff] }
 0x235   :  { %v4153_v48 = vpop.eup %4152  ;;  %v6305_v57 = vadd.f32 1.0, %v4151_v46 }
 0x236   :  { %1794 = vmatmul.f32.vlgmr.msra.gmra.mxu3 %v6283_v29  ;;  %1834 = vmatmul.f32.vlgmr.msrb.gmra.mxu1 %v6283_v29  ;;  %v6313_v42 = vadd.f32 1.0, %v4153_v48  ;;  %v9070_v48 = vld [vmem:[#allocation90_spill] sm:$0xff] }
 0x237   :  { %1938 = vmatpush.msra.mxu3 %v6287_v44  ;;  %1978 = vmatpush.msrb.mxu1 %v6290_v23  ;;  %4154 = vrcp.f32 %v6305_v57  ;;  %vm1728_vm0 = vweird.f32 %v6305_v57  ;;  %v1734_v46 = vand.u32 2147483648, %v6305_v57 }
 0x238   :  { %4156 = vrcp.f32 %v6313_v42  ;;  %v1749_v19 = vand.u32 2147483648, %v6313_v42  ;;  %vm1743_vm1 = vweird.f32 %v6313_v42 }
 0x239   :  { %1939 = vmatpush.msra.mxu3 %v6293_v2  ;;  %1979 = vmatpush.msrb.mxu1 %v6296_v8 }
 0x23b   :  { %1940 = vmatpush.msra.mxu3 %v6299_v50  ;;  %1980 = vmatpush.msrb.mxu1 %v6302_v13 }
 0x23d   :  { %1941 = vmatpush.msra.mxu3 %v6307_v1  ;;  %1981 = vmatpush.msrb.mxu1 %v6310_v17  ;;  %v6339_v4 = vpop.eup %4154 }
 0x23e   :  { %1874 = vmatmul.f32.vlgmr.msrb.gmra.mxu3 %v6283_v29  ;;  %1914 = vmatmul.f32.vlgmr.msra.gmra.mxu1 %v6283_v29  ;;  %v6345_v41 = vpop.eup %4156  ;;  %vm1729_vm14 = vweird.f32 %v6339_v4 }
 0x23f   :  { %1942 = vmatpush.msra.mxu3 %v6317_v60  ;;  %1982 = vmatpush.msrb.mxu1 %v6320_v16  ;;  %vm1744_vm15 = vweird.f32 %v6345_v41  ;;  %vm6385_vm2 = vmor %vm1728_vm0, %vm1729_vm14 }
 0x240   :  { %vm6395_vm3 = vmor %vm1743_vm1, %vm1744_vm15 }
 0x241   :  { %1943 = vmatpush.msra.mxu3 %v6324_v55  ;;  %1983 = vmatpush.msrb.mxu1 %v6327_v14 }
 0x243   :  { %1944 = vmatpush.msra.mxu3 %v6331_v34  ;;  %1984 = vmatpush.msrb.mxu1 %v5722_v12  ;;  %v1724_v12 = vmul.f32 %v6339_v4, %v6305_v57 }
 0x245   :  { %1945 = vmatpush.msra.mxu3 %v6335_v63  ;;  %1985 = vmatpush.msrb.mxu1 %v5726_v61  ;;  %v1739_v61 = vmul.f32 %v6345_v41, %v6313_v42  ;;  %v1725_v3 = vsub.f32 1.0, %v1724_v12  ;;  %v1732_v12 = vand.u32 2147483647, %v6305_v57 }
 0x247   :  { %1946 = vmatpush.msra.mxu3 %v6341_v5  ;;  %1986 = vmatpush.msrb.mxu1 %v5731_v10  ;;  %v1621_v10 = vpop.f32.mrf.mxu1  ;;  %v1740_v56 = vsub.f32 1.0, %v1739_v61  ;;  %v1747_v61 = vand.u32 2147483647, %v6313_v42  ;;  %vm1733_vm4 = vcmp.eq.f32.partialorder %v1732_v12, 8.507059e+37 }
 0x248   :  { %v1642_v31 = vadd.f32 %v1641_v38, %v1621_v10 }
 0x249   :  { %1947 = vmatpush.msra.mxu3 %v6347_v58  ;;  %1987 = vmatpush.msrb.mxu1 %v5741_v52  ;;  %v1602_v52 = vadd.f32 %v1601_v15, %v1581_v9  ;;  %v9055_v9 = vld [vmem:[#allocation61_spill] sm:$0xff]  ;;  %v9056_v15 = vld [vmem:[#allocation72_spill] sm:$0xff]  ;;  %vm1748_vm5 = vcmp.eq.f32.partialorder %v1747_v61, 8.507059e+37 }
 0x24a   :  { %v1651_v30 = vadd.f32 %v1642_v31, %v6219_v62  ;;  %v9059_v31 = vld [vmem:[#allocation64_spill] sm:$0xff] }
 0x24b   :  { %1948 = vmatpush.msra.mxu3 %v6355_v47  ;;  %1988 = vmatpush.msrb.mxu1 %v5747_v49  ;;  %v1650_v49 = vadd.f32 %v1602_v52, %v6211_v11 }
 0x24c   :  { %v4087_v26 = vmul.f32 -1.442695, %v1651_v30  ;;  %v1750_v30 = vor.u32 1.1754944e-38, %v1749_v19 }
 0x24d   :  { %1949 = vmatpush.msra.mxu3 %v5729_v22  ;;  %1989 = vmatpush.msrb.mxu1 %v5755_v40  ;;  %v1741_v22 = vmul.f32 %v6345_v41, %v1740_v56  ;;  %v1726_v40 = vmul.f32 %v6339_v4, %v1725_v3  ;;  %v9060_v3 = vld [vmem:[#allocation75_spill] sm:$0xff] }
 0x24e   :  { %4158 = vpow2.f32 %v4087_v26 }
 0x24f   :  { %1950 = vmatpush.msra.mxu3 %v5738_v36  ;;  %1990 = vmatpush.msrb.mxu1 %v5763_v54  ;;  %v9049_v36 = vld [vmem:[#allocation55_spill] sm:$0xff]  ;;  %v9050_v54 = vld [vmem:[#allocation66_spill] sm:$0xff]  ;;  %4160 = vtanh.f32 %v1650_v49  ;;  %v1727_v62 = vadd.f32 %v6339_v4, %v1726_v40  ;;  %v1742_v11 = vadd.f32 %v6345_v41, %v1741_v22 }
 0x250   :  { %v9062_v49 = vld [vmem:[#allocation78_spill] sm:$0xff]  ;;  %v9063_v40 = vld [vmem:[#allocation71_spill] sm:$0xff] }
 0x251   :  { %1951 = vmatpush.msra.mxu3 %v9045_v20  ;;  %1991 = vmatpush.msrb.mxu1 %v9046_v39  ;;  %v1731_v52 = vsel %vm6385_vm2, %v6339_v4, %v1727_v62  ;;  %v1746_v57 = vsel %vm6395_vm3, %v6345_v41, %v1742_v11  ;;  %v1735_v20 = vor.u32 1.1754944e-38, %v1734_v46  ;;  %v4133_v39 = vld [vmem:[%s8451_s7 + $0x1] ss:$0 sm:$0xff]  ;;  %v9061_v4 = vld [vmem:[#allocation67_spill] sm:$0xff]  ;;  %v9069_v46 = vld [vmem:[#allocation81_spill] sm:$0xff] }
 0x252   :  { %v1751_v26 = vsel %vm1748_vm5, %v1750_v30, %v1746_v57  ;;  %v9074_v57 = vld [vmem:[#allocation96_spill] sm:$0xff]  ;;  %v9076_v30 = vld [vmem:[#allocation99_spill] sm:$0xff] }
 0x253   :  { %1952 = vmatpush.msra.mxu3 %v9047_v28  ;;  %1992 = vmatpush.msrb.mxu1 %v9048_v32  ;;  %v1736_v41 = vsel %vm1733_vm4, %v1735_v20, %v1731_v52  ;;  %v9064_v28 = vld [vmem:[#allocation82_spill] sm:$0xff]  ;;  %v1753_v32 = vmul.f32 %v4133_v39, %v1751_v26  ;;  %v9073_v52 = vld [vmem:[#allocation85_spill] sm:$0xff] }
 0x254   :  { %v4159_v10 = vpop.eup %4158 }
 0x255   :  { %1953 = vmatpush.msra.mxu3 %v9049_v36  ;;  %1993 = vmatpush.msrb.mxu1 %v9050_v54  ;;  %v1760_v42 = vadd.f32 1.0, %v4159_v10  ;;  %v4161_v56 = vpop.eup %4160  ;;  %v9065_v36 = vld [vmem:[#allocation73_spill] sm:$0xff]  ;;  %v9066_v54 = vld [vmem:[#allocation84_spill] sm:$0xff] }
 0x256   :  { %1954 = vmatmul.f32.vlgmr.msra.gmra.mxu3 %v6283_v29  ;;  %1994 = vmatmul.f32.vlgmr.msrb.gmra.mxu1 %v6283_v29  ;;  %v1755_v22 = vmul.f32 %v4161_v56, %v1736_v41  ;;  %v9075_v56 = vld [vmem:[#allocation88_spill] sm:$0xff]  ;;  %v9078_v41 = vld [vmem:[#allocation102_spill] sm:$0xff] }
 0x257   :  { %2018 = vmatpush.msrb.mxu3 %v9051_v33  ;;  %2058 = vmatpush.msra.mxu1 %v9052_v24  ;;  %4162 = vrcp.f32 %v1760_v42  ;;  %v9067_v33 = vld [vmem:[#allocation76_spill] sm:$0xff]  ;;  %v9068_v24 = vld [vmem:[#allocation87_spill] sm:$0xff]  ;;  %v1772_v61 = vand.u32 2147483648, %v1760_v42  ;;  %v1770_v38 = vand.u32 2147483647, %v1760_v42  ;;  %vm1766_vm7 = vweird.f32 %v1760_v42 }
 0x258   :  { %v6416_v11 = vadd.f32 %v1755_v22, %v1753_v32  ;;  %v9079_v22 = vld [vmem:[#allocation95_spill] sm:$0xff]  ;;  %v9081_v32 = vld [vmem:[#allocation97_spill] sm:$0xff] }
 0x259   :  { %2019 = vmatpush.msrb.mxu3 %v9055_v9  ;;  %2059 = vmatpush.msra.mxu1 %v9056_v15  ;;  %v9071_v9 = vld [vmem:[#allocation83_spill] sm:$0xff]  ;;  %v9072_v15 = vld [vmem:[#allocation94_spill] sm:$0xff]  ;;  %vm1771_vm9 = vcmp.eq.f32.partialorder %v1770_v38, 8.507059e+37 }
 0x25a   :  { %4164 = vtanh.f32 %v6416_v11  ;;  %v6493_v38 = vld [vmem:[#allocation7 + $0x620] sm:$0xff] }
 0x25b   :  { %2020 = vmatpush.msrb.mxu3 %v9059_v31  ;;  %2060 = vmatpush.msra.mxu1 %v9060_v3  ;;  %v1773_v3 = vor.u32 1.1754944e-38, %v1772_v61  ;;  %v9084_v61 = vld [vmem:[#allocation109_spill] sm:$0xff] }
 0x25d   :  { %2021 = vmatpush.msrb.mxu3 %v9061_v4  ;;  %2061 = vmatpush.msra.mxu1 %v9062_v49  ;;  %v4163_v62 = vpop.eup %4162  ;;  %v9077_v49 = vld [vmem:[#allocation93_spill] sm:$0xff] }
 0x25e   :  { %v1762_v19 = vmul.f32 %v4163_v62, %v1760_v42  ;;  %vm1767_vm6 = vweird.f32 %v4163_v62  ;;  %v6437_v42 = vld [vmem:[#allocation7 + $0x7e0] sm:$0xff] }
 0x25f   :  { %2022 = vmatpush.msrb.mxu3 %v9063_v40  ;;  %2062 = vmatpush.msra.mxu1 %v9064_v28  ;;  %vm1768_vm8 = vmor %vm1766_vm7, %vm1767_vm6  ;;  %v9080_v40 = vld [vmem:[#allocation104_spill] sm:$0xff] }
 0x260   :  { %v1763_v12 = vsub.f32 1.0, %v1762_v19  ;;  %v4165_v39 = vpop.eup %4164  ;;  %v6440_v28 = vld [vmem:[#allocation7 + $0x7e8] sm:$0xff]  ;;  %v6461_v19 = vld [vmem:[#allocation7 + $0x720] sm:$0xff] }
 0x261   :  { %2023 = vmatpush.msrb.mxu3 %v9065_v36  ;;  %2063 = vmatpush.msra.mxu1 %v9066_v54  ;;  %v6445_v36 = vld [vmem:[#allocation7 + $0x7a0] sm:$0xff]  ;;  %v6448_v54 = vld [vmem:[#allocation7 + $0x7a8] sm:$0xff] }
 0x262   :  { %v1764_v10 = vmul.f32 %v4163_v62, %v1763_v12  ;;  %v6480_v12 = vld [vmem:[#allocation7 + $0x6a8] sm:$0xff] }
 0x263   :  { %2024 = vmatpush.msrb.mxu3 %v9067_v33  ;;  %2064 = vmatpush.msra.mxu1 %v9068_v24  ;;  %v6453_v33 = vld [vmem:[#allocation7 + $0x760] sm:$0xff]  ;;  %v6456_v24 = vld [vmem:[#allocation7 + $0x768] sm:$0xff] }
 0x264   :  { %v1765_v31 = vadd.f32 %v4163_v62, %v1764_v10  ;;  %v9086_v10 = vld [vmem:[#allocation111_spill] sm:$0xff] }
 0x265   :  { %2025 = vmatpush.msrb.mxu3 %v9069_v46  ;;  %2065 = vmatpush.msra.mxu1 %v9070_v48  ;;  %v6464_v46 = vld [vmem:[#allocation7 + $0x728] sm:$0xff] }
 0x266   :  { %v1769_v20 = vsel %vm1768_vm8, %v4163_v62, %v1765_v31  ;;  %v9082_v62 = vld [vmem:[#allocation100_spill] sm:$0xff]  ;;  %v6501_v31 = vld [vmem:[#allocation7 + $0x5e0] sm:$0xff] }
 0x267   :  { %2026 = vmatpush.msrb.mxu3 %v9071_v9  ;;  %2066 = vmatpush.msra.mxu1 %v9072_v15  ;;  %v1774_v4 = vsel %vm1771_vm9, %v1773_v3, %v1769_v20  ;;  %v6472_v48 = vld [vmem:[#allocation7 + $0x6e8] sm:$0xff]  ;;  %v6485_v9 = vld [vmem:[#allocation7 + $0x660] sm:$0xff] }
 0x268   :  { %v6431_v26 = vmul.f32 %v4165_v39, %v1774_v4  ;;  %v6488_v15 = vld [vmem:[#allocation7 + $0x668] sm:$0xff]  ;;  %v9093_v39 = vld [vmem:[#allocation114_spill] sm:$0xff] }
 0x269   :  { %2027 = vmatpush.msrb.mxu3 %v9073_v52  ;;  %2067 = vmatpush.msra.mxu1 %v9074_v57  ;;  %v6496_v52 = vld [vmem:[#allocation7 + $0x628] sm:$0xff]  ;;  %v9088_v57 = vld [vmem:[#allocation115_spill] sm:$0xff]  ;;  %v9094_v4 = vld [vmem:[#allocation122_spill] sm:$0xff] }
 0x26a   :  { %1814 = vmatmul.f32.vlgmr.msrb.gmra.mxu0 %v6431_v26  ;;  %1854 = vmatmul.f32.vlgmr.msrb.gmra.mxu2 %v6431_v26  ;;  %v6504_v3 = vld [vmem:[#allocation7 + $0x5e8] sm:$0xff] }
 0x26b   :  { %2028 = vmatpush.msrb.mxu3 %v9075_v56  ;;  %2068 = vmatpush.msra.mxu1 %v9076_v30  ;;  %9089 = vst [vmem:[#allocation52_spill] sm:$0xff] %v6504_v3  ;;  %v9090_v56 = vld [vmem:[#allocation110_spill] sm:$0xff]  ;;  %v6509_v30 = vld [vmem:[#allocation7 + $0x5a0] sm:$0xff]  ;;  %v6512_v20 = vld [vmem:[#allocation7 + $0x5a8] sm:$0xff] }
 0x26c   :  { %1958 = vmatpush.msrb.mxu0 %v6437_v42  ;;  %1998 = vmatpush.msrb.mxu2 %v6440_v28  ;;  %9091 = vst [vmem:[#allocation60_spill] sm:$0xff] %v6509_v30 }
 0x26d   :  { %2029 = vmatpush.msrb.mxu3 %v9077_v49  ;;  %2069 = vmatpush.msra.mxu1 %v9078_v41  ;;  %9092 = vst [vmem:[#allocation53_spill] sm:$0xff] %v6512_v20  ;;  %v6517_v49 = vld [vmem:[#allocation7 + $0x560] sm:$0xff]  ;;  %v6520_v41 = vld [vmem:[#allocation7 + $0x568] sm:$0xff] }
 0x26e   :  { %1959 = vmatpush.msrb.mxu0 %v6445_v36  ;;  %1999 = vmatpush.msrb.mxu2 %v6448_v54  ;;  %9095 = vst [vmem:[#allocation62_spill] sm:$0xff] %v6517_v49 }
 0x26f   :  { %2030 = vmatpush.msrb.mxu3 %v9079_v22  ;;  %2070 = vmatpush.msra.mxu1 %v9080_v40  ;;  %9096 = vst [vmem:[#allocation55_spill] sm:$0xff] %v6520_v41  ;;  %v9098_v22 = vld [vmem:[#allocation127_spill] sm:$0xff] }
 0x270   :  { %1960 = vmatpush.msrb.mxu0 %v6453_v33  ;;  %2000 = vmatpush.msrb.mxu2 %v6456_v24  ;;  %v6525_v40 = vld [vmem:[#allocation7 + $0x520] sm:$0xff] }
 0x271   :  { %2031 = vmatpush.msrb.mxu3 %v9081_v32  ;;  %2071 = vmatpush.msra.mxu1 %v5903_v45  ;;  %v9083_v45 = vld [vmem:[#allocation103_spill] sm:$0xff]  ;;  %9099 = vst [vmem:[#allocation66_spill] sm:$0xff] %v6525_v40  ;;  %v6528_v32 = vld [vmem:[#allocation7 + $0x528] sm:$0xff] }
 0x272   :  { %1961 = vmatpush.msrb.mxu0 %v6461_v19  ;;  %2001 = vmatpush.msrb.mxu2 %v6464_v46  ;;  %9100 = vst [vmem:[#allocation59_spill] sm:$0xff] %v6528_v32 }
 0x273   :  { %2032 = vmatpush.msrb.mxu3 %v9082_v62  ;;  %2072 = vmatpush.msra.mxu1 %v5909_v53  ;;  %v6469_v53 = vld [vmem:[#allocation7 + $0x6e0] sm:$0xff]  ;;  %v9101_v62 = vld [vmem:[#allocation120_spill] sm:$0xff] }
 0x274   :  { %1894 = vmatmul.f32.vlgmr.msra.gmra.mxu0 %v6431_v26  ;;  %1934 = vmatmul.f32.vlgmr.msra.gmra.mxu2 %v6431_v26 }
 0x275   :  { %2033 = vmatpush.msrb.mxu3 %v9083_v45  ;;  %2073 = vmatpush.msra.mxu1 %v5915_v25  ;;  %v6477_v25 = vld [vmem:[#allocation7 + $0x6a0] sm:$0xff] }
 0x276   :  { %1962 = vmatpush.msrb.mxu0 %v6469_v53  ;;  %2002 = vmatpush.msrb.mxu2 %v6472_v48  ;;  %v9102_v45 = vld [vmem:[#allocation131_spill] sm:$0xff] }
 0x277   :  { %2034 = vmatmul.f32.vlgmr.msrb.gmra.mxu3 %v6283_v29  ;;  %2074 = vmatmul.f32.vlgmr.msra.gmra.mxu1 %v6283_v29  ;;  %v9085_v29 = vld [vmem:[#allocation106_spill] sm:$0xff] }
 0x278   :  { %1963 = vmatpush.msrb.mxu0 %v6477_v25  ;;  %2003 = vmatpush.msrb.mxu2 %v6480_v12 }
 0x279   :  { %2232 = vmatpush.msra.mxu3 %v5919_v27  ;;  %2272 = vmatpush.msrb.mxu1 %v9084_v61  ;;  %v9087_v27 = vld [vmem:[#allocation107_spill] sm:$0xff] }
 0x27a   :  { %1964 = vmatpush.msrb.mxu0 %v6485_v9  ;;  %2004 = vmatpush.msrb.mxu2 %v6488_v15  ;;  %v6533_v61 = vld [vmem:[#allocation7 + $0x4e0] sm:$0xff] }
 0x27b   :  { %2233 = vmatpush.msra.mxu3 %v9085_v29  ;;  %2273 = vmatpush.msrb.mxu1 %v9086_v10  ;;  %9103 = vst [vmem:[#allocation70_spill] sm:$0xff] %v6533_v61  ;;  %v6536_v29 = vld [vmem:[#allocation7 + $0x4e8] sm:$0xff] }
 0x27c   :  { %1965 = vmatpush.msrb.mxu0 %v6493_v38  ;;  %2005 = vmatpush.msrb.mxu2 %v6496_v52  ;;  %9104 = vst [vmem:[#allocation61_spill] sm:$0xff] %v6536_v29  ;;  %v9105_v10 = vld [vmem:[#allocation124_spill] sm:$0xff] }
 0x27d   :  { %2234 = vmatpush.msra.mxu3 %v9087_v27  ;;  %2274 = vmatpush.msrb.mxu1 %v9088_v57  ;;  %v9106_v27 = vld [vmem:[#allocation136_spill] sm:$0xff]  ;;  %v6541_v57 = vld [vmem:[#allocation7 + $0x4a0] sm:$0xff] }
 0x27e   :  { %1966 = vmatpush.msrb.mxu0 %v6501_v31  ;;  %2006 = vmatpush.msrb.mxu2 %v6504_v3  ;;  %9107 = vst [vmem:[#allocation72_spill] sm:$0xff] %v6541_v57  ;;  %v9261_v3 = vld [vmem:[#allocation92_spill] sm:$0xff] }
 0x27f   :  { %2235 = vmatpush.msra.mxu3 %v9090_v56  ;;  %2275 = vmatpush.msrb.mxu1 %v5962_v35  ;;  %v9097_v35 = vld [vmem:[#allocation118_spill] sm:$0xff]  ;;  %v6544_v56 = vld [vmem:[#allocation7 + $0x4a8] sm:$0xff] }
 0x280   :  { %1967 = vmatpush.msrb.mxu0 %v6509_v30  ;;  %2007 = vmatpush.msrb.mxu2 %v6512_v20  ;;  %9108 = vst [vmem:[#allocation64_spill] sm:$0xff] %v6544_v56 }
 0x281   :  { %2236 = vmatpush.msra.mxu3 %v9093_v39  ;;  %2276 = vmatpush.msrb.mxu1 %v9094_v4  ;;  %v9109_v39 = vld [vmem:[#allocation129_spill] sm:$0xff]  ;;  %v9110_v4 = vld [vmem:[#allocation142_spill] sm:$0xff] }
 0x282   :  { %1968 = vmatpush.msrb.mxu0 %v6517_v49  ;;  %2008 = vmatpush.msrb.mxu2 %v6520_v41 }
 0x283   :  { %2237 = vmatpush.msra.mxu3 %v9097_v35  ;;  %2277 = vmatpush.msrb.mxu1 %v9098_v22  ;;  %v6549_v35 = vld [vmem:[#allocation7 + $0x460] sm:$0xff]  ;;  %v6552_v22 = vld [vmem:[#allocation7 + $0x468] sm:$0xff] }
 0x284   :  { %1969 = vmatpush.msrb.mxu0 %v6525_v40  ;;  %2009 = vmatpush.msrb.mxu2 %v6528_v32  ;;  %9111 = vst [vmem:[#allocation75_spill] sm:$0xff] %v6549_v35 }
 0x285   :  { %2238 = vmatpush.msra.mxu3 %v9101_v62  ;;  %2278 = vmatpush.msrb.mxu1 %v9102_v45  ;;  %9112 = vst [vmem:[#allocation67_spill] sm:$0xff] %v6552_v22  ;;  %v9113_v62 = vld [vmem:[#allocation134_spill] sm:$0xff]  ;;  %v9114_v45 = vld [vmem:[#allocation147_spill] sm:$0xff] }
 0x286   :  { %1970 = vmatpush.msrb.mxu0 %v6533_v61  ;;  %2010 = vmatpush.msrb.mxu2 %v6536_v29 }
 0x287   :  { %2239 = vmatpush.msra.mxu3 %v9105_v10  ;;  %2279 = vmatpush.msrb.mxu1 %v9106_v27  ;;  %v6557_v10 = vld [vmem:[#allocation7 + $0x420] sm:$0xff]  ;;  %v6560_v27 = vld [vmem:[#allocation7 + $0x428] sm:$0xff] }
 0x288   :  { %1971 = vmatpush.msrb.mxu0 %v6541_v57  ;;  %2011 = vmatpush.msrb.mxu2 %v6544_v56  ;;  %9115 = vst [vmem:[#allocation78_spill] sm:$0xff] %v6557_v10  ;;  %v9212_v56 = vld [vmem:[#allocation145_spill] sm:$0xff]  ;;  %v9214_v57 = vld [vmem:[#allocation150_spill] sm:$0xff] }
 0x289   :  { %2240 = vmatpush.msra.mxu3 %v9109_v39  ;;  %2280 = vmatpush.msrb.mxu1 %v9110_v4  ;;  %9116 = vst [vmem:[#allocation71_spill] sm:$0xff] %v6560_v27  ;;  %v6565_v39 = vld [vmem:[#allocation7 + $0x7f0] sm:$0xff]  ;;  %v6568_v4 = vld [vmem:[#allocation7 + $0x7f8] sm:$0xff] }
 0x28a   :  { %1972 = vmatpush.msrb.mxu0 %v6549_v35  ;;  %2012 = vmatpush.msrb.mxu2 %v6552_v22  ;;  %9117 = vst [vmem:[#allocation82_spill] sm:$0xff] %v6565_v39  ;;  %v9123_v22 = vld [vmem:[#allocation144_spill] sm:$0xff]  ;;  %v9124_v35 = vld [vmem:[#allocation155_spill] sm:$0xff] }
 0x28b   :  { %2241 = vmatpush.msra.mxu3 %v9113_v62  ;;  %2281 = vmatpush.msrb.mxu1 %v9114_v45  ;;  %9118 = vst [vmem:[#allocation73_spill] sm:$0xff] %v6568_v4  ;;  %v9119_v62 = vld [vmem:[#allocation139_spill] sm:$0xff] }
 0x28c   :  { %1973 = vmatpush.msrb.mxu0 %v6557_v10  ;;  %2013 = vmatpush.msrb.mxu2 %v6560_v27  ;;  %v9120_v45 = vld [vmem:[#allocation151_spill] sm:$0xff]  ;;  %v6573_v10 = vld [vmem:[#allocation7 + $0x7b0] sm:$0xff]  ;;  %v6576_v27 = vld [vmem:[#allocation7 + $0x7b8] sm:$0xff] }
 0x28d   :  { %1974 = vmatmul.f32.vlgmr.msrb.gmra.mxu0 %v6431_v26  ;;  %2014 = vmatmul.f32.vlgmr.msrb.gmra.mxu2 %v6431_v26  ;;  %9121 = vst [vmem:[#allocation84_spill] sm:$0xff] %v6573_v10 }
 0x28e   :  { %2038 = vmatpush.msra.mxu0 %v6565_v39  ;;  %2078 = vmatpush.msra.mxu2 %v6568_v4  ;;  %9122 = vst [vmem:[#allocation76_spill] sm:$0xff] %v6576_v27  ;;  %v6581_v39 = vld [vmem:[#allocation7 + $0x770] sm:$0xff]  ;;  %v6584_v4 = vld [vmem:[#allocation7 + $0x778] sm:$0xff] }
 0x28f   :  { %2242 = vmatpush.msra.mxu3 %v9119_v62  ;;  %2282 = vmatpush.msrb.mxu1 %v9120_v45  ;;  %9125 = vst [vmem:[#allocation87_spill] sm:$0xff] %v6581_v39  ;;  %v9127_v62 = vld [vmem:[#allocation149_spill] sm:$0xff] }
 0x290   :  { %2039 = vmatpush.msra.mxu0 %v6573_v10  ;;  %2079 = vmatpush.msra.mxu2 %v6576_v27  ;;  %9126 = vst [vmem:[#allocation81_spill] sm:$0xff] %v6584_v4  ;;  %v9128_v45 = vld [vmem:[#allocation161_spill] sm:$0xff]  ;;  %v6592_v27 = vld [vmem:[#allocation7 + $0x738] sm:$0xff] }
 0x291   :  { %2243 = vmatpush.msra.mxu3 %v9123_v22  ;;  %2283 = vmatpush.msrb.mxu1 %v9124_v35  ;;  %v6589_v10 = vld [vmem:[#allocation7 + $0x730] sm:$0xff]  ;;  %9130 = vst [vmem:[#allocation83_spill] sm:$0xff] %v6592_v27  ;;  %v9132_v22 = vld [vmem:[#allocation167_spill] sm:$0xff] }
 0x292   :  { %2040 = vmatpush.msra.mxu0 %v6581_v39  ;;  %2080 = vmatpush.msra.mxu2 %v6584_v4  ;;  %9129 = vst [vmem:[#allocation90_spill] sm:$0xff] %v6589_v10  ;;  %v9131_v35 = vld [vmem:[#allocation153_spill] sm:$0xff]  ;;  %v6600_v4 = vld [vmem:[#allocation7 + $0x6f8] sm:$0xff] }
 0x293   :  { %2244 = vmatpush.msra.mxu3 %v9127_v62  ;;  %2284 = vmatpush.msrb.mxu1 %v9128_v45  ;;  %v6597_v39 = vld [vmem:[#allocation7 + $0x6f0] sm:$0xff]  ;;  %9134 = vst [vmem:[#allocation85_spill] sm:$0xff] %v6600_v4  ;;  %v9135_v62 = vld [vmem:[#allocation158_spill] sm:$0xff]  ;;  %v9136_v45 = vld [vmem:[#allocation171_spill] sm:$0xff] }
 0x294   :  { %2041 = vmatpush.msra.mxu0 %v6589_v10  ;;  %2081 = vmatpush.msra.mxu2 %v6592_v27  ;;  %9133 = vst [vmem:[#allocation94_spill] sm:$0xff] %v6597_v39  ;;  %v6605_v10 = vld [vmem:[#allocation7 + $0x6b0] sm:$0xff]  ;;  %v6608_v27 = vld [vmem:[#allocation7 + $0x6b8] sm:$0xff] }
 0x295   :  { %2245 = vmatpush.msra.mxu3 %v9131_v35  ;;  %2285 = vmatpush.msrb.mxu1 %v9132_v22  ;;  %9137 = vst [vmem:[#allocation96_spill] sm:$0xff] %v6605_v10  ;;  %v9139_v35 = vld [vmem:[#allocation164_spill] sm:$0xff]  ;;  %v9140_v22 = vld [vmem:[#allocation175_spill] sm:$0xff] }
 0x296   :  { %2042 = vmatpush.msra.mxu0 %v6597_v39  ;;  %2082 = vmatpush.msra.mxu2 %v6600_v4  ;;  %9138 = vst [vmem:[#allocation88_spill] sm:$0xff] %v6608_v27  ;;  %v6613_v39 = vld [vmem:[#allocation7 + $0x670] sm:$0xff]  ;;  %v6616_v4 = vld [vmem:[#allocation7 + $0x678] sm:$0xff] }
 0x297   :  { %2246 = vmatpush.msra.mxu3 %v9135_v62  ;;  %2286 = vmatpush.msrb.mxu1 %v9136_v45  ;;  %9141 = vst [vmem:[#allocation99_spill] sm:$0xff] %v6613_v39  ;;  %v9143_v62 = vld [vmem:[#allocation168_spill] sm:$0xff]  ;;  %v9144_v45 = vld [vmem:[#allocation177_spill] sm:$0xff] }
 0x298   :  { %2043 = vmatpush.msra.mxu0 %v6605_v10  ;;  %2083 = vmatpush.msra.mxu2 %v6608_v27  ;;  %9142 = vst [vmem:[#allocation93_spill] sm:$0xff] %v6616_v4  ;;  %v6621_v10 = vld [vmem:[#allocation7 + $0x630] sm:$0xff]  ;;  %v6624_v27 = vld [vmem:[#allocation7 + $0x638] sm:$0xff] }
 0x299   :  { %2247 = vmatpush.msra.mxu3 %v9139_v35  ;;  %2287 = vmatpush.msrb.mxu1 %v9140_v22  ;;  %9145 = vst [vmem:[#allocation102_spill] sm:$0xff] %v6621_v10  ;;  %v9147_v35 = vld [vmem:[#allocation172_spill] sm:$0xff]  ;;  %v9148_v22 = vld [vmem:[#allocation183_spill] sm:$0xff] }
 0x29a   :  { %2044 = vmatpush.msra.mxu0 %v6613_v39  ;;  %2084 = vmatpush.msra.mxu2 %v6616_v4  ;;  %9146 = vst [vmem:[#allocation95_spill] sm:$0xff] %v6624_v27  ;;  %v6629_v39 = vld [vmem:[#allocation7 + $0x5f0] sm:$0xff]  ;;  %v6632_v4 = vld [vmem:[#allocation7 + $0x5f8] sm:$0xff] }
 0x29b   :  { %2312 = vmatpush.msrb.mxu3 %v9143_v62  ;;  %2352 = vmatpush.msra.mxu1 %v9144_v45  ;;  %9149 = vst [vmem:[#allocation104_spill] sm:$0xff] %v6629_v39  ;;  %v9151_v62 = vld [vmem:[#allocation176_spill] sm:$0xff]  ;;  %v9152_v45 = vld [vmem:[#allocation189_spill] sm:$0xff] }
 0x29c   :  { %2045 = vmatpush.msra.mxu0 %v6621_v10  ;;  %2085 = vmatpush.msra.mxu2 %v6624_v27  ;;  %9150 = vst [vmem:[#allocation97_spill] sm:$0xff] %v6632_v4  ;;  %v6637_v10 = vld [vmem:[#allocation7 + $0x5b0] sm:$0xff]  ;;  %v6640_v27 = vld [vmem:[#allocation7 + $0x5b8] sm:$0xff] }
 0x29d   :  { %2313 = vmatpush.msrb.mxu3 %v9147_v35  ;;  %2353 = vmatpush.msra.mxu1 %v9148_v22  ;;  %9153 = vst [vmem:[#allocation100_spill] sm:$0xff] %v6637_v10  ;;  %v9155_v35 = vld [vmem:[#allocation179_spill] sm:$0xff]  ;;  %v9156_v22 = vld [vmem:[#allocation193_spill] sm:$0xff] }
 0x29e   :  { %2046 = vmatpush.msra.mxu0 %v6629_v39  ;;  %2086 = vmatpush.msra.mxu2 %v6632_v4  ;;  %9154 = vst [vmem:[#allocation103_spill] sm:$0xff] %v6640_v27  ;;  %v6645_v39 = vld [vmem:[#allocation7 + $0x570] sm:$0xff]  ;;  %v6648_v4 = vld [vmem:[#allocation7 + $0x578] sm:$0xff] }
 0x29f   :  { %2314 = vmatpush.msrb.mxu3 %v9151_v62  ;;  %2354 = vmatpush.msra.mxu1 %v9152_v45  ;;  %9157 = vst [vmem:[#allocation109_spill] sm:$0xff] %v6645_v39  ;;  %v9159_v62 = vld [vmem:[#allocation185_spill] sm:$0xff] }
 0x2a0   :  { %2047 = vmatpush.msra.mxu0 %v6637_v10  ;;  %2087 = vmatpush.msra.mxu2 %v6640_v27  ;;  %9158 = vst [vmem:[#allocation106_spill] sm:$0xff] %v6648_v4  ;;  %v9160_v45 = vld [vmem:[#allocation197_spill] sm:$0xff]  ;;  %v6656_v27 = vld [vmem:[#allocation7 + $0x538] sm:$0xff] }
 0x2a1   :  { %2315 = vmatpush.msrb.mxu3 %v9155_v35  ;;  %2355 = vmatpush.msra.mxu1 %v9156_v22  ;;  %v6653_v10 = vld [vmem:[#allocation7 + $0x530] sm:$0xff]  ;;  %9162 = vst [vmem:[#allocation107_spill] sm:$0xff] %v6656_v27  ;;  %v9163_v35 = vld [vmem:[#allocation191_spill] sm:$0xff]  ;;  %v6660_v22 = vld [vmem:[#allocation7 + $0x298] sm:$0xff] }
 0x2a2   :  { %2048 = vmatpush.msra.mxu0 %v6645_v39  ;;  %2088 = vmatpush.msra.mxu2 %v6648_v4  ;;  %9161 = vst [vmem:[#allocation111_spill] sm:$0xff] %v6653_v10  ;;  %v6663_v39 = vld [vmem:[#allocation7 + $0x4f0] sm:$0xff]  ;;  %v9208_v4 = vld [vmem:[#allocation135_spill] sm:$0xff] }
 0x2a3   :  { %2316 = vmatpush.msrb.mxu3 %v9159_v62  ;;  %2356 = vmatpush.msra.mxu1 %v9160_v45  ;;  %9164 = vst [vmem:[#allocation115_spill] sm:$0xff] %v6660_v22  ;;  %v6666_v62 = vld [vmem:[#allocation7 + $0x4f8] sm:$0xff]  ;;  %v9167_v45 = vld [vmem:[#allocation195_spill] sm:$0xff] }
 0x2a4   :  { %2049 = vmatpush.msra.mxu0 %v6653_v10  ;;  %2089 = vmatpush.msra.mxu2 %v6656_v27  ;;  %9165 = vst [vmem:[#allocation110_spill] sm:$0xff] %v6663_v39  ;;  %v6670_v10 = vld [vmem:[#allocation7 + $0x258] sm:$0xff]  ;;  %v6673_v27 = vld [vmem:[#allocation7 + $0x4b0] sm:$0xff] }
 0x2a5   :  { %2317 = vmatpush.msrb.mxu3 %v9163_v35  ;;  %2357 = vmatpush.msra.mxu1 %v6660_v22  ;;  %9166 = vst [vmem:[#allocation114_spill] sm:$0xff] %v6666_v62  ;;  %v6676_v35 = vld [vmem:[#allocation7 + $0x4b8] sm:$0xff]  ;;  %v9171_v22 = vld [vmem:[#allocation199_spill] sm:$0xff] }
 0x2a6   :  { %2050 = vmatpush.msra.mxu0 %v6663_v39  ;;  %2090 = vmatpush.msra.mxu2 %v6666_v62  ;;  %9168 = vst [vmem:[#allocation122_spill] sm:$0xff] %v6670_v10  ;;  %v6680_v39 = vld [vmem:[#allocation7 + $0x218] sm:$0xff]  ;;  %v6683_v62 = vld [vmem:[#allocation7 + $0x470] sm:$0xff] }
 0x2a7   :  { %2318 = vmatpush.msrb.mxu3 %v9167_v45  ;;  %2358 = vmatpush.msra.mxu1 %v6670_v10  ;;  %9169 = vst [vmem:[#allocation118_spill] sm:$0xff] %v6673_v27  ;;  %v6686_v45 = vld [vmem:[#allocation7 + $0x478] sm:$0xff] }
 0x2a8   :  { %2051 = vmatpush.msra.mxu0 %v6673_v27  ;;  %9170 = vst [vmem:[#allocation127_spill] sm:$0xff] %v6676_v35  ;;  %2091 = vmatpush.msra.mxu2 %v6676_v35  ;;  %v9175_v10 = vld [vmem:[#allocation202_spill] sm:$0xff]  ;;  %v6693_v35 = vld [vmem:[#allocation7 + $0x430] sm:$0xff] }
 0x2a9   :  { %2319 = vmatpush.msrb.mxu3 %v9171_v22  ;;  %9172 = vst [vmem:[#allocation120_spill] sm:$0xff] %v6680_v39  ;;  %2359 = vmatpush.msra.mxu1 %v6680_v39  ;;  %v6690_v27 = vld [vmem:[#allocation7 + $0x1d8] sm:$0xff]  ;;  %v6701_v39 = vld [vmem:[#allocation7 + $0x190] sm:$0xff] }
 0x2aa   :  { %9173 = vst [vmem:[#allocation131_spill] sm:$0xff] %v6683_v62  ;;  %2052 = vmatpush.msra.mxu0 %v6683_v62  ;;  %2092 = vmatpush.msra.mxu2 %v6686_v45  ;;  %v6696_v22 = vld [vmem:[#allocation7 + $0x438] sm:$0xff]  ;;  %v6761_v62 = vld [vmem:[#allocation7 + $0x10] sm:$0xff] }
 0x2ab   :  { %9174 = vst [vmem:[#allocation124_spill] sm:$0xff] %v6686_v45  ;;  %2320 = vmatpush.msrb.mxu3 %v9175_v10  ;;  %2360 = vmatpush.msra.mxu1 %v6690_v27  ;;  %v6704_v10 = vld [vmem:[#allocation7 + $0x198] sm:$0xff]  ;;  %v6720_v45 = vld [vmem:[#allocation7 + $0x788] sm:$0xff] }
 0x2ac   :  { %9176 = vst [vmem:[#allocation136_spill] sm:$0xff] %v6690_v27  ;;  %2053 = vmatpush.msra.mxu0 %v6693_v35  ;;  %2093 = vmatpush.msra.mxu2 %v6696_v22  ;;  %v6707_v27 = vld [vmem:[#allocation7 + $0x7c0] sm:$0xff] }
 0x2ad   :  { %9177 = vst [vmem:[#allocation129_spill] sm:$0xff] %v6693_v35  ;;  %2054 = vmatmul.f32.vlgmr.msra.gmra.mxu0 %v6431_v26  ;;  %2094 = vmatmul.f32.vlgmr.msra.gmra.mxu2 %v6431_v26  ;;  %v6710_v35 = vld [vmem:[#allocation7 + $0x7c8] sm:$0xff]  ;;  %v6716_v26 = vld [vmem:[#allocation7 + $0x158] sm:$0xff] }
 0x2ae   :  { %9178 = vst [vmem:[#allocation142_spill] sm:$0xff] %v6696_v22  ;;  %2321 = vmatpush.msrb.mxu3 %v6701_v39  ;;  %2361 = vmatpush.msra.mxu1 %v6704_v10  ;;  %v6713_v22 = vld [vmem:[#allocation7 + $0x150] sm:$0xff] }
 0x2af   :  { %9179 = vst [vmem:[#allocation134_spill] sm:$0xff] %v6701_v39  ;;  %2252 = vmatpush.msrb.mxu0 %v6707_v27  ;;  %2292 = vmatpush.msrb.mxu2 %v6710_v35  ;;  %v9185_v39 = vld [vmem:[#allocation112_spill] sm:$0xff] }
 0x2b0   :  { %9180 = vst [vmem:[#allocation147_spill] sm:$0xff] %v6704_v10  ;;  %2322 = vmatpush.msrb.mxu3 %v6713_v22  ;;  %2362 = vmatpush.msra.mxu1 %v6716_v26  ;;  %v6723_v10 = vld [vmem:[#allocation7 + $0x110] sm:$0xff] }
 0x2b1   :  { %9181 = vst [vmem:[#allocation139_spill] sm:$0xff] %v6707_v27  ;;  %2253 = vmatpush.msrb.mxu0 %v9185_v39  ;;  %2293 = vmatpush.msrb.mxu2 %v6720_v45  ;;  %v6726_v27 = vld [vmem:[#allocation7 + $0x118] sm:$0xff] }
 0x2b2   :  { %9182 = vst [vmem:[#allocation151_spill] sm:$0xff] %v6710_v35  ;;  %2323 = vmatpush.msrb.mxu3 %v6723_v10  ;;  %2363 = vmatpush.msra.mxu1 %v6726_v27  ;;  %v9189_v35 = vld [vmem:[#allocation116_spill] sm:$0xff]  ;;  %v6736_v39 = vld [vmem:[#allocation7 + $0xd8] sm:$0xff] }
 0x2b3   :  { %9183 = vst [vmem:[#allocation144_spill] sm:$0xff] %v6713_v22  ;;  %2254 = vmatpush.msrb.mxu0 %v9189_v35  ;;  %v6730_v22 = vld [vmem:[#allocation7 + $0x748] sm:$0xff]  ;;  %v6746_v35 = vld [vmem:[#allocation7 + $0x98] sm:$0xff] }
 0x2b4   :  { %9184 = vst [vmem:[#allocation155_spill] sm:$0xff] %v6716_v26  ;;  %2294 = vmatpush.msrb.mxu2 %v6730_v22  ;;  %v6733_v26 = vld [vmem:[#allocation7 + $0xd0] sm:$0xff]  ;;  %2364 = vmatpush.msra.mxu1 %v6736_v39 }
 0x2b5   :  { %9186 = vst [vmem:[#allocation149_spill] sm:$0xff] %v6720_v45  ;;  %2324 = vmatpush.msrb.mxu3 %v6733_v26  ;;  %v9193_v45 = vld [vmem:[#allocation119_spill] sm:$0xff] }
 0x2b6   :  { %9187 = vst [vmem:[#allocation161_spill] sm:$0xff] %v6723_v10  ;;  %2255 = vmatpush.msrb.mxu0 %v9193_v45  ;;  %v6740_v10 = vld [vmem:[#allocation7 + $0x708] sm:$0xff]  ;;  %2365 = vmatpush.msra.mxu1 %v6746_v35  ;;  %v6756_v45 = vld [vmem:[#allocation7 + $0x58] sm:$0xff] }
 0x2b7   :  { %9188 = vst [vmem:[#allocation153_spill] sm:$0xff] %v6726_v27  ;;  %2295 = vmatpush.msrb.mxu2 %v6740_v10  ;;  %v6743_v27 = vld [vmem:[#allocation7 + $0x90] sm:$0xff] }
 0x2b8   :  { %9190 = vst [vmem:[#allocation167_spill] sm:$0xff] %v6730_v22  ;;  %2325 = vmatpush.msrb.mxu3 %v6743_v27  ;;  %v9197_v22 = vld [vmem:[#allocation123_spill] sm:$0xff]  ;;  %2366 = vmatpush.msra.mxu1 %v6756_v45 }
 0x2b9   :  { %9191 = vst [vmem:[#allocation158_spill] sm:$0xff] %v6733_v26  ;;  %2256 = vmatpush.msrb.mxu0 %v9197_v22  ;;  %v6750_v26 = vld [vmem:[#allocation7 + $0x6c8] sm:$0xff]  ;;  %v6764_v22 = vld [vmem:[#allocation7 + $0x18] sm:$0xff] }
 0x2ba   :  { %9192 = vst [vmem:[#allocation171_spill] sm:$0xff] %v6736_v39  ;;  %2296 = vmatpush.msrb.mxu2 %v6750_v26  ;;  %v6753_v39 = vld [vmem:[#allocation7 + $0x50] sm:$0xff]  ;;  %2367 = vmatpush.msra.mxu1 %v6764_v22 }
 0x2bb   :  { %9194 = vst [vmem:[#allocation164_spill] sm:$0xff] %v6740_v10  ;;  %2326 = vmatpush.msrb.mxu3 %v6753_v39  ;;  %v9201_v10 = vld [vmem:[#allocation128_spill] sm:$0xff] }
 0x2bc   :  { %9195 = vst [vmem:[#allocation175_spill] sm:$0xff] %v6743_v27  ;;  %2257 = vmatpush.msrb.mxu0 %v9201_v10  ;;  %v9202_v27 = vld [vmem:[#allocation125_spill] sm:$0xff]  ;;  %v9210_v10 = vld [vmem:[#allocation140_spill] sm:$0xff] }
 0x2bd   :  { %9196 = vst [vmem:[#allocation168_spill] sm:$0xff] %v6746_v35  ;;  %2297 = vmatpush.msrb.mxu2 %v9202_v27  ;;  %2327 = vmatpush.msrb.mxu3 %v6761_v62  ;;  %v9205_v35 = vld [vmem:[#allocation132_spill] sm:$0xff] }
 0x2be   :  { %9198 = vst [vmem:[#allocation177_spill] sm:$0xff] %v6750_v26  ;;  %2258 = vmatpush.msrb.mxu0 %v9205_v35  ;;  %v9206_v26 = vld [vmem:[#allocation130_spill] sm:$0xff]  ;;  %v9211_v27 = vld [vmem:[#allocation148_spill] sm:$0xff] }
 0x2bf   :  { %9199 = vst [vmem:[#allocation172_spill] sm:$0xff] %v6753_v39  ;;  %2298 = vmatpush.msrb.mxu2 %v9206_v26  ;;  %v9207_v39 = vld [vmem:[#allocation137_spill] sm:$0xff]  ;;  %v9216_v35 = vld [vmem:[#allocation154_spill] sm:$0xff] }
 0x2c0   :  { %9200 = vst [vmem:[#allocation183_spill] sm:$0xff] %v6756_v45  ;;  %2259 = vmatpush.msrb.mxu0 %v9207_v39  ;;  %v9209_v45 = vld [vmem:[#allocation143_spill] sm:$0xff]  ;;  %v9217_v26 = vld [vmem:[#allocation162_spill] sm:$0xff] }
 0x2c1   :  { %9203 = vst [vmem:[#allocation176_spill] sm:$0xff] %v6761_v62  ;;  %2299 = vmatpush.msrb.mxu2 %v9208_v4  ;;  %v9213_v62 = vld [vmem:[#allocation152_spill] sm:$0xff]  ;;  %v9218_v39 = vld [vmem:[#allocation159_spill] sm:$0xff]  ;;  %v9219_v4 = vld [vmem:[#allocation169_spill] sm:$0xff] }
 0x2c2   :  { %9204 = vst [vmem:[#allocation189_spill] sm:$0xff] %v6764_v22  ;;  %2260 = vmatpush.msrb.mxu0 %v9209_v45  ;;  %v9215_v22 = vld [vmem:[#allocation156_spill] sm:$0xff]  ;;  %v9220_v45 = vld [vmem:[#allocation165_spill] sm:$0xff] }
 0x2c3   :  { %2300 = vmatpush.msrb.mxu2 %v9210_v10  ;;  %v9221_v10 = vld [vmem:[#allocation173_spill] sm:$0xff] }
 0x2c4   :  { %2261 = vmatpush.msrb.mxu0 %v9211_v27  ;;  %v9222_v27 = vld [vmem:[#allocation170_spill] sm:$0xff] }
 0x2c5   :  { %2301 = vmatpush.msrb.mxu2 %v9212_v56  ;;  %v9223_v56 = vld [vmem:[#allocation178_spill] sm:$0xff] }
 0x2c6   :  { %2262 = vmatpush.msrb.mxu0 %v9213_v62  ;;  %v9224_v62 = vld [vmem:[#allocation174_spill] sm:$0xff] }
 0x2c7   :  { %2302 = vmatpush.msrb.mxu2 %v9214_v57  ;;  %v9225_v57 = vld [vmem:[#allocation180_spill] sm:$0xff] }
 0x2c8   :  { %2263 = vmatpush.msrb.mxu0 %v9215_v22  ;;  %v9226_v22 = vld [vmem:[#allocation184_spill] sm:$0xff] }
 0x2c9   :  { %2303 = vmatpush.msrb.mxu2 %v9216_v35  ;;  %v9227_v35 = vld [vmem:[#allocation186_spill] sm:$0xff] }
 0x2ca   :  { %2264 = vmatpush.msrb.mxu0 %v9217_v26  ;;  %v9228_v26 = vld [vmem:[#allocation190_spill] sm:$0xff] }
 0x2cb   :  { %2304 = vmatpush.msrb.mxu2 %v9218_v39  ;;  %v9229_v39 = vld [vmem:[#allocation192_spill] sm:$0xff] }
 0x2cc   :  { %2265 = vmatpush.msrb.mxu0 %v9219_v4  ;;  %v9230_v4 = vld [vmem:[#allocation194_spill] sm:$0xff] }
 0x2cd   :  { %2305 = vmatpush.msrb.mxu2 %v9220_v45  ;;  %v9231_v45 = vld [vmem:[#allocation196_spill] sm:$0xff] }
 0x2ce   :  { %2266 = vmatpush.msrb.mxu0 %v9221_v10  ;;  %v9232_v10 = vld [vmem:[#allocation198_spill] sm:$0xff] }
 0x2cf   :  { %2306 = vmatpush.msrb.mxu2 %v9222_v27  ;;  %v9233_v27 = vld [vmem:[#allocation200_spill] sm:$0xff] }
 0x2d0   :  { %2267 = vmatpush.msrb.mxu0 %v9223_v56  ;;  %v9234_v56 = vld [vmem:[#allocation201_spill] sm:$0xff] }
 0x2d1   :  { %2307 = vmatpush.msrb.mxu2 %v9224_v62  ;;  %v9235_v62 = vld [vmem:[#allocation203_spill] sm:$0xff] }
 0x2d2   :  { %2332 = vmatpush.msra.mxu0 %v9225_v57  ;;  %v6799_v57 = vld [vmem:[#allocation7 + $0x650] sm:$0xff] }
 0x2d3   :  { %2372 = vmatpush.msra.mxu2 %v9226_v22  ;;  %9236 = vst [vmem:[#allocation179_spill] sm:$0xff] %v6799_v57  ;;  %v6803_v22 = vld [vmem:[#allocation7 + $0x610] sm:$0xff] }
 0x2d4   :  { %2333 = vmatpush.msra.mxu0 %v9227_v35  ;;  %9237 = vst [vmem:[#allocation193_spill] sm:$0xff] %v6803_v22  ;;  %v6807_v35 = vld [vmem:[#allocation7 + $0x5d0] sm:$0xff] }
 0x2d5   :  { %2373 = vmatpush.msra.mxu2 %v9228_v26  ;;  %9238 = vst [vmem:[#allocation185_spill] sm:$0xff] %v6807_v35  ;;  %v6811_v26 = vld [vmem:[#allocation7 + $0x590] sm:$0xff] }
 0x2d6   :  { %2334 = vmatpush.msra.mxu0 %v9229_v39  ;;  %9239 = vst [vmem:[#allocation197_spill] sm:$0xff] %v6811_v26 }
 0x2d7   :  { %2374 = vmatpush.msra.mxu2 %v9230_v4  ;;  %v6833_v4 = vld [vmem:[#allocation7 + $0x450] sm:$0xff] }
 0x2d8   :  { %2335 = vmatpush.msra.mxu0 %v9231_v45  ;;  %9245 = vst [vmem:[#allocation116_spill] sm:$0xff] %v6833_v4  ;;  %v9247_v45 = vld [vmem:[#allocation14_spill] sm:$0xff] }
 0x2d9   :  { %2375 = vmatpush.msra.mxu2 %v9232_v10 }
 0x2da   :  { %2336 = vmatpush.msra.mxu0 %v9233_v27 }
 0x2db   :  { %2376 = vmatpush.msra.mxu2 %v9234_v56  ;;  %v6841_v56 = vld [vmem:[#allocation7 + $0x410] sm:$0xff] }
 0x2dc   :  { %2337 = vmatpush.msra.mxu0 %v9235_v62  ;;  %9249 = vst [vmem:[#allocation123_spill] sm:$0xff] %v6841_v56  ;;  %v6844_v62 = vld [vmem:[#allocation7 + $0x418] sm:$0xff] }
 0x2dd   :  { %2377 = vmatpush.msra.mxu2 %v6208_v6  ;;  %v6815_v6 = vld [vmem:[#allocation7 + $0x550] sm:$0xff]  ;;  %9250 = vst [vmem:[#allocation128_spill] sm:$0xff] %v6844_v62 }
 0x2de   :  { %2338 = vmatpush.msra.mxu0 %v6799_v57  ;;  %9240 = vst [vmem:[#allocation191_spill] sm:$0xff] %v6815_v6  ;;  %v9254_v57 = vld [vmem:[#allocation35_spill] sm:$0xff] }
 0x2df   :  { %2378 = vmatpush.msra.mxu2 %v6216_v7  ;;  %v6819_v7 = vld [vmem:[#allocation7 + $0x510] sm:$0xff] }
 0x2e0   :  { %2339 = vmatpush.msra.mxu0 %v6803_v22  ;;  %9241 = vst [vmem:[#allocation195_spill] sm:$0xff] %v6819_v7  ;;  %v9253_v22 = vld [vmem:[#allocation33_spill] sm:$0xff] }
 0x2e1   :  { %2379 = vmatpush.msra.mxu2 %v6224_v21  ;;  %v6823_v21 = vld [vmem:[#allocation7 + $0x4d0] sm:$0xff]  ;;  %v769_v29 = vadd.f32 %v9254_v57, %v9253_v22 }
 0x2e2   :  { %2340 = vmatpush.msra.mxu0 %v6807_v35  ;;  %9242 = vst [vmem:[#allocation199_spill] sm:$0xff] %v6823_v21 }
 0x2e3   :  { %2380 = vmatpush.msra.mxu2 %v6230_v37  ;;  %v6827_v37 = vld [vmem:[#allocation7 + $0x490] sm:$0xff] }
 0x2e4   :  { %2341 = vmatpush.msra.mxu0 %v6811_v26  ;;  %9243 = vst [vmem:[#allocation202_spill] sm:$0xff] %v6827_v37 }
 0x2e5   :  { %2381 = vmatpush.msra.mxu2 %v6236_v18  ;;  %v6830_v18 = vld [vmem:[#allocation7 + $0x498] sm:$0xff] }
 0x2e6   :  { %2342 = vmatpush.msra.mxu0 %v6815_v6  ;;  %9244 = vst [vmem:[#allocation112_spill] sm:$0xff] %v6830_v18  ;;  %v9252_v6 = vld [vmem:[#allocation15_spill] sm:$0xff] }
 0x2e7   :  { %2382 = vmatpush.msra.mxu2 %v6242_v59  ;;  %v1795_v59 = vpop.f32.mrf.mxu3  ;;  %v1815_v39 = vpop.f32.mrf.mxu0 }
 0x2e8   :  { %2343 = vmatpush.msra.mxu0 %v6819_v7  ;;  %v1816_v27 = vadd.f32 %v1815_v39, %v1795_v59  ;;  %v9251_v7 = vld [vmem:[#allocation13_spill] sm:$0xff] }
 0x2e9   :  { %2383 = vmatpush.msra.mxu2 %v6250_v43  ;;  %v6836_v43 = vld [vmem:[#allocation7 + $0x458] sm:$0xff]  ;;  %v630_v26 = vadd.f32 %v9252_v6, %v9251_v7 }
 0x2ea   :  { %2344 = vmatpush.msra.mxu0 %v6823_v21  ;;  %9246 = vst [vmem:[#allocation119_spill] sm:$0xff] %v6836_v43 }
 0x2eb   :  { %2384 = vmatpush.msra.mxu2 %v6258_v0  ;;  %v9248_v0 = vld [vmem:[#allocation12_spill] sm:$0xff] }
 0x2ec   :  { %2345 = vmatpush.msra.mxu0 %v6827_v37  ;;  %v560_v10 = vadd.f32 %v9248_v0, %v9247_v45  ;;  %v1835_v37 = vpop.f32.mrf.mxu1 }
 0x2ed   :  { %2385 = vmatpush.msra.mxu2 %v6830_v18 }
 0x2ee   :  { %2346 = vmatpush.msra.mxu0 %v6833_v4  ;;  %v2098_v18 = vadd.f32 %v1816_v27, %v560_v10  ;;  %v1855_v4 = vpop.f32.mrf.mxu2 }
 0x2ef   :  { %2386 = vmatpush.msra.mxu2 %v6836_v43  ;;  %v1856_v43 = vadd.f32 %v1855_v4, %v1835_v37  ;;  %v9255_v37 = vld [vmem:[#allocation34_spill] sm:$0xff]  ;;  %v9256_v4 = vld [vmem:[#allocation32_spill] sm:$0xff] }
 0x2f0   :  { %2347 = vmatpush.msra.mxu0 %v6841_v56  ;;  %v4088_v21 = vmul.f32 -1.442695, %v2098_v18 }
 0x2f1   :  { %2387 = vmatpush.msra.mxu2 %v6844_v62  ;;  %v2099_v35 = vadd.f32 %v1856_v43, %v630_v26  ;;  %v1895_v32 = vpop.f32.mrf.mxu0  ;;  %v1875_v26 = vpop.f32.mrf.mxu3  ;;  %v700_v43 = vadd.f32 %v9256_v4, %v9255_v37 }
 0x2f2   :  { %4166 = vpow2.f32 %v4088_v21  ;;  %v1896_v7 = vadd.f32 %v1895_v32, %v1875_v26  ;;  %v9262_v32 = vld [vmem:[#allocation101_spill] sm:$0xff] }
 0x2f3   :  { %v4089_v45 = vmul.f32 -1.442695, %v2099_v35 }
 0x2f4   :  { %v1915_v39 = vpop.f32.mrf.mxu1  ;;  %v2100_v22 = vadd.f32 %v1896_v7, %v700_v43  ;;  %v9259_v43 = vld [vmem:[#allocation98_spill] sm:$0xff] }
 0x2f5   :  { %4168 = vpow2.f32 %v4089_v45 }
 0x2f7   :  { %v1935_v56 = vpop.f32.mrf.mxu2 }
 0x2f8   :  { %v4167_v59 = vpop.eup %4166  ;;  %v1936_v62 = vadd.f32 %v1935_v56, %v1915_v39 }
 0x2f9   :  { %v2112_v0 = vadd.f32 1.0, %v4167_v59 }
 0x2fa   :  { %v2101_v10 = vadd.f32 %v1936_v62, %v769_v29 }
 0x2fb   :  { %4170 = vrcp.f32 %v2112_v0  ;;  %v4169_v18 = vpop.eup %4168  ;;  %v2125_v39 = vand.u32 2147483648, %v2112_v0  ;;  %vm2119_vm11 = vweird.f32 %v2112_v0 }
 0x2fc   :  { %v4090_v27 = vmul.f32 -1.442695, %v2101_v10  ;;  %v2113_v61 = vadd.f32 1.0, %v4169_v18  ;;  %v2123_v18 = vand.u32 2147483647, %v2112_v0 }
 0x2fd   :  { %v2126_v4 = vor.u32 1.1754944e-38, %v2125_v39 }
 0x2fe   :  { %4172 = vpow2.f32 %v4090_v27  ;;  %v1955_v27 = vpop.f32.mrf.mxu3  ;;  %v2140_v40 = vand.u32 2147483648, %v2113_v61  ;;  %v2138_v26 = vand.u32 2147483647, %v2113_v61  ;;  %vm2134_vm14 = vweird.f32 %v2113_v61 }
 0x2ff   :  { %4174 = vrcp.f32 %v2113_v61  ;;  %vm2124_vm15 = vcmp.eq.f32.partialorder %v2123_v18, 8.507059e+37 }
 0x300   :  { %v2141_v41 = vor.u32 1.1754944e-38, %v2140_v40  ;;  %vm2139_vm1 = vcmp.eq.f32.partialorder %v2138_v26, 8.507059e+37 }
 0x301   :  { %v4171_v6 = vpop.eup %4170 }
 0x302   :  { %v2115_v35 = vmul.f32 %v4171_v6, %v2112_v0  ;;  %vm2120_vm10 = vweird.f32 %v4171_v6 }
 0x303   :  { %vm6853_vm12 = vmor %vm2119_vm11, %vm2120_vm10 }
 0x304   :  { %v2116_v21 = vsub.f32 1.0, %v2115_v35  ;;  %v4173_v45 = vpop.eup %4172 }
 0x305   :  { %v4175_v57 = vpop.eup %4174  ;;  %v2151_v56 = vadd.f32 1.0, %v4173_v45  ;;  %v9260_v45 = vld [vmem:[#allocation91_spill] sm:$0xff] }
 0x306   :  { %v2117_v59 = vmul.f32 %v4171_v6, %v2116_v21  ;;  %v2130_v29 = vmul.f32 %v4175_v57, %v2113_v61  ;;  %vm2135_vm13 = vweird.f32 %v4175_v57 }
 0x307   :  { %4176 = vrcp.f32 %v2151_v56  ;;  %vm2136_vm0 = vmor %vm2134_vm14, %vm2135_vm13  ;;  %vm2157_vm3 = vweird.f32 %v2151_v56 }
 0x308   :  { %v2118_v62 = vadd.f32 %v4171_v6, %v2117_v59  ;;  %v2131_v10 = vsub.f32 1.0, %v2130_v29  ;;  %4178 = vtanh.f32 %v2100_v22  ;;  %v847_v59 = vadd.f32 %v9260_v45, %v9259_v43 }
 0x30a   :  { %v1975_v35 = vpop.f32.mrf.mxu0  ;;  %v2132_v21 = vmul.f32 %v4175_v57, %v2131_v10  ;;  %v2122_v7 = vsel %vm6853_vm12, %v4171_v6, %v2118_v62  ;;  %v917_v6 = vadd.f32 %v9262_v32, %v9261_v3  ;;  %v1995_v62 = vpop.f32.mrf.mxu1  ;;  %v2161_v3 = vand.u32 2147483647, %v2151_v56 }
 0x30b   :  { %v1976_v37 = vadd.f32 %v1975_v35, %v1955_v27  ;;  %v2127_v49 = vsel %vm2124_vm15, %v2126_v4, %v2122_v7 }
 0x30c   :  { %v2133_v0 = vadd.f32 %v4175_v57, %v2132_v21  ;;  %vm2162_vm5 = vcmp.eq.f32.partialorder %v2161_v3, 8.507059e+37 }
 0x30d   :  { %v4177_v29 = vpop.eup %4176  ;;  %v2102_v10 = vadd.f32 %v1976_v37, %v847_v59  ;;  %v2163_v37 = vand.u32 2147483648, %v2151_v56 }
 0x30e   :  { %v2137_v20 = vsel %vm2136_vm0, %v4175_v57, %v2133_v0  ;;  %v2153_v22 = vmul.f32 %v4177_v29, %v2151_v56  ;;  %v4179_v30 = vpop.eup %4178  ;;  %vm2158_vm2 = vweird.f32 %v4177_v29 }
 0x30f   :  { %v2142_v39 = vsel %vm2139_vm1, %v2141_v41, %v2137_v20  ;;  %v2146_v61 = vmul.f32 %v4179_v30, %v2127_v49  ;;  %v4091_v7 = vmul.f32 -1.442695, %v2102_v10  ;;  %vm2159_vm4 = vmor %vm2157_vm3, %vm2158_vm2  ;;  %v6914_v10 = vld [vmem:[#allocation7 + $0x1a8] sm:$0xff] }
 0x310   :  { %v2015_v27 = vpop.f32.mrf.mxu2  ;;  %v2144_v35 = vmul.f32 %v2142_v39, %v6278_v51  ;;  %v2154_v18 = vsub.f32 1.0, %v2153_v22  ;;  %v2164_v51 = vor.u32 1.1754944e-38, %v2163_v37  ;;  %v6941_v37 = vld [vmem:[#allocation7 + $0xa8] sm:$0xff] }
 0x311   :  { %v2016_v21 = vadd.f32 %v2015_v27, %v1995_v62  ;;  %v9266_v62 = vld [vmem:[#allocation181_spill] sm:$0xff] }
 0x312   :  { %v6864_v43 = vadd.f32 %v2146_v61, %v2144_v35  ;;  %v2155_v40 = vmul.f32 %v4177_v29, %v2154_v18  ;;  %v6920_v35 = vld [vmem:[#allocation7 + $0x168] sm:$0xff] }
 0x313   :  { %v2103_v57 = vadd.f32 %v2016_v21, %v917_v6  ;;  %v6923_v21 = vld [vmem:[#allocation7 + $0x120] sm:$0xff] }
 0x314   :  { %4180 = vtanh.f32 %v6864_v43  ;;  %v2156_v26 = vadd.f32 %v4177_v29, %v2155_v40 }
 0x315   :  { %v4092_v4 = vmul.f32 -1.442695, %v2103_v57  ;;  %4182 = vpow2.f32 %v4091_v7  ;;  %v6934_v57 = vld [vmem:[#allocation7 + $0xe8] sm:$0xff] }
 0x316   :  { %v2160_v20 = vsel %vm2159_vm4, %v4177_v29, %v2156_v26  ;;  %v6938_v26 = vld [vmem:[#allocation7 + $0xa0] sm:$0xff] }
 0x317   :  { %4184 = vpow2.f32 %v4092_v4  ;;  %v2165_v49 = vsel %vm2162_vm5, %v2164_v51, %v2160_v20 }
 0x31a   :  { %v4181_v30 = vpop.eup %4180 }
 0x31b   :  { %v6867_v41 = vmul.f32 %v4181_v30, %v2165_v49  ;;  %v4183_v45 = vpop.eup %4182  ;;  %v6950_v30 = vld [vmem:[#allocation7 + $0x60] sm:$0xff]  ;;  %v6953_v49 = vld [vmem:[#allocation7 + $0x68] sm:$0xff] }
 0x31c   :  { %v6873_v56 = vadd.f32 1.0, %v4183_v45  ;;  %v7021_v45 = vld [vmem:[#allocation7 + $0x2b8] sm:$0xff] }
 0x31d   :  { %v4185_v59 = vpop.eup %4184  ;;  %2248 = vmatmul.f32.vlgmr.msra.gmra.mxu3 %v6867_v41  ;;  %2288 = vmatmul.f32.vlgmr.msrb.gmra.mxu1 %v6867_v41 }
 0x31e   :  { %2392 = vmatpush.msra.mxu3 %v6287_v44  ;;  %2432 = vmatpush.msrb.mxu1 %v6290_v23  ;;  %v6875_v0 = vadd.f32 1.0, %v4185_v59  ;;  %4186 = vrcp.f32 %v6873_v56  ;;  %vm2182_vm8 = vweird.f32 %v6873_v56  ;;  %v2188_v51 = vand.u32 2147483648, %v6873_v56 }
 0x31f   :  { %v2186_v59 = vand.u32 2147483647, %v6873_v56 }
 0x320   :  { %2393 = vmatpush.msra.mxu3 %v6293_v2  ;;  %2433 = vmatpush.msrb.mxu1 %v6296_v8  ;;  %4188 = vrcp.f32 %v6875_v0  ;;  %v6896_v2 = vld [vmem:[#allocation7 + $0x268] sm:$0xff]  ;;  %v2203_v20 = vand.u32 2147483648, %v6875_v0  ;;  %vm2197_vm9 = vweird.f32 %v6875_v0 }
 0x321   :  { %v6900_v8 = vld [vmem:[#allocation7 + $0x228] sm:$0xff]  ;;  %vm2187_vm12 = vcmp.eq.f32.partialorder %v2186_v59, 8.507059e+37 }
 0x322   :  { %2394 = vmatpush.msra.mxu3 %v6299_v50  ;;  %2434 = vmatpush.msrb.mxu1 %v6302_v13 }
 0x324   :  { %2395 = vmatpush.msra.mxu3 %v6307_v1  ;;  %2435 = vmatpush.msrb.mxu1 %v6310_v17  ;;  %v6891_v44 = vpop.eup %4186  ;;  %v2075_v17 = vpop.f32.mrf.mxu1 }
 0x325   :  { %2328 = vmatmul.f32.vlgmr.msrb.gmra.mxu3 %v6867_v41  ;;  %2368 = vmatmul.f32.vlgmr.msra.gmra.mxu1 %v6867_v41  ;;  %v2178_v50 = vmul.f32 %v6891_v44, %v6873_v56  ;;  %vm2183_vm6 = vweird.f32 %v6891_v44 }
 0x326   :  { %2396 = vmatpush.msra.mxu3 %v6317_v60  ;;  %2436 = vmatpush.msrb.mxu1 %v6320_v16  ;;  %v6893_v23 = vpop.eup %4188  ;;  %v6908_v60 = vld [vmem:[#allocation7 + $0x1e8] sm:$0xff]  ;;  %v2035_v16 = vpop.f32.mrf.mxu3  ;;  %vm6959_vm10 = vmor %vm2182_vm8, %vm2183_vm6 }
 0x327   :  { %v2193_v13 = vmul.f32 %v6893_v23, %v6875_v0  ;;  %v2179_v32 = vsub.f32 1.0, %v2178_v50  ;;  %vm2198_vm7 = vweird.f32 %v6893_v23  ;;  %v2201_v50 = vand.u32 2147483647, %v6875_v0 }
 0x328   :  { %2397 = vmatpush.msra.mxu3 %v6324_v55  ;;  %2437 = vmatpush.msrb.mxu1 %v6327_v14  ;;  %v9263_v14 = vld [vmem:[#allocation187_spill] sm:$0xff]  ;;  %vm6967_vm11 = vmor %vm2197_vm9, %vm2198_vm7 }
 0x329   :  { %v2194_v6 = vsub.f32 1.0, %v2193_v13  ;;  %v2180_v7 = vmul.f32 %v6891_v44, %v2179_v32  ;;  %vm2202_vm13 = vcmp.eq.f32.partialorder %v2201_v50, 8.507059e+37  ;;  %v6991_v32 = vld [vmem:[#allocation7 + $0x3b0] sm:$0xff] }
 0x32a   :  { %2398 = vmatpush.msra.mxu3 %v6331_v34  ;;  %2438 = vmatpush.msrb.mxu1 %v6896_v2  ;;  %v2055_v1 = vpop.f32.mrf.mxu0  ;;  %v9264_v34 = vld [vmem:[#allocation188_spill] sm:$0xff] }
 0x32b   :  { %v2056_v29 = vadd.f32 %v2055_v1, %v2035_v16  ;;  %v2195_v40 = vmul.f32 %v6893_v23, %v2194_v6  ;;  %v2181_v4 = vadd.f32 %v6891_v44, %v2180_v7  ;;  %v6974_v16 = vld [vmem:[#allocation7 + $0x28] sm:$0xff]  ;;  %v6994_v6 = vld [vmem:[#allocation7 + $0x3b8] sm:$0xff]  ;;  %v7025_v1 = vld [vmem:[#allocation7 + $0x270] sm:$0xff] }
 0x32c   :  { %2399 = vmatpush.msra.mxu3 %v6335_v63  ;;  %2439 = vmatpush.msrb.mxu1 %v6900_v8  ;;  %v1055_v63 = vadd.f32 %v9264_v34, %v9263_v14  ;;  %v2204_v34 = vor.u32 1.1754944e-38, %v2203_v20  ;;  %v7015_v20 = vld [vmem:[#allocation7 + $0x2f8] sm:$0xff] }
 0x32d   :  { %v2196_v3 = vadd.f32 %v6893_v23, %v2195_v40  ;;  %v2185_v56 = vsel %vm6959_vm10, %v6891_v44, %v2181_v4 }
 0x32e   :  { %2400 = vmatpush.msra.mxu3 %v6341_v5  ;;  %2440 = vmatpush.msrb.mxu1 %v6908_v60  ;;  %v9265_v5 = vld [vmem:[#allocation182_spill] sm:$0xff] }
 0x32f   :  { %v987_v39 = vadd.f32 %v9266_v62, %v9265_v5  ;;  %v2200_v0 = vsel %vm6967_vm11, %v6893_v23, %v2196_v3  ;;  %v6997_v62 = vld [vmem:[#allocation7 + $0x370] sm:$0xff] }
 0x330   :  { %v2095_v55 = vpop.f32.mrf.mxu2  ;;  %2401 = vmatpush.msra.mxu3 %v6347_v58  ;;  %2441 = vmatpush.msrb.mxu1 %v6914_v10  ;;  %v6926_v58 = vld [vmem:[#allocation7 + $0x128] sm:$0xff]  ;;  %v2205_v23 = vsel %vm2202_vm13, %v2204_v34, %v2200_v0  ;;  %v7012_v3 = vld [vmem:[#allocation7 + $0x2f0] sm:$0xff]  ;;  %v7034_v34 = vld [vmem:[#allocation7 + $0x238] sm:$0xff] }
 0x331   :  { %v2096_v22 = vadd.f32 %v2095_v55, %v2075_v17  ;;  %v2104_v61 = vadd.f32 %v2056_v29, %v987_v39  ;;  %v6971_v17 = vld [vmem:[#allocation7 + $0x20] sm:$0xff]  ;;  %v6985_v29 = vld [vmem:[#allocation7 + $0x3f0] sm:$0xff]  ;;  %v7000_v39 = vld [vmem:[#allocation7 + $0x378] sm:$0xff] }
 0x332   :  { %2402 = vmatpush.msra.mxu3 %v6355_v47  ;;  %2442 = vmatpush.msrb.mxu1 %v6920_v35  ;;  %v6931_v47 = vld [vmem:[#allocation7 + $0xe0] sm:$0xff] }
 0x333   :  { %v2105_v27 = vadd.f32 %v2096_v22, %v1055_v63  ;;  %v2189_v63 = vor.u32 1.1754944e-38, %v2188_v51  ;;  %v6988_v22 = vld [vmem:[#allocation7 + $0x3f8] sm:$0xff]  ;;  %v7018_v51 = vld [vmem:[#allocation7 + $0x2b0] sm:$0xff] }
 0x334   :  { %2403 = vmatpush.msra.mxu3 %v6923_v21  ;;  %2443 = vmatpush.msrb.mxu1 %v6926_v58 }
 0x335   :  { %v4093_v18 = vmul.f32 -1.442695, %v2105_v27  ;;  %v2190_v44 = vsel %vm2187_vm12, %v2189_v63, %v2185_v56  ;;  %v2207_v27 = vmul.f32 %v2205_v23, %v6416_v11  ;;  %v7028_v56 = vld [vmem:[#allocation7 + $0x278] sm:$0xff]  ;;  %v7037_v23 = vld [vmem:[#allocation7 + $0x1f0] sm:$0xff] }
 0x336   :  { %2404 = vmatpush.msra.mxu3 %v6931_v47  ;;  %2444 = vmatpush.msrb.mxu1 %v6934_v57 }
 0x337   :  { %4190 = vpow2.f32 %v4093_v18  ;;  %v7007_v18 = vld [vmem:[#allocation7 + $0x338] sm:$0xff] }
 0x338   :  { %4192 = vtanh.f32 %v2104_v61  ;;  %2405 = vmatpush.msra.mxu3 %v6938_v26  ;;  %2445 = vmatpush.msrb.mxu1 %v6941_v37  ;;  %v7004_v61 = vld [vmem:[#allocation7 + $0x330] sm:$0xff] }
 0x33a   :  { %2406 = vmatpush.msra.mxu3 %v6950_v30  ;;  %2446 = vmatpush.msrb.mxu1 %v6953_v49 }
 0x33c   :  { %2407 = vmatpush.msra.mxu3 %v6971_v17  ;;  %2447 = vmatpush.msrb.mxu1 %v6974_v16 }
 0x33d   :  { %v4191_v13 = vpop.eup %4190  ;;  %2408 = vmatmul.f32.vlgmr.msra.gmra.mxu3 %v6867_v41  ;;  %2448 = vmatmul.f32.vlgmr.msrb.gmra.mxu1 %v6867_v41 }
 0x33e   :  { %v2214_v55 = vadd.f32 1.0, %v4191_v13  ;;  %v4193_v14 = vpop.eup %4192  ;;  %2472 = vmatpush.msrb.mxu3 %v6985_v29  ;;  %2512 = vmatpush.msra.mxu1 %v6988_v22 }
 0x33f   :  { %v2209_v5 = vmul.f32 %v4193_v14, %v2190_v44  ;;  %v7031_v14 = vld [vmem:[#allocation7 + $0x230] sm:$0xff] }
 0x340   :  { %4194 = vrcp.f32 %v2214_v55  ;;  %2473 = vmatpush.msrb.mxu3 %v6991_v32  ;;  %2513 = vmatpush.msra.mxu1 %v6994_v6  ;;  %v2226_v59 = vand.u32 2147483648, %v2214_v55  ;;  %v2224_v13 = vand.u32 2147483647, %v2214_v55  ;;  %vm2220_vm15 = vweird.f32 %v2214_v55 }
 0x341   :  { %v7010_v7 = vadd.f32 %v2209_v5, %v2207_v27  ;;  %v7040_v5 = vld [vmem:[#allocation7 + $0x1f8] sm:$0xff] }
 0x342   :  { %2474 = vmatpush.msrb.mxu3 %v6997_v62  ;;  %2514 = vmatpush.msra.mxu1 %v7000_v39  ;;  %v2227_v63 = vor.u32 1.1754944e-38, %v2226_v59  ;;  %vm2225_vm1 = vcmp.eq.f32.partialorder %v2224_v13, 8.507059e+37  ;;  %v7058_v59 = vld [vmem:[#allocation7 + $0x178] sm:$0xff]  ;;  %v7063_v13 = vld [vmem:[#allocation7 + $0x130] sm:$0xff] }
 0x343   :  { %4196 = vtanh.f32 %v7010_v7  ;;  %9271 = vst [vmem:[#allocation125_spill] sm:$0xff] %v7058_v59 }
 0x344   :  { %2475 = vmatpush.msrb.mxu3 %v7004_v61  ;;  %2515 = vmatpush.msra.mxu1 %v7007_v18  ;;  %9272 = vst [vmem:[#allocation132_spill] sm:$0xff] %v7063_v13 }
 0x346   :  { %v4195_v40 = vpop.eup %4194  ;;  %2476 = vmatpush.msrb.mxu3 %v7012_v3  ;;  %2516 = vmatpush.msra.mxu1 %v7015_v20 }
 0x347   :  { %v2216_v4 = vmul.f32 %v4195_v40, %v2214_v55  ;;  %vm2221_vm14 = vweird.f32 %v4195_v40 }
 0x348   :  { %2477 = vmatpush.msrb.mxu3 %v7018_v51  ;;  %2517 = vmatpush.msra.mxu1 %v7021_v45  ;;  %vm2222_vm0 = vmor %vm2220_vm15, %vm2221_vm14 }
 0x349   :  { %v2217_v11 = vsub.f32 1.0, %v2216_v4  ;;  %v4197_v55 = vpop.eup %4196 }
 0x34a   :  { %2478 = vmatpush.msrb.mxu3 %v7025_v1  ;;  %2518 = vmatpush.msra.mxu1 %v7028_v56 }
 0x34b   :  { %v2218_v50 = vmul.f32 %v4195_v40, %v2217_v11  ;;  %v7045_v11 = vld [vmem:[#allocation7 + $0x1b0] sm:$0xff] }
 0x34c   :  { %2479 = vmatpush.msrb.mxu3 %v7031_v14  ;;  %2519 = vmatpush.msra.mxu1 %v7034_v34 }
 0x34d   :  { %v2219_v0 = vadd.f32 %v4195_v40, %v2218_v50  ;;  %v7048_v50 = vld [vmem:[#allocation7 + $0x1b8] sm:$0xff] }
 0x34e   :  { %2480 = vmatpush.msrb.mxu3 %v7037_v23  ;;  %2520 = vmatpush.msra.mxu1 %v7040_v5 }
 0x34f   :  { %v2223_v44 = vsel %vm2222_vm0, %v4195_v40, %v2219_v0  ;;  %v7055_v40 = vld [vmem:[#allocation7 + $0x170] sm:$0xff]  ;;  %v7066_v0 = vld [vmem:[#allocation7 + $0x138] sm:$0xff] }
 0x350   :  { %v2228_v27 = vsel %vm2225_vm1, %v2227_v63, %v2223_v44  ;;  %2481 = vmatpush.msrb.mxu3 %v7045_v11  ;;  %2521 = vmatpush.msra.mxu1 %v7048_v50  ;;  %9273 = vst [vmem:[#allocation130_spill] sm:$0xff] %v7066_v0  ;;  %v7131_v63 = vld [vmem:[#allocation7 + $0x300] sm:$0xff]  ;;  %v7134_v44 = vld [vmem:[#allocation7 + $0x308] sm:$0xff] }
 0x351   :  { %v7043_v4 = vmul.f32 %v4197_v55, %v2228_v27  ;;  %9291 = vst [vmem:[#allocation173_spill] sm:$0xff] %v7131_v63  ;;  %v9294_v55 = vld [vmem:[#allocation55_spill] sm:$0xff] }
 0x352   :  { %2482 = vmatpush.msrb.mxu3 %v7055_v40  ;;  %2522 = vmatpush.msra.mxu1 %v7058_v59  ;;  %9292 = vst [vmem:[#allocation170_spill] sm:$0xff] %v7134_v44  ;;  %v7139_v27 = vld [vmem:[#allocation7 + $0x2c0] sm:$0xff] }
 0x353   :  { %2268 = vmatmul.f32.vlgmr.msrb.gmra.mxu0 %v7043_v4  ;;  %2308 = vmatmul.f32.vlgmr.msrb.gmra.mxu2 %v7043_v4  ;;  %9295 = vst [vmem:[#allocation178_spill] sm:$0xff] %v7139_v27 }
 0x354   :  { %2412 = vmatpush.msrb.mxu0 %v6437_v42  ;;  %2452 = vmatpush.msrb.mxu2 %v6440_v28  ;;  %v7071_v42 = vld [vmem:[#allocation7 + $0xf0] sm:$0xff]  ;;  %v7074_v28 = vld [vmem:[#allocation7 + $0xf8] sm:$0xff] }
 0x355   :  { %2483 = vmatpush.msrb.mxu3 %v7063_v13  ;;  %2523 = vmatpush.msra.mxu1 %v7066_v0  ;;  %9274 = vst [vmem:[#allocation137_spill] sm:$0xff] %v7071_v42 }
 0x356   :  { %2413 = vmatpush.msrb.mxu0 %v6445_v36  ;;  %2453 = vmatpush.msrb.mxu2 %v6448_v54  ;;  %9275 = vst [vmem:[#allocation135_spill] sm:$0xff] %v7074_v28  ;;  %v7079_v36 = vld [vmem:[#allocation7 + $0xb0] sm:$0xff]  ;;  %v7082_v54 = vld [vmem:[#allocation7 + $0xb8] sm:$0xff] }
 0x357   :  { %2484 = vmatpush.msrb.mxu3 %v7071_v42  ;;  %2524 = vmatpush.msra.mxu1 %v7074_v28  ;;  %9276 = vst [vmem:[#allocation143_spill] sm:$0xff] %v7079_v36 }
 0x358   :  { %2414 = vmatpush.msrb.mxu0 %v6453_v33  ;;  %2454 = vmatpush.msrb.mxu2 %v6456_v24  ;;  %9277 = vst [vmem:[#allocation140_spill] sm:$0xff] %v7082_v54  ;;  %v7089_v33 = vld [vmem:[#allocation7 + $0x70] sm:$0xff]  ;;  %v7092_v24 = vld [vmem:[#allocation7 + $0x78] sm:$0xff] }
 0x359   :  { %2485 = vmatpush.msrb.mxu3 %v7079_v36  ;;  %2525 = vmatpush.msra.mxu1 %v7082_v54  ;;  %9278 = vst [vmem:[#allocation148_spill] sm:$0xff] %v7089_v33 }
 0x35a   :  { %2415 = vmatpush.msrb.mxu0 %v6461_v19  ;;  %2455 = vmatpush.msrb.mxu2 %v6464_v46  ;;  %9279 = vst [vmem:[#allocation145_spill] sm:$0xff] %v7092_v24  ;;  %v7097_v19 = vld [vmem:[#allocation7 + $0x30] sm:$0xff]  ;;  %v7100_v46 = vld [vmem:[#allocation7 + $0x38] sm:$0xff] }
 0x35b   :  { %2348 = vmatmul.f32.vlgmr.msra.gmra.mxu0 %v7043_v4  ;;  %2388 = vmatmul.f32.vlgmr.msra.gmra.mxu2 %v7043_v4  ;;  %9280 = vst [vmem:[#allocation152_spill] sm:$0xff] %v7097_v19 }
 0x35c   :  { %2416 = vmatpush.msrb.mxu0 %v6469_v53  ;;  %2456 = vmatpush.msrb.mxu2 %v6472_v48  ;;  %9281 = vst [vmem:[#allocation150_spill] sm:$0xff] %v7100_v46  ;;  %v7107_v53 = vld [vmem:[#allocation7 + $0x3c0] sm:$0xff]  ;;  %v7110_v48 = vld [vmem:[#allocation7 + $0x3c8] sm:$0xff] }
 0x35d   :  { %2486 = vmatpush.msrb.mxu3 %v7089_v33  ;;  %2526 = vmatpush.msra.mxu1 %v7092_v24  ;;  %9282 = vst [vmem:[#allocation156_spill] sm:$0xff] %v7107_v53 }
 0x35e   :  { %2417 = vmatpush.msrb.mxu0 %v6477_v25  ;;  %2457 = vmatpush.msrb.mxu2 %v6480_v12  ;;  %9283 = vst [vmem:[#allocation154_spill] sm:$0xff] %v7110_v48  ;;  %v7115_v25 = vld [vmem:[#allocation7 + $0x380] sm:$0xff]  ;;  %v7118_v12 = vld [vmem:[#allocation7 + $0x388] sm:$0xff] }
 0x35f   :  { %2487 = vmatpush.msrb.mxu3 %v7097_v19  ;;  %2527 = vmatpush.msra.mxu1 %v7100_v46  ;;  %9284 = vst [vmem:[#allocation162_spill] sm:$0xff] %v7115_v25  ;;  %v9459_v19 = vld [vmem:[#allocation17_spill] sm:$0xff] }
 0x360   :  { %2488 = vmatmul.f32.vlgmr.msrb.gmra.mxu3 %v6867_v41  ;;  %2528 = vmatmul.f32.vlgmr.msra.gmra.mxu1 %v6867_v41  ;;  %9285 = vst [vmem:[#allocation159_spill] sm:$0xff] %v7118_v12  ;;  %v7126_v41 = vld [vmem:[#allocation7 + $0x348] sm:$0xff] }
 0x361   :  { %2418 = vmatpush.msrb.mxu0 %v6485_v9  ;;  %2458 = vmatpush.msrb.mxu2 %v6488_v15  ;;  %v9286_v9 = vld [vmem:[#allocation52_spill] sm:$0xff]  ;;  %v7123_v15 = vld [vmem:[#allocation7 + $0x340] sm:$0xff]  ;;  %9288 = vst [vmem:[#allocation165_spill] sm:$0xff] %v7126_v41 }
 0x362   :  { %2686 = vmatpush.msra.mxu3 %v7107_v53  ;;  %2726 = vmatpush.msrb.mxu1 %v7110_v48  ;;  %9287 = vst [vmem:[#allocation169_spill] sm:$0xff] %v7123_v15  ;;  %v9458_v48 = vld [vmem:[#allocation128_spill] sm:$0xff] }
 0x363   :  { %2419 = vmatpush.msrb.mxu0 %v6493_v38  ;;  %2459 = vmatpush.msrb.mxu2 %v6496_v52  ;;  %v9289_v38 = vld [vmem:[#allocation60_spill] sm:$0xff]  ;;  %v9290_v52 = vld [vmem:[#allocation53_spill] sm:$0xff] }
 0x364   :  { %2687 = vmatpush.msra.mxu3 %v7115_v25  ;;  %2727 = vmatpush.msrb.mxu1 %v7118_v12  ;;  %v9455_v12 = vld [vmem:[#allocation116_spill] sm:$0xff]  ;;  %v9456_v25 = vld [vmem:[#allocation119_spill] sm:$0xff] }
 0x365   :  { %2420 = vmatpush.msrb.mxu0 %v6501_v31  ;;  %2460 = vmatpush.msrb.mxu2 %v9286_v9  ;;  %v9293_v31 = vld [vmem:[#allocation62_spill] sm:$0xff]  ;;  %v7142_v9 = vld [vmem:[#allocation7 + $0x2c8] sm:$0xff] }
 0x366   :  { %2688 = vmatpush.msra.mxu3 %v7123_v15  ;;  %2728 = vmatpush.msrb.mxu1 %v7126_v41  ;;  %9296 = vst [vmem:[#allocation174_spill] sm:$0xff] %v7142_v9  ;;  %v7285_v41 = vld [vmem:[#allocation7 + $0x250] sm:$0xff] }
 0x367   :  { %2421 = vmatpush.msrb.mxu0 %v9289_v38  ;;  %2461 = vmatpush.msrb.mxu2 %v9290_v52  ;;  %v9297_v38 = vld [vmem:[#allocation66_spill] sm:$0xff]  ;;  %v9298_v52 = vld [vmem:[#allocation59_spill] sm:$0xff] }
 0x368   :  { %2689 = vmatpush.msra.mxu3 %v7131_v63  ;;  %2729 = vmatpush.msrb.mxu1 %v7134_v44  ;;  %v7147_v63 = vld [vmem:[#allocation7 + $0x280] sm:$0xff]  ;;  %v7150_v44 = vld [vmem:[#allocation7 + $0x288] sm:$0xff]  ;;  %9369 = vst [vmem:[#allocation59_spill] sm:$0xff] %v7285_v41 }
 0x369   :  { %2422 = vmatpush.msrb.mxu0 %v9293_v31  ;;  %2462 = vmatpush.msrb.mxu2 %v9294_v55  ;;  %9299 = vst [vmem:[#allocation180_spill] sm:$0xff] %v7147_v63  ;;  %v9301_v31 = vld [vmem:[#allocation70_spill] sm:$0xff]  ;;  %v9302_v55 = vld [vmem:[#allocation61_spill] sm:$0xff] }
 0x36a   :  { %2690 = vmatpush.msra.mxu3 %v7139_v27  ;;  %2730 = vmatpush.msrb.mxu1 %v7142_v9  ;;  %9300 = vst [vmem:[#allocation184_spill] sm:$0xff] %v7150_v44  ;;  %v7155_v27 = vld [vmem:[#allocation7 + $0x240] sm:$0xff]  ;;  %v7158_v9 = vld [vmem:[#allocation7 + $0x248] sm:$0xff] }
 0x36b   :  { %2423 = vmatpush.msrb.mxu0 %v9297_v38  ;;  %2463 = vmatpush.msrb.mxu2 %v9298_v52  ;;  %9303 = vst [vmem:[#allocation186_spill] sm:$0xff] %v7155_v27  ;;  %v9305_v38 = vld [vmem:[#allocation72_spill] sm:$0xff] }
 0x36c   :  { %2691 = vmatpush.msra.mxu3 %v7147_v63  ;;  %2731 = vmatpush.msrb.mxu1 %v7150_v44  ;;  %9304 = vst [vmem:[#allocation190_spill] sm:$0xff] %v7158_v9  ;;  %v9306_v52 = vld [vmem:[#allocation64_spill] sm:$0xff]  ;;  %v7163_v63 = vld [vmem:[#allocation7 + $0x200] sm:$0xff] }
 0x36d   :  { %2424 = vmatpush.msrb.mxu0 %v9301_v31  ;;  %2464 = vmatpush.msrb.mxu2 %v9302_v55  ;;  %9307 = vst [vmem:[#allocation192_spill] sm:$0xff] %v7163_v63  ;;  %v7166_v44 = vld [vmem:[#allocation7 + $0x208] sm:$0xff]  ;;  %v9309_v31 = vld [vmem:[#allocation75_spill] sm:$0xff] }
 0x36e   :  { %2692 = vmatpush.msra.mxu3 %v7155_v27  ;;  %2732 = vmatpush.msrb.mxu1 %v7158_v9  ;;  %9308 = vst [vmem:[#allocation194_spill] sm:$0xff] %v7166_v44  ;;  %v9310_v55 = vld [vmem:[#allocation67_spill] sm:$0xff]  ;;  %v7174_v9 = vld [vmem:[#allocation7 + $0x1c8] sm:$0xff] }
 0x36f   :  { %2425 = vmatpush.msrb.mxu0 %v9305_v38  ;;  %2465 = vmatpush.msrb.mxu2 %v9306_v52  ;;  %v7171_v27 = vld [vmem:[#allocation7 + $0x1c0] sm:$0xff]  ;;  %9312 = vst [vmem:[#allocation198_spill] sm:$0xff] %v7174_v9  ;;  %v9313_v38 = vld [vmem:[#allocation78_spill] sm:$0xff] }
 0x370   :  { %2693 = vmatpush.msra.mxu3 %v7163_v63  ;;  %2733 = vmatpush.msrb.mxu1 %v7166_v44  ;;  %9311 = vst [vmem:[#allocation196_spill] sm:$0xff] %v7171_v27  ;;  %v9314_v52 = vld [vmem:[#allocation71_spill] sm:$0xff]  ;;  %v9315_v44 = vld [vmem:[#allocation82_spill] sm:$0xff]  ;;  %v7194_v63 = vld [vmem:[#allocation7 + $0x148] sm:$0xff] }
 0x371   :  { %2426 = vmatpush.msrb.mxu0 %v9309_v31  ;;  %2466 = vmatpush.msrb.mxu2 %v9310_v55  ;;  %v9316_v31 = vld [vmem:[#allocation73_spill] sm:$0xff]  ;;  %v7183_v55 = vld [vmem:[#allocation7 + $0x180] sm:$0xff]  ;;  %9322 = vst [vmem:[#allocation14_spill] sm:$0xff] %v7194_v63 }
 0x372   :  { %2694 = vmatpush.msra.mxu3 %v7171_v27  ;;  %2734 = vmatpush.msrb.mxu1 %v7174_v9  ;;  %9317 = vst [vmem:[#allocation200_spill] sm:$0xff] %v7183_v55  ;;  %v7186_v27 = vld [vmem:[#allocation7 + $0x188] sm:$0xff] }
 0x373   :  { %2427 = vmatpush.msrb.mxu0 %v9313_v38  ;;  %2467 = vmatpush.msrb.mxu2 %v9314_v52  ;;  %9318 = vst [vmem:[#allocation201_spill] sm:$0xff] %v7186_v27  ;;  %v9319_v9 = vld [vmem:[#allocation84_spill] sm:$0xff]  ;;  %v7191_v52 = vld [vmem:[#allocation7 + $0x140] sm:$0xff] }
 0x374   :  { %2428 = vmatmul.f32.vlgmr.msrb.gmra.mxu0 %v7043_v4  ;;  %2468 = vmatmul.f32.vlgmr.msrb.gmra.mxu2 %v7043_v4  ;;  %v9320_v38 = vld [vmem:[#allocation76_spill] sm:$0xff]  ;;  %9321 = vst [vmem:[#allocation203_spill] sm:$0xff] %v7191_v52 }
 0x375   :  { %2492 = vmatpush.msra.mxu0 %v9315_v44  ;;  %2532 = vmatpush.msra.mxu2 %v9316_v31  ;;  %v9323_v44 = vld [vmem:[#allocation87_spill] sm:$0xff]  ;;  %v9324_v31 = vld [vmem:[#allocation81_spill] sm:$0xff] }
 0x376   :  { %2695 = vmatpush.msra.mxu3 %v7183_v55  ;;  %2735 = vmatpush.msrb.mxu1 %v7186_v27  ;;  %v7199_v55 = vld [vmem:[#allocation7 + $0x100] sm:$0xff]  ;;  %v7202_v27 = vld [vmem:[#allocation7 + $0x108] sm:$0xff] }
 0x377   :  { %2493 = vmatpush.msra.mxu0 %v9319_v9  ;;  %2533 = vmatpush.msra.mxu2 %v9320_v38  ;;  %9325 = vst [vmem:[#allocation12_spill] sm:$0xff] %v7199_v55  ;;  %v9327_v9 = vld [vmem:[#allocation90_spill] sm:$0xff]  ;;  %v9328_v38 = vld [vmem:[#allocation83_spill] sm:$0xff] }
 0x378   :  { %2696 = vmatpush.msra.mxu3 %v7191_v52  ;;  %2736 = vmatpush.msrb.mxu1 %v7194_v63  ;;  %9326 = vst [vmem:[#allocation13_spill] sm:$0xff] %v7202_v27  ;;  %v7207_v52 = vld [vmem:[#allocation7 + $0xc0] sm:$0xff]  ;;  %v7210_v63 = vld [vmem:[#allocation7 + $0xc8] sm:$0xff] }
 0x379   :  { %2494 = vmatpush.msra.mxu0 %v9323_v44  ;;  %2534 = vmatpush.msra.mxu2 %v9324_v31  ;;  %9329 = vst [vmem:[#allocation15_spill] sm:$0xff] %v7207_v52  ;;  %v9331_v44 = vld [vmem:[#allocation94_spill] sm:$0xff]  ;;  %v9332_v31 = vld [vmem:[#allocation85_spill] sm:$0xff] }
 0x37a   :  { %2697 = vmatpush.msra.mxu3 %v7199_v55  ;;  %2737 = vmatpush.msrb.mxu1 %v7202_v27  ;;  %9330 = vst [vmem:[#allocation33_spill] sm:$0xff] %v7210_v63  ;;  %v7215_v55 = vld [vmem:[#allocation7 + $0x80] sm:$0xff]  ;;  %v7218_v27 = vld [vmem:[#allocation7 + $0x88] sm:$0xff] }
 0x37b   :  { %2495 = vmatpush.msra.mxu0 %v9327_v9  ;;  %2535 = vmatpush.msra.mxu2 %v9328_v38  ;;  %9333 = vst [vmem:[#allocation35_spill] sm:$0xff] %v7215_v55  ;;  %v9335_v9 = vld [vmem:[#allocation96_spill] sm:$0xff] }
 0x37c   :  { %2698 = vmatpush.msra.mxu3 %v7207_v52  ;;  %2738 = vmatpush.msrb.mxu1 %v7210_v63  ;;  %9334 = vst [vmem:[#allocation34_spill] sm:$0xff] %v7218_v27  ;;  %v9336_v38 = vld [vmem:[#allocation88_spill] sm:$0xff]  ;;  %v7223_v52 = vld [vmem:[#allocation7 + $0x40] sm:$0xff] }
 0x37d   :  { %2496 = vmatpush.msra.mxu0 %v9331_v44  ;;  %2536 = vmatpush.msra.mxu2 %v9332_v31  ;;  %9337 = vst [vmem:[#allocation32_spill] sm:$0xff] %v7223_v52  ;;  %v7226_v63 = vld [vmem:[#allocation7 + $0x48] sm:$0xff]  ;;  %v9339_v44 = vld [vmem:[#allocation99_spill] sm:$0xff]  ;;  %v9340_v31 = vld [vmem:[#allocation93_spill] sm:$0xff] }
 0x37e   :  { %2699 = vmatpush.msra.mxu3 %v7215_v55  ;;  %2739 = vmatpush.msrb.mxu1 %v7218_v27  ;;  %9338 = vst [vmem:[#allocation98_spill] sm:$0xff] %v7226_v63  ;;  %v7231_v55 = vld [vmem:[#allocation7] sm:$0xff]  ;;  %v7234_v27 = vld [vmem:[#allocation7 + $0x8] sm:$0xff] }
 0x37f   :  { %2497 = vmatpush.msra.mxu0 %v9335_v9  ;;  %2537 = vmatpush.msra.mxu2 %v9336_v38  ;;  %9341 = vst [vmem:[#allocation91_spill] sm:$0xff] %v7231_v55  ;;  %v9343_v9 = vld [vmem:[#allocation102_spill] sm:$0xff]  ;;  %v9344_v38 = vld [vmem:[#allocation95_spill] sm:$0xff] }
 0x380   :  { %2700 = vmatpush.msra.mxu3 %v7223_v52  ;;  %2740 = vmatpush.msrb.mxu1 %v7226_v63  ;;  %9342 = vst [vmem:[#allocation92_spill] sm:$0xff] %v7234_v27  ;;  %v7239_v52 = vld [vmem:[#allocation7 + $0x3d0] sm:$0xff]  ;;  %v7242_v63 = vld [vmem:[#allocation7 + $0x3d8] sm:$0xff] }
 0x381   :  { %2498 = vmatpush.msra.mxu0 %v9339_v44  ;;  %2538 = vmatpush.msra.mxu2 %v9340_v31  ;;  %9345 = vst [vmem:[#allocation101_spill] sm:$0xff] %v7239_v52  ;;  %v9347_v44 = vld [vmem:[#allocation104_spill] sm:$0xff]  ;;  %v9348_v31 = vld [vmem:[#allocation97_spill] sm:$0xff] }
 0x382   :  { %2701 = vmatpush.msra.mxu3 %v7231_v55  ;;  %2741 = vmatpush.msrb.mxu1 %v7234_v27  ;;  %9346 = vst [vmem:[#allocation187_spill] sm:$0xff] %v7242_v63  ;;  %v7247_v55 = vld [vmem:[#allocation7 + $0x390] sm:$0xff]  ;;  %v7250_v27 = vld [vmem:[#allocation7 + $0x398] sm:$0xff] }
 0x383   :  { %2499 = vmatpush.msra.mxu0 %v9343_v9  ;;  %2539 = vmatpush.msra.mxu2 %v9344_v38  ;;  %9349 = vst [vmem:[#allocation188_spill] sm:$0xff] %v7247_v55  ;;  %v9351_v9 = vld [vmem:[#allocation100_spill] sm:$0xff]  ;;  %v9352_v38 = vld [vmem:[#allocation103_spill] sm:$0xff] }
 0x384   :  { %2766 = vmatpush.msrb.mxu3 %v7239_v52  ;;  %2806 = vmatpush.msra.mxu1 %v7242_v63  ;;  %9350 = vst [vmem:[#allocation182_spill] sm:$0xff] %v7250_v27  ;;  %v7255_v52 = vld [vmem:[#allocation7 + $0x350] sm:$0xff]  ;;  %v7258_v63 = vld [vmem:[#allocation7 + $0x358] sm:$0xff] }
 0x385   :  { %2500 = vmatpush.msra.mxu0 %v9347_v44  ;;  %2540 = vmatpush.msra.mxu2 %v9348_v31  ;;  %9353 = vst [vmem:[#allocation181_spill] sm:$0xff] %v7255_v52  ;;  %v9355_v44 = vld [vmem:[#allocation109_spill] sm:$0xff]  ;;  %v9356_v31 = vld [vmem:[#allocation106_spill] sm:$0xff] }
 0x386   :  { %2767 = vmatpush.msrb.mxu3 %v7247_v55  ;;  %2807 = vmatpush.msra.mxu1 %v7250_v27  ;;  %9354 = vst [vmem:[#allocation52_spill] sm:$0xff] %v7258_v63  ;;  %v7263_v55 = vld [vmem:[#allocation7 + $0x310] sm:$0xff]  ;;  %v7266_v27 = vld [vmem:[#allocation7 + $0x318] sm:$0xff] }
 0x387   :  { %2501 = vmatpush.msra.mxu0 %v9351_v9  ;;  %2541 = vmatpush.msra.mxu2 %v9352_v38  ;;  %9357 = vst [vmem:[#allocation60_spill] sm:$0xff] %v7263_v55  ;;  %v9359_v9 = vld [vmem:[#allocation111_spill] sm:$0xff] }
 0x388   :  { %2768 = vmatpush.msrb.mxu3 %v7255_v52  ;;  %2808 = vmatpush.msra.mxu1 %v7258_v63  ;;  %9358 = vst [vmem:[#allocation53_spill] sm:$0xff] %v7266_v27  ;;  %v9360_v38 = vld [vmem:[#allocation107_spill] sm:$0xff]  ;;  %v7271_v52 = vld [vmem:[#allocation7 + $0x2d0] sm:$0xff]  ;;  %v7274_v63 = vld [vmem:[#allocation7 + $0x2d8] sm:$0xff] }
 0x389   :  { %2502 = vmatpush.msra.mxu0 %v9355_v44  ;;  %2542 = vmatpush.msra.mxu2 %v9356_v31  ;;  %9361 = vst [vmem:[#allocation62_spill] sm:$0xff] %v7271_v52  ;;  %v9363_v44 = vld [vmem:[#allocation110_spill] sm:$0xff] }
 0x38a   :  { %2769 = vmatpush.msrb.mxu3 %v7263_v55  ;;  %2809 = vmatpush.msra.mxu1 %v7266_v27  ;;  %9362 = vst [vmem:[#allocation55_spill] sm:$0xff] %v7274_v63  ;;  %v9364_v31 = vld [vmem:[#allocation114_spill] sm:$0xff]  ;;  %v7279_v55 = vld [vmem:[#allocation7 + $0x290] sm:$0xff]  ;;  %v9366_v27 = vld [vmem:[#allocation115_spill] sm:$0xff] }
 0x38b   :  { %2503 = vmatpush.msra.mxu0 %v9359_v9  ;;  %2543 = vmatpush.msra.mxu2 %v9360_v38  ;;  %9365 = vst [vmem:[#allocation66_spill] sm:$0xff] %v7279_v55  ;;  %v9367_v9 = vld [vmem:[#allocation118_spill] sm:$0xff]  ;;  %v9368_v38 = vld [vmem:[#allocation127_spill] sm:$0xff] }
 0x38c   :  { %2770 = vmatpush.msrb.mxu3 %v7271_v52  ;;  %2810 = vmatpush.msra.mxu1 %v7274_v63  ;;  %v9370_v52 = vld [vmem:[#allocation122_spill] sm:$0xff]  ;;  %v9371_v63 = vld [vmem:[#allocation131_spill] sm:$0xff] }
 0x38d   :  { %2504 = vmatpush.msra.mxu0 %v9363_v44  ;;  %2544 = vmatpush.msra.mxu2 %v9364_v31  ;;  %v9372_v44 = vld [vmem:[#allocation124_spill] sm:$0xff]  ;;  %v7291_v31 = vld [vmem:[#allocation7 + $0x210] sm:$0xff] }
 0x38e   :  { %2771 = vmatpush.msrb.mxu3 %v7279_v55  ;;  %2811 = vmatpush.msra.mxu1 %v9366_v27  ;;  %9373 = vst [vmem:[#allocation70_spill] sm:$0xff] %v7291_v31  ;;  %v9374_v55 = vld [vmem:[#allocation120_spill] sm:$0xff]  ;;  %v9375_v27 = vld [vmem:[#allocation129_spill] sm:$0xff] }
 0x38f   :  { %2505 = vmatpush.msra.mxu0 %v9367_v9  ;;  %2545 = vmatpush.msra.mxu2 %v9368_v38  ;;  %v9376_v9 = vld [vmem:[#allocation142_spill] sm:$0xff]  ;;  %v7299_v38 = vld [vmem:[#allocation7 + $0x1d0] sm:$0xff] }
 0x390   :  { %2772 = vmatpush.msrb.mxu3 %v7285_v41  ;;  %2812 = vmatpush.msra.mxu1 %v9370_v52  ;;  %9377 = vst [vmem:[#allocation61_spill] sm:$0xff] %v7299_v38  ;;  %v9379_v52 = vld [vmem:[#allocation139_spill] sm:$0xff] }
 0x391   :  { %2506 = vmatpush.msra.mxu0 %v9371_v63  ;;  %2546 = vmatpush.msra.mxu2 %v9372_v44  ;;  %v9378_v63 = vld [vmem:[#allocation136_spill] sm:$0xff]  ;;  %v9380_v44 = vld [vmem:[#allocation151_spill] sm:$0xff] }
 0x392   :  { %2773 = vmatpush.msrb.mxu3 %v7291_v31  ;;  %2813 = vmatpush.msra.mxu1 %v9374_v55  ;;  %v9381_v31 = vld [vmem:[#allocation134_spill] sm:$0xff]  ;;  %v9382_v55 = vld [vmem:[#allocation147_spill] sm:$0xff] }
 0x393   :  { %2507 = vmatpush.msra.mxu0 %v9375_v27  ;;  %2547 = vmatpush.msra.mxu2 %v9376_v9  ;;  %v7307_v27 = vld [vmem:[#allocation7 + $0x780] sm:$0xff]  ;;  %v9384_v9 = vld [vmem:[#allocation149_spill] sm:$0xff] }
 0x394   :  { %2508 = vmatmul.f32.vlgmr.msra.gmra.mxu0 %v7043_v4  ;;  %2548 = vmatmul.f32.vlgmr.msra.gmra.mxu2 %v7043_v4  ;;  %9383 = vst [vmem:[#allocation72_spill] sm:$0xff] %v7307_v27  ;;  %v9385_v4 = vld [vmem:[#allocation144_spill] sm:$0xff]  ;;  %v9386_v41 = vld [vmem:[#allocation155_spill] sm:$0xff] }
 0x395   :  { %2774 = vmatpush.msrb.mxu3 %v7299_v38  ;;  %2814 = vmatpush.msra.mxu1 %v9378_v63  ;;  %v7313_v38 = vld [vmem:[#allocation7 + $0x740] sm:$0xff] }
 0x396   :  { %2706 = vmatpush.msrb.mxu0 %v9379_v52  ;;  %2746 = vmatpush.msrb.mxu2 %v9380_v44  ;;  %9387 = vst [vmem:[#allocation64_spill] sm:$0xff] %v7313_v38  ;;  %v9388_v63 = vld [vmem:[#allocation167_spill] sm:$0xff]  ;;  %v9389_v52 = vld [vmem:[#allocation161_spill] sm:$0xff] }
 0x397   :  { %2775 = vmatpush.msrb.mxu3 %v9381_v31  ;;  %2815 = vmatpush.msra.mxu1 %v9382_v55  ;;  %v9390_v31 = vld [vmem:[#allocation153_spill] sm:$0xff]  ;;  %v7319_v44 = vld [vmem:[#allocation7 + $0x700] sm:$0xff]  ;;  %v9392_v55 = vld [vmem:[#allocation164_spill] sm:$0xff] }
 0x398   :  { %2707 = vmatpush.msrb.mxu0 %v7307_v27  ;;  %2747 = vmatpush.msrb.mxu2 %v9384_v9  ;;  %9391 = vst [vmem:[#allocation75_spill] sm:$0xff] %v7319_v44  ;;  %v9393_v9 = vld [vmem:[#allocation158_spill] sm:$0xff] }
 0x399   :  { %2776 = vmatpush.msrb.mxu3 %v9385_v4  ;;  %2816 = vmatpush.msra.mxu1 %v9386_v41  ;;  %v9394_v4 = vld [vmem:[#allocation171_spill] sm:$0xff]  ;;  %v9453_v27 = vld [vmem:[#allocation18_spill] sm:$0xff] }
 0x39a   :  { %2708 = vmatpush.msrb.mxu0 %v7313_v38  ;;  %2748 = vmatpush.msrb.mxu2 %v9388_v63  ;;  %v7325_v41 = vld [vmem:[#allocation7 + $0x6c0] sm:$0xff]  ;;  %v9396_v38 = vld [vmem:[#allocation177_spill] sm:$0xff]  ;;  %v2289_v53 = vpop.f32.mrf.mxu1 }
 0x39b   :  { %2777 = vmatpush.msrb.mxu3 %v9389_v52  ;;  %2817 = vmatpush.msra.mxu1 %v9390_v31  ;;  %9395 = vst [vmem:[#allocation67_spill] sm:$0xff] %v7325_v41  ;;  %v9397_v63 = vld [vmem:[#allocation175_spill] sm:$0xff]  ;;  %v9398_v52 = vld [vmem:[#allocation168_spill] sm:$0xff] }
 0x39c   :  { %2709 = vmatpush.msrb.mxu0 %v7319_v44  ;;  %2749 = vmatpush.msrb.mxu2 %v9392_v55  ;;  %v7331_v31 = vld [vmem:[#allocation7 + $0x680] sm:$0xff]  ;;  %v7334_v44 = vld [vmem:[#allocation7 + $0x688] sm:$0xff] }
 0x39d   :  { %2778 = vmatpush.msrb.mxu3 %v9393_v9  ;;  %2818 = vmatpush.msra.mxu1 %v9394_v4  ;;  %9399 = vst [vmem:[#allocation78_spill] sm:$0xff] %v7331_v31  ;;  %v9401_v55 = vld [vmem:[#allocation172_spill] sm:$0xff]  ;;  %v9402_v9 = vld [vmem:[#allocation183_spill] sm:$0xff] }
 0x39e   :  { %2710 = vmatpush.msrb.mxu0 %v7325_v41  ;;  %2750 = vmatpush.msrb.mxu2 %v9396_v38  ;;  %9400 = vst [vmem:[#allocation71_spill] sm:$0xff] %v7334_v44  ;;  %v7339_v4 = vld [vmem:[#allocation7 + $0x640] sm:$0xff]  ;;  %v7342_v38 = vld [vmem:[#allocation7 + $0x648] sm:$0xff]  ;;  %v9451_v41 = vld [vmem:[#allocation202_spill] sm:$0xff] }
 0x39f   :  { %2779 = vmatpush.msrb.mxu3 %v9397_v63  ;;  %2819 = vmatpush.msra.mxu1 %v9398_v52  ;;  %9403 = vst [vmem:[#allocation82_spill] sm:$0xff] %v7339_v4  ;;  %v9405_v63 = vld [vmem:[#allocation176_spill] sm:$0xff]  ;;  %v9406_v52 = vld [vmem:[#allocation189_spill] sm:$0xff] }
 0x3a0   :  { %2711 = vmatpush.msrb.mxu0 %v7331_v31  ;;  %2751 = vmatpush.msrb.mxu2 %v7334_v44  ;;  %9404 = vst [vmem:[#allocation73_spill] sm:$0xff] %v7342_v38  ;;  %v7347_v31 = vld [vmem:[#allocation7 + $0x600] sm:$0xff]  ;;  %v7350_v44 = vld [vmem:[#allocation7 + $0x608] sm:$0xff] }
 0x3a1   :  { %2780 = vmatpush.msrb.mxu3 %v9401_v55  ;;  %2820 = vmatpush.msra.mxu1 %v9402_v9  ;;  %9407 = vst [vmem:[#allocation84_spill] sm:$0xff] %v7347_v31  ;;  %v7353_v55 = vld [vmem:[#allocation7 + $0x5c0] sm:$0xff]  ;;  %v7356_v9 = vld [vmem:[#allocation7 + $0x5c8] sm:$0xff] }
 0x3a2   :  { %2712 = vmatpush.msrb.mxu0 %v7339_v4  ;;  %2752 = vmatpush.msrb.mxu2 %v7342_v38  ;;  %9408 = vst [vmem:[#allocation76_spill] sm:$0xff] %v7350_v44  ;;  %v7359_v38 = vld [vmem:[#allocation7 + $0x580] sm:$0xff]  ;;  %v7446_v4 = vld [vmem:[#allocation7 + $0x5d8] sm:$0xff] }
 0x3a3   :  { %2781 = vmatpush.msrb.mxu3 %v9405_v63  ;;  %2821 = vmatpush.msra.mxu1 %v9406_v52  ;;  %9409 = vst [vmem:[#allocation87_spill] sm:$0xff] %v7353_v55  ;;  %v7362_v63 = vld [vmem:[#allocation7 + $0x588] sm:$0xff]  ;;  %v7365_v52 = vld [vmem:[#allocation7 + $0x540] sm:$0xff] }
 0x3a4   :  { %2713 = vmatpush.msrb.mxu0 %v7347_v31  ;;  %2753 = vmatpush.msrb.mxu2 %v7350_v44  ;;  %9410 = vst [vmem:[#allocation81_spill] sm:$0xff] %v7356_v9  ;;  %v7368_v44 = vld [vmem:[#allocation7 + $0x548] sm:$0xff]  ;;  %v7438_v31 = vld [vmem:[#allocation7 + $0x658] sm:$0xff] }
 0x3a5   :  { %9411 = vst [vmem:[#allocation90_spill] sm:$0xff] %v7359_v38 }
 0x3a6   :  { %2714 = vmatpush.msrb.mxu0 %v7353_v55  ;;  %2754 = vmatpush.msrb.mxu2 %v7356_v9  ;;  %9412 = vst [vmem:[#allocation83_spill] sm:$0xff] %v7362_v63  ;;  %v7371_v55 = vld [vmem:[#allocation7 + $0x500] sm:$0xff]  ;;  %v7374_v9 = vld [vmem:[#allocation7 + $0x508] sm:$0xff] }
 0x3a7   :  { %9413 = vst [vmem:[#allocation94_spill] sm:$0xff] %v7365_v52 }
 0x3a8   :  { %2715 = vmatpush.msrb.mxu0 %v7359_v38  ;;  %2755 = vmatpush.msrb.mxu2 %v7362_v63  ;;  %9414 = vst [vmem:[#allocation85_spill] sm:$0xff] %v7368_v44  ;;  %v7377_v38 = vld [vmem:[#allocation7 + $0x4c0] sm:$0xff]  ;;  %v7380_v63 = vld [vmem:[#allocation7 + $0x4c8] sm:$0xff] }
 0x3a9   :  { %9415 = vst [vmem:[#allocation96_spill] sm:$0xff] %v7371_v55 }
 0x3aa   :  { %2716 = vmatpush.msrb.mxu0 %v7365_v52  ;;  %2756 = vmatpush.msrb.mxu2 %v7368_v44  ;;  %9416 = vst [vmem:[#allocation88_spill] sm:$0xff] %v7374_v9  ;;  %v7383_v52 = vld [vmem:[#allocation7 + $0x480] sm:$0xff]  ;;  %v7386_v44 = vld [vmem:[#allocation7 + $0x488] sm:$0xff] }
 0x3ab   :  { %9417 = vst [vmem:[#allocation99_spill] sm:$0xff] %v7377_v38 }
 0x3ac   :  { %2717 = vmatpush.msrb.mxu0 %v7371_v55  ;;  %2757 = vmatpush.msrb.mxu2 %v7374_v9  ;;  %9418 = vst [vmem:[#allocation93_spill] sm:$0xff] %v7380_v63  ;;  %v7389_v55 = vld [vmem:[#allocation7 + $0x440] sm:$0xff]  ;;  %v7392_v9 = vld [vmem:[#allocation7 + $0x448] sm:$0xff] }
 0x3ad   :  { %9419 = vst [vmem:[#allocation102_spill] sm:$0xff] %v7383_v52 }
 0x3ae   :  { %2718 = vmatpush.msrb.mxu0 %v7377_v38  ;;  %2758 = vmatpush.msrb.mxu2 %v7380_v63  ;;  %9420 = vst [vmem:[#allocation95_spill] sm:$0xff] %v7386_v44  ;;  %v7395_v38 = vld [vmem:[#allocation7 + $0x400] sm:$0xff]  ;;  %v7398_v63 = vld [vmem:[#allocation7 + $0x408] sm:$0xff] }
 0x3af   :  { %9421 = vst [vmem:[#allocation104_spill] sm:$0xff] %v7389_v55 }
 0x3b0   :  { %2719 = vmatpush.msrb.mxu0 %v7383_v52  ;;  %2759 = vmatpush.msrb.mxu2 %v7386_v44  ;;  %9422 = vst [vmem:[#allocation97_spill] sm:$0xff] %v7392_v9  ;;  %v7401_v52 = vld [vmem:[#allocation7 + $0x7d0] sm:$0xff]  ;;  %v7404_v44 = vld [vmem:[#allocation7 + $0x7d8] sm:$0xff] }
 0x3b1   :  { %9423 = vst [vmem:[#allocation100_spill] sm:$0xff] %v7395_v38 }
 0x3b2   :  { %2720 = vmatpush.msrb.mxu0 %v7389_v55  ;;  %2760 = vmatpush.msrb.mxu2 %v7392_v9  ;;  %9424 = vst [vmem:[#allocation103_spill] sm:$0xff] %v7398_v63  ;;  %v7407_v55 = vld [vmem:[#allocation7 + $0x790] sm:$0xff]  ;;  %v7410_v9 = vld [vmem:[#allocation7 + $0x798] sm:$0xff] }
 0x3b3   :  { %9425 = vst [vmem:[#allocation109_spill] sm:$0xff] %v7401_v52 }
 0x3b4   :  { %2721 = vmatpush.msrb.mxu0 %v7395_v38  ;;  %2761 = vmatpush.msrb.mxu2 %v7398_v63  ;;  %9426 = vst [vmem:[#allocation106_spill] sm:$0xff] %v7404_v44  ;;  %v7413_v38 = vld [vmem:[#allocation7 + $0x750] sm:$0xff]  ;;  %v7416_v63 = vld [vmem:[#allocation7 + $0x758] sm:$0xff] }
 0x3b5   :  { %9427 = vst [vmem:[#allocation111_spill] sm:$0xff] %v7407_v55 }
 0x3b6   :  { %2786 = vmatpush.msra.mxu0 %v7401_v52  ;;  %2826 = vmatpush.msra.mxu2 %v7404_v44  ;;  %9428 = vst [vmem:[#allocation107_spill] sm:$0xff] %v7410_v9  ;;  %v7419_v52 = vld [vmem:[#allocation7 + $0x710] sm:$0xff]  ;;  %v7422_v44 = vld [vmem:[#allocation7 + $0x718] sm:$0xff] }
 0x3b7   :  { %9429 = vst [vmem:[#allocation110_spill] sm:$0xff] %v7413_v38 }
 0x3b8   :  { %2787 = vmatpush.msra.mxu0 %v7407_v55  ;;  %2827 = vmatpush.msra.mxu2 %v7410_v9  ;;  %9430 = vst [vmem:[#allocation114_spill] sm:$0xff] %v7416_v63  ;;  %v7425_v55 = vld [vmem:[#allocation7 + $0x6d0] sm:$0xff]  ;;  %v7428_v9 = vld [vmem:[#allocation7 + $0x6d8] sm:$0xff] }
 0x3b9   :  { %9431 = vst [vmem:[#allocation115_spill] sm:$0xff] %v7419_v52 }
 0x3ba   :  { %2788 = vmatpush.msra.mxu0 %v7413_v38  ;;  %2828 = vmatpush.msra.mxu2 %v7416_v63  ;;  %9432 = vst [vmem:[#allocation118_spill] sm:$0xff] %v7422_v44  ;;  %v7431_v38 = vld [vmem:[#allocation7 + $0x690] sm:$0xff]  ;;  %v7434_v63 = vld [vmem:[#allocation7 + $0x698] sm:$0xff] }
 0x3bb   :  { %9433 = vst [vmem:[#allocation127_spill] sm:$0xff] %v7425_v55 }
 0x3bc   :  { %2789 = vmatpush.msra.mxu0 %v7419_v52  ;;  %2829 = vmatpush.msra.mxu2 %v7422_v44  ;;  %9434 = vst [vmem:[#allocation122_spill] sm:$0xff] %v7428_v9  ;;  %v9437_v52 = vld [vmem:[#allocation179_spill] sm:$0xff]  ;;  %v9439_v44 = vld [vmem:[#allocation193_spill] sm:$0xff] }
 0x3bd   :  { %9435 = vst [vmem:[#allocation131_spill] sm:$0xff] %v7431_v38 }
 0x3be   :  { %2790 = vmatpush.msra.mxu0 %v7425_v55  ;;  %2830 = vmatpush.msra.mxu2 %v7428_v9  ;;  %9436 = vst [vmem:[#allocation124_spill] sm:$0xff] %v7434_v63  ;;  %v7442_v55 = vld [vmem:[#allocation7 + $0x618] sm:$0xff]  ;;  %v9441_v9 = vld [vmem:[#allocation185_spill] sm:$0xff] }
 0x3bf   :  { %9438 = vst [vmem:[#allocation120_spill] sm:$0xff] %v7438_v31 }
 0x3c0   :  { %2791 = vmatpush.msra.mxu0 %v7431_v38  ;;  %2831 = vmatpush.msra.mxu2 %v7434_v63  ;;  %9440 = vst [vmem:[#allocation129_spill] sm:$0xff] %v7442_v55  ;;  %v9443_v38 = vld [vmem:[#allocation197_spill] sm:$0xff]  ;;  %v7450_v63 = vld [vmem:[#allocation7 + $0x598] sm:$0xff] }
 0x3c1   :  { %9442 = vst [vmem:[#allocation142_spill] sm:$0xff] %v7446_v4 }
 0x3c2   :  { %2792 = vmatpush.msra.mxu0 %v9437_v52  ;;  %2832 = vmatpush.msra.mxu2 %v7438_v31  ;;  %9444 = vst [vmem:[#allocation136_spill] sm:$0xff] %v7450_v63  ;;  %v9445_v52 = vld [vmem:[#allocation191_spill] sm:$0xff]  ;;  %v7454_v31 = vld [vmem:[#allocation7 + $0x558] sm:$0xff] }
 0x3c3   :  { %9446 = vst [vmem:[#allocation139_spill] sm:$0xff] %v7454_v31 }
 0x3c4   :  { %2793 = vmatpush.msra.mxu0 %v9439_v44  ;;  %2833 = vmatpush.msra.mxu2 %v7442_v55  ;;  %v9447_v44 = vld [vmem:[#allocation195_spill] sm:$0xff]  ;;  %v7458_v55 = vld [vmem:[#allocation7 + $0x518] sm:$0xff] }
 0x3c5   :  { %9448 = vst [vmem:[#allocation151_spill] sm:$0xff] %v7458_v55 }
 0x3c6   :  { %2794 = vmatpush.msra.mxu0 %v9441_v9  ;;  %2834 = vmatpush.msra.mxu2 %v7446_v4  ;;  %v9449_v9 = vld [vmem:[#allocation199_spill] sm:$0xff]  ;;  %v7462_v4 = vld [vmem:[#allocation7 + $0x4d8] sm:$0xff] }
 0x3c7   :  { %9450 = vst [vmem:[#allocation134_spill] sm:$0xff] %v7462_v4 }
 0x3c8   :  { %2795 = vmatpush.msra.mxu0 %v9443_v38  ;;  %2835 = vmatpush.msra.mxu2 %v7450_v63  ;;  %v2249_v38 = vpop.f32.mrf.mxu3 }
 0x3ca   :  { %2796 = vmatpush.msra.mxu0 %v9445_v52  ;;  %2836 = vmatpush.msra.mxu2 %v7454_v31  ;;  %v9452_v52 = vld [vmem:[#allocation112_spill] sm:$0xff] }
 0x3cb   :  { %v9454_v31 = vld [vmem:[#allocation16_spill] sm:$0xff] }
 0x3cc   :  { %2797 = vmatpush.msra.mxu0 %v9447_v44  ;;  %2837 = vmatpush.msra.mxu2 %v7458_v55  ;;  %v563_v15 = vadd.f32 %v9454_v31, %v9453_v27 }
 0x3ce   :  { %2798 = vmatpush.msra.mxu0 %v9449_v9  ;;  %2838 = vmatpush.msra.mxu2 %v7462_v4  ;;  %v9457_v9 = vld [vmem:[#allocation123_spill] sm:$0xff] }
 0x3d0   :  { %v2269_v63 = vpop.f32.mrf.mxu0  ;;  %2799 = vmatpush.msra.mxu0 %v9451_v41  ;;  %2839 = vmatpush.msra.mxu2 %v9452_v52  ;;  %v9460_v41 = vld [vmem:[#allocation19_spill] sm:$0xff] }
 0x3d1   :  { %v2270_v44 = vadd.f32 %v2269_v63, %v2249_v38  ;;  %v633_v24 = vadd.f32 %v9460_v41, %v9459_v19  ;;  %v9462_v38 = vld [vmem:[#allocation39_spill] sm:$0xff] }
 0x3d2   :  { %2800 = vmatpush.msra.mxu0 %v9455_v12  ;;  %2840 = vmatpush.msra.mxu2 %v9456_v25  ;;  %v2369_v25 = vpop.f32.mrf.mxu1 }
 0x3d3   :  { %v2552_v55 = vadd.f32 %v2270_v44, %v563_v15  ;;  %v9461_v15 = vld [vmem:[#allocation37_spill] sm:$0xff] }
 0x3d4   :  { %2801 = vmatpush.msra.mxu0 %v9457_v9  ;;  %2841 = vmatpush.msra.mxu2 %v9458_v48  ;;  %v772_v44 = vadd.f32 %v9462_v38, %v9461_v15 }
 0x3d5   :  { %v4094_v4 = vmul.f32 -1.442695, %v2552_v55 }
 0x3d6   :  { %v2309_v46 = vpop.f32.mrf.mxu2 }
 0x3d7   :  { %4198 = vpow2.f32 %v4094_v4  ;;  %v2310_v52 = vadd.f32 %v2309_v46, %v2289_v53  ;;  %v2329_v4 = vpop.f32.mrf.mxu3  ;;  %v9463_v46 = vld [vmem:[#allocation38_spill] sm:$0xff]  ;;  %v9464_v53 = vld [vmem:[#allocation36_spill] sm:$0xff] }
 0x3d8   :  { %v2349_v36 = vpop.f32.mrf.mxu0  ;;  %v703_v41 = vadd.f32 %v9464_v53, %v9463_v46 }
 0x3d9   :  { %v2553_v33 = vadd.f32 %v2310_v52, %v633_v24 }
 0x3db   :  { %v4095_v27 = vmul.f32 -1.442695, %v2553_v33  ;;  %v2350_v33 = vadd.f32 %v2349_v36, %v2329_v4 }
 0x3dd   :  { %v4199_v31 = vpop.eup %4198  ;;  %4200 = vpow2.f32 %v4095_v27  ;;  %v2554_v27 = vadd.f32 %v2350_v33, %v703_v41 }
 0x3de   :  { %v2566_v12 = vadd.f32 1.0, %v4199_v31  ;;  %v2389_v63 = vpop.f32.mrf.mxu2 }
 0x3df   :  { %v2390_v48 = vadd.f32 %v2389_v63, %v2369_v25  ;;  %v2409_v33 = vpop.f32.mrf.mxu3 }
 0x3e0   :  { %4202 = vrcp.f32 %v2566_v12  ;;  %v2579_v38 = vand.u32 2147483648, %v2566_v12  ;;  %vm2573_vm3 = vweird.f32 %v2566_v12 }
 0x3e1   :  { %v2555_v9 = vadd.f32 %v2390_v48, %v772_v44 }
 0x3e2   :  { %v2580_v46 = vor.u32 1.1754944e-38, %v2579_v38 }
 0x3e3   :  { %v4201_v55 = vpop.eup %4200  ;;  %v4096_v28 = vmul.f32 -1.442695, %v2555_v9 }
 0x3e4   :  { %v2567_v54 = vadd.f32 1.0, %v4201_v55  ;;  %v2577_v55 = vand.u32 2147483647, %v2566_v12 }
 0x3e6   :  { %v4203_v19 = vpop.eup %4202  ;;  %4204 = vrcp.f32 %v2567_v54  ;;  %v2594_v9 = vand.u32 2147483648, %v2567_v54  ;;  %vm2588_vm6 = vweird.f32 %v2567_v54  ;;  %vm2578_vm7 = vcmp.eq.f32.partialorder %v2577_v55, 8.507059e+37 }
 0x3e7   :  { %v2569_v24 = vmul.f32 %v4203_v19, %v2566_v12  ;;  %4206 = vpow2.f32 %v4096_v28  ;;  %vm2574_vm2 = vweird.f32 %v4203_v19 }
 0x3e8   :  { %4208 = vtanh.f32 %v2554_v27  ;;  %vm7479_vm4 = vmor %vm2573_vm3, %vm2574_vm2 }
 0x3e9   :  { %v2570_v52 = vsub.f32 1.0, %v2569_v24  ;;  %v2592_v24 = vand.u32 2147483647, %v2567_v54 }
 0x3eb   :  { %v2571_v31 = vmul.f32 %v4203_v19, %v2570_v52  ;;  %v2595_v52 = vor.u32 1.1754944e-38, %v2594_v9  ;;  %vm2593_vm9 = vcmp.eq.f32.partialorder %v2592_v24, 8.507059e+37 }
 0x3ec   :  { %v4205_v42 = vpop.eup %4204 }
 0x3ed   :  { %v4207_v15 = vpop.eup %4206  ;;  %v2584_v63 = vmul.f32 %v4205_v42, %v2567_v54  ;;  %v2572_v25 = vadd.f32 %v4203_v19, %v2571_v31  ;;  %vm2589_vm5 = vweird.f32 %v4205_v42  ;;  %v2449_v54 = vpop.f32.mrf.mxu1 }
 0x3ee   :  { %v2605_v44 = vadd.f32 1.0, %v4207_v15  ;;  %vm2590_vm8 = vmor %vm2588_vm6, %vm2589_vm5  ;;  %v4209_v31 = vpop.eup %4208  ;;  %v9467_v15 = vld [vmem:[#allocation86_spill] sm:$0xff] }
 0x3ef   :  { %v2585_v48 = vsub.f32 1.0, %v2584_v63  ;;  %v2576_v4 = vsel %vm7479_vm4, %v4203_v19, %v2572_v25  ;;  %v9468_v63 = vld [vmem:[#allocation79_spill] sm:$0xff] }
 0x3f0   :  { %4210 = vrcp.f32 %v2605_v44  ;;  %v2581_v27 = vsel %vm2578_vm7, %v2580_v46, %v2576_v4  ;;  %v844_v0 = vadd.f32 %v9468_v63, %v9467_v15  ;;  %v2617_v15 = vand.u32 2147483648, %v2605_v44 }
 0x3f1   :  { %v2586_v36 = vmul.f32 %v4205_v42, %v2585_v48  ;;  %v2429_v53 = vpop.f32.mrf.mxu0  ;;  %v2600_v25 = vmul.f32 %v4209_v31, %v2581_v27  ;;  %vm2611_vm11 = vweird.f32 %v2605_v44 }
 0x3f2   :  { %v2430_v12 = vadd.f32 %v2429_v53, %v2409_v33  ;;  %v9470_v33 = vld [vmem:[#allocation89_spill] sm:$0xff]  ;;  %v2618_v27 = vor.u32 1.1754944e-38, %v2617_v15  ;;  %v7535_v15 = vld [vmem:[#allocation7 + $0x2a0] sm:$0xff] }
 0x3f3   :  { %v2587_v41 = vadd.f32 %v4205_v42, %v2586_v36  ;;  %v9469_v36 = vld [vmem:[#allocation80_spill] sm:$0xff]  ;;  %9475 = vst [vmem:[#allocation167_spill] sm:$0xff] %v7535_v15 }
 0x3f4   :  { %v2556_v59 = vadd.f32 %v2430_v12, %v844_v0  ;;  %v914_v53 = vadd.f32 %v9470_v33, %v9469_v36  ;;  %v7516_v36 = vld [vmem:[#allocation7 + $0x368] sm:$0xff]  ;;  %v7519_v33 = vld [vmem:[#allocation7 + $0x320] sm:$0xff] }
 0x3f5   :  { %v2591_v48 = vsel %vm2590_vm8, %v4205_v42, %v2587_v41  ;;  %9471 = vst [vmem:[#allocation147_spill] sm:$0xff] %v7519_v33 }
 0x3f6   :  { %v4211_v13 = vpop.eup %4210  ;;  %v2596_v28 = vsel %vm2593_vm9, %v2595_v52, %v2591_v48  ;;  %v4097_v24 = vmul.f32 -1.442695, %v2556_v59 }
 0x3f7   :  { %v2598_v19 = vmul.f32 %v2596_v28, %v6864_v43  ;;  %v2607_v38 = vmul.f32 %v4211_v13, %v2605_v44  ;;  %v2469_v55 = vpop.f32.mrf.mxu2  ;;  %vm2612_vm10 = vweird.f32 %v4211_v13  ;;  %v2615_v43 = vand.u32 2147483647, %v2605_v44  ;;  %v7497_v28 = vld [vmem:[#allocation7 + $0x3e0] sm:$0xff]  ;;  %v7500_v44 = vld [vmem:[#allocation7 + $0x3e8] sm:$0xff] }
 0x3f8   :  { %v2470_v46 = vadd.f32 %v2469_v55, %v2449_v54  ;;  %vm2613_vm12 = vmor %vm2611_vm11, %vm2612_vm10  ;;  %v7513_v55 = vld [vmem:[#allocation7 + $0x360] sm:$0xff] }
 0x3f9   :  { %v7490_v9 = vadd.f32 %v2600_v25, %v2598_v19  ;;  %v2608_v4 = vsub.f32 1.0, %v2607_v38  ;;  %vm2616_vm13 = vcmp.eq.f32.partialorder %v2615_v43, 8.507059e+37  ;;  %v7503_v19 = vld [vmem:[#allocation7 + $0x3a0] sm:$0xff]  ;;  %v7506_v25 = vld [vmem:[#allocation7 + $0x3a8] sm:$0xff] }
 0x3fa   :  { %v2557_v41 = vadd.f32 %v2470_v46, %v914_v53  ;;  %v7522_v53 = vld [vmem:[#allocation7 + $0x328] sm:$0xff] }
 0x3fb   :  { %4212 = vtanh.f32 %v7490_v9  ;;  %v2609_v42 = vmul.f32 %v4211_v13, %v2608_v4  ;;  %9472 = vst [vmem:[#allocation149_spill] sm:$0xff] %v7522_v53  ;;  %v7529_v4 = vld [vmem:[#allocation7 + $0x2e0] sm:$0xff]  ;;  %v7532_v46 = vld [vmem:[#allocation7 + $0x2e8] sm:$0xff] }
 0x3fc   :  { %v4098_v0 = vmul.f32 -1.442695, %v2557_v41  ;;  %4214 = vpow2.f32 %v4097_v24  ;;  %9473 = vst [vmem:[#allocation144_spill] sm:$0xff] %v7529_v4  ;;  %v7541_v24 = vld [vmem:[#allocation7 + $0x260] sm:$0xff] }
 0x3fd   :  { %v2610_v52 = vadd.f32 %v4211_v13, %v2609_v42  ;;  %9474 = vst [vmem:[#allocation155_spill] sm:$0xff] %v7532_v46  ;;  %v7538_v42 = vld [vmem:[#allocation7 + $0x2a8] sm:$0xff] }
 0x3fe   :  { %4216 = vpow2.f32 %v4098_v0  ;;  %9476 = vst [vmem:[#allocation161_spill] sm:$0xff] %v7538_v42  ;;  %v7553_v0 = vld [vmem:[#allocation7 + $0x1e0] sm:$0xff] }
 0x3ff   :  { %v2614_v12 = vsel %vm2613_vm12, %v4211_v13, %v2610_v52  ;;  %9477 = vst [vmem:[#allocation153_spill] sm:$0xff] %v7541_v24  ;;  %v7549_v52 = vld [vmem:[#allocation7 + $0x220] sm:$0xff] }
 0x400   :  { %v2619_v63 = vsel %vm2616_vm13, %v2618_v27, %v2614_v12  ;;  %9478 = vst [vmem:[#allocation164_spill] sm:$0xff] %v7549_v52 }
 0x401   :  { %v4213_v31 = vpop.eup %4212  ;;  %9479 = vst [vmem:[#allocation158_spill] sm:$0xff] %v7553_v0 }
 0x402   :  { %v7493_v48 = vmul.f32 %v4213_v31, %v2619_v63  ;;  %v4215_v59 = vpop.eup %4214  ;;  %v2529_v31 = vpop.f32.mrf.mxu1  ;;  %v7561_v63 = vld [vmem:[#allocation7 + $0x1a0] sm:$0xff] }
 0x403   :  { %v7509_v38 = vadd.f32 1.0, %v4215_v59  ;;  %9480 = vst [vmem:[#allocation171_spill] sm:$0xff] %v7561_v63 }
 0x404   :  { %2702 = vmatmul.f32.vlgmr.msra.gmra.mxu3 %v7493_v48  ;;  %2742 = vmatmul.f32.vlgmr.msrb.gmra.mxu1 %v7493_v48  ;;  %v4217_v13 = vpop.eup %4216 }
 0x405   :  { %2846 = vmatpush.msra.mxu3 %v7497_v28  ;;  %2886 = vmatpush.msrb.mxu1 %v7500_v44  ;;  %v7511_v54 = vadd.f32 1.0, %v4217_v13  ;;  %4218 = vrcp.f32 %v7509_v38  ;;  %v9481_v13 = vld [vmem:[#allocation163_spill] sm:$0xff]  ;;  %vm2636_vm0 = vweird.f32 %v7509_v38 }
 0x407   :  { %2847 = vmatpush.msra.mxu3 %v7503_v19  ;;  %2887 = vmatpush.msrb.mxu1 %v7506_v25  ;;  %4220 = vrcp.f32 %v7511_v54  ;;  %vm2651_vm1 = vweird.f32 %v7511_v54 }
 0x409   :  { %2848 = vmatpush.msra.mxu3 %v7513_v55  ;;  %2888 = vmatpush.msrb.mxu1 %v7516_v36 }
 0x40b   :  { %2849 = vmatpush.msra.mxu3 %v7519_v33  ;;  %2889 = vmatpush.msrb.mxu1 %v7522_v53  ;;  %v7545_v41 = vpop.eup %4218  ;;  %v9484_v53 = vld [vmem:[#allocation157_spill] sm:$0xff] }
 0x40c   :  { %2782 = vmatmul.f32.vlgmr.msrb.gmra.mxu3 %v7493_v48  ;;  %2822 = vmatmul.f32.vlgmr.msra.gmra.mxu1 %v7493_v48  ;;  %v2632_v12 = vmul.f32 %v7545_v41, %v7509_v38  ;;  %vm2637_vm14 = vweird.f32 %v7545_v41 }
 0x40d   :  { %2850 = vmatpush.msra.mxu3 %v7529_v4  ;;  %2890 = vmatpush.msrb.mxu1 %v7532_v46  ;;  %v7547_v43 = vpop.eup %4220  ;;  %v9483_v4 = vld [vmem:[#allocation160_spill] sm:$0xff]  ;;  %vm7593_vm2 = vmor %vm2636_vm0, %vm2637_vm14 }
 0x40e   :  { %vm2652_vm15 = vweird.f32 %v7547_v43 }
 0x40f   :  { %2851 = vmatpush.msra.mxu3 %v7535_v15  ;;  %2891 = vmatpush.msrb.mxu1 %v7538_v42  ;;  %v7567_v42 = vld [vmem:[#allocation7 + $0x160] sm:$0xff]  ;;  %v2633_v15 = vsub.f32 1.0, %v2632_v12  ;;  %vm7603_vm3 = vmor %vm2651_vm1, %vm2652_vm15 }
 0x410   :  { %v9494_v12 = vld [vmem:[#allocation143_spill] sm:$0xff] }
 0x411   :  { %2852 = vmatpush.msra.mxu3 %v7541_v24  ;;  %2892 = vmatpush.msrb.mxu1 %v6896_v2  ;;  %v2647_v2 = vmul.f32 %v7547_v43, %v7511_v54  ;;  %v2509_v27 = vpop.f32.mrf.mxu0 }
 0x413   :  { %2853 = vmatpush.msra.mxu3 %v7549_v52  ;;  %2893 = vmatpush.msrb.mxu1 %v6900_v8  ;;  %v2489_v8 = vpop.f32.mrf.mxu3  ;;  %v2648_v46 = vsub.f32 1.0, %v2647_v2  ;;  %v9495_v2 = vld [vmem:[#allocation140_spill] sm:$0xff] }
 0x415   :  { %2854 = vmatpush.msra.mxu3 %v7553_v0  ;;  %2894 = vmatpush.msrb.mxu1 %v6908_v60  ;;  %v9482_v0 = vld [vmem:[#allocation166_spill] sm:$0xff]  ;;  %v2510_v60 = vadd.f32 %v2509_v27, %v2489_v8  ;;  %v2649_v27 = vmul.f32 %v7547_v43, %v2648_v46  ;;  %v7675_v8 = vld [vmem:[#allocation7 + $0x6e0] sm:$0xff] }
 0x416   :  { %v1052_v52 = vadd.f32 %v9482_v0, %v9481_v13  ;;  %v9496_v13 = vld [vmem:[#allocation148_spill] sm:$0xff] }
 0x417   :  { %2855 = vmatpush.msra.mxu3 %v7561_v63  ;;  %2895 = vmatpush.msrb.mxu1 %v6914_v10  ;;  %v2549_v59 = vpop.f32.mrf.mxu2  ;;  %v984_v63 = vadd.f32 %v9484_v53, %v9483_v4 }
 0x418   :  { %v2550_v24 = vadd.f32 %v2549_v59, %v2529_v31  ;;  %v7667_v31 = vld [vmem:[#allocation7 + $0x720] sm:$0xff]  ;;  %v7678_v59 = vld [vmem:[#allocation7 + $0x6e8] sm:$0xff] }
 0x419   :  { %2856 = vmatpush.msra.mxu3 %v7567_v42  ;;  %2896 = vmatpush.msrb.mxu1 %v6920_v35  ;;  %v2558_v10 = vadd.f32 %v2510_v60, %v984_v63  ;;  %v2634_v35 = vmul.f32 %v7545_v41, %v2633_v15  ;;  %v7670_v63 = vld [vmem:[#allocation7 + $0x728] sm:$0xff]  ;;  %v9497_v60 = vld [vmem:[#allocation145_spill] sm:$0xff] }
 0x41a   :  { %v2559_v33 = vadd.f32 %v2550_v24, %v1052_v52  ;;  %v7662_v52 = vld [vmem:[#allocation7 + $0x768] sm:$0xff] }
 0x41b   :  { %2857 = vmatpush.msra.mxu3 %v6923_v21  ;;  %2897 = vmatpush.msrb.mxu1 %v6926_v58  ;;  %v2635_v21 = vadd.f32 %v7545_v41, %v2634_v35  ;;  %v2650_v58 = vadd.f32 %v7547_v43, %v2649_v27  ;;  %v9498_v27 = vld [vmem:[#allocation152_spill] sm:$0xff]  ;;  %v9499_v35 = vld [vmem:[#allocation150_spill] sm:$0xff] }
 0x41c   :  { %v4099_v0 = vmul.f32 -1.442695, %v2559_v33 }
 0x41d   :  { %2858 = vmatpush.msra.mxu3 %v6931_v47  ;;  %2898 = vmatpush.msrb.mxu1 %v6934_v57  ;;  %v2657_v47 = vand.u32 2147483648, %v7511_v54  ;;  %v2642_v57 = vand.u32 2147483648, %v7509_v38 }
 0x41e   :  { %4222 = vpow2.f32 %v4099_v0  ;;  %v7686_v0 = vld [vmem:[#allocation7 + $0x6a8] sm:$0xff] }
 0x41f   :  { %2859 = vmatpush.msra.mxu3 %v6938_v26  ;;  %2899 = vmatpush.msrb.mxu1 %v6941_v37  ;;  %4224 = vtanh.f32 %v2558_v10  ;;  %v2640_v37 = vand.u32 2147483647, %v7509_v38  ;;  %v2654_v38 = vsel %vm7603_vm3, %v7547_v43, %v2650_v58  ;;  %v2658_v53 = vor.u32 1.1754944e-38, %v2657_v47  ;;  %v7659_v43 = vld [vmem:[#allocation7 + $0x760] sm:$0xff]  ;;  %v7696_v58 = vld [vmem:[#allocation7 + $0x668] sm:$0xff] }
 0x420   :  { %v2643_v4 = vor.u32 1.1754944e-38, %v2642_v57  ;;  %v7683_v10 = vld [vmem:[#allocation7 + $0x6a0] sm:$0xff]  ;;  %v9500_v47 = vld [vmem:[#allocation156_spill] sm:$0xff]  ;;  %v9501_v57 = vld [vmem:[#allocation154_spill] sm:$0xff] }
 0x421   :  { %2860 = vmatpush.msra.mxu3 %v6950_v30  ;;  %2900 = vmatpush.msrb.mxu1 %v6953_v49  ;;  %v2655_v30 = vand.u32 2147483647, %v7511_v54  ;;  %vm2641_vm4 = vcmp.eq.f32.partialorder %v2640_v37, 8.507059e+37  ;;  %v7701_v26 = vld [vmem:[#allocation7 + $0x620] sm:$0xff]  ;;  %v7704_v37 = vld [vmem:[#allocation7 + $0x628] sm:$0xff] }
 0x423   :  { %2861 = vmatpush.msra.mxu3 %v6971_v17  ;;  %2901 = vmatpush.msrb.mxu1 %v6974_v16  ;;  %v2639_v16 = vsel %vm7593_vm2, %v7545_v41, %v2635_v21  ;;  %vm2656_vm5 = vcmp.eq.f32.partialorder %v2655_v30, 8.507059e+37  ;;  %v9493_v41 = vld [vmem:[#allocation135_spill] sm:$0xff]  ;;  %v7712_v17 = vld [vmem:[#allocation7 + $0x5e8] sm:$0xff] }
 0x424   :  { %2862 = vmatmul.f32.vlgmr.msra.gmra.mxu3 %v7493_v48  ;;  %2902 = vmatmul.f32.vlgmr.msrb.gmra.mxu1 %v7493_v48  ;;  %v4223_v49 = vpop.eup %4222  ;;  %v7693_v21 = vld [vmem:[#allocation7 + $0x660] sm:$0xff] }
 0x425   :  { %2926 = vmatpush.msrb.mxu3 %v6985_v29  ;;  %2966 = vmatpush.msra.mxu1 %v6988_v22  ;;  %v2668_v54 = vadd.f32 1.0, %v4223_v49  ;;  %v4225_v33 = vpop.eup %4224  ;;  %v2644_v29 = vsel %vm2641_vm4, %v2643_v4, %v2639_v16  ;;  %v2659_v22 = vsel %vm2656_vm5, %v2658_v53, %v2654_v38  ;;  %v9503_v30 = vld [vmem:[#allocation159_spill] sm:$0xff]  ;;  %v9504_v16 = vld [vmem:[#allocation169_spill] sm:$0xff]  ;;  %v9507_v4 = vld [vmem:[#allocation170_spill] sm:$0xff] }
 0x426   :  { %v2663_v46 = vmul.f32 %v4225_v33, %v2644_v29  ;;  %v2661_v15 = vmul.f32 %v2659_v22, %v7010_v7  ;;  %v7709_v49 = vld [vmem:[#allocation7 + $0x5e0] sm:$0xff]  ;;  %v9505_v38 = vld [vmem:[#allocation165_spill] sm:$0xff]  ;;  %v7720_v33 = vld [vmem:[#allocation7 + $0x5a8] sm:$0xff] }
 0x427   :  { %2927 = vmatpush.msrb.mxu3 %v6991_v32  ;;  %2967 = vmatpush.msra.mxu1 %v6994_v6  ;;  %4226 = vrcp.f32 %v2668_v54  ;;  %vm2674_vm7 = vweird.f32 %v2668_v54  ;;  %v9506_v53 = vld [vmem:[#allocation173_spill] sm:$0xff]  ;;  %v7725_v29 = vld [vmem:[#allocation7 + $0x560] sm:$0xff]  ;;  %v7728_v22 = vld [vmem:[#allocation7 + $0x568] sm:$0xff] }
 0x428   :  { %v7624_v6 = vadd.f32 %v2663_v46, %v2661_v15  ;;  %v9508_v46 = vld [vmem:[#allocation178_spill] sm:$0xff] }
 0x429   :  { %2928 = vmatpush.msrb.mxu3 %v6997_v62  ;;  %2968 = vmatpush.msra.mxu1 %v7000_v39  ;;  %v2680_v39 = vand.u32 2147483648, %v2668_v54  ;;  %v9509_v15 = vld [vmem:[#allocation174_spill] sm:$0xff] }
 0x42a   :  { %4228 = vtanh.f32 %v7624_v6 }
 0x42b   :  { %2929 = vmatpush.msrb.mxu3 %v7004_v61  ;;  %2969 = vmatpush.msra.mxu1 %v7007_v18  ;;  %v2678_v18 = vand.u32 2147483647, %v2668_v54 }
 0x42d   :  { %2930 = vmatpush.msrb.mxu3 %v7012_v3  ;;  %2970 = vmatpush.msra.mxu1 %v7015_v20  ;;  %v4227_v32 = vpop.eup %4226  ;;  %v2681_v3 = vor.u32 1.1754944e-38, %v2680_v39  ;;  %vm2679_vm9 = vcmp.eq.f32.partialorder %v2678_v18, 8.507059e+37  ;;  %v9511_v39 = vld [vmem:[#allocation184_spill] sm:$0xff] }
 0x42e   :  { %v2670_v24 = vmul.f32 %v4227_v32, %v2668_v54  ;;  %vm2675_vm6 = vweird.f32 %v4227_v32  ;;  %v7717_v54 = vld [vmem:[#allocation7 + $0x5a0] sm:$0xff]  ;;  %v7744_v18 = vld [vmem:[#allocation7 + $0x4e8] sm:$0xff] }
 0x42f   :  { %2931 = vmatpush.msrb.mxu3 %v7018_v51  ;;  %2971 = vmatpush.msra.mxu1 %v7021_v45  ;;  %vm2676_vm8 = vmor %vm2674_vm7, %vm2675_vm6 }
 0x430   :  { %v2671_v62 = vsub.f32 1.0, %v2670_v24  ;;  %v4229_v51 = vpop.eup %4228  ;;  %v7736_v24 = vld [vmem:[#allocation7 + $0x528] sm:$0xff] }
 0x431   :  { %2932 = vmatpush.msrb.mxu3 %v7025_v1  ;;  %2972 = vmatpush.msra.mxu1 %v7028_v56  ;;  %v9489_v56 = vld [vmem:[#allocation125_spill] sm:$0xff] }
 0x432   :  { %v2672_v61 = vmul.f32 %v4227_v32, %v2671_v62  ;;  %v9510_v62 = vld [vmem:[#allocation180_spill] sm:$0xff] }
 0x433   :  { %2933 = vmatpush.msrb.mxu3 %v7031_v14  ;;  %2973 = vmatpush.msra.mxu1 %v7034_v34  ;;  %v7643_v14 = vld [vmem:[#allocation7 + $0x7e0] sm:$0xff]  ;;  %v7646_v34 = vld [vmem:[#allocation7 + $0x7e8] sm:$0xff] }
 0x434   :  { %v2673_v7 = vadd.f32 %v4227_v32, %v2672_v61  ;;  %v7741_v61 = vld [vmem:[#allocation7 + $0x4e0] sm:$0xff] }
 0x435   :  { %2934 = vmatpush.msrb.mxu3 %v7037_v23  ;;  %2974 = vmatpush.msra.mxu1 %v7040_v5  ;;  %v9490_v23 = vld [vmem:[#allocation132_spill] sm:$0xff]  ;;  %v9491_v5 = vld [vmem:[#allocation130_spill] sm:$0xff] }
 0x436   :  { %v2677_v20 = vsel %vm2676_vm8, %v4227_v32, %v2673_v7  ;;  %v7733_v32 = vld [vmem:[#allocation7 + $0x520] sm:$0xff]  ;;  %v9512_v7 = vld [vmem:[#allocation186_spill] sm:$0xff] }
 0x437   :  { %2935 = vmatpush.msrb.mxu3 %v7045_v11  ;;  %2975 = vmatpush.msra.mxu1 %v7048_v50  ;;  %v2682_v45 = vsel %vm2679_vm9, %v2681_v3, %v2677_v20  ;;  %v7651_v11 = vld [vmem:[#allocation7 + $0x7a0] sm:$0xff]  ;;  %v7654_v50 = vld [vmem:[#allocation7 + $0x7a8] sm:$0xff]  ;;  %v9513_v3 = vld [vmem:[#allocation190_spill] sm:$0xff] }
 0x438   :  { %v7637_v1 = vmul.f32 %v4229_v51, %v2682_v45  ;;  %v7749_v20 = vld [vmem:[#allocation7 + $0x4a0] sm:$0xff]  ;;  %v7752_v51 = vld [vmem:[#allocation7 + $0x4a8] sm:$0xff] }
 0x439   :  { %2936 = vmatpush.msrb.mxu3 %v7055_v40  ;;  %2976 = vmatpush.msra.mxu1 %v9489_v56  ;;  %v9492_v40 = vld [vmem:[#allocation137_spill] sm:$0xff]  ;;  %9514 = vst [vmem:[#allocation177_spill] sm:$0xff] %v7752_v51  ;;  %v9515_v45 = vld [vmem:[#allocation192_spill] sm:$0xff]  ;;  %v9516_v56 = vld [vmem:[#allocation194_spill] sm:$0xff] }
 0x43a   :  { %2722 = vmatmul.f32.vlgmr.msrb.gmra.mxu0 %v7637_v1  ;;  %2762 = vmatmul.f32.vlgmr.msrb.gmra.mxu2 %v7637_v1 }
 0x43b   :  { %2866 = vmatpush.msrb.mxu0 %v7643_v14  ;;  %2906 = vmatpush.msrb.mxu2 %v7646_v34 }
 0x43c   :  { %2937 = vmatpush.msrb.mxu3 %v9490_v23  ;;  %2977 = vmatpush.msra.mxu1 %v9491_v5  ;;  %v7757_v23 = vld [vmem:[#allocation7 + $0x460] sm:$0xff]  ;;  %v7760_v5 = vld [vmem:[#allocation7 + $0x468] sm:$0xff] }
 0x43d   :  { %2867 = vmatpush.msrb.mxu0 %v7651_v11  ;;  %2907 = vmatpush.msrb.mxu2 %v7654_v50  ;;  %9517 = vst [vmem:[#allocation175_spill] sm:$0xff] %v7757_v23 }
 0x43e   :  { %2938 = vmatpush.msrb.mxu3 %v9492_v40  ;;  %2978 = vmatpush.msra.mxu1 %v9493_v41  ;;  %9518 = vst [vmem:[#allocation168_spill] sm:$0xff] %v7760_v5  ;;  %v9519_v40 = vld [vmem:[#allocation196_spill] sm:$0xff]  ;;  %v9520_v41 = vld [vmem:[#allocation198_spill] sm:$0xff] }
 0x43f   :  { %2868 = vmatpush.msrb.mxu0 %v7659_v43  ;;  %2908 = vmatpush.msrb.mxu2 %v7662_v52 }
 0x440   :  { %2939 = vmatpush.msrb.mxu3 %v9494_v12  ;;  %2979 = vmatpush.msra.mxu1 %v9495_v2  ;;  %v7765_v12 = vld [vmem:[#allocation7 + $0x420] sm:$0xff]  ;;  %v7768_v2 = vld [vmem:[#allocation7 + $0x428] sm:$0xff] }
 0x441   :  { %2869 = vmatpush.msrb.mxu0 %v7667_v31  ;;  %2909 = vmatpush.msrb.mxu2 %v7670_v63  ;;  %9521 = vst [vmem:[#allocation172_spill] sm:$0xff] %v7765_v12 }
 0x442   :  { %2802 = vmatmul.f32.vlgmr.msra.gmra.mxu0 %v7637_v1  ;;  %2842 = vmatmul.f32.vlgmr.msra.gmra.mxu2 %v7637_v1  ;;  %9522 = vst [vmem:[#allocation183_spill] sm:$0xff] %v7768_v2 }
 0x443   :  { %2870 = vmatpush.msrb.mxu0 %v7675_v8  ;;  %2910 = vmatpush.msrb.mxu2 %v7678_v59 }
 0x444   :  { %2940 = vmatpush.msrb.mxu3 %v9496_v13  ;;  %2980 = vmatpush.msra.mxu1 %v9497_v60  ;;  %v7773_v13 = vld [vmem:[#allocation7 + $0x7f0] sm:$0xff]  ;;  %v7776_v60 = vld [vmem:[#allocation7 + $0x7f8] sm:$0xff] }
 0x445   :  { %2871 = vmatpush.msrb.mxu0 %v7683_v10  ;;  %2911 = vmatpush.msrb.mxu2 %v7686_v0  ;;  %9523 = vst [vmem:[#allocation176_spill] sm:$0xff] %v7773_v13 }
 0x446   :  { %2941 = vmatpush.msrb.mxu3 %v9498_v27  ;;  %2981 = vmatpush.msra.mxu1 %v9499_v35  ;;  %9524 = vst [vmem:[#allocation189_spill] sm:$0xff] %v7776_v60  ;;  %v9525_v27 = vld [vmem:[#allocation200_spill] sm:$0xff]  ;;  %v9526_v35 = vld [vmem:[#allocation201_spill] sm:$0xff] }
 0x447   :  { %2942 = vmatmul.f32.vlgmr.msrb.gmra.mxu3 %v7493_v48  ;;  %2982 = vmatmul.f32.vlgmr.msra.gmra.mxu1 %v7493_v48  ;;  %v9502_v48 = vld [vmem:[#allocation162_spill] sm:$0xff] }
 0x448   :  { %2872 = vmatpush.msrb.mxu0 %v7693_v21  ;;  %2912 = vmatpush.msrb.mxu2 %v7696_v58 }
 0x449   :  { %3140 = vmatpush.msra.mxu3 %v9500_v47  ;;  %3180 = vmatpush.msrb.mxu1 %v9501_v57  ;;  %v7781_v47 = vld [vmem:[#allocation7 + $0x7b0] sm:$0xff]  ;;  %v7784_v57 = vld [vmem:[#allocation7 + $0x7b8] sm:$0xff] }
 0x44a   :  { %2873 = vmatpush.msrb.mxu0 %v7701_v26  ;;  %2913 = vmatpush.msrb.mxu2 %v7704_v37  ;;  %9527 = vst [vmem:[#allocation179_spill] sm:$0xff] %v7781_v47 }
 0x44b   :  { %3141 = vmatpush.msra.mxu3 %v9502_v48  ;;  %3181 = vmatpush.msrb.mxu1 %v9503_v30  ;;  %9528 = vst [vmem:[#allocation193_spill] sm:$0xff] %v7784_v57  ;;  %v9529_v48 = vld [vmem:[#allocation203_spill] sm:$0xff]  ;;  %v9530_v30 = vld [vmem:[#allocation14_spill] sm:$0xff] }
 0x44c   :  { %2874 = vmatpush.msrb.mxu0 %v7709_v49  ;;  %2914 = vmatpush.msrb.mxu2 %v7712_v17 }
 0x44d   :  { %3142 = vmatpush.msra.mxu3 %v9504_v16  ;;  %3182 = vmatpush.msrb.mxu1 %v9505_v38  ;;  %v7789_v16 = vld [vmem:[#allocation7 + $0x770] sm:$0xff]  ;;  %v7792_v38 = vld [vmem:[#allocation7 + $0x778] sm:$0xff] }
 0x44e   :  { %2875 = vmatpush.msrb.mxu0 %v7717_v54  ;;  %2915 = vmatpush.msrb.mxu2 %v7720_v33  ;;  %9531 = vst [vmem:[#allocation185_spill] sm:$0xff] %v7789_v16 }
 0x44f   :  { %3143 = vmatpush.msra.mxu3 %v9506_v53  ;;  %3183 = vmatpush.msrb.mxu1 %v9507_v4  ;;  %9532 = vst [vmem:[#allocation197_spill] sm:$0xff] %v7792_v38  ;;  %v9533_v53 = vld [vmem:[#allocation12_spill] sm:$0xff]  ;;  %v9534_v4 = vld [vmem:[#allocation13_spill] sm:$0xff] }
 0x450   :  { %2876 = vmatpush.msrb.mxu0 %v7725_v29  ;;  %2916 = vmatpush.msrb.mxu2 %v7728_v22 }
 0x451   :  { %3144 = vmatpush.msra.mxu3 %v9508_v46  ;;  %3184 = vmatpush.msrb.mxu1 %v9509_v15  ;;  %v7797_v46 = vld [vmem:[#allocation7 + $0x730] sm:$0xff]  ;;  %v7800_v15 = vld [vmem:[#allocation7 + $0x738] sm:$0xff] }
 0x452   :  { %2877 = vmatpush.msrb.mxu0 %v7733_v32  ;;  %2917 = vmatpush.msrb.mxu2 %v7736_v24  ;;  %9535 = vst [vmem:[#allocation191_spill] sm:$0xff] %v7797_v46 }
 0x453   :  { %3145 = vmatpush.msra.mxu3 %v9510_v62  ;;  %3185 = vmatpush.msrb.mxu1 %v9511_v39  ;;  %9536 = vst [vmem:[#allocation195_spill] sm:$0xff] %v7800_v15  ;;  %v9537_v62 = vld [vmem:[#allocation15_spill] sm:$0xff]  ;;  %v9538_v39 = vld [vmem:[#allocation33_spill] sm:$0xff] }
 0x454   :  { %2878 = vmatpush.msrb.mxu0 %v7741_v61  ;;  %2918 = vmatpush.msrb.mxu2 %v7744_v18 }
 0x455   :  { %3146 = vmatpush.msra.mxu3 %v9512_v7  ;;  %3186 = vmatpush.msrb.mxu1 %v9513_v3  ;;  %v7805_v7 = vld [vmem:[#allocation7 + $0x6f0] sm:$0xff]  ;;  %v7808_v3 = vld [vmem:[#allocation7 + $0x6f8] sm:$0xff] }
 0x456   :  { %2879 = vmatpush.msrb.mxu0 %v7749_v20  ;;  %2919 = vmatpush.msrb.mxu2 %v7752_v51  ;;  %9539 = vst [vmem:[#allocation199_spill] sm:$0xff] %v7805_v7 }
 0x457   :  { %3147 = vmatpush.msra.mxu3 %v9515_v45  ;;  %3187 = vmatpush.msrb.mxu1 %v9516_v56  ;;  %9540 = vst [vmem:[#allocation202_spill] sm:$0xff] %v7808_v3  ;;  %v9541_v45 = vld [vmem:[#allocation35_spill] sm:$0xff]  ;;  %v9542_v56 = vld [vmem:[#allocation34_spill] sm:$0xff] }
 0x458   :  { %2880 = vmatpush.msrb.mxu0 %v7757_v23  ;;  %2920 = vmatpush.msrb.mxu2 %v7760_v5 }
 0x459   :  { %3148 = vmatpush.msra.mxu3 %v9519_v40  ;;  %3188 = vmatpush.msrb.mxu1 %v9520_v41  ;;  %v7813_v40 = vld [vmem:[#allocation7 + $0x6b0] sm:$0xff]  ;;  %v7816_v41 = vld [vmem:[#allocation7 + $0x6b8] sm:$0xff] }
 0x45a   :  { %2881 = vmatpush.msrb.mxu0 %v7765_v12  ;;  %2921 = vmatpush.msrb.mxu2 %v7768_v2  ;;  %9543 = vst [vmem:[#allocation112_spill] sm:$0xff] %v7813_v40 }
 0x45b   :  { %2882 = vmatmul.f32.vlgmr.msrb.gmra.mxu0 %v7637_v1  ;;  %2922 = vmatmul.f32.vlgmr.msrb.gmra.mxu2 %v7637_v1  ;;  %9544 = vst [vmem:[#allocation18_spill] sm:$0xff] %v7816_v41 }
 0x45c   :  { %2946 = vmatpush.msra.mxu0 %v7773_v13  ;;  %2986 = vmatpush.msra.mxu2 %v7776_v60 }
 0x45d   :  { %3149 = vmatpush.msra.mxu3 %v9525_v27  ;;  %3189 = vmatpush.msrb.mxu1 %v9526_v35  ;;  %v9545_v27 = vld [vmem:[#allocation32_spill] sm:$0xff]  ;;  %v9546_v35 = vld [vmem:[#allocation98_spill] sm:$0xff] }
 0x45e   :  { %2947 = vmatpush.msra.mxu0 %v7781_v47  ;;  %2987 = vmatpush.msra.mxu2 %v7784_v57 }
 0x45f   :  { %3150 = vmatpush.msra.mxu3 %v9529_v48  ;;  %3190 = vmatpush.msrb.mxu1 %v9530_v30  ;;  %v7821_v48 = vld [vmem:[#allocation7 + $0x670] sm:$0xff]  ;;  %v7824_v30 = vld [vmem:[#allocation7 + $0x678] sm:$0xff] }
 0x460   :  { %2948 = vmatpush.msra.mxu0 %v7789_v16  ;;  %2988 = vmatpush.msra.mxu2 %v7792_v38  ;;  %9547 = vst [vmem:[#allocation16_spill] sm:$0xff] %v7821_v48  ;;  %v9656_v38 = vld [vmem:[#allocation43_spill] sm:$0xff] }
 0x461   :  { %3151 = vmatpush.msra.mxu3 %v9533_v53  ;;  %3191 = vmatpush.msrb.mxu1 %v9534_v4  ;;  %9548 = vst [vmem:[#allocation116_spill] sm:$0xff] %v7824_v30  ;;  %v9549_v53 = vld [vmem:[#allocation91_spill] sm:$0xff]  ;;  %v9550_v4 = vld [vmem:[#allocation92_spill] sm:$0xff] }
 0x462   :  { %2949 = vmatpush.msra.mxu0 %v7797_v46  ;;  %2989 = vmatpush.msra.mxu2 %v7800_v15  ;;  %v9654_v15 = vld [vmem:[#allocation23_spill] sm:$0xff]  ;;  %v9655_v46 = vld [vmem:[#allocation41_spill] sm:$0xff] }
 0x463   :  { %3152 = vmatpush.msra.mxu3 %v9537_v62  ;;  %3192 = vmatpush.msrb.mxu1 %v9538_v39  ;;  %v7829_v62 = vld [vmem:[#allocation7 + $0x630] sm:$0xff]  ;;  %v7832_v39 = vld [vmem:[#allocation7 + $0x638] sm:$0xff] }
 0x464   :  { %2950 = vmatpush.msra.mxu0 %v7805_v7  ;;  %2990 = vmatpush.msra.mxu2 %v7808_v3  ;;  %9551 = vst [vmem:[#allocation119_spill] sm:$0xff] %v7829_v62  ;;  %v9653_v7 = vld [vmem:[#allocation21_spill] sm:$0xff] }
 0x465   :  { %3153 = vmatpush.msra.mxu3 %v9541_v45  ;;  %3193 = vmatpush.msrb.mxu1 %v9542_v56  ;;  %9552 = vst [vmem:[#allocation123_spill] sm:$0xff] %v7832_v39  ;;  %v9553_v45 = vld [vmem:[#allocation101_spill] sm:$0xff]  ;;  %v9554_v56 = vld [vmem:[#allocation187_spill] sm:$0xff] }
 0x466   :  { %2951 = vmatpush.msra.mxu0 %v7813_v40  ;;  %2991 = vmatpush.msra.mxu2 %v7816_v41  ;;  %v8009_v41 = vld [vmem:[#allocation7 + $0x450] sm:$0xff] }
 0x467   :  { %3154 = vmatpush.msra.mxu3 %v9545_v27  ;;  %3194 = vmatpush.msrb.mxu1 %v9546_v35  ;;  %v7837_v27 = vld [vmem:[#allocation7 + $0x5f0] sm:$0xff]  ;;  %v7840_v35 = vld [vmem:[#allocation7 + $0x5f8] sm:$0xff]  ;;  %9651 = vst [vmem:[#allocation184_spill] sm:$0xff] %v8009_v41 }
 0x468   :  { %2952 = vmatpush.msra.mxu0 %v7821_v48  ;;  %2992 = vmatpush.msra.mxu2 %v7824_v30  ;;  %9555 = vst [vmem:[#allocation128_spill] sm:$0xff] %v7837_v27  ;;  %v9607_v30 = vld [vmem:[#allocation81_spill] sm:$0xff]  ;;  %v9612_v48 = vld [vmem:[#allocation96_spill] sm:$0xff] }
 0x469   :  { %3155 = vmatpush.msra.mxu3 %v9549_v53  ;;  %3195 = vmatpush.msrb.mxu1 %v9550_v4  ;;  %9556 = vst [vmem:[#allocation17_spill] sm:$0xff] %v7840_v35  ;;  %v9557_v53 = vld [vmem:[#allocation188_spill] sm:$0xff]  ;;  %v9558_v4 = vld [vmem:[#allocation182_spill] sm:$0xff] }
 0x46a   :  { %2953 = vmatpush.msra.mxu0 %v7829_v62  ;;  %2993 = vmatpush.msra.mxu2 %v7832_v39  ;;  %v7845_v62 = vld [vmem:[#allocation7 + $0x5b0] sm:$0xff]  ;;  %v7848_v39 = vld [vmem:[#allocation7 + $0x5b8] sm:$0xff] }
 0x46b   :  { %3220 = vmatpush.msrb.mxu3 %v9553_v45  ;;  %3260 = vmatpush.msra.mxu1 %v9554_v56  ;;  %9559 = vst [vmem:[#allocation19_spill] sm:$0xff] %v7845_v62  ;;  %v9561_v45 = vld [vmem:[#allocation181_spill] sm:$0xff]  ;;  %v9562_v56 = vld [vmem:[#allocation52_spill] sm:$0xff] }
 0x46c   :  { %2954 = vmatpush.msra.mxu0 %v7837_v27  ;;  %2994 = vmatpush.msra.mxu2 %v7840_v35  ;;  %9560 = vst [vmem:[#allocation37_spill] sm:$0xff] %v7848_v39  ;;  %v7853_v27 = vld [vmem:[#allocation7 + $0x570] sm:$0xff]  ;;  %v7856_v35 = vld [vmem:[#allocation7 + $0x578] sm:$0xff] }
 0x46d   :  { %3221 = vmatpush.msrb.mxu3 %v9557_v53  ;;  %3261 = vmatpush.msra.mxu1 %v9558_v4  ;;  %9563 = vst [vmem:[#allocation39_spill] sm:$0xff] %v7853_v27  ;;  %v9565_v53 = vld [vmem:[#allocation60_spill] sm:$0xff]  ;;  %v9566_v4 = vld [vmem:[#allocation53_spill] sm:$0xff] }
 0x46e   :  { %2955 = vmatpush.msra.mxu0 %v7845_v62  ;;  %2995 = vmatpush.msra.mxu2 %v7848_v39  ;;  %9564 = vst [vmem:[#allocation38_spill] sm:$0xff] %v7856_v35  ;;  %v7861_v62 = vld [vmem:[#allocation7 + $0x530] sm:$0xff]  ;;  %v7864_v39 = vld [vmem:[#allocation7 + $0x538] sm:$0xff] }
 0x46f   :  { %3222 = vmatpush.msrb.mxu3 %v9561_v45  ;;  %3262 = vmatpush.msra.mxu1 %v9562_v56  ;;  %9567 = vst [vmem:[#allocation36_spill] sm:$0xff] %v7861_v62  ;;  %v9569_v45 = vld [vmem:[#allocation62_spill] sm:$0xff]  ;;  %v9570_v56 = vld [vmem:[#allocation55_spill] sm:$0xff] }
 0x470   :  { %2956 = vmatpush.msra.mxu0 %v7853_v27  ;;  %2996 = vmatpush.msra.mxu2 %v7856_v35  ;;  %9568 = vst [vmem:[#allocation86_spill] sm:$0xff] %v7864_v39  ;;  %v7869_v27 = vld [vmem:[#allocation7 + $0x4f0] sm:$0xff]  ;;  %v7872_v35 = vld [vmem:[#allocation7 + $0x4f8] sm:$0xff] }
 0x471   :  { %3223 = vmatpush.msrb.mxu3 %v9565_v53  ;;  %3263 = vmatpush.msra.mxu1 %v9566_v4  ;;  %9571 = vst [vmem:[#allocation79_spill] sm:$0xff] %v7869_v27  ;;  %v9573_v53 = vld [vmem:[#allocation66_spill] sm:$0xff] }
 0x472   :  { %2957 = vmatpush.msra.mxu0 %v7861_v62  ;;  %2997 = vmatpush.msra.mxu2 %v7864_v39  ;;  %9572 = vst [vmem:[#allocation80_spill] sm:$0xff] %v7872_v35  ;;  %v4742_v4 = vld [vmem:[#allocation7 + $0x298] sm:$0xff]  ;;  %v7876_v62 = vld [vmem:[#allocation7 + $0x4b0] sm:$0xff] }
 0x473   :  { %3224 = vmatpush.msrb.mxu3 %v9569_v45  ;;  %3264 = vmatpush.msra.mxu1 %v9570_v56  ;;  %9574 = vst [vmem:[#allocation89_spill] sm:$0xff] %v7876_v62  ;;  %v7879_v39 = vld [vmem:[#allocation7 + $0x4b8] sm:$0xff]  ;;  %v9576_v45 = vld [vmem:[#allocation59_spill] sm:$0xff] }
 0x474   :  { %2958 = vmatpush.msra.mxu0 %v7869_v27  ;;  %2998 = vmatpush.msra.mxu2 %v7872_v35  ;;  %9575 = vst [vmem:[#allocation163_spill] sm:$0xff] %v7879_v39  ;;  %v4745_v56 = vld [vmem:[#allocation7 + $0x258] sm:$0xff]  ;;  %v7883_v27 = vld [vmem:[#allocation7 + $0x470] sm:$0xff] }
 0x475   :  { %3225 = vmatpush.msrb.mxu3 %v9573_v53  ;;  %3265 = vmatpush.msra.mxu1 %v4742_v4  ;;  %9577 = vst [vmem:[#allocation166_spill] sm:$0xff] %v7883_v27  ;;  %v7886_v35 = vld [vmem:[#allocation7 + $0x478] sm:$0xff] }
 0x476   :  { %2959 = vmatpush.msra.mxu0 %v7876_v62  ;;  %2999 = vmatpush.msra.mxu2 %v7879_v39  ;;  %9578 = vst [vmem:[#allocation160_spill] sm:$0xff] %v7886_v35  ;;  %v9579_v53 = vld [vmem:[#allocation70_spill] sm:$0xff]  ;;  %v7890_v62 = vld [vmem:[#allocation7 + $0x430] sm:$0xff] }
 0x477   :  { %3226 = vmatpush.msrb.mxu3 %v9576_v45  ;;  %3266 = vmatpush.msra.mxu1 %v4745_v56  ;;  %v4748_v4 = vld [vmem:[#allocation7 + $0x218] sm:$0xff]  ;;  %9580 = vst [vmem:[#allocation157_spill] sm:$0xff] %v7890_v62  ;;  %v9582_v45 = vld [vmem:[#allocation61_spill] sm:$0xff] }
 0x478   :  { %2960 = vmatpush.msra.mxu0 %v7883_v27  ;;  %3000 = vmatpush.msra.mxu2 %v7886_v35  ;;  %v7893_v39 = vld [vmem:[#allocation7 + $0x438] sm:$0xff]  ;;  %v7899_v35 = vld [vmem:[#allocation7 + $0x7c0] sm:$0xff]  ;;  %v7938_v27 = vld [vmem:[#allocation7 + $0x50] sm:$0xff] }
 0x479   :  { %3227 = vmatpush.msrb.mxu3 %v9579_v53  ;;  %3267 = vmatpush.msra.mxu1 %v4748_v4  ;;  %9581 = vst [vmem:[#allocation125_spill] sm:$0xff] %v7893_v39  ;;  %v4751_v56 = vld [vmem:[#allocation7 + $0x1d8] sm:$0xff]  ;;  %v7902_v53 = vld [vmem:[#allocation7 + $0x7c8] sm:$0xff]  ;;  %v7905_v4 = vld [vmem:[#allocation7 + $0x190] sm:$0xff] }
 0x47a   :  { %2961 = vmatpush.msra.mxu0 %v7890_v62  ;;  %3001 = vmatpush.msra.mxu2 %v7893_v39  ;;  %9583 = vst [vmem:[#allocation132_spill] sm:$0xff] %v7899_v35  ;;  %v4755_v39 = vld [vmem:[#allocation7 + $0x198] sm:$0xff]  ;;  %v9586_v62 = vld [vmem:[#allocation72_spill] sm:$0xff] }
 0x47b   :  { %2962 = vmatmul.f32.vlgmr.msra.gmra.mxu0 %v7637_v1  ;;  %3002 = vmatmul.f32.vlgmr.msra.gmra.mxu2 %v7637_v1  ;;  %9584 = vst [vmem:[#allocation130_spill] sm:$0xff] %v7902_v53  ;;  %v7909_v1 = vld [vmem:[#allocation7 + $0x788] sm:$0xff] }
 0x47c   :  { %3228 = vmatpush.msrb.mxu3 %v9582_v45  ;;  %3268 = vmatpush.msra.mxu1 %v4751_v56  ;;  %9585 = vst [vmem:[#allocation137_spill] sm:$0xff] %v7905_v4  ;;  %v7912_v45 = vld [vmem:[#allocation7 + $0x150] sm:$0xff]  ;;  %v4758_v56 = vld [vmem:[#allocation7 + $0x158] sm:$0xff] }
 0x47d   :  { %3160 = vmatpush.msrb.mxu0 %v7899_v35  ;;  %3200 = vmatpush.msrb.mxu2 %v7902_v53  ;;  %9587 = vst [vmem:[#allocation135_spill] sm:$0xff] %v7909_v1  ;;  %v9589_v35 = vld [vmem:[#allocation64_spill] sm:$0xff] }
 0x47e   :  { %3229 = vmatpush.msrb.mxu3 %v7905_v4  ;;  %3269 = vmatpush.msra.mxu1 %v4755_v39  ;;  %9588 = vst [vmem:[#allocation143_spill] sm:$0xff] %v7912_v45  ;;  %v7916_v53 = vld [vmem:[#allocation7 + $0x748] sm:$0xff]  ;;  %v7919_v4 = vld [vmem:[#allocation7 + $0x110] sm:$0xff]  ;;  %v9592_v39 = vld [vmem:[#allocation75_spill] sm:$0xff] }
 0x47f   :  { %3161 = vmatpush.msrb.mxu0 %v9586_v62  ;;  %3201 = vmatpush.msrb.mxu2 %v7909_v1  ;;  %9590 = vst [vmem:[#allocation140_spill] sm:$0xff] %v7916_v53  ;;  %v4761_v62 = vld [vmem:[#allocation7 + $0x118] sm:$0xff]  ;;  %v7923_v1 = vld [vmem:[#allocation7 + $0x708] sm:$0xff] }
 0x480   :  { %3230 = vmatpush.msrb.mxu3 %v7912_v45  ;;  %3270 = vmatpush.msra.mxu1 %v4758_v56  ;;  %9591 = vst [vmem:[#allocation148_spill] sm:$0xff] %v7919_v4  ;;  %v7926_v45 = vld [vmem:[#allocation7 + $0xd0] sm:$0xff]  ;;  %v9595_v56 = vld [vmem:[#allocation67_spill] sm:$0xff] }
 0x481   :  { %3162 = vmatpush.msrb.mxu0 %v9589_v35  ;;  %3202 = vmatpush.msrb.mxu2 %v7916_v53  ;;  %9593 = vst [vmem:[#allocation145_spill] sm:$0xff] %v7923_v1  ;;  %v4764_v35 = vld [vmem:[#allocation7 + $0xd8] sm:$0xff]  ;;  %v7930_v53 = vld [vmem:[#allocation7 + $0x6c8] sm:$0xff] }
 0x482   :  { %3231 = vmatpush.msrb.mxu3 %v7919_v4  ;;  %3271 = vmatpush.msra.mxu1 %v4761_v62  ;;  %9594 = vst [vmem:[#allocation152_spill] sm:$0xff] %v7926_v45  ;;  %v7933_v4 = vld [vmem:[#allocation7 + $0x90] sm:$0xff]  ;;  %v4767_v62 = vld [vmem:[#allocation7 + $0x98] sm:$0xff] }
 0x483   :  { %3163 = vmatpush.msrb.mxu0 %v9592_v39  ;;  %3203 = vmatpush.msrb.mxu2 %v7923_v1  ;;  %9596 = vst [vmem:[#allocation150_spill] sm:$0xff] %v7930_v53  ;;  %v9598_v39 = vld [vmem:[#allocation78_spill] sm:$0xff]  ;;  %v9599_v1 = vld [vmem:[#allocation71_spill] sm:$0xff] }
 0x484   :  { %3232 = vmatpush.msrb.mxu3 %v7926_v45  ;;  %3272 = vmatpush.msra.mxu1 %v4764_v35  ;;  %9597 = vst [vmem:[#allocation156_spill] sm:$0xff] %v7933_v4  ;;  %v4769_v35 = vld [vmem:[#allocation7 + $0x58] sm:$0xff]  ;;  %v9602_v45 = vld [vmem:[#allocation73_spill] sm:$0xff] }
 0x485   :  { %3164 = vmatpush.msrb.mxu0 %v9595_v56  ;;  %3204 = vmatpush.msrb.mxu2 %v7930_v53  ;;  %9600 = vst [vmem:[#allocation154_spill] sm:$0xff] %v7938_v27  ;;  %v9601_v56 = vld [vmem:[#allocation82_spill] sm:$0xff]  ;;  %v7943_v53 = vld [vmem:[#allocation7 + $0x10] sm:$0xff] }
 0x486   :  { %3233 = vmatpush.msrb.mxu3 %v7933_v4  ;;  %3273 = vmatpush.msra.mxu1 %v4767_v62  ;;  %9603 = vst [vmem:[#allocation162_spill] sm:$0xff] %v7943_v53  ;;  %v4771_v4 = vld [vmem:[#allocation7 + $0x18] sm:$0xff]  ;;  %v9604_v62 = vld [vmem:[#allocation84_spill] sm:$0xff] }
 0x487   :  { %3165 = vmatpush.msrb.mxu0 %v9598_v39  ;;  %3205 = vmatpush.msrb.mxu2 %v9599_v1  ;;  %v9605_v39 = vld [vmem:[#allocation76_spill] sm:$0xff]  ;;  %v9606_v1 = vld [vmem:[#allocation87_spill] sm:$0xff] }
 0x488   :  { %3234 = vmatpush.msrb.mxu3 %v7938_v27  ;;  %3274 = vmatpush.msra.mxu1 %v4769_v35  ;;  %v9608_v27 = vld [vmem:[#allocation90_spill] sm:$0xff]  ;;  %v9609_v35 = vld [vmem:[#allocation83_spill] sm:$0xff] }
 0x489   :  { %3166 = vmatpush.msrb.mxu0 %v9601_v56  ;;  %3206 = vmatpush.msrb.mxu2 %v9602_v45  ;;  %v9610_v56 = vld [vmem:[#allocation94_spill] sm:$0xff]  ;;  %v9611_v45 = vld [vmem:[#allocation85_spill] sm:$0xff] }
 0x48a   :  { %3235 = vmatpush.msrb.mxu3 %v7943_v53  ;;  %3275 = vmatpush.msra.mxu1 %v4771_v4  ;;  %v9613_v53 = vld [vmem:[#allocation88_spill] sm:$0xff]  ;;  %v9614_v4 = vld [vmem:[#allocation99_spill] sm:$0xff] }
 0x48b   :  { %3167 = vmatpush.msrb.mxu0 %v9604_v62  ;;  %3207 = vmatpush.msrb.mxu2 %v9605_v39  ;;  %v9615_v62 = vld [vmem:[#allocation93_spill] sm:$0xff]  ;;  %v9616_v39 = vld [vmem:[#allocation102_spill] sm:$0xff] }
 0x48d   :  { %3168 = vmatpush.msrb.mxu0 %v9606_v1  ;;  %3208 = vmatpush.msrb.mxu2 %v9607_v30  ;;  %v9617_v1 = vld [vmem:[#allocation95_spill] sm:$0xff]  ;;  %v9618_v30 = vld [vmem:[#allocation104_spill] sm:$0xff] }
 0x48f   :  { %3169 = vmatpush.msrb.mxu0 %v9608_v27  ;;  %3209 = vmatpush.msrb.mxu2 %v9609_v35  ;;  %v9619_v27 = vld [vmem:[#allocation97_spill] sm:$0xff]  ;;  %v9620_v35 = vld [vmem:[#allocation100_spill] sm:$0xff] }
 0x491   :  { %3170 = vmatpush.msrb.mxu0 %v9610_v56  ;;  %3210 = vmatpush.msrb.mxu2 %v9611_v45  ;;  %v9621_v56 = vld [vmem:[#allocation103_spill] sm:$0xff]  ;;  %v9622_v45 = vld [vmem:[#allocation109_spill] sm:$0xff] }
 0x493   :  { %3171 = vmatpush.msrb.mxu0 %v9612_v48  ;;  %3211 = vmatpush.msrb.mxu2 %v9613_v53  ;;  %v9623_v48 = vld [vmem:[#allocation106_spill] sm:$0xff]  ;;  %v9624_v53 = vld [vmem:[#allocation111_spill] sm:$0xff] }
 0x495   :  { %3172 = vmatpush.msrb.mxu0 %v9614_v4  ;;  %3212 = vmatpush.msrb.mxu2 %v9615_v62  ;;  %v9625_v4 = vld [vmem:[#allocation107_spill] sm:$0xff]  ;;  %v9626_v62 = vld [vmem:[#allocation110_spill] sm:$0xff] }
 0x497   :  { %3173 = vmatpush.msrb.mxu0 %v9616_v39  ;;  %3213 = vmatpush.msrb.mxu2 %v9617_v1  ;;  %v9627_v39 = vld [vmem:[#allocation114_spill] sm:$0xff]  ;;  %v9628_v1 = vld [vmem:[#allocation115_spill] sm:$0xff] }
 0x499   :  { %3174 = vmatpush.msrb.mxu0 %v9618_v30  ;;  %3214 = vmatpush.msrb.mxu2 %v9619_v27  ;;  %v9629_v30 = vld [vmem:[#allocation118_spill] sm:$0xff]  ;;  %v9630_v27 = vld [vmem:[#allocation127_spill] sm:$0xff] }
 0x49b   :  { %3175 = vmatpush.msrb.mxu0 %v9620_v35  ;;  %3215 = vmatpush.msrb.mxu2 %v9621_v56  ;;  %v9631_v35 = vld [vmem:[#allocation122_spill] sm:$0xff]  ;;  %v9632_v56 = vld [vmem:[#allocation131_spill] sm:$0xff] }
 0x49d   :  { %3240 = vmatpush.msra.mxu0 %v9622_v45  ;;  %3280 = vmatpush.msra.mxu2 %v9623_v48  ;;  %v9633_v45 = vld [vmem:[#allocation124_spill] sm:$0xff]  ;;  %v7976_v48 = vld [vmem:[#allocation7 + $0x650] sm:$0xff] }
 0x49e   :  { %9634 = vst [vmem:[#allocation159_spill] sm:$0xff] %v7976_v48 }
 0x49f   :  { %3241 = vmatpush.msra.mxu0 %v9624_v53  ;;  %3281 = vmatpush.msra.mxu2 %v9625_v4  ;;  %v9635_v53 = vld [vmem:[#allocation120_spill] sm:$0xff]  ;;  %v7980_v4 = vld [vmem:[#allocation7 + $0x610] sm:$0xff] }
 0x4a0   :  { %9636 = vst [vmem:[#allocation169_spill] sm:$0xff] %v7980_v4 }
 0x4a1   :  { %3242 = vmatpush.msra.mxu0 %v9626_v62  ;;  %3282 = vmatpush.msra.mxu2 %v9627_v39  ;;  %v9637_v62 = vld [vmem:[#allocation129_spill] sm:$0xff] }
 0x4a2   :  { %v7984_v39 = vld [vmem:[#allocation7 + $0x5d0] sm:$0xff] }
 0x4a3   :  { %3243 = vmatpush.msra.mxu0 %v9628_v1  ;;  %3283 = vmatpush.msra.mxu2 %v9629_v30  ;;  %9638 = vst [vmem:[#allocation165_spill] sm:$0xff] %v7984_v39  ;;  %v9639_v1 = vld [vmem:[#allocation142_spill] sm:$0xff]  ;;  %v7988_v30 = vld [vmem:[#allocation7 + $0x590] sm:$0xff] }
 0x4a4   :  { %9640 = vst [vmem:[#allocation173_spill] sm:$0xff] %v7988_v30 }
 0x4a5   :  { %3244 = vmatpush.msra.mxu0 %v9630_v27  ;;  %3284 = vmatpush.msra.mxu2 %v9631_v35  ;;  %v9641_v27 = vld [vmem:[#allocation136_spill] sm:$0xff]  ;;  %v7992_v35 = vld [vmem:[#allocation7 + $0x550] sm:$0xff] }
 0x4a6   :  { %9642 = vst [vmem:[#allocation170_spill] sm:$0xff] %v7992_v35 }
 0x4a7   :  { %3245 = vmatpush.msra.mxu0 %v9632_v56  ;;  %3285 = vmatpush.msra.mxu2 %v9633_v45  ;;  %v9643_v56 = vld [vmem:[#allocation139_spill] sm:$0xff]  ;;  %v7996_v45 = vld [vmem:[#allocation7 + $0x510] sm:$0xff] }
 0x4a8   :  { %9644 = vst [vmem:[#allocation178_spill] sm:$0xff] %v7996_v45 }
 0x4a9   :  { %3246 = vmatpush.msra.mxu0 %v7976_v48  ;;  %3286 = vmatpush.msra.mxu2 %v9635_v53  ;;  %v9645_v53 = vld [vmem:[#allocation151_spill] sm:$0xff] }
 0x4ab   :  { %3247 = vmatpush.msra.mxu0 %v7980_v4  ;;  %3287 = vmatpush.msra.mxu2 %v9637_v62  ;;  %v8000_v62 = vld [vmem:[#allocation7 + $0x4d0] sm:$0xff]  ;;  %v9650_v4 = vld [vmem:[#allocation20_spill] sm:$0xff] }
 0x4ac   :  { %9646 = vst [vmem:[#allocation174_spill] sm:$0xff] %v8000_v62 }
 0x4ad   :  { %3248 = vmatpush.msra.mxu0 %v7984_v39  ;;  %3288 = vmatpush.msra.mxu2 %v9639_v1  ;;  %v9647_v1 = vld [vmem:[#allocation134_spill] sm:$0xff] }
 0x4ae   :  { %v9649_v39 = vld [vmem:[#allocation22_spill] sm:$0xff] }
 0x4af   :  { %3249 = vmatpush.msra.mxu0 %v7988_v30  ;;  %3289 = vmatpush.msra.mxu2 %v9641_v27  ;;  %v8004_v30 = vld [vmem:[#allocation7 + $0x490] sm:$0xff]  ;;  %v4780_v27 = vld [vmem:[#allocation7 + $0x498] sm:$0xff]  ;;  %v566_v48 = vadd.f32 %v9650_v4, %v9649_v39  ;;  %v636_v4 = vadd.f32 %v9654_v15, %v9653_v7 }
 0x4b0   :  { %9648 = vst [vmem:[#allocation180_spill] sm:$0xff] %v8004_v30 }
 0x4b1   :  { %3250 = vmatpush.msra.mxu0 %v7992_v35  ;;  %3290 = vmatpush.msra.mxu2 %v9643_v56  ;;  %v2703_v35 = vpop.f32.mrf.mxu3 }
 0x4b3   :  { %3251 = vmatpush.msra.mxu0 %v7996_v45  ;;  %3291 = vmatpush.msra.mxu2 %v9645_v53  ;;  %v4782_v53 = vld [vmem:[#allocation7 + $0x458] sm:$0xff] }
 0x4b5   :  { %3252 = vmatpush.msra.mxu0 %v8000_v62  ;;  %3292 = vmatpush.msra.mxu2 %v9647_v1  ;;  %v8012_v1 = vld [vmem:[#allocation7 + $0x410] sm:$0xff] }
 0x4b6   :  { %9652 = vst [vmem:[#allocation186_spill] sm:$0xff] %v8012_v1 }
 0x4b7   :  { %3253 = vmatpush.msra.mxu0 %v8004_v30  ;;  %3293 = vmatpush.msra.mxu2 %v4780_v27  ;;  %v2723_v56 = vpop.f32.mrf.mxu0  ;;  %v4784_v30 = vld [vmem:[#allocation7 + $0x418] sm:$0xff]  ;;  %v2743_v27 = vpop.f32.mrf.mxu1 }
 0x4b8   :  { %v2724_v45 = vadd.f32 %v2723_v56, %v2703_v35 }
 0x4b9   :  { %3254 = vmatpush.msra.mxu0 %v8009_v41  ;;  %3294 = vmatpush.msra.mxu2 %v4782_v53  ;;  %v2783_v7 = vpop.f32.mrf.mxu3 }
 0x4ba   :  { %v3006_v62 = vadd.f32 %v2724_v45, %v566_v48 }
 0x4bb   :  { %3255 = vmatpush.msra.mxu0 %v8012_v1  ;;  %3295 = vmatpush.msra.mxu2 %v4784_v30  ;;  %v775_v1 = vadd.f32 %v9656_v38, %v9655_v46 }
 0x4bc   :  { %v4100_v40 = vmul.f32 -1.442695, %v3006_v62 }
 0x4bd   :  { %v2763_v3 = vpop.f32.mrf.mxu2 }
 0x4be   :  { %4230 = vpow2.f32 %v4100_v40  ;;  %v2764_v39 = vadd.f32 %v2763_v3, %v2743_v27 }
 0x4bf   :  { %v2823_v53 = vpop.f32.mrf.mxu1  ;;  %v2803_v60 = vpop.f32.mrf.mxu0 }
 0x4c0   :  { %v3007_v35 = vadd.f32 %v2764_v39, %v636_v4  ;;  %v2804_v40 = vadd.f32 %v2803_v60, %v2783_v7  ;;  %v9657_v4 = vld [vmem:[#allocation42_spill] sm:$0xff] }
 0x4c1   :  { %v2863_v7 = vpop.f32.mrf.mxu3 }
 0x4c2   :  { %v4101_v56 = vmul.f32 -1.442695, %v3007_v35 }
 0x4c4   :  { %v4231_v41 = vpop.eup %4230  ;;  %4232 = vpow2.f32 %v4101_v56 }
 0x4c5   :  { %v3020_v48 = vadd.f32 1.0, %v4231_v41  ;;  %v2843_v45 = vpop.f32.mrf.mxu2  ;;  %v9658_v41 = vld [vmem:[#allocation40_spill] sm:$0xff] }
 0x4c6   :  { %v2844_v16 = vadd.f32 %v2843_v45, %v2823_v53  ;;  %v706_v39 = vadd.f32 %v9658_v41, %v9657_v4 }
 0x4c7   :  { %4234 = vrcp.f32 %v3020_v48  ;;  %v3033_v45 = vand.u32 2147483648, %v3020_v48  ;;  %vm3027_vm11 = vweird.f32 %v3020_v48 }
 0x4c8   :  { %v3009_v30 = vadd.f32 %v2844_v16, %v775_v1  ;;  %v3008_v46 = vadd.f32 %v2804_v40, %v706_v39 }
 0x4c9   :  { %v3034_v41 = vor.u32 1.1754944e-38, %v3033_v45 }
 0x4ca   :  { %v4233_v62 = vpop.eup %4232  ;;  %v4102_v57 = vmul.f32 -1.442695, %v3009_v30  ;;  %v3031_v30 = vand.u32 2147483647, %v3020_v48 }
 0x4cb   :  { %v3021_v47 = vadd.f32 1.0, %v4233_v62 }
 0x4cc   :  { %4236 = vpow2.f32 %v4102_v57  ;;  %vm3032_vm15 = vcmp.eq.f32.partialorder %v3031_v30, 8.507059e+37 }
 0x4cd   :  { %v4235_v15 = vpop.eup %4234  ;;  %4238 = vrcp.f32 %v3021_v47  ;;  %v3048_v62 = vand.u32 2147483648, %v3021_v47  ;;  %vm3042_vm14 = vweird.f32 %v3021_v47 }
 0x4ce   :  { %v3023_v3 = vmul.f32 %v4235_v15, %v3020_v48  ;;  %vm3028_vm10 = vweird.f32 %v4235_v15 }
 0x4cf   :  { %vm8021_vm12 = vmor %vm3027_vm11, %vm3028_vm10  ;;  %v3049_v2 = vor.u32 1.1754944e-38, %v3048_v62 }
 0x4d0   :  { %v3024_v27 = vsub.f32 1.0, %v3023_v3 }
 0x4d2   :  { %v4237_v35 = vpop.eup %4236  ;;  %v3025_v56 = vmul.f32 %v4235_v15, %v3024_v27  ;;  %v3046_v27 = vand.u32 2147483647, %v3021_v47 }
 0x4d3   :  { %v4239_v38 = vpop.eup %4238  ;;  %v3059_v53 = vadd.f32 1.0, %v4237_v35 }
 0x4d4   :  { %v3038_v16 = vmul.f32 %v4239_v38, %v3021_v47  ;;  %v3026_v1 = vadd.f32 %v4235_v15, %v3025_v56  ;;  %vm3043_vm13 = vweird.f32 %v4239_v38  ;;  %v9661_v56 = vld [vmem:[#allocation74_spill] sm:$0xff]  ;;  %vm3047_vm1 = vcmp.eq.f32.partialorder %v3046_v27, 8.507059e+37 }
 0x4d5   :  { %4240 = vrcp.f32 %v3059_v53  ;;  %vm3044_vm0 = vmor %vm3042_vm14, %vm3043_vm13  ;;  %vm3065_vm3 = vweird.f32 %v3059_v53 }
 0x4d6   :  { %v3039_v57 = vsub.f32 1.0, %v3038_v16  ;;  %4242 = vtanh.f32 %v3008_v46  ;;  %v3030_v40 = vsel %vm8021_vm12, %v4235_v15, %v3026_v1  ;;  %v9662_v16 = vld [vmem:[#allocation68_spill] sm:$0xff]  ;;  %v2903_v1 = vpop.f32.mrf.mxu1 }
 0x4d7   :  { %v841_v13 = vadd.f32 %v9662_v16, %v9661_v56  ;;  %v3035_v46 = vsel %vm3032_vm15, %v3034_v41, %v3030_v40 }
 0x4d8   :  { %v3040_v3 = vmul.f32 %v4239_v38, %v3039_v57  ;;  %v2883_v4 = vpop.f32.mrf.mxu0 }
 0x4d9   :  { %v2884_v39 = vadd.f32 %v2883_v4, %v2863_v7  ;;  %v9664_v4 = vld [vmem:[#allocation77_spill] sm:$0xff] }
 0x4da   :  { %v3041_v35 = vadd.f32 %v4239_v38, %v3040_v3  ;;  %v9663_v3 = vld [vmem:[#allocation69_spill] sm:$0xff] }
 0x4db   :  { %v4241_v48 = vpop.eup %4240  ;;  %v3010_v15 = vadd.f32 %v2884_v39, %v841_v13  ;;  %v911_v23 = vadd.f32 %v9664_v4, %v9663_v3  ;;  %v3069_v13 = vand.u32 2147483647, %v3059_v53  ;;  %v8076_v3 = vld [vmem:[#allocation7 + $0x1e8] sm:$0xff] }
 0x4dc   :  { %v3045_v12 = vsel %vm3044_vm0, %v4239_v38, %v3041_v35  ;;  %v3061_v57 = vmul.f32 %v4241_v48, %v3059_v53  ;;  %v4243_v5 = vpop.eup %4242  ;;  %vm3066_vm2 = vweird.f32 %v4241_v48 }
 0x4dd   :  { %v3050_v60 = vsel %vm3047_vm1, %v3049_v2, %v3045_v12  ;;  %v3054_v7 = vmul.f32 %v4243_v5, %v3035_v46  ;;  %v4103_v38 = vmul.f32 -1.442695, %v3010_v15  ;;  %v3071_v2 = vand.u32 2147483648, %v3059_v53  ;;  %vm3067_vm4 = vmor %vm3065_vm3, %vm3066_vm2  ;;  %v9666_v46 = vld [vmem:[#allocation149_spill] sm:$0xff]  ;;  %v9672_v15 = vld [vmem:[#allocation164_spill] sm:$0xff] }
 0x4de   :  { %v3052_v45 = vmul.f32 %v3050_v60, %v7490_v9  ;;  %v3062_v47 = vsub.f32 1.0, %v3061_v57  ;;  %v2923_v30 = vpop.f32.mrf.mxu2  ;;  %vm3070_vm5 = vcmp.eq.f32.partialorder %v3069_v13, 8.507059e+37  ;;  %v8062_v57 = vld [vmem:[#allocation7 + $0x268] sm:$0xff]  ;;  %v2983_v4 = vpop.f32.mrf.mxu1  ;;  %v9676_v13 = vld [vmem:[#allocation146_spill] sm:$0xff] }
 0x4df   :  { %v2924_v51 = vadd.f32 %v2923_v30, %v2903_v1  ;;  %v3072_v27 = vor.u32 1.1754944e-38, %v3071_v2  ;;  %v8068_v1 = vld [vmem:[#allocation7 + $0x228] sm:$0xff]  ;;  %v9673_v30 = vld [vmem:[#allocation158_spill] sm:$0xff] }
 0x4e0   :  { %v8032_v56 = vadd.f32 %v3054_v7, %v3052_v45  ;;  %v3063_v62 = vmul.f32 %v4241_v48, %v3062_v47  ;;  %v9675_v2 = vld [vmem:[#allocation138_spill] sm:$0xff] }
 0x4e1   :  { %v3011_v40 = vadd.f32 %v2924_v51, %v911_v23 }
 0x4e2   :  { %4244 = vtanh.f32 %v8032_v56  ;;  %v3064_v12 = vadd.f32 %v4241_v48, %v3063_v62  ;;  %v2943_v62 = vpop.f32.mrf.mxu3 }
 0x4e3   :  { %v4104_v9 = vmul.f32 -1.442695, %v3011_v40  ;;  %4246 = vpow2.f32 %v4103_v38  ;;  %v9674_v40 = vld [vmem:[#allocation171_spill] sm:$0xff] }
 0x4e4   :  { %v3068_v5 = vsel %vm3067_vm4, %v4241_v48, %v3064_v12  ;;  %v9665_v48 = vld [vmem:[#allocation147_spill] sm:$0xff]  ;;  %v8080_v12 = vld [vmem:[#allocation7 + $0x1a8] sm:$0xff] }
 0x4e5   :  { %4248 = vpow2.f32 %v4104_v9  ;;  %v3073_v39 = vsel %vm3070_vm5, %v3072_v27, %v3068_v5  ;;  %v1049_v9 = vadd.f32 %v9676_v13, %v9675_v2 }
 0x4e8   :  { %v4245_v41 = vpop.eup %4244 }
 0x4e9   :  { %v8035_v35 = vmul.f32 %v4245_v41, %v3073_v39  ;;  %v4247_v16 = vpop.eup %4246 }
 0x4ea   :  { %v8041_v23 = vadd.f32 1.0, %v4247_v16  ;;  %v8086_v16 = vld [vmem:[#allocation7 + $0x168] sm:$0xff] }
 0x4eb   :  { %3156 = vmatmul.f32.vlgmr.msra.gmra.mxu3 %v8035_v35  ;;  %3196 = vmatmul.f32.vlgmr.msrb.gmra.mxu1 %v8035_v35  ;;  %v4249_v51 = vpop.eup %4248 }
 0x4ec   :  { %3300 = vmatpush.msra.mxu3 %v7497_v28  ;;  %3340 = vmatpush.msrb.mxu1 %v7500_v44  ;;  %v8045_v53 = vadd.f32 1.0, %v4249_v51  ;;  %4250 = vrcp.f32 %v8041_v23  ;;  %v9667_v28 = vld [vmem:[#allocation144_spill] sm:$0xff]  ;;  %v9668_v44 = vld [vmem:[#allocation155_spill] sm:$0xff]  ;;  %v9677_v51 = vld [vmem:[#allocation141_spill] sm:$0xff]  ;;  %vm3090_vm8 = vweird.f32 %v8041_v23  ;;  %v3096_v13 = vand.u32 2147483648, %v8041_v23 }
 0x4ee   :  { %3301 = vmatpush.msra.mxu3 %v7503_v19  ;;  %3341 = vmatpush.msrb.mxu1 %v7506_v25  ;;  %4252 = vrcp.f32 %v8045_v53  ;;  %v9669_v19 = vld [vmem:[#allocation167_spill] sm:$0xff]  ;;  %v9670_v25 = vld [vmem:[#allocation161_spill] sm:$0xff]  ;;  %v3111_v2 = vand.u32 2147483648, %v8045_v53  ;;  %vm3105_vm9 = vweird.f32 %v8045_v53 }
 0x4f0   :  { %3302 = vmatpush.msra.mxu3 %v7513_v55  ;;  %3342 = vmatpush.msrb.mxu1 %v7516_v36  ;;  %v9671_v36 = vld [vmem:[#allocation153_spill] sm:$0xff] }
 0x4f2   :  { %3303 = vmatpush.msra.mxu3 %v9665_v48  ;;  %3343 = vmatpush.msrb.mxu1 %v9666_v46  ;;  %v8059_v55 = vpop.eup %4250  ;;  %v9678_v48 = vld [vmem:[#allocation133_spill] sm:$0xff] }
 0x4f3   :  { %3236 = vmatmul.f32.vlgmr.msrb.gmra.mxu3 %v8035_v35  ;;  %3276 = vmatmul.f32.vlgmr.msra.gmra.mxu1 %v8035_v35  ;;  %v3086_v45 = vmul.f32 %v8059_v55, %v8041_v23  ;;  %v981_v46 = vadd.f32 %v9678_v48, %v9677_v51  ;;  %vm3091_vm6 = vweird.f32 %v8059_v55 }
 0x4f4   :  { %3304 = vmatpush.msra.mxu3 %v9667_v28  ;;  %3344 = vmatpush.msrb.mxu1 %v9668_v44  ;;  %v8065_v60 = vpop.eup %4252  ;;  %v8091_v44 = vld [vmem:[#allocation7 + $0x120] sm:$0xff]  ;;  %vm8125_vm10 = vmor %vm3090_vm8, %vm3091_vm6 }
 0x4f5   :  { %v3101_v7 = vmul.f32 %v8065_v60, %v8045_v53  ;;  %v3087_v41 = vsub.f32 1.0, %v3086_v45  ;;  %v8099_v45 = vld [vmem:[#allocation7 + $0xe0] sm:$0xff]  ;;  %vm3106_vm7 = vweird.f32 %v8065_v60 }
 0x4f6   :  { %3305 = vmatpush.msra.mxu3 %v9669_v19  ;;  %3345 = vmatpush.msrb.mxu1 %v9670_v25  ;;  %v8094_v19 = vld [vmem:[#allocation7 + $0x128] sm:$0xff]  ;;  %vm8139_vm11 = vmor %vm3105_vm9, %vm3106_vm7 }
 0x4f7   :  { %v3102_v39 = vsub.f32 1.0, %v3101_v7  ;;  %v8102_v7 = vld [vmem:[#allocation7 + $0xe8] sm:$0xff] }
 0x4f8   :  { %3306 = vmatpush.msra.mxu3 %v9671_v36  ;;  %3346 = vmatpush.msrb.mxu1 %v8062_v57  ;;  %v2963_v47 = vpop.f32.mrf.mxu0 }
 0x4f9   :  { %v2964_v5 = vadd.f32 %v2963_v47, %v2943_v62  ;;  %v8105_v47 = vld [vmem:[#allocation7 + $0xa0] sm:$0xff] }
 0x4fa   :  { %3307 = vmatpush.msra.mxu3 %v9672_v15  ;;  %3347 = vmatpush.msrb.mxu1 %v8068_v1  ;;  %v3088_v15 = vmul.f32 %v8059_v55, %v3087_v41  ;;  %v8131_v41 = vld [vmem:[#allocation7 + $0x20] sm:$0xff] }
 0x4fb   :  { %v3012_v25 = vadd.f32 %v2964_v5, %v981_v46  ;;  %v3094_v5 = vand.u32 2147483647, %v8041_v23 }
 0x4fc   :  { %3308 = vmatpush.msra.mxu3 %v9673_v30  ;;  %3348 = vmatpush.msrb.mxu1 %v8076_v3  ;;  %v8108_v30 = vld [vmem:[#allocation7 + $0xa8] sm:$0xff] }
 0x4fd   :  { %9679 = vst [vmem:[#allocation190_spill] sm:$0xff] %v8108_v30  ;;  %vm3095_vm12 = vcmp.eq.f32.partialorder %v3094_v5, 8.507059e+37  ;;  %v4807_v5 = vld [vmem:[#allocation7 + $0x338] sm:$0xff] }
 0x4fe   :  { %v3003_v38 = vpop.f32.mrf.mxu2  ;;  %3309 = vmatpush.msra.mxu3 %v9674_v40  ;;  %3349 = vmatpush.msrb.mxu1 %v8080_v12  ;;  %v8118_v40 = vld [vmem:[#allocation7 + $0x68] sm:$0xff] }
 0x4ff   :  { %v3004_v27 = vadd.f32 %v3003_v38, %v2983_v4  ;;  %v3089_v4 = vadd.f32 %v8059_v55, %v3088_v15  ;;  %v8115_v38 = vld [vmem:[#allocation7 + $0x60] sm:$0xff]  ;;  %9680 = vst [vmem:[#allocation192_spill] sm:$0xff] %v8118_v40  ;;  %v3097_v15 = vor.u32 1.1754944e-38, %v3096_v13  ;;  %v8161_v13 = vld [vmem:[#allocation7 + $0x330] sm:$0xff] }
 0x500   :  { %3310 = vmatpush.msra.mxu3 %v7567_v42  ;;  %3350 = vmatpush.msrb.mxu1 %v8086_v16  ;;  %v3103_v42 = vmul.f32 %v8065_v60, %v3102_v39  ;;  %v8134_v39 = vld [vmem:[#allocation7 + $0x28] sm:$0xff] }
 0x501   :  { %v3013_v28 = vadd.f32 %v3004_v27, %v1049_v9  ;;  %v3109_v27 = vand.u32 2147483647, %v8045_v53  ;;  %9683 = vst [vmem:[#allocation194_spill] sm:$0xff] %v8134_v39  ;;  %v3093_v23 = vsel %vm8125_vm10, %v8059_v55, %v3089_v4  ;;  %v4803_v55 = vld [vmem:[#allocation7 + $0x3b8] sm:$0xff]  ;;  %v8157_v9 = vld [vmem:[#allocation7 + $0x370] sm:$0xff] }
 0x502   :  { %3311 = vmatpush.msra.mxu3 %v8091_v44  ;;  %3351 = vmatpush.msrb.mxu1 %v8094_v19  ;;  %v3104_v62 = vadd.f32 %v8065_v60, %v3103_v42  ;;  %v3112_v42 = vor.u32 1.1754944e-38, %v3111_v2 }
 0x503   :  { %v4105_v36 = vmul.f32 -1.442695, %v3013_v28  ;;  %v8151_v28 = vld [vmem:[#allocation7 + $0x3f0] sm:$0xff]  ;;  %vm3110_vm13 = vcmp.eq.f32.partialorder %v3109_v27, 8.507059e+37 }
 0x504   :  { %3312 = vmatpush.msra.mxu3 %v8099_v45  ;;  %3352 = vmatpush.msrb.mxu1 %v8102_v7  ;;  %v3108_v53 = vsel %vm8139_vm11, %v8065_v60, %v3104_v62  ;;  %v3098_v60 = vsel %vm3095_vm12, %v3097_v15, %v3093_v23  ;;  %v8166_v23 = vld [vmem:[#allocation7 + $0x2f0] sm:$0xff] }
 0x505   :  { %4254 = vpow2.f32 %v4105_v36  ;;  %v3113_v4 = vsel %vm3110_vm13, %v3112_v42, %v3108_v53  ;;  %v4809_v53 = vld [vmem:[#allocation7 + $0x2f8] sm:$0xff] }
 0x506   :  { %3313 = vmatpush.msra.mxu3 %v8105_v47  ;;  %3353 = vmatpush.msrb.mxu1 %v8108_v30  ;;  %4256 = vtanh.f32 %v3012_v25  ;;  %v4801_v25 = vld [vmem:[#allocation7 + $0x3f8] sm:$0xff]  ;;  %v3115_v2 = vmul.f32 %v3113_v4, %v7624_v6 }
 0x507   :  { %v4811_v6 = vld [vmem:[#allocation7 + $0x2b8] sm:$0xff] }
 0x508   :  { %3314 = vmatpush.msra.mxu3 %v8115_v38  ;;  %3354 = vmatpush.msrb.mxu1 %v8118_v40  ;;  %v8182_v40 = vld [vmem:[#allocation7 + $0x1b0] sm:$0xff]  ;;  %v4819_v30 = vld [vmem:[#allocation7 + $0x1b8] sm:$0xff] }
 0x50a   :  { %3315 = vmatpush.msra.mxu3 %v8131_v41  ;;  %3355 = vmatpush.msrb.mxu1 %v8134_v39  ;;  %v8154_v39 = vld [vmem:[#allocation7 + $0x3b0] sm:$0xff] }
 0x50b   :  { %v4255_v51 = vpop.eup %4254  ;;  %3316 = vmatmul.f32.vlgmr.msra.gmra.mxu3 %v8035_v35  ;;  %3356 = vmatmul.f32.vlgmr.msrb.gmra.mxu1 %v8035_v35 }
 0x50c   :  { %v3122_v46 = vadd.f32 1.0, %v4255_v51  ;;  %3380 = vmatpush.msrb.mxu3 %v8151_v28  ;;  %3420 = vmatpush.msra.mxu1 %v4801_v25  ;;  %v4257_v36 = vpop.eup %4256  ;;  %v4805_v51 = vld [vmem:[#allocation7 + $0x378] sm:$0xff] }
 0x50d   :  { %v3117_v62 = vmul.f32 %v4257_v36, %v3098_v60  ;;  %v8169_v36 = vld [vmem:[#allocation7 + $0x2b0] sm:$0xff]  ;;  %v4813_v60 = vld [vmem:[#allocation7 + $0x278] sm:$0xff] }
 0x50e   :  { %4258 = vrcp.f32 %v3122_v46  ;;  %3381 = vmatpush.msrb.mxu3 %v8154_v39  ;;  %3421 = vmatpush.msra.mxu1 %v4803_v55  ;;  %v3134_v15 = vand.u32 2147483648, %v3122_v46  ;;  %v8173_v55 = vld [vmem:[#allocation7 + $0x270] sm:$0xff]  ;;  %vm3128_vm15 = vweird.f32 %v3122_v46 }
 0x50f   :  { %v8164_v48 = vadd.f32 %v3117_v62, %v3115_v2  ;;  %v3132_v62 = vand.u32 2147483647, %v3122_v46  ;;  %v4815_v2 = vld [vmem:[#allocation7 + $0x238] sm:$0xff] }
 0x510   :  { %3382 = vmatpush.msrb.mxu3 %v8157_v9  ;;  %3422 = vmatpush.msra.mxu1 %v4805_v51  ;;  %v8176_v51 = vld [vmem:[#allocation7 + $0x230] sm:$0xff] }
 0x511   :  { %9686 = vst [vmem:[#allocation196_spill] sm:$0xff] %v8164_v48  ;;  %4260 = vtanh.f32 %v8164_v48  ;;  %vm3133_vm1 = vcmp.eq.f32.partialorder %v3132_v62, 8.507059e+37  ;;  %v4825_v62 = vld [vmem:[#allocation7 + $0xf8] sm:$0xff] }
 0x512   :  { %3383 = vmatpush.msrb.mxu3 %v8161_v13  ;;  %3423 = vmatpush.msra.mxu1 %v4807_v5 }
 0x514   :  { %v4259_v27 = vpop.eup %4258  ;;  %3384 = vmatpush.msrb.mxu3 %v8166_v23  ;;  %3424 = vmatpush.msra.mxu1 %v4809_v53  ;;  %v3135_v53 = vor.u32 1.1754944e-38, %v3134_v15  ;;  %v4821_v15 = vld [vmem:[#allocation7 + $0x178] sm:$0xff] }
 0x515   :  { %v3124_v25 = vmul.f32 %v4259_v27, %v3122_v46  ;;  %vm3129_vm14 = vweird.f32 %v4259_v27  ;;  %v8187_v46 = vld [vmem:[#allocation7 + $0x170] sm:$0xff] }
 0x516   :  { %3385 = vmatpush.msrb.mxu3 %v8169_v36  ;;  %3425 = vmatpush.msra.mxu1 %v4811_v6  ;;  %vm3130_vm0 = vmor %vm3128_vm15, %vm3129_vm14  ;;  %v4817_v6 = vld [vmem:[#allocation7 + $0x1f8] sm:$0xff] }
 0x517   :  { %v3125_v42 = vsub.f32 1.0, %v3124_v25  ;;  %v8179_v25 = vld [vmem:[#allocation7 + $0x1f0] sm:$0xff] }
 0x518   :  { %3386 = vmatpush.msrb.mxu3 %v8173_v55  ;;  %3426 = vmatpush.msra.mxu1 %v4813_v60 }
 0x519   :  { %v3126_v4 = vmul.f32 %v4259_v27, %v3125_v42  ;;  %v4261_v42 = vpop.eup %4260 }
 0x51a   :  { %3387 = vmatpush.msrb.mxu3 %v8176_v51  ;;  %3427 = vmatpush.msra.mxu1 %v4815_v2  ;;  %v4848_v2 = vld [vmem:[#allocation7 + $0x1c0] sm:$0xff] }
 0x51b   :  { %v3127_v5 = vadd.f32 %v4259_v27, %v3126_v4 }
 0x51c   :  { %3388 = vmatpush.msrb.mxu3 %v8179_v25  ;;  %3428 = vmatpush.msra.mxu1 %v4817_v6  ;;  %v4850_v6 = vld [vmem:[#allocation7 + $0x180] sm:$0xff] }
 0x51d   :  { %v3131_v60 = vsel %vm3130_vm0, %v4259_v27, %v3127_v5  ;;  %v8194_v27 = vld [vmem:[#allocation7 + $0x130] sm:$0xff]  ;;  %v9691_v5 = vld [vmem:[#allocation183_spill] sm:$0xff] }
 0x51e   :  { %v3136_v48 = vsel %vm3133_vm1, %v3135_v53, %v3131_v60  ;;  %3389 = vmatpush.msrb.mxu3 %v8182_v40  ;;  %3429 = vmatpush.msra.mxu1 %v4819_v30  ;;  %v4823_v30 = vld [vmem:[#allocation7 + $0x138] sm:$0xff]  ;;  %v9693_v53 = vld [vmem:[#allocation189_spill] sm:$0xff]  ;;  %v4851_v60 = vld [vmem:[#allocation7 + $0x188] sm:$0xff] }
 0x51f   :  { %v8185_v4 = vmul.f32 %v4261_v42, %v3136_v48  ;;  %v8199_v48 = vld [vmem:[#allocation7 + $0xf0] sm:$0xff]  ;;  %v9694_v42 = vld [vmem:[#allocation179_spill] sm:$0xff] }
 0x520   :  { %3390 = vmatpush.msrb.mxu3 %v8187_v46  ;;  %3430 = vmatpush.msra.mxu1 %v4821_v15  ;;  %v9695_v15 = vld [vmem:[#allocation193_spill] sm:$0xff] }
 0x521   :  { %3176 = vmatmul.f32.vlgmr.msrb.gmra.mxu0 %v8185_v4  ;;  %3216 = vmatmul.f32.vlgmr.msrb.gmra.mxu2 %v8185_v4 }
 0x522   :  { %3320 = vmatpush.msrb.mxu0 %v7643_v14  ;;  %3360 = vmatpush.msrb.mxu2 %v7646_v34  ;;  %v8204_v14 = vld [vmem:[#allocation7 + $0xb0] sm:$0xff]  ;;  %v4827_v34 = vld [vmem:[#allocation7 + $0xb8] sm:$0xff] }
 0x523   :  { %3391 = vmatpush.msrb.mxu3 %v8194_v27  ;;  %3431 = vmatpush.msra.mxu1 %v4823_v30  ;;  %v4852_v30 = vld [vmem:[#allocation7 + $0x140] sm:$0xff] }
 0x524   :  { %3321 = vmatpush.msrb.mxu0 %v7651_v11  ;;  %3361 = vmatpush.msrb.mxu2 %v7654_v50  ;;  %v8213_v11 = vld [vmem:[#allocation7 + $0x70] sm:$0xff]  ;;  %v4829_v50 = vld [vmem:[#allocation7 + $0x78] sm:$0xff] }
 0x525   :  { %3392 = vmatpush.msrb.mxu3 %v8199_v48  ;;  %3432 = vmatpush.msra.mxu1 %v4825_v62  ;;  %v4853_v62 = vld [vmem:[#allocation7 + $0x148] sm:$0xff] }
 0x526   :  { %3322 = vmatpush.msrb.mxu0 %v7659_v43  ;;  %3362 = vmatpush.msrb.mxu2 %v7662_v52  ;;  %v8218_v43 = vld [vmem:[#allocation7 + $0x30] sm:$0xff]  ;;  %v4831_v52 = vld [vmem:[#allocation7 + $0x38] sm:$0xff] }
 0x527   :  { %3393 = vmatpush.msrb.mxu3 %v8204_v14  ;;  %3433 = vmatpush.msra.mxu1 %v4827_v34  ;;  %v9696_v34 = vld [vmem:[#allocation185_spill] sm:$0xff] }
 0x528   :  { %3323 = vmatpush.msrb.mxu0 %v7667_v31  ;;  %3363 = vmatpush.msrb.mxu2 %v7670_v63  ;;  %v4832_v31 = vld [vmem:[#allocation7 + $0x3c0] sm:$0xff]  ;;  %v4833_v63 = vld [vmem:[#allocation7 + $0x3c8] sm:$0xff] }
 0x529   :  { %3256 = vmatmul.f32.vlgmr.msra.gmra.mxu0 %v8185_v4  ;;  %3296 = vmatmul.f32.vlgmr.msra.gmra.mxu2 %v8185_v4 }
 0x52a   :  { %3324 = vmatpush.msrb.mxu0 %v7675_v8  ;;  %3364 = vmatpush.msrb.mxu2 %v7678_v59  ;;  %v4834_v8 = vld [vmem:[#allocation7 + $0x380] sm:$0xff]  ;;  %v4835_v59 = vld [vmem:[#allocation7 + $0x388] sm:$0xff] }
 0x52b   :  { %3394 = vmatpush.msrb.mxu3 %v8213_v11  ;;  %3434 = vmatpush.msra.mxu1 %v4829_v50  ;;  %v9697_v50 = vld [vmem:[#allocation197_spill] sm:$0xff] }
 0x52c   :  { %3325 = vmatpush.msrb.mxu0 %v7683_v10  ;;  %3365 = vmatpush.msrb.mxu2 %v7686_v0  ;;  %v4836_v10 = vld [vmem:[#allocation7 + $0x340] sm:$0xff]  ;;  %v4837_v0 = vld [vmem:[#allocation7 + $0x348] sm:$0xff] }
 0x52d   :  { %3395 = vmatpush.msrb.mxu3 %v8218_v43  ;;  %3435 = vmatpush.msra.mxu1 %v4831_v52  ;;  %v4854_v52 = vld [vmem:[#allocation7 + $0x100] sm:$0xff] }
 0x52e   :  { %3396 = vmatmul.f32.vlgmr.msrb.gmra.mxu3 %v8035_v35  ;;  %3436 = vmatmul.f32.vlgmr.msra.gmra.mxu1 %v8035_v35  ;;  %v9689_v35 = vld [vmem:[#allocation168_spill] sm:$0xff] }
 0x52f   :  { %3326 = vmatpush.msrb.mxu0 %v7693_v21  ;;  %3366 = vmatpush.msrb.mxu2 %v7696_v58  ;;  %v4838_v21 = vld [vmem:[#allocation7 + $0x300] sm:$0xff]  ;;  %v4839_v58 = vld [vmem:[#allocation7 + $0x308] sm:$0xff] }
 0x530   :  { %3594 = vmatpush.msra.mxu3 %v4832_v31  ;;  %3634 = vmatpush.msrb.mxu1 %v4833_v63  ;;  %v4855_v31 = vld [vmem:[#allocation7 + $0x108] sm:$0xff]  ;;  %v9698_v63 = vld [vmem:[#allocation191_spill] sm:$0xff] }
 0x531   :  { %3327 = vmatpush.msrb.mxu0 %v7701_v26  ;;  %3367 = vmatpush.msrb.mxu2 %v7704_v37  ;;  %v4840_v26 = vld [vmem:[#allocation7 + $0x2c0] sm:$0xff]  ;;  %v4841_v37 = vld [vmem:[#allocation7 + $0x2c8] sm:$0xff] }
 0x532   :  { %3595 = vmatpush.msra.mxu3 %v4834_v8  ;;  %3635 = vmatpush.msrb.mxu1 %v4835_v59  ;;  %v9699_v8 = vld [vmem:[#allocation195_spill] sm:$0xff] }
 0x533   :  { %3328 = vmatpush.msrb.mxu0 %v7709_v49  ;;  %3368 = vmatpush.msrb.mxu2 %v7712_v17  ;;  %v4842_v49 = vld [vmem:[#allocation7 + $0x280] sm:$0xff]  ;;  %v4843_v17 = vld [vmem:[#allocation7 + $0x288] sm:$0xff] }
 0x534   :  { %3596 = vmatpush.msra.mxu3 %v4836_v10  ;;  %3636 = vmatpush.msrb.mxu1 %v4837_v0  ;;  %v4856_v59 = vld [vmem:[#allocation7 + $0xc0] sm:$0xff]  ;;  %v4857_v10 = vld [vmem:[#allocation7 + $0xc8] sm:$0xff] }
 0x535   :  { %3329 = vmatpush.msrb.mxu0 %v7717_v54  ;;  %3369 = vmatpush.msrb.mxu2 %v7720_v33  ;;  %v4844_v54 = vld [vmem:[#allocation7 + $0x240] sm:$0xff]  ;;  %v4845_v33 = vld [vmem:[#allocation7 + $0x248] sm:$0xff] }
 0x536   :  { %3597 = vmatpush.msra.mxu3 %v4838_v21  ;;  %3637 = vmatpush.msrb.mxu1 %v4839_v58  ;;  %v9700_v0 = vld [vmem:[#allocation199_spill] sm:$0xff]  ;;  %v9701_v21 = vld [vmem:[#allocation202_spill] sm:$0xff] }
 0x537   :  { %3330 = vmatpush.msrb.mxu0 %v7725_v29  ;;  %3370 = vmatpush.msrb.mxu2 %v7728_v22  ;;  %v9687_v29 = vld [vmem:[#allocation177_spill] sm:$0xff]  ;;  %v4846_v22 = vld [vmem:[#allocation7 + $0x200] sm:$0xff] }
 0x538   :  { %3598 = vmatpush.msra.mxu3 %v4840_v26  ;;  %3638 = vmatpush.msrb.mxu1 %v4841_v37  ;;  %v4858_v58 = vld [vmem:[#allocation7 + $0x80] sm:$0xff]  ;;  %v4859_v26 = vld [vmem:[#allocation7 + $0x88] sm:$0xff] }
 0x539   :  { %3331 = vmatpush.msrb.mxu0 %v7733_v32  ;;  %3371 = vmatpush.msrb.mxu2 %v7736_v24  ;;  %v4847_v32 = vld [vmem:[#allocation7 + $0x208] sm:$0xff]  ;;  %v9688_v24 = vld [vmem:[#allocation175_spill] sm:$0xff] }
 0x53a   :  { %3599 = vmatpush.msra.mxu3 %v4842_v49  ;;  %3639 = vmatpush.msrb.mxu1 %v4843_v17  ;;  %v9702_v37 = vld [vmem:[#allocation112_spill] sm:$0xff]  ;;  %v9703_v49 = vld [vmem:[#allocation18_spill] sm:$0xff]  ;;  %v4860_v17 = vld [vmem:[#allocation7 + $0x40] sm:$0xff] }
 0x53b   :  { %3332 = vmatpush.msrb.mxu0 %v7741_v61  ;;  %3372 = vmatpush.msrb.mxu2 %v7744_v18  ;;  %v4849_v61 = vld [vmem:[#allocation7 + $0x1c8] sm:$0xff] }
 0x53c   :  { %3600 = vmatpush.msra.mxu3 %v4844_v54  ;;  %3640 = vmatpush.msrb.mxu1 %v4845_v33  ;;  %v9690_v18 = vld [vmem:[#allocation172_spill] sm:$0xff] }
 0x53d   :  { %3333 = vmatpush.msrb.mxu0 %v7749_v20  ;;  %3373 = vmatpush.msrb.mxu2 %v9687_v29  ;;  %v9692_v20 = vld [vmem:[#allocation176_spill] sm:$0xff] }
 0x53e   :  { %3601 = vmatpush.msra.mxu3 %v4846_v22  ;;  %3641 = vmatpush.msrb.mxu1 %v4847_v32  ;;  %v4861_v54 = vld [vmem:[#allocation7 + $0x48] sm:$0xff]  ;;  %v4862_v22 = vld [vmem:[#allocation7] sm:$0xff] }
 0x53f   :  { %3334 = vmatpush.msrb.mxu0 %v9688_v24  ;;  %3374 = vmatpush.msrb.mxu2 %v9689_v35  ;;  %v9704_v33 = vld [vmem:[#allocation16_spill] sm:$0xff]  ;;  %v9706_v24 = vld [vmem:[#allocation119_spill] sm:$0xff] }
 0x540   :  { %3602 = vmatpush.msra.mxu3 %v4848_v2  ;;  %3642 = vmatpush.msrb.mxu1 %v4849_v61  ;;  %v9705_v29 = vld [vmem:[#allocation116_spill] sm:$0xff]  ;;  %v9707_v35 = vld [vmem:[#allocation123_spill] sm:$0xff]  ;;  %v4864_v2 = vld [vmem:[#allocation7 + $0x3d0] sm:$0xff] }
 0x541   :  { %3335 = vmatpush.msrb.mxu0 %v9690_v18  ;;  %3375 = vmatpush.msrb.mxu2 %v9691_v5  ;;  %v4863_v32 = vld [vmem:[#allocation7 + $0x8] sm:$0xff]  ;;  %v4865_v61 = vld [vmem:[#allocation7 + $0x3e0] sm:$0xff]  ;;  %v9709_v5 = vld [vmem:[#allocation17_spill] sm:$0xff] }
 0x542   :  { %3336 = vmatmul.f32.vlgmr.msrb.gmra.mxu0 %v8185_v4  ;;  %3376 = vmatmul.f32.vlgmr.msrb.gmra.mxu2 %v8185_v4  ;;  %v9708_v18 = vld [vmem:[#allocation128_spill] sm:$0xff] }
 0x543   :  { %3400 = vmatpush.msra.mxu0 %v9692_v20  ;;  %3440 = vmatpush.msra.mxu2 %v9693_v53  ;;  %v4866_v20 = vld [vmem:[#allocation7 + $0x390] sm:$0xff]  ;;  %v4867_v53 = vld [vmem:[#allocation7 + $0x3a0] sm:$0xff] }
 0x544   :  { %3603 = vmatpush.msra.mxu3 %v4850_v6  ;;  %3643 = vmatpush.msrb.mxu1 %v4851_v60  ;;  %v9710_v6 = vld [vmem:[#allocation19_spill] sm:$0xff]  ;;  %v9711_v60 = vld [vmem:[#allocation37_spill] sm:$0xff] }
 0x545   :  { %3401 = vmatpush.msra.mxu0 %v9694_v42  ;;  %3441 = vmatpush.msra.mxu2 %v9695_v15  ;;  %v4868_v42 = vld [vmem:[#allocation7 + $0x350] sm:$0xff]  ;;  %v4869_v15 = vld [vmem:[#allocation7 + $0x360] sm:$0xff] }
 0x546   :  { %3604 = vmatpush.msra.mxu3 %v4852_v30  ;;  %3644 = vmatpush.msrb.mxu1 %v4853_v62  ;;  %v9712_v30 = vld [vmem:[#allocation39_spill] sm:$0xff]  ;;  %v9713_v62 = vld [vmem:[#allocation38_spill] sm:$0xff] }
 0x547   :  { %3402 = vmatpush.msra.mxu0 %v9696_v34  ;;  %3442 = vmatpush.msra.mxu2 %v9697_v50  ;;  %v4870_v34 = vld [vmem:[#allocation7 + $0x310] sm:$0xff]  ;;  %v4871_v50 = vld [vmem:[#allocation7 + $0x320] sm:$0xff] }
 0x548   :  { %3605 = vmatpush.msra.mxu3 %v4854_v52  ;;  %3645 = vmatpush.msrb.mxu1 %v4855_v31  ;;  %v9714_v52 = vld [vmem:[#allocation36_spill] sm:$0xff]  ;;  %v9715_v31 = vld [vmem:[#allocation86_spill] sm:$0xff] }
 0x549   :  { %3403 = vmatpush.msra.mxu0 %v9698_v63  ;;  %3443 = vmatpush.msra.mxu2 %v9699_v8  ;;  %v4872_v63 = vld [vmem:[#allocation7 + $0x2d0] sm:$0xff]  ;;  %v4873_v8 = vld [vmem:[#allocation7 + $0x2e0] sm:$0xff] }
 0x54a   :  { %3606 = vmatpush.msra.mxu3 %v4856_v59  ;;  %3646 = vmatpush.msrb.mxu1 %v4857_v10  ;;  %v9716_v59 = vld [vmem:[#allocation79_spill] sm:$0xff]  ;;  %v9717_v10 = vld [vmem:[#allocation80_spill] sm:$0xff] }
 0x54b   :  { %3404 = vmatpush.msra.mxu0 %v9700_v0  ;;  %3444 = vmatpush.msra.mxu2 %v9701_v21  ;;  %v4874_v0 = vld [vmem:[#allocation7 + $0x290] sm:$0xff]  ;;  %v4875_v21 = vld [vmem:[#allocation7 + $0x2a0] sm:$0xff] }
 0x54c   :  { %3607 = vmatpush.msra.mxu3 %v4858_v58  ;;  %3647 = vmatpush.msrb.mxu1 %v4859_v26  ;;  %v9718_v58 = vld [vmem:[#allocation89_spill] sm:$0xff]  ;;  %v9719_v26 = vld [vmem:[#allocation163_spill] sm:$0xff] }
 0x54d   :  { %3405 = vmatpush.msra.mxu0 %v9702_v37  ;;  %3445 = vmatpush.msra.mxu2 %v9703_v49  ;;  %v4876_v37 = vld [vmem:[#allocation7 + $0x250] sm:$0xff]  ;;  %v4877_v49 = vld [vmem:[#allocation7 + $0x260] sm:$0xff] }
 0x54e   :  { %3608 = vmatpush.msra.mxu3 %v4860_v17  ;;  %3648 = vmatpush.msrb.mxu1 %v4861_v54  ;;  %v9720_v17 = vld [vmem:[#allocation166_spill] sm:$0xff]  ;;  %v9721_v54 = vld [vmem:[#allocation160_spill] sm:$0xff] }
 0x54f   :  { %3406 = vmatpush.msra.mxu0 %v9704_v33  ;;  %3446 = vmatpush.msra.mxu2 %v9705_v29  ;;  %v4878_v33 = vld [vmem:[#allocation7 + $0x210] sm:$0xff]  ;;  %v4879_v29 = vld [vmem:[#allocation7 + $0x220] sm:$0xff] }
 0x550   :  { %3609 = vmatpush.msra.mxu3 %v4862_v22  ;;  %3649 = vmatpush.msrb.mxu1 %v4863_v32  ;;  %v9722_v22 = vld [vmem:[#allocation157_spill] sm:$0xff] }
 0x551   :  { %3407 = vmatpush.msra.mxu0 %v9706_v24  ;;  %3447 = vmatpush.msra.mxu2 %v9707_v35  ;;  %v9723_v32 = vld [vmem:[#allocation125_spill] sm:$0xff]  ;;  %v4881_v35 = vld [vmem:[#allocation7 + $0x1e0] sm:$0xff] }
 0x552   :  { %3674 = vmatpush.msrb.mxu3 %v4864_v2  ;;  %3714 = vmatpush.msra.mxu1 %v4865_v61  ;;  %v4880_v24 = vld [vmem:[#allocation7 + $0x1d0] sm:$0xff]  ;;  %v9724_v2 = vld [vmem:[#allocation132_spill] sm:$0xff]  ;;  %v9725_v61 = vld [vmem:[#allocation130_spill] sm:$0xff] }
 0x553   :  { %3408 = vmatpush.msra.mxu0 %v9708_v18  ;;  %3448 = vmatpush.msra.mxu2 %v9709_v5  ;;  %v9726_v18 = vld [vmem:[#allocation137_spill] sm:$0xff]  ;;  %v4882_v5 = vld [vmem:[#allocation7 + $0x1a0] sm:$0xff] }
 0x554   :  { %3675 = vmatpush.msrb.mxu3 %v4866_v20  ;;  %3715 = vmatpush.msra.mxu1 %v4867_v53  ;;  %v4883_v20 = vld [vmem:[#allocation7 + $0x780] sm:$0xff] }
 0x555   :  { %3409 = vmatpush.msra.mxu0 %v9710_v6  ;;  %3449 = vmatpush.msra.mxu2 %v9711_v60  ;;  %v9727_v53 = vld [vmem:[#allocation135_spill] sm:$0xff] }
 0x556   :  { %3676 = vmatpush.msrb.mxu3 %v4868_v42  ;;  %3716 = vmatpush.msra.mxu1 %v4869_v15  ;;  %v9728_v6 = vld [vmem:[#allocation143_spill] sm:$0xff]  ;;  %v9729_v42 = vld [vmem:[#allocation140_spill] sm:$0xff] }
 0x557   :  { %3410 = vmatpush.msra.mxu0 %v9712_v30  ;;  %3450 = vmatpush.msra.mxu2 %v9713_v62  ;;  %v4884_v60 = vld [vmem:[#allocation7 + $0x160] sm:$0xff]  ;;  %v9730_v15 = vld [vmem:[#allocation148_spill] sm:$0xff]  ;;  %v9731_v62 = vld [vmem:[#allocation145_spill] sm:$0xff] }
 0x558   :  { %3677 = vmatpush.msrb.mxu3 %v4870_v34  ;;  %3717 = vmatpush.msra.mxu1 %v4871_v50  ;;  %v4886_v30 = vld [vmem:[#allocation7 + $0x700] sm:$0xff]  ;;  %v9732_v34 = vld [vmem:[#allocation152_spill] sm:$0xff] }
 0x559   :  { %3411 = vmatpush.msra.mxu0 %v9714_v52  ;;  %3451 = vmatpush.msra.mxu2 %v9715_v31  ;;  %v4887_v50 = vld [vmem:[#allocation7 + $0x6c0] sm:$0xff]  ;;  %v9733_v52 = vld [vmem:[#allocation150_spill] sm:$0xff]  ;;  %v9734_v31 = vld [vmem:[#allocation156_spill] sm:$0xff] }
 0x55a   :  { %3678 = vmatpush.msrb.mxu3 %v4872_v63  ;;  %3718 = vmatpush.msra.mxu1 %v4873_v8  ;;  %v4888_v63 = vld [vmem:[#allocation7 + $0x680] sm:$0xff]  ;;  %v4889_v8 = vld [vmem:[#allocation7 + $0x688] sm:$0xff] }
 0x55b   :  { %3412 = vmatpush.msra.mxu0 %v9716_v59  ;;  %3452 = vmatpush.msra.mxu2 %v9717_v10  ;;  %v4890_v59 = vld [vmem:[#allocation7 + $0x640] sm:$0xff]  ;;  %v4891_v10 = vld [vmem:[#allocation7 + $0x648] sm:$0xff] }
 0x55c   :  { %3679 = vmatpush.msrb.mxu3 %v4874_v0  ;;  %3719 = vmatpush.msra.mxu1 %v4875_v21  ;;  %v4892_v0 = vld [vmem:[#allocation7 + $0x600] sm:$0xff]  ;;  %v4893_v21 = vld [vmem:[#allocation7 + $0x608] sm:$0xff] }
 0x55d   :  { %3413 = vmatpush.msra.mxu0 %v9718_v58  ;;  %3453 = vmatpush.msra.mxu2 %v9719_v26  ;;  %v4895_v58 = vld [vmem:[#allocation7 + $0x5c8] sm:$0xff]  ;;  %v4896_v26 = vld [vmem:[#allocation7 + $0x580] sm:$0xff] }
 0x55e   :  { %3680 = vmatpush.msrb.mxu3 %v4876_v37  ;;  %3720 = vmatpush.msra.mxu1 %v4877_v49  ;;  %v4897_v37 = vld [vmem:[#allocation7 + $0x588] sm:$0xff] }
 0x55f   :  { %3414 = vmatpush.msra.mxu0 %v9720_v17  ;;  %3454 = vmatpush.msra.mxu2 %v9721_v54  ;;  %v4899_v49 = vld [vmem:[#allocation7 + $0x548] sm:$0xff]  ;;  %v4900_v17 = vld [vmem:[#allocation7 + $0x500] sm:$0xff] }
 0x560   :  { %3681 = vmatpush.msrb.mxu3 %v4878_v33  ;;  %3721 = vmatpush.msra.mxu1 %v4879_v29  ;;  %v4901_v54 = vld [vmem:[#allocation7 + $0x508] sm:$0xff]  ;;  %v4904_v29 = vld [vmem:[#allocation7 + $0x480] sm:$0xff] }
 0x561   :  { %3415 = vmatpush.msra.mxu0 %v9722_v22  ;;  %3455 = vmatpush.msra.mxu2 %v9723_v32  ;;  %v4903_v33 = vld [vmem:[#allocation7 + $0x4c8] sm:$0xff]  ;;  %v4906_v32 = vld [vmem:[#allocation7 + $0x440] sm:$0xff] }
 0x562   :  { %3416 = vmatmul.f32.vlgmr.msra.gmra.mxu0 %v8185_v4  ;;  %3456 = vmatmul.f32.vlgmr.msra.gmra.mxu2 %v8185_v4  ;;  %v4885_v4 = vld [vmem:[#allocation7 + $0x740] sm:$0xff]  ;;  %v4905_v22 = vld [vmem:[#allocation7 + $0x488] sm:$0xff] }
 0x563   :  { %3682 = vmatpush.msrb.mxu3 %v4880_v24  ;;  %3722 = vmatpush.msra.mxu1 %v4881_v35  ;;  %v4907_v24 = vld [vmem:[#allocation7 + $0x448] sm:$0xff]  ;;  %v4908_v35 = vld [vmem:[#allocation7 + $0x400] sm:$0xff] }
 0x564   :  { %3614 = vmatpush.msrb.mxu0 %v9724_v2  ;;  %3654 = vmatpush.msrb.mxu2 %v9725_v61  ;;  %v4909_v2 = vld [vmem:[#allocation7 + $0x408] sm:$0xff]  ;;  %v4910_v61 = vld [vmem:[#allocation7 + $0x7d0] sm:$0xff] }
 0x565   :  { %3683 = vmatpush.msrb.mxu3 %v9726_v18  ;;  %3723 = vmatpush.msra.mxu1 %v4882_v5  ;;  %v4911_v18 = vld [vmem:[#allocation7 + $0x7e0] sm:$0xff]  ;;  %v4912_v5 = vld [vmem:[#allocation7 + $0x790] sm:$0xff] }
 0x566   :  { %3615 = vmatpush.msrb.mxu0 %v4883_v20  ;;  %3655 = vmatpush.msrb.mxu2 %v9727_v53  ;;  %v4913_v20 = vld [vmem:[#allocation7 + $0x7a0] sm:$0xff]  ;;  %v4914_v53 = vld [vmem:[#allocation7 + $0x750] sm:$0xff] }
 0x567   :  { %3684 = vmatpush.msrb.mxu3 %v9728_v6  ;;  %3724 = vmatpush.msra.mxu1 %v4884_v60  ;;  %v4915_v6 = vld [vmem:[#allocation7 + $0x760] sm:$0xff]  ;;  %v4916_v60 = vld [vmem:[#allocation7 + $0x710] sm:$0xff] }
 0x568   :  { %3616 = vmatpush.msrb.mxu0 %v4885_v4  ;;  %3656 = vmatpush.msrb.mxu2 %v9729_v42  ;;  %v4917_v4 = vld [vmem:[#allocation7 + $0x720] sm:$0xff]  ;;  %v4918_v42 = vld [vmem:[#allocation7 + $0x6d0] sm:$0xff] }
 0x569   :  { %3685 = vmatpush.msrb.mxu3 %v9730_v15  ;;  %3725 = vmatpush.msra.mxu1 %v8091_v44  ;;  %v9735_v44 = vld [vmem:[#allocation154_spill] sm:$0xff]  ;;  %v4919_v15 = vld [vmem:[#allocation7 + $0x6e0] sm:$0xff] }
 0x56a   :  { %3617 = vmatpush.msrb.mxu0 %v4886_v30  ;;  %3657 = vmatpush.msrb.mxu2 %v9731_v62  ;;  %v4920_v30 = vld [vmem:[#allocation7 + $0x690] sm:$0xff]  ;;  %v4921_v62 = vld [vmem:[#allocation7 + $0x6a0] sm:$0xff] }
 0x56b   :  { %3686 = vmatpush.msrb.mxu3 %v9732_v34  ;;  %3726 = vmatpush.msra.mxu1 %v8099_v45  ;;  %v9736_v45 = vld [vmem:[#allocation162_spill] sm:$0xff]  ;;  %v9737_v34 = vld [vmem:[#allocation159_spill] sm:$0xff] }
 0x56c   :  { %3618 = vmatpush.msrb.mxu0 %v4887_v50  ;;  %3658 = vmatpush.msrb.mxu2 %v9733_v52  ;;  %v4922_v50 = vld [vmem:[#allocation7 + $0x660] sm:$0xff]  ;;  %v9738_v52 = vld [vmem:[#allocation169_spill] sm:$0xff] }
 0x56d   :  { %3687 = vmatpush.msrb.mxu3 %v9734_v31  ;;  %3727 = vmatpush.msra.mxu1 %v8105_v47  ;;  %v4894_v47 = vld [vmem:[#allocation7 + $0x5c0] sm:$0xff] }
 0x56e   :  { %3619 = vmatpush.msrb.mxu0 %v4888_v63  ;;  %3659 = vmatpush.msrb.mxu2 %v4889_v8  ;;  %v4923_v31 = vld [vmem:[#allocation7 + $0x620] sm:$0xff]  ;;  %v9739_v63 = vld [vmem:[#allocation165_spill] sm:$0xff] }
 0x56f   :  { %3688 = vmatpush.msrb.mxu3 %v9735_v44  ;;  %3728 = vmatpush.msra.mxu1 %v8115_v38  ;;  %v4898_v38 = vld [vmem:[#allocation7 + $0x540] sm:$0xff]  ;;  %v9740_v44 = vld [vmem:[#allocation173_spill] sm:$0xff] }
 0x570   :  { %3620 = vmatpush.msrb.mxu0 %v4890_v59  ;;  %3660 = vmatpush.msrb.mxu2 %v4891_v10  ;;  %v4924_v8 = vld [vmem:[#allocation7 + $0x5e0] sm:$0xff]  ;;  %v9741_v10 = vld [vmem:[#allocation170_spill] sm:$0xff] }
 0x571   :  { %3689 = vmatpush.msrb.mxu3 %v9736_v45  ;;  %3729 = vmatpush.msra.mxu1 %v8131_v41  ;;  %v4902_v41 = vld [vmem:[#allocation7 + $0x4c0] sm:$0xff] }
 0x572   :  { %3621 = vmatpush.msrb.mxu0 %v4892_v0  ;;  %3661 = vmatpush.msrb.mxu2 %v4893_v21  ;;  %v4925_v59 = vld [vmem:[#allocation7 + $0x5a0] sm:$0xff]  ;;  %v9742_v0 = vld [vmem:[#allocation178_spill] sm:$0xff] }
 0x573   :  { %v4926_v45 = vld [vmem:[#allocation7 + $0x560] sm:$0xff] }
 0x574   :  { %3622 = vmatpush.msrb.mxu0 %v4894_v47  ;;  %3662 = vmatpush.msrb.mxu2 %v4895_v58  ;;  %v4927_v21 = vld [vmem:[#allocation7 + $0x520] sm:$0xff]  ;;  %v9743_v47 = vld [vmem:[#allocation174_spill] sm:$0xff] }
 0x575   :  { %v4928_v58 = vld [vmem:[#allocation7 + $0x4e0] sm:$0xff] }
 0x576   :  { %3623 = vmatpush.msrb.mxu0 %v4896_v26  ;;  %3663 = vmatpush.msrb.mxu2 %v4897_v37  ;;  %v9744_v26 = vld [vmem:[#allocation180_spill] sm:$0xff]  ;;  %v4929_v37 = vld [vmem:[#allocation7 + $0x4a0] sm:$0xff] }
 0x578   :  { %3624 = vmatpush.msrb.mxu0 %v4898_v38  ;;  %3664 = vmatpush.msrb.mxu2 %v4899_v49  ;;  %v3157_v38 = vpop.f32.mrf.mxu3 }
 0x57a   :  { %3625 = vmatpush.msrb.mxu0 %v4900_v17  ;;  %3665 = vmatpush.msrb.mxu2 %v4901_v54  ;;  %v9745_v17 = vld [vmem:[#allocation26_spill] sm:$0xff]  ;;  %v9746_v54 = vld [vmem:[#allocation24_spill] sm:$0xff] }
 0x57c   :  { %3626 = vmatpush.msrb.mxu0 %v4902_v41  ;;  %3666 = vmatpush.msrb.mxu2 %v4903_v33  ;;  %v569_v41 = vadd.f32 %v9746_v54, %v9745_v17 }
 0x57e   :  { %3627 = vmatpush.msrb.mxu0 %v4904_v29  ;;  %3667 = vmatpush.msrb.mxu2 %v4905_v22  ;;  %v9747_v29 = vld [vmem:[#allocation184_spill] sm:$0xff]  ;;  %v4930_v22 = vld [vmem:[#allocation7 + $0x460] sm:$0xff] }
 0x580   :  { %3628 = vmatpush.msrb.mxu0 %v4906_v32  ;;  %3668 = vmatpush.msrb.mxu2 %v4907_v24  ;;  %v9748_v24 = vld [vmem:[#allocation186_spill] sm:$0xff] }
 0x582   :  { %3629 = vmatpush.msrb.mxu0 %v4908_v35  ;;  %3669 = vmatpush.msrb.mxu2 %v4909_v2  ;;  %v4931_v35 = vld [vmem:[#allocation7 + $0x420] sm:$0xff]  ;;  %v3197_v2 = vpop.f32.mrf.mxu1 }
 0x584   :  { %3694 = vmatpush.msra.mxu0 %v4910_v61  ;;  %3734 = vmatpush.msra.mxu2 %v4911_v18 }
 0x586   :  { %3695 = vmatpush.msra.mxu0 %v4912_v5  ;;  %3735 = vmatpush.msra.mxu2 %v4913_v20  ;;  %v9749_v5 = vld [vmem:[#allocation25_spill] sm:$0xff]  ;;  %v9750_v20 = vld [vmem:[#allocation27_spill] sm:$0xff] }
 0x588   :  { %3696 = vmatpush.msra.mxu0 %v4914_v53  ;;  %3736 = vmatpush.msra.mxu2 %v4915_v6  ;;  %v639_v53 = vadd.f32 %v9750_v20, %v9749_v5 }
 0x58a   :  { %3697 = vmatpush.msra.mxu0 %v4916_v60  ;;  %3737 = vmatpush.msra.mxu2 %v4917_v4 }
 0x58c   :  { %3698 = vmatpush.msra.mxu0 %v4918_v42  ;;  %3738 = vmatpush.msra.mxu2 %v4919_v15  ;;  %v3277_v15 = vpop.f32.mrf.mxu1 }
 0x58e   :  { %3699 = vmatpush.msra.mxu0 %v4920_v30  ;;  %3739 = vmatpush.msra.mxu2 %v4921_v62 }
 0x590   :  { %3700 = vmatpush.msra.mxu0 %v9737_v34  ;;  %3740 = vmatpush.msra.mxu2 %v4922_v50  ;;  %v9751_v34 = vld [vmem:[#allocation45_spill] sm:$0xff]  ;;  %v9752_v50 = vld [vmem:[#allocation47_spill] sm:$0xff] }
 0x592   :  { %3701 = vmatpush.msra.mxu0 %v9738_v52  ;;  %3741 = vmatpush.msra.mxu2 %v4923_v31  ;;  %v778_v52 = vadd.f32 %v9752_v50, %v9751_v34 }
 0x594   :  { %3702 = vmatpush.msra.mxu0 %v9739_v63  ;;  %3742 = vmatpush.msra.mxu2 %v4924_v8 }
 0x596   :  { %3703 = vmatpush.msra.mxu0 %v9740_v44  ;;  %3743 = vmatpush.msra.mxu2 %v4925_v59 }
 0x598   :  { %3704 = vmatpush.msra.mxu0 %v9741_v10  ;;  %3744 = vmatpush.msra.mxu2 %v4926_v45 }
 0x59a   :  { %3705 = vmatpush.msra.mxu0 %v9742_v0  ;;  %3745 = vmatpush.msra.mxu2 %v4927_v21  ;;  %v3237_v0 = vpop.f32.mrf.mxu3 }
 0x59c   :  { %3706 = vmatpush.msra.mxu0 %v9743_v47  ;;  %3746 = vmatpush.msra.mxu2 %v4928_v58 }
 0x59e   :  { %3707 = vmatpush.msra.mxu0 %v9744_v26  ;;  %3747 = vmatpush.msra.mxu2 %v4929_v37  ;;  %v3177_v49 = vpop.f32.mrf.mxu0  ;;  %v9753_v26 = vld [vmem:[#allocation46_spill] sm:$0xff]  ;;  %v9754_v37 = vld [vmem:[#allocation44_spill] sm:$0xff] }
 0x59f   :  { %v3178_v33 = vadd.f32 %v3177_v49, %v3157_v38  ;;  %v709_v38 = vadd.f32 %v9754_v37, %v9753_v26  ;;  %v9760_v26 = vld [vmem:[#allocation65_spill] sm:$0xff] }
 0x5a0   :  { %3708 = vmatpush.msra.mxu0 %v9747_v29  ;;  %3748 = vmatpush.msra.mxu2 %v4930_v22 }
 0x5a1   :  { %v3460_v32 = vadd.f32 %v3178_v33, %v569_v41 }
 0x5a2   :  { %3709 = vmatpush.msra.mxu0 %v9748_v24  ;;  %3749 = vmatpush.msra.mxu2 %v4931_v35 }
 0x5a3   :  { %v4106_v61 = vmul.f32 -1.442695, %v3460_v32 }
 0x5a4   :  { %v3217_v18 = vpop.f32.mrf.mxu2 }
 0x5a5   :  { %4262 = vpow2.f32 %v4106_v61  ;;  %v3218_v6 = vadd.f32 %v3217_v18, %v3197_v2  ;;  %v3317_v18 = vpop.f32.mrf.mxu3 }
 0x5a6   :  { %v3257_v10 = vpop.f32.mrf.mxu0 }
 0x5a7   :  { %v3461_v60 = vadd.f32 %v3218_v6, %v639_v53  ;;  %v3258_v47 = vadd.f32 %v3257_v10, %v3237_v0 }
 0x5a9   :  { %v4107_v4 = vmul.f32 -1.442695, %v3461_v60  ;;  %v3462_v41 = vadd.f32 %v3258_v47, %v709_v38 }
 0x5ab   :  { %v4263_v42 = vpop.eup %4262  ;;  %4264 = vpow2.f32 %v4107_v4 }
 0x5ac   :  { %v3474_v30 = vadd.f32 1.0, %v4263_v42  ;;  %v3297_v62 = vpop.f32.mrf.mxu2 }
 0x5ad   :  { %v3298_v31 = vadd.f32 %v3297_v62, %v3277_v15  ;;  %v9758_v62 = vld [vmem:[#allocation57_spill] sm:$0xff] }
 0x5ae   :  { %4266 = vrcp.f32 %v3474_v30  ;;  %v3487_v32 = vand.u32 2147483648, %v3474_v30  ;;  %vm3481_vm3 = vweird.f32 %v3474_v30  ;;  %v3485_v35 = vand.u32 2147483647, %v3474_v30 }
 0x5af   :  { %v3463_v63 = vadd.f32 %v3298_v31, %v778_v52 }
 0x5b0   :  { %v3488_v60 = vor.u32 1.1754944e-38, %v3487_v32  ;;  %vm3486_vm7 = vcmp.eq.f32.partialorder %v3485_v35, 8.507059e+37 }
 0x5b1   :  { %v4265_v8 = vpop.eup %4264  ;;  %v4108_v44 = vmul.f32 -1.442695, %v3463_v63 }
 0x5b2   :  { %v3475_v59 = vadd.f32 1.0, %v4265_v8 }
 0x5b3   :  { %4268 = vpow2.f32 %v4108_v44 }
 0x5b4   :  { %v4267_v45 = vpop.eup %4266  ;;  %4270 = vrcp.f32 %v3475_v59  ;;  %v3502_v2 = vand.u32 2147483648, %v3475_v59  ;;  %v3500_v53 = vand.u32 2147483647, %v3475_v59  ;;  %vm3496_vm6 = vweird.f32 %v3475_v59 }
 0x5b5   :  { %v3477_v21 = vmul.f32 %v4267_v45, %v3474_v30  ;;  %vm3482_vm2 = vweird.f32 %v4267_v45  ;;  %v9757_v30 = vld [vmem:[#allocation63_spill] sm:$0xff] }
 0x5b6   :  { %vm8315_vm4 = vmor %vm3481_vm3, %vm3482_vm2  ;;  %v838_v34 = vadd.f32 %v9758_v62, %v9757_v30  ;;  %v3503_v50 = vor.u32 1.1754944e-38, %v3502_v2  ;;  %vm3501_vm9 = vcmp.eq.f32.partialorder %v3500_v53, 8.507059e+37  ;;  %v4932_v53 = vld [vmem:[#allocation7 + $0x3e8] sm:$0xff] }
 0x5b7   :  { %v3478_v58 = vsub.f32 1.0, %v3477_v21 }
 0x5b9   :  { %v4269_v49 = vpop.eup %4268  ;;  %v3479_v17 = vmul.f32 %v4267_v45, %v3478_v58  ;;  %v9759_v58 = vld [vmem:[#allocation58_spill] sm:$0xff] }
 0x5ba   :  { %v4271_v54 = vpop.eup %4270  ;;  %v3513_v33 = vadd.f32 1.0, %v4269_v49  ;;  %v908_v37 = vadd.f32 %v9760_v26, %v9759_v58 }
 0x5bb   :  { %v3492_v29 = vmul.f32 %v4271_v54, %v3475_v59  ;;  %v3480_v22 = vadd.f32 %v4267_v45, %v3479_v17  ;;  %vm3497_vm5 = vweird.f32 %v4271_v54 }
 0x5bc   :  { %4272 = vrcp.f32 %v3513_v33  ;;  %vm3498_vm8 = vmor %vm3496_vm6, %vm3497_vm5  ;;  %vm3519_vm11 = vweird.f32 %v3513_v33  ;;  %v3523_v32 = vand.u32 2147483647, %v3513_v33 }
 0x5bd   :  { %v3493_v24 = vsub.f32 1.0, %v3492_v29  ;;  %4274 = vtanh.f32 %v3462_v41  ;;  %v3484_v20 = vsel %vm8315_vm4, %v4267_v45, %v3480_v22  ;;  %v3357_v45 = vpop.f32.mrf.mxu1  ;;  %v3525_v22 = vand.u32 2147483648, %v3513_v33 }
 0x5be   :  { %v3489_v52 = vsel %vm3486_vm7, %v3488_v60, %v3484_v20  ;;  %vm3524_vm13 = vcmp.eq.f32.partialorder %v3523_v32, 8.507059e+37 }
 0x5bf   :  { %v3494_v5 = vmul.f32 %v4271_v54, %v3493_v24  ;;  %v3337_v6 = vpop.f32.mrf.mxu0  ;;  %v3526_v35 = vor.u32 1.1754944e-38, %v3525_v22 }
 0x5c0   :  { %v3338_v4 = vadd.f32 %v3337_v6, %v3317_v18  ;;  %v4933_v6 = vld [vmem:[#allocation7 + $0x3a8] sm:$0xff] }
 0x5c1   :  { %v3495_v42 = vadd.f32 %v4271_v54, %v3494_v5 }
 0x5c2   :  { %v4273_v15 = vpop.eup %4272  ;;  %v3464_v10 = vadd.f32 %v3338_v4, %v838_v34  ;;  %v4934_v4 = vld [vmem:[#allocation7 + $0x368] sm:$0xff] }
 0x5c3   :  { %v3499_v31 = vsel %vm3498_vm8, %v4271_v54, %v3495_v42  ;;  %v3515_v63 = vmul.f32 %v4273_v15, %v3513_v33  ;;  %v4275_v8 = vpop.eup %4274  ;;  %vm3520_vm10 = vweird.f32 %v4273_v15  ;;  %v4935_v42 = vld [vmem:[#allocation7 + $0x328] sm:$0xff] }
 0x5c4   :  { %v3504_v44 = vsel %vm3501_vm9, %v3503_v50, %v3499_v31  ;;  %v3508_v21 = vmul.f32 %v4275_v8, %v3489_v52  ;;  %v4109_v54 = vmul.f32 -1.442695, %v3464_v10  ;;  %vm3521_vm12 = vmor %vm3519_vm11, %vm3520_vm10 }
 0x5c5   :  { %v3506_v0 = vmul.f32 %v3504_v44, %v8032_v56  ;;  %v3516_v59 = vsub.f32 1.0, %v3515_v63  ;;  %v3377_v47 = vpop.f32.mrf.mxu2 }
 0x5c6   :  { %v3378_v38 = vadd.f32 %v3377_v47, %v3357_v45 }
 0x5c7   :  { %v8326_v49 = vadd.f32 %v3508_v21, %v3506_v0  ;;  %v3517_v17 = vmul.f32 %v4273_v15, %v3516_v59  ;;  %v9769_v21 = vld [vmem:[#allocation194_spill] sm:$0xff] }
 0x5c8   :  { %v3465_v41 = vadd.f32 %v3378_v38, %v908_v37 }
 0x5c9   :  { %4276 = vtanh.f32 %v8326_v49  ;;  %v3518_v29 = vadd.f32 %v4273_v15, %v3517_v17 }
 0x5ca   :  { %v4110_v56 = vmul.f32 -1.442695, %v3465_v41  ;;  %4278 = vpow2.f32 %v4109_v54  ;;  %v9770_v41 = vld [vmem:[#allocation196_spill] sm:$0xff] }
 0x5cb   :  { %v3522_v24 = vsel %vm3521_vm12, %v4273_v15, %v3518_v29 }
 0x5cc   :  { %4280 = vpow2.f32 %v4110_v56  ;;  %v3527_v61 = vsel %vm3524_vm13, %v3526_v35, %v3522_v24 }
 0x5cf   :  { %v4277_v2 = vpop.eup %4276 }
 0x5d0   :  { %v8329_v18 = vmul.f32 %v4277_v2, %v3527_v61  ;;  %v4279_v5 = vpop.eup %4278 }
 0x5d1   :  { %v8334_v33 = vadd.f32 1.0, %v4279_v5 }
 0x5d2   :  { %3610 = vmatmul.f32.vlgmr.msra.gmra.mxu3 %v8329_v18  ;;  %3650 = vmatmul.f32.vlgmr.msrb.gmra.mxu1 %v8329_v18  ;;  %v4281_v20 = vpop.eup %4280 }
 0x5d3   :  { %3754 = vmatpush.msra.mxu3 %v4932_v53  ;;  %3794 = vmatpush.msrb.mxu1 %v8151_v28  ;;  %v8337_v60 = vadd.f32 1.0, %v4281_v20  ;;  %4282 = vrcp.f32 %v8334_v33  ;;  %v4936_v28 = vld [vmem:[#allocation7 + $0x2e8] sm:$0xff]  ;;  %vm3544_vm0 = vweird.f32 %v8334_v33  ;;  %v3548_v45 = vand.u32 2147483647, %v8334_v33 }
 0x5d5   :  { %3755 = vmatpush.msra.mxu3 %v4933_v6  ;;  %3795 = vmatpush.msrb.mxu1 %v8154_v39  ;;  %4284 = vrcp.f32 %v8337_v60  ;;  %v4937_v39 = vld [vmem:[#allocation7 + $0x2a8] sm:$0xff]  ;;  %vm3559_vm1 = vweird.f32 %v8337_v60  ;;  %v3563_v0 = vand.u32 2147483647, %v8337_v60  ;;  %vm3549_vm4 = vcmp.eq.f32.partialorder %v3548_v45, 8.507059e+37 }
 0x5d6   :  { %v9772_v45 = vld [vmem:[#allocation28_spill] sm:$0xff] }
 0x5d7   :  { %3756 = vmatpush.msra.mxu3 %v4934_v4  ;;  %3796 = vmatpush.msrb.mxu1 %v8157_v9  ;;  %vm3564_vm5 = vcmp.eq.f32.partialorder %v3563_v0, 8.507059e+37  ;;  %v4939_v4 = vld [vmem:[#allocation7 + $0x7f0] sm:$0xff] }
 0x5d9   :  { %3757 = vmatpush.msra.mxu3 %v4935_v42  ;;  %3797 = vmatpush.msrb.mxu1 %v8161_v13  ;;  %v8347_v9 = vpop.eup %4282  ;;  %v4940_v42 = vld [vmem:[#allocation7 + $0x7a8] sm:$0xff] }
 0x5da   :  { %3690 = vmatmul.f32.vlgmr.msrb.gmra.mxu3 %v8329_v18  ;;  %3730 = vmatmul.f32.vlgmr.msra.gmra.mxu1 %v8329_v18  ;;  %v3540_v15 = vmul.f32 %v8347_v9, %v8334_v33  ;;  %vm3545_vm14 = vweird.f32 %v8347_v9 }
 0x5db   :  { %3758 = vmatpush.msra.mxu3 %v4936_v28  ;;  %3798 = vmatpush.msrb.mxu1 %v8166_v23  ;;  %v8351_v13 = vpop.eup %4284  ;;  %vm8387_vm2 = vmor %vm3544_vm0, %vm3545_vm14  ;;  %v4941_v28 = vld [vmem:[#allocation7 + $0x7b0] sm:$0xff] }
 0x5dc   :  { %v3555_v23 = vmul.f32 %v8351_v13, %v8337_v60  ;;  %v3541_v52 = vsub.f32 1.0, %v3540_v15  ;;  %vm3560_vm15 = vweird.f32 %v8351_v13  ;;  %v4945_v15 = vld [vmem:[#allocation7 + $0x730] sm:$0xff] }
 0x5dd   :  { %3759 = vmatpush.msra.mxu3 %v4937_v39  ;;  %3799 = vmatpush.msrb.mxu1 %v8169_v36  ;;  %v3397_v36 = vpop.f32.mrf.mxu3  ;;  %vm3561_vm3 = vmor %vm3559_vm1, %vm3560_vm15  ;;  %v4942_v39 = vld [vmem:[#allocation7 + $0x768] sm:$0xff] }
 0x5de   :  { %v3556_v31 = vsub.f32 1.0, %v3555_v23  ;;  %v3542_v10 = vmul.f32 %v8347_v9, %v3541_v52  ;;  %v4946_v23 = vld [vmem:[#allocation7 + $0x6e8] sm:$0xff] }
 0x5df   :  { %3760 = vmatpush.msra.mxu3 %v8062_v57  ;;  %3800 = vmatpush.msrb.mxu1 %v8173_v55  ;;  %v3417_v30 = vpop.f32.mrf.mxu0  ;;  %v3437_v57 = vpop.f32.mrf.mxu1  ;;  %v4956_v52 = vld [vmem:[#allocation7 + $0x5a8] sm:$0xff] }
 0x5e0   :  { %v3418_v34 = vadd.f32 %v3417_v30, %v3397_v36  ;;  %v3557_v44 = vmul.f32 %v8351_v13, %v3556_v31  ;;  %v4947_v30 = vld [vmem:[#allocation7 + $0x6f0] sm:$0xff] }
 0x5e1   :  { %3761 = vmatpush.msra.mxu3 %v8068_v1  ;;  %3801 = vmatpush.msrb.mxu1 %v8176_v51  ;;  %v9761_v1 = vld [vmem:[#allocation117_spill] sm:$0xff]  ;;  %v9762_v51 = vld [vmem:[#allocation126_spill] sm:$0xff] }
 0x5e2   :  { %v1046_v62 = vadd.f32 %v9762_v51, %v9761_v1  ;;  %v4949_v36 = vld [vmem:[#allocation7 + $0x6b0] sm:$0xff]  ;;  %v4952_v51 = vld [vmem:[#allocation7 + $0x628] sm:$0xff] }
 0x5e3   :  { %3762 = vmatpush.msra.mxu3 %v8076_v3  ;;  %3802 = vmatpush.msrb.mxu1 %v8179_v25  ;;  %v9763_v3 = vld [vmem:[#allocation121_spill] sm:$0xff] }
 0x5e4   :  { %v9764_v25 = vld [vmem:[#allocation113_spill] sm:$0xff] }
 0x5e5   :  { %v3457_v55 = vpop.f32.mrf.mxu2  ;;  %3763 = vmatpush.msra.mxu3 %v8080_v12  ;;  %3803 = vmatpush.msrb.mxu1 %v8182_v40  ;;  %v978_v63 = vadd.f32 %v9764_v25, %v9763_v3  ;;  %v4951_v1 = vld [vmem:[#allocation7 + $0x670] sm:$0xff]  ;;  %v4958_v3 = vld [vmem:[#allocation7 + $0x568] sm:$0xff] }
 0x5e6   :  { %v3458_v50 = vadd.f32 %v3457_v55, %v3437_v57  ;;  %v4948_v57 = vld [vmem:[#allocation7 + $0x6a8] sm:$0xff]  ;;  %v4957_v31 = vld [vmem:[#allocation7 + $0x5b0] sm:$0xff] }
 0x5e7   :  { %3764 = vmatpush.msra.mxu3 %v8086_v16  ;;  %3804 = vmatpush.msrb.mxu1 %v8187_v46  ;;  %v3466_v12 = vadd.f32 %v3418_v34, %v978_v63  ;;  %v9765_v16 = vld [vmem:[#allocation190_spill] sm:$0xff]  ;;  %v3558_v46 = vadd.f32 %v8351_v13, %v3557_v44  ;;  %v4950_v55 = vld [vmem:[#allocation7 + $0x668] sm:$0xff]  ;;  %v4959_v25 = vld [vmem:[#allocation7 + $0x570] sm:$0xff] }
 0x5e8   :  { %v3467_v8 = vadd.f32 %v3458_v50, %v1046_v62  ;;  %v4953_v62 = vld [vmem:[#allocation7 + $0x630] sm:$0xff]  ;;  %v4954_v34 = vld [vmem:[#allocation7 + $0x5e8] sm:$0xff] }
 0x5e9   :  { %3765 = vmatpush.msra.mxu3 %v8094_v19  ;;  %3805 = vmatpush.msrb.mxu1 %v8194_v27  ;;  %v3543_v19 = vadd.f32 %v8347_v9, %v3542_v10  ;;  %v9766_v27 = vld [vmem:[#allocation192_spill] sm:$0xff]  ;;  %v3562_v47 = vsel %vm3561_vm3, %v8351_v13, %v3558_v46  ;;  %v4955_v50 = vld [vmem:[#allocation7 + $0x5f0] sm:$0xff] }
 0x5ea   :  { %v4111_v40 = vmul.f32 -1.442695, %v3467_v8  ;;  %v4944_v13 = vld [vmem:[#allocation7 + $0x728] sm:$0xff]  ;;  %v4961_v8 = vld [vmem:[#allocation7 + $0x530] sm:$0xff] }
 0x5eb   :  { %3766 = vmatpush.msra.mxu3 %v8102_v7  ;;  %3806 = vmatpush.msrb.mxu1 %v8199_v48  ;;  %v3565_v7 = vand.u32 2147483648, %v8337_v60  ;;  %v3550_v48 = vand.u32 2147483648, %v8334_v33  ;;  %v3547_v59 = vsel %vm8387_vm2, %v8347_v9, %v3543_v19  ;;  %v4938_v60 = vld [vmem:[#allocation7 + $0x7e8] sm:$0xff]  ;;  %v4943_v9 = vld [vmem:[#allocation7 + $0x770] sm:$0xff] }
 0x5ec   :  { %4286 = vpow2.f32 %v4111_v40  ;;  %v4960_v63 = vld [vmem:[#allocation7 + $0x528] sm:$0xff]  ;;  %v4963_v40 = vld [vmem:[#allocation7 + $0x4f0] sm:$0xff] }
 0x5ed   :  { %3767 = vmatpush.msra.mxu3 %v9765_v16  ;;  %3807 = vmatpush.msrb.mxu1 %v8204_v14  ;;  %4288 = vtanh.f32 %v3466_v12  ;;  %v3566_v37 = vor.u32 1.1754944e-38, %v3565_v7  ;;  %v3551_v38 = vor.u32 1.1754944e-38, %v3550_v48  ;;  %v4962_v12 = vld [vmem:[#allocation7 + $0x4e8] sm:$0xff]  ;;  %v4965_v10 = vld [vmem:[#allocation7 + $0x4b0] sm:$0xff]  ;;  %v9771_v14 = vld [vmem:[#allocation30_spill] sm:$0xff] }
 0x5ee   :  { %v4964_v44 = vld [vmem:[#allocation7 + $0x4a8] sm:$0xff]  ;;  %v4967_v19 = vld [vmem:[#allocation7 + $0x470] sm:$0xff]  ;;  %v572_v0 = vadd.f32 %v9772_v45, %v9771_v14 }
 0x5ef   :  { %3768 = vmatpush.msra.mxu3 %v9766_v27  ;;  %3808 = vmatpush.msrb.mxu1 %v8213_v11  ;;  %v3567_v17 = vsel %vm3564_vm5, %v3566_v37, %v3562_v47  ;;  %v4966_v16 = vld [vmem:[#allocation7 + $0x468] sm:$0xff]  ;;  %v4969_v27 = vld [vmem:[#allocation7 + $0x430] sm:$0xff]  ;;  %v9774_v37 = vld [vmem:[#allocation31_spill] sm:$0xff] }
 0x5f0   :  { %v3569_v29 = vmul.f32 %v3567_v17, %v9770_v41  ;;  %v4968_v46 = vld [vmem:[#allocation7 + $0x428] sm:$0xff] }
 0x5f1   :  { %3769 = vmatpush.msra.mxu3 %v9769_v21  ;;  %3809 = vmatpush.msrb.mxu1 %v8218_v43  ;;  %v3552_v43 = vsel %vm3549_vm4, %v3551_v38, %v3547_v59 }
 0x5f2   :  { %v4287_v11 = vpop.eup %4286  ;;  %3770 = vmatmul.f32.vlgmr.msra.gmra.mxu3 %v8329_v18  ;;  %3810 = vmatmul.f32.vlgmr.msrb.gmra.mxu1 %v8329_v18 }
 0x5f3   :  { %v3576_v58 = vadd.f32 1.0, %v4287_v11  ;;  %v4289_v26 = vpop.eup %4288 }
 0x5f4   :  { %v3571_v54 = vmul.f32 %v4289_v26, %v3552_v43  ;;  %v9773_v26 = vld [vmem:[#allocation29_spill] sm:$0xff] }
 0x5f5   :  { %4290 = vrcp.f32 %v3576_v58  ;;  %v3588_v35 = vand.u32 2147483648, %v3576_v58  ;;  %v3586_v61 = vand.u32 2147483647, %v3576_v58  ;;  %vm3582_vm7 = vweird.f32 %v3576_v58 }
 0x5f6   :  { %v8404_v32 = vadd.f32 %v3571_v54, %v3569_v29  ;;  %v642_v38 = vadd.f32 %v9774_v37, %v9773_v26 }
 0x5f7   :  { %v3589_v5 = vor.u32 1.1754944e-38, %v3588_v35  ;;  %vm3587_vm9 = vcmp.eq.f32.partialorder %v3586_v61, 8.507059e+37  ;;  %v9776_v35 = vld [vmem:[#allocation50_spill] sm:$0xff] }
 0x5f8   :  { %4292 = vtanh.f32 %v8404_v32 }
 0x5fb   :  { %v4291_v22 = vpop.eup %4290 }
 0x5fc   :  { %v3578_v56 = vmul.f32 %v4291_v22, %v3576_v58  ;;  %vm3583_vm6 = vweird.f32 %v4291_v22 }
 0x5fd   :  { %vm3584_vm8 = vmor %vm3582_vm7, %vm3583_vm6 }
 0x5fe   :  { %v3579_v24 = vsub.f32 1.0, %v3578_v56  ;;  %v4293_v53 = vpop.eup %4292 }
 0x600   :  { %v3580_v2 = vmul.f32 %v4291_v22, %v3579_v24  ;;  %v9775_v24 = vld [vmem:[#allocation54_spill] sm:$0xff] }
 0x602   :  { %v3581_v18 = vadd.f32 %v4291_v22, %v3580_v2  ;;  %v835_v2 = vadd.f32 %v9776_v35, %v9775_v24 }
 0x604   :  { %v3585_v20 = vsel %vm3584_vm8, %v4291_v22, %v3581_v18 }
 0x605   :  { %v3590_v33 = vsel %vm3587_vm9, %v3589_v5, %v3585_v20 }
 0x606   :  { %v8407_v6 = vmul.f32 %v4293_v53, %v3590_v33 }
 0x608   :  { %3630 = vmatmul.f32.vlgmr.msrb.gmra.mxu0 %v8407_v6  ;;  %3670 = vmatmul.f32.vlgmr.msrb.gmra.mxu2 %v8407_v6 }
 0x609   :  { %3774 = vmatpush.msrb.mxu0 %v4938_v60  ;;  %3814 = vmatpush.msrb.mxu2 %v4939_v4 }
 0x60b   :  { %3775 = vmatpush.msrb.mxu0 %v4940_v42  ;;  %3815 = vmatpush.msrb.mxu2 %v4941_v28 }
 0x60d   :  { %3776 = vmatpush.msrb.mxu0 %v4942_v39  ;;  %3816 = vmatpush.msrb.mxu2 %v4943_v9  ;;  %v9777_v39 = vld [vmem:[#allocation49_spill] sm:$0xff]  ;;  %v9778_v9 = vld [vmem:[#allocation48_spill] sm:$0xff] }
 0x60f   :  { %3777 = vmatpush.msrb.mxu0 %v4944_v13  ;;  %3817 = vmatpush.msrb.mxu2 %v4945_v15  ;;  %v712_v13 = vadd.f32 %v9778_v9, %v9777_v39 }
 0x610   :  { %3710 = vmatmul.f32.vlgmr.msra.gmra.mxu0 %v8407_v6  ;;  %3750 = vmatmul.f32.vlgmr.msra.gmra.mxu2 %v8407_v6 }
 0x611   :  { %3778 = vmatpush.msrb.mxu0 %v4946_v23  ;;  %3818 = vmatpush.msrb.mxu2 %v4947_v30 }
 0x613   :  { %3779 = vmatpush.msrb.mxu0 %v4948_v57  ;;  %3819 = vmatpush.msrb.mxu2 %v4949_v36 }
 0x615   :  { %3780 = vmatpush.msrb.mxu0 %v4950_v55  ;;  %3820 = vmatpush.msrb.mxu2 %v4951_v1 }
 0x617   :  { %3781 = vmatpush.msrb.mxu0 %v4952_v51  ;;  %3821 = vmatpush.msrb.mxu2 %v4953_v62  ;;  %v9779_v51 = vld [vmem:[#allocation51_spill] sm:$0xff]  ;;  %v9780_v62 = vld [vmem:[#allocation56_spill] sm:$0xff] }
 0x619   :  { %3782 = vmatpush.msrb.mxu0 %v4954_v34  ;;  %3822 = vmatpush.msrb.mxu2 %v4955_v50  ;;  %v905_v34 = vadd.f32 %v9780_v62, %v9779_v51 }
 0x61b   :  { %3783 = vmatpush.msrb.mxu0 %v4956_v52  ;;  %3823 = vmatpush.msrb.mxu2 %v4957_v31 }
 0x61d   :  { %3784 = vmatpush.msrb.mxu0 %v4958_v3  ;;  %3824 = vmatpush.msrb.mxu2 %v4959_v25 }
 0x61f   :  { %3785 = vmatpush.msrb.mxu0 %v4960_v63  ;;  %3825 = vmatpush.msrb.mxu2 %v4961_v8 }
 0x621   :  { %3786 = vmatpush.msrb.mxu0 %v4962_v12  ;;  %3826 = vmatpush.msrb.mxu2 %v4963_v40 }
 0x623   :  { %3787 = vmatpush.msrb.mxu0 %v4964_v44  ;;  %3827 = vmatpush.msrb.mxu2 %v4965_v10 }
 0x625   :  { %3788 = vmatpush.msrb.mxu0 %v4966_v16  ;;  %3828 = vmatpush.msrb.mxu2 %v4967_v19 }
 0x627   :  { %3789 = vmatpush.msrb.mxu0 %v4968_v46  ;;  %3829 = vmatpush.msrb.mxu2 %v4969_v27 }
 0x628   :  { %3790 = vmatmul.f32.vlgmr.msrb.gmra.mxu0 %v8407_v6  ;;  %3830 = vmatmul.f32.vlgmr.msrb.gmra.mxu2 %v8407_v6 }
 0x64f   :  { %v3651_v59 = vpop.f32.mrf.mxu1 }
 0x655   :  { %v3611_v7 = vpop.f32.mrf.mxu3 }
 0x657   :  { %v3731_v29 = vpop.f32.mrf.mxu1 }
 0x65d   :  { %v3691_v60 = vpop.f32.mrf.mxu3 }
 0x675   :  { %v3771_v31 = vpop.f32.mrf.mxu3 }
 0x685   :  { %v3631_v48 = vpop.f32.mrf.mxu0 }
 0x686   :  { %v3632_v21 = vadd.f32 %v3631_v48, %v3611_v7 }
 0x688   :  { %v3834_v11 = vadd.f32 %v3632_v21, %v572_v0 }
 0x68a   :  { %v4112_v47 = vmul.f32 -1.442695, %v3834_v11 }
 0x68b   :  { %v3671_v58 = vpop.f32.mrf.mxu2 }
 0x68c   :  { %4294 = vpow2.f32 %v4112_v47  ;;  %v3672_v43 = vadd.f32 %v3671_v58, %v3651_v59  ;;  %v3927_v59 = vld [vmem:[%s8446_s2 + $0x18] sm:$0xff] }
 0x68d   :  { %v3711_v33 = vpop.f32.mrf.mxu0  ;;  %vm3932_vm2 = vcmp.ge.s32.totalorder %v3927_v59, 3355443 }
 0x68e   :  { %v3835_v17 = vadd.f32 %v3672_v43, %v642_v38  ;;  %v3712_v42 = vadd.f32 %v3711_v33, %v3691_v60 }
 0x690   :  { %v4113_v54 = vmul.f32 -1.442695, %v3835_v17  ;;  %v3836_v30 = vadd.f32 %v3712_v42, %v712_v13 }
 0x692   :  { %v4295_v41 = vpop.eup %4294  ;;  %4296 = vpow2.f32 %v4113_v54 }
 0x693   :  { %v3846_v22 = vadd.f32 1.0, %v4295_v41  ;;  %v3751_v56 = vpop.f32.mrf.mxu2  ;;  %v3811_v41 = vpop.f32.mrf.mxu1 }
 0x694   :  { %v3752_v61 = vadd.f32 %v3751_v56, %v3731_v29  ;;  %v9784_v56 = vld [vmem:[#allocation105_spill] sm:$0xff] }
 0x695   :  { %4298 = vrcp.f32 %v3846_v22  ;;  %v3859_v1 = vand.u32 2147483648, %v3846_v22  ;;  %vm3853_vm11 = vweird.f32 %v3846_v22  ;;  %v3857_v52 = vand.u32 2147483647, %v3846_v22 }
 0x696   :  { %v3837_v18 = vadd.f32 %v3752_v61, %v835_v2 }
 0x697   :  { %v3860_v16 = vor.u32 1.1754944e-38, %v3859_v1  ;;  %vm3858_vm15 = vcmp.eq.f32.partialorder %v3857_v52, 8.507059e+37 }
 0x698   :  { %v4297_v5 = vpop.eup %4296  ;;  %v4114_v20 = vmul.f32 -1.442695, %v3837_v18 }
 0x699   :  { %v3847_v53 = vadd.f32 1.0, %v4297_v5 }
 0x69b   :  { %v4299_v6 = vpop.eup %4298  ;;  %4300 = vrcp.f32 %v3847_v53  ;;  %v3874_v3 = vand.u32 2147483648, %v3847_v53  ;;  %v3872_v63 = vand.u32 2147483647, %v3847_v53  ;;  %vm3868_vm14 = vweird.f32 %v3847_v53 }
 0x69c   :  { %v3849_v4 = vmul.f32 %v4299_v6, %v3846_v22  ;;  %4302 = vpow2.f32 %v4114_v20  ;;  %vm3854_vm10 = vweird.f32 %v4299_v6  ;;  %v9783_v22 = vld [vmem:[#allocation108_spill] sm:$0xff] }
 0x69d   :  { %vm8425_vm12 = vmor %vm3853_vm11, %vm3854_vm10  ;;  %4304 = vtanh.f32 %v3836_v30  ;;  %v3875_v27 = vor.u32 1.1754944e-38, %v3874_v3  ;;  %vm3873_vm1 = vcmp.eq.f32.partialorder %v3872_v63, 8.507059e+37  ;;  %v975_v24 = vadd.f32 %v9784_v56, %v9783_v22 }
 0x69e   :  { %v3850_v28 = vsub.f32 1.0, %v3849_v4 }
 0x6a0   :  { %v3851_v15 = vmul.f32 %v4299_v6, %v3850_v28 }
 0x6a1   :  { %v4301_v23 = vpop.eup %4300 }
 0x6a2   :  { %v4303_v57 = vpop.eup %4302  ;;  %v3864_v36 = vmul.f32 %v4301_v23, %v3847_v53  ;;  %v3852_v55 = vadd.f32 %v4299_v6, %v3851_v15  ;;  %vm3869_vm13 = vweird.f32 %v4301_v23 }
 0x6a3   :  { %v3888_v8 = vadd.f32 1.0, %v4303_v57  ;;  %vm3870_vm0 = vmor %vm3868_vm14, %vm3869_vm13  ;;  %v4305_v45 = vpop.eup %4304 }
 0x6a4   :  { %v3865_v50 = vsub.f32 1.0, %v3864_v36  ;;  %v3856_v44 = vsel %vm8425_vm12, %v4299_v6, %v3852_v55  ;;  %v3928_v55 = vld [vmem:[%s8446_s2 + $0x20] sm:$0xff] }
 0x6a5   :  { %v3791_v12 = vpop.f32.mrf.mxu0  ;;  %v3861_v7 = vsel %vm3858_vm15, %v3860_v16, %v3856_v44  ;;  %4306 = vrcp.f32 %v3888_v8  ;;  %vm3895_vm4 = vweird.f32 %v3888_v8  ;;  %v3901_v33 = vand.u32 2147483648, %v3888_v8 }
 0x6a6   :  { %v3866_v40 = vmul.f32 %v4301_v23, %v3865_v50  ;;  %v3792_v10 = vadd.f32 %v3791_v12, %v3771_v31  ;;  %v3880_v11 = vmul.f32 %v4305_v45, %v3861_v7  ;;  %v3899_v60 = vand.u32 2147483647, %v3888_v8 }
 0x6a7   :  { %v3902_v13 = vor.u32 1.1754944e-38, %v3901_v33  ;;  %vm3933_vm11 = vcmp.ge.s32.totalorder %v3928_v55, 3355443 }
 0x6a8   :  { %v3867_v19 = vadd.f32 %v4301_v23, %v3866_v40  ;;  %v3838_v46 = vadd.f32 %v3792_v10, %v905_v34  ;;  %vm3900_vm9 = vcmp.eq.f32.partialorder %v3899_v60, 8.507059e+37 }
 0x6aa   :  { %v3871_v48 = vsel %vm3870_vm0, %v4301_v23, %v3867_v19  ;;  %v4115_v14 = vmul.f32 -1.442695, %v3838_v46 }
 0x6ab   :  { %v3876_v0 = vsel %vm3873_vm1, %v3875_v27, %v3871_v48  ;;  %v4307_v58 = vpop.eup %4306  ;;  %v3831_v17 = vpop.f32.mrf.mxu2 }
 0x6ac   :  { %v3878_v21 = vmul.f32 %v3876_v0, %v8326_v49  ;;  %4308 = vpow2.f32 %v4115_v14  ;;  %v3891_v43 = vmul.f32 %v4307_v58, %v3888_v8  ;;  %v3832_v29 = vadd.f32 %v3831_v17, %v3811_v41 }
 0x6ad   :  { %vm3896_vm3 = vweird.f32 %v4307_v58 }
 0x6ae   :  { %v3881_v47 = vadd.f32 %v3880_v11, %v3878_v21  ;;  %v3892_v49 = vsub.f32 1.0, %v3891_v43  ;;  %v3839_v35 = vadd.f32 %v3832_v29, %v975_v24  ;;  %vm3897_vm6 = vmor %vm3895_vm4, %vm3896_vm3 }
 0x6b0   :  { %v3937_v26 = vmul.f32 1.25, %v3881_v47  ;;  %v3893_v2 = vmul.f32 %v4307_v58, %v3892_v49 }
 0x6b2   :  { %v4309_v37 = vpop.eup %4308  ;;  %v3942_v38 = vsel %vm3932_vm2, %v3937_v26, 0.0  ;;  %v3894_v20 = vadd.f32 %v4307_v58, %v3893_v2 }
 0x6b3   :  { %3947 = vst [vmem:[#allocation8 + $0x18] sm:$0xff] %v3942_v38  ;;  %v3889_v54 = vadd.f32 1.0, %v4309_v37 }
 0x6b4   :  { %v3898_v42 = vsel %vm3897_vm6, %v4307_v58, %v3894_v20 }
 0x6b5   :  { %4310 = vrcp.f32 %v3889_v54  ;;  %v3916_v53 = vand.u32 2147483648, %v3889_v54  ;;  %v3914_v4 = vand.u32 2147483647, %v3889_v54  ;;  %vm3910_vm7 = vweird.f32 %v3889_v54 }
 0x6b6   :  { %4312 = vtanh.f32 %v3839_v35  ;;  %v3903_v23 = vsel %vm3900_vm9, %v3902_v13, %v3898_v42 }
 0x6b7   :  { %v3917_v9 = vor.u32 1.1754944e-38, %v3916_v53  ;;  %vm3915_vm10 = vcmp.eq.f32.partialorder %v3914_v4, 8.507059e+37 }
 0x6bb   :  { %v4311_v61 = vpop.eup %4310 }
 0x6bc   :  { %v3906_v18 = vmul.f32 %v4311_v61, %v3889_v54  ;;  %vm3911_vm5 = vweird.f32 %v4311_v61  ;;  %v4313_v39 = vpop.eup %4312 }
 0x6bd   :  { %vm3912_vm8 = vmor %vm3910_vm7, %vm3911_vm5  ;;  %v3922_v36 = vmul.f32 %v4313_v39, %v3903_v23 }
 0x6be   :  { %v3907_v5 = vsub.f32 1.0, %v3906_v18 }
 0x6c0   :  { %v3908_v6 = vmul.f32 %v4311_v61, %v3907_v5 }
 0x6c2   :  { %v3909_v28 = vadd.f32 %v4311_v61, %v3908_v6 }
 0x6c4   :  { %v3913_v15 = vsel %vm3912_vm8, %v4311_v61, %v3909_v28 }
 0x6c5   :  { %v3918_v30 = vsel %vm3915_vm10, %v3917_v9, %v3913_v15 }
 0x6c6   :  { %v3920_v57 = vmul.f32 %v3918_v30, %v8404_v32 }
 0x6c8   :  { %v3923_v1 = vadd.f32 %v3922_v36, %v3920_v57 }
 0x6ca   :  { %v3938_v51 = vmul.f32 1.25, %v3923_v1 }
 0x6cc   :  { %v3943_v62 = vsel %vm3933_vm11, %v3938_v51, 0.0 }
 0x6cd   :  { %3948 = vst [vmem:[#allocation8 + $0x20] sm:$0xff] %v3943_v62 }
 0x6ce   :  { %3959 = dma.vmem_to_hbm [thread:$0]  %s3955_s5, 640, %s3957_s27, [#allocation4]  }
 0x6cf   :  { %5070 = dma.done.wait [#allocation4], 640  }
 0x6d0   :  { %5071 = vsyncadd [#allocation4], 4294966656 }
 0x6d1   :  { %3964 = vsyncpa [#allocation3], 1 }
 0x6d2   :  { %3965 = vsyncpa [#allocation6], 1 }
 0x6d3   :  { %3966 = vsyncpa [#allocation4], 1 }

</bundles_post_ra>
